<compile_context>
chip_gen: v7x
topology: tpu7x:2x2x1
jax: 0.10.0
libtpu: 0.0.40
codegen_flags: <defaults>
</compile_context>

<pallas_src>
import math
import functools

import jax
import jax.numpy as jnp
from jax.experimental import pallas as pl
from jax.experimental.pallas import tpu as pltpu


# ----------------------------------------------------------------------------
# Single fused kernel.
# ----------------------------------------------------------------------------
def fused_kernel(lens_ref, src_ref, mask_ref,
                 enc_w_ref, enc_b_ref, pe_ref,
                 wqkv_ref, bqkv_ref, wo_ref, bo_ref,
                 ln1g_ref, ln1b_ref, ln2g_ref, ln2b_ref,
                 w1_ref, b1_ref, w2_ref, b2_ref,
                 sndT_ref, rcvT_ref, rcv_ref, relinfo_ref,
                 rw1s_ref, rw1r_ref, rw1i_ref, rb1_ref,
                 rw2_ref, rb2_ref, rw3_ref, rb3_ref, rw4_ref, rb4_ref,
                 ow1o_ref, ow1e_ref, ob1_ref, ow2_ref, ob2_ref,
                 out_ref, *, n_objs, seq_len, nlayers, nhead, d_model):
    NS = n_objs * seq_len
    dh = d_model // nhead
    scale = 1.0 / math.sqrt(dh)
    f32 = jnp.float32

    # ---- encoder Linear + positional encoding (all objects batched) ----------
    x = jnp.dot(src_ref[...], enc_w_ref[...], preferred_element_type=f32)
    x = x + enc_b_ref[...] + pe_ref[...]                     # [NS, d_model]

    mask = mask_ref[...]                                     # block-diag causal, [NS, NS]

    def layer_norm(v, g, b):
        mu = jnp.mean(v, axis=-1, keepdims=True)
        var = jnp.mean((v - mu) ** 2, axis=-1, keepdims=True)
        return (v - mu) * jax.lax.rsqrt(var + 1e-5) * g + b

    for l in range(nlayers):                                 # static unrolled layers
        wqkv = wqkv_ref[l]                                   # [d_model, 3*d_model]
        wo = wo_ref[l]                                       # [d_model, d_model]

        # --- multi-head self-attention (heads via static lane slices) ---------
        qkv = jnp.dot(x, wqkv, preferred_element_type=f32) + bqkv_ref[l]
        attn = jnp.zeros((NS, d_model), f32)
        for h in range(nhead):
            q = qkv[:, h * dh:(h + 1) * dh]
            k = qkv[:, d_model + h * dh:d_model + (h + 1) * dh]
            v = qkv[:, 2 * d_model + h * dh:2 * d_model + (h + 1) * dh]
            s = jax.lax.dot_general(q, k, (((1,), (1,)), ((), ())),
                                    preferred_element_type=f32) * scale + mask
            s = s - jnp.max(s, axis=-1, keepdims=True)
            p = jnp.exp(s)
            p = p * pl.reciprocal(jnp.sum(p, axis=-1, keepdims=True), approx=True)
            o_h = jnp.dot(p, v, preferred_element_type=f32)          # [NS, dh]
            # fold this head through its slice of W_o (no concat of heads)
            attn = attn + jnp.dot(o_h, wo[h * dh:(h + 1) * dh, :],
                                  preferred_element_type=f32)
        attn = attn + bo_ref[l]
        x = layer_norm(x + attn, ln1g_ref[l], ln1b_ref[l])

        # --- feed-forward ------------------------------------------------------
        hmid = jnp.maximum(
            jnp.dot(x, w1_ref[l], preferred_element_type=f32) + b1_ref[l], 0.0)
        ff = jnp.dot(hmid, w2_ref[l], preferred_element_type=f32) + b2_ref[l]
        x = layer_norm(x + ff, ln2g_ref[l], ln2b_ref[l])

    # ---- gather hidden state at the last valid position per object ----------
    lens = jnp.maximum(lens_ref[...], 1)                     # [n, 1] int32 (clamp L>=1)
    col = jax.lax.broadcasted_iota(jnp.int32, (n_objs, NS), 1)
    base = jax.lax.broadcasted_iota(jnp.int32, (n_objs, NS), 0) * seq_len
    sel = (col == base + lens - 1).astype(f32)               # one-hot row selector
    traj = jnp.dot(sel, x, preferred_element_type=f32)       # [n, d_model]

    # ---- InteractionNetwork decoder ------------------------------------------
    senders = jnp.dot(sndT_ref[...], traj, preferred_element_type=f32)    # [n_rel, d_model]
    receivers = jnp.dot(rcvT_ref[...], traj, preferred_element_type=f32)  # [n_rel, d_model]

    # relational MLP on concat([senders, receivers, relation_info]) as a split matmul
    h1 = (jnp.dot(senders, rw1s_ref[...], preferred_element_type=f32)
          + jnp.dot(receivers, rw1r_ref[...], preferred_element_type=f32)
          + relinfo_ref[...] * rw1i_ref[...] + rb1_ref[...])
    h1 = jnp.maximum(h1, 0.0)
    h2 = jnp.maximum(jnp.dot(h1, rw2_ref[...], preferred_element_type=f32) + rb2_ref[...], 0.0)
    h3 = jnp.maximum(jnp.dot(h2, rw3_ref[...], preferred_element_type=f32) + rb3_ref[...], 0.0)
    effects = jnp.maximum(
        jnp.dot(h3, rw4_ref[...], preferred_element_type=f32) + rb4_ref[...], 0.0)

    eff_rcv = jnp.dot(rcv_ref[...], effects, preferred_element_type=f32)  # [n, d_effect]

    # object MLP on concat([objects, effect_receivers]) as a split matmul
    g1 = jnp.maximum(jnp.dot(traj, ow1o_ref[...], preferred_element_type=f32)
                     + jnp.dot(eff_rcv, ow1e_ref[...], preferred_element_type=f32)
                     + ob1_ref[...], 0.0)
    pred = jnp.dot(g1, ow2_ref[...], preferred_element_type=f32) + ob2_ref[...]   # [n, 1]
    prob = pl.reciprocal(1.0 + jnp.exp(-pred), approx=True)  # sigmoid probability

    # AvgPool1d over the n objects -> [1, 1]
    out_ref[...] = jnp.mean(prob, keepdims=True)


# ----------------------------------------------------------------------------
# Host-side wrapper: layout prep + a single pallas_call.
# ----------------------------------------------------------------------------
def make_block_causal_mask(n_objs, seq_len):
    """Additive mask: 0 where (same object AND key <= query), -1e30 elsewhere."""
    ns = n_objs * seq_len
    idx = jnp.arange(ns)
    same = (idx[:, None] // seq_len) == (idx[None, :] // seq_len)
    causal = idx[None, :] <= idx[:, None]
    return jnp.where(same & causal, 0.0, -1e30).astype(jnp.float32)


def multi_object_forward(params, src, track_lengths, relation_info, *, nhead):
    snd, rcv, relinfo = relation_info
    n, S, d_in = src.shape
    d_model = params["enc_w"].shape[1]
    nlayers = params["wqkv"].shape[0]

    # layout prep (compile-time constants / trivial reshapes)
    src_flat = src.reshape(n * S, d_in)
    pe_tiled = jnp.tile(params["pe"], (n, 1))                # [n*S, d_model]
    mask = make_block_causal_mask(n, S)                      # [n*S, n*S]
    lens = track_lengths.astype(jnp.int32).reshape(n, 1)
    sndT = snd.T                                             # pre-transposed relations
    rcvT = rcv.T

    args = [lens, src_flat, mask,
            params["enc_w"], params["enc_b"], pe_tiled,
            params["wqkv"], params["bqkv"], params["wo"], params["bo"],
            params["ln1g"], params["ln1b"], params["ln2g"], params["ln2b"],
            params["w1"], params["b1"], params["w2"], params["b2"],
            sndT, rcvT, rcv, relinfo,
            params["rw1s"], params["rw1r"], params["rw1i"], params["rb1"],
            params["rw2"], params["rb2"], params["rw3"], params["rb3"],
            params["rw4"], params["rb4"],
            params["ow1o"], params["ow1e"], params["ob1"],
            params["ow2"], params["ob2"]]

    kernel = functools.partial(fused_kernel, n_objs=n, seq_len=S,
                               nlayers=nlayers, nhead=nhead, d_model=d_model)

    vmem = pl.BlockSpec(memory_space=pltpu.MemorySpace.VMEM)
    out = pl.pallas_call(
        kernel,
        out_shape=jax.ShapeDtypeStruct((1, 1), jnp.float32),
        in_specs=[vmem] * len(args),
        out_specs=vmem,
    )(*args)
    return out.reshape(1)                                    # matches PyTorch output [1]


# ----------------------------------------------------------------------------
# Deterministic synthetic parameters.
# ----------------------------------------------------------------------------
def make_pe(S, d_model):
    position = jnp.arange(S, dtype=jnp.float32)[:, None]
    div_term = jnp.exp(jnp.arange(0, d_model, 2, dtype=jnp.float32)
                       * (-math.log(10000.0) / d_model))
    pe = jnp.zeros((S, d_model), jnp.float32)
    pe = pe.at[:, 0::2].set(jnp.sin(position * div_term))
    pe = pe.at[:, 1::2].set(jnp.cos(position * div_term))
    return pe


def init_params(key, *, input_dim, d_model, nhead, d_hid, nlayers, d_effect, S):
    ks = iter(jax.random.split(key, 64))

    def u(shape, scale=0.1):
        return jax.random.uniform(next(ks), shape, jnp.float32, -scale, scale)

    p = {}
    p["enc_w"] = u((input_dim, d_model))                     # encoder.weight uniform ±0.1
    p["enc_b"] = jnp.zeros((1, d_model), jnp.float32)
    p["pe"] = make_pe(S, d_model)

    # transformer layers (stacked over nlayers)
    p["wqkv"] = u((nlayers, d_model, 3 * d_model))
    p["bqkv"] = u((nlayers, 1, 3 * d_model), 0.02)
    p["wo"] = u((nlayers, d_model, d_model))
    p["bo"] = u((nlayers, 1, d_model), 0.02)
    p["ln1g"] = jnp.ones((nlayers, 1, d_model), jnp.float32)
    p["ln1b"] = jnp.zeros((nlayers, 1, d_model), jnp.float32)
    p["ln2g"] = jnp.ones((nlayers, 1, d_model), jnp.float32)
    p["ln2b"] = jnp.zeros((nlayers, 1, d_model), jnp.float32)
    p["w1"] = u((nlayers, d_model, d_hid))
    p["b1"] = u((nlayers, 1, d_hid), 0.02)
    p["w2"] = u((nlayers, d_hid, d_model))
    p["b2"] = u((nlayers, 1, d_model), 0.02)

    # InteractionNetwork: RelationalModel(2*d_model+1 -> 150 -> 150 -> 150 -> d_effect)
    p["rw1s"] = u((d_model, 150))
    p["rw1r"] = u((d_model, 150))
    p["rw1i"] = u((1, 150))
    p["rb1"] = u((1, 150), 0.02)
    p["rw2"] = u((150, 150))
    p["rb2"] = u((1, 150), 0.02)
    p["rw3"] = u((150, 150))
    p["rb3"] = u((1, 150), 0.02)
    p["rw4"] = u((150, d_effect))
    p["rb4"] = u((1, d_effect), 0.02)
    # ObjectModel(d_model + d_effect -> 100 -> 1)
    p["ow1o"] = u((d_model, 100))
    p["ow1e"] = u((d_effect, 100))
    p["ob1"] = u((1, 100), 0.02)
    p["ow2"] = u((100, 1))
    p["ob2"] = u((1, 1), 0.02)
    return p


# TODO(synk): nn.Dropout paths (pos-encoder + transformer, p=0.5) are inference
# no-ops here; training-mode dropout is not implemented.

if __name__ == "__main__":
    input_dim, d_model, nhead, d_hid, nlayers, d_effect = 4, 32, 4, 64, 2, 64
    n_objs, S = 4, 16

    key = jax.random.PRNGKey(0)
    k_params, k_src, k_rel = jax.random.split(key, 3)

    params = init_params(k_params, input_dim=input_dim, d_model=d_model,
                         nhead=nhead, d_hid=d_hid, nlayers=nlayers,
                         d_effect=d_effect, S=S)

    src = jax.random.normal(k_src, (n_objs, S, input_dim), jnp.float32)
    track_lengths = jnp.array([16, 10, 7, 12], dtype=jnp.int32)

    # fully connected relation graph (one-hot sender / receiver matrices)
    pairs = [(i, j) for i in range(n_objs) for j in range(n_objs) if i != j]
    n_rel = len(pairs)
    snd = jnp.array([[1.0 if i == p[0] else 0.0 for p in pairs]
                     for i in range(n_objs)], jnp.float32)   # [n, n_rel]
    rcv = jnp.array([[1.0 if j == p[1] else 0.0 for p in pairs]
                     for j in range(n_objs)], jnp.float32)   # [n, n_rel]
    relinfo = jax.random.uniform(k_rel, (n_rel, 1), jnp.float32)

    fwd = jax.jit(functools.partial(multi_object_forward, nhead=nhead))
    out = fwd(params, src, track_lengths, (snd, rcv, relinfo))
    jax.block_until_ready(out)
    assert out.shape == (1,) and bool(jnp.isfinite(out).all())
    print("KERNEL_OK")
</pallas_src>

<mosaic_0001>
module attributes {stable_mosaic.version = 11 : i64} {
  func.func @fused_kernel(%arg0: memref<4x1xi32, #tpu.memory_space<vmem>>, %arg1: memref<64x4xf32, #tpu.memory_space<vmem>>, %arg2: memref<64x64xf32, #tpu.memory_space<vmem>>, %arg3: memref<4x32xf32, #tpu.memory_space<vmem>>, %arg4: memref<1x32xf32, #tpu.memory_space<vmem>>, %arg5: memref<64x32xf32, #tpu.memory_space<vmem>>, %arg6: memref<2x32x96xf32, #tpu.memory_space<vmem>>, %arg7: memref<2x1x96xf32, #tpu.memory_space<vmem>>, %arg8: memref<2x32x32xf32, #tpu.memory_space<vmem>>, %arg9: memref<2x1x32xf32, #tpu.memory_space<vmem>>, %arg10: memref<2x1x32xf32, #tpu.memory_space<vmem>>, %arg11: memref<2x1x32xf32, #tpu.memory_space<vmem>>, %arg12: memref<2x1x32xf32, #tpu.memory_space<vmem>>, %arg13: memref<2x1x32xf32, #tpu.memory_space<vmem>>, %arg14: memref<2x32x64xf32, #tpu.memory_space<vmem>>, %arg15: memref<2x1x64xf32, #tpu.memory_space<vmem>>, %arg16: memref<2x64x32xf32, #tpu.memory_space<vmem>>, %arg17: memref<2x1x32xf32, #tpu.memory_space<vmem>>, %arg18: memref<12x4xf32, #tpu.memory_space<vmem>>, %arg19: memref<12x4xf32, #tpu.memory_space<vmem>>, %arg20: memref<4x12xf32, #tpu.memory_space<vmem>>, %arg21: memref<12x1xf32, #tpu.memory_space<vmem>>, %arg22: memref<32x150xf32, #tpu.memory_space<vmem>>, %arg23: memref<32x150xf32, #tpu.memory_space<vmem>>, %arg24: memref<1x150xf32, #tpu.memory_space<vmem>>, %arg25: memref<1x150xf32, #tpu.memory_space<vmem>>, %arg26: memref<150x150xf32, #tpu.memory_space<vmem>>, %arg27: memref<1x150xf32, #tpu.memory_space<vmem>>, %arg28: memref<150x150xf32, #tpu.memory_space<vmem>>, %arg29: memref<1x150xf32, #tpu.memory_space<vmem>>, %arg30: memref<150x64xf32, #tpu.memory_space<vmem>>, %arg31: memref<1x64xf32, #tpu.memory_space<vmem>>, %arg32: memref<32x100xf32, #tpu.memory_space<vmem>>, %arg33: memref<64x100xf32, #tpu.memory_space<vmem>>, %arg34: memref<1x100xf32, #tpu.memory_space<vmem>>, %arg35: memref<100x1xf32, #tpu.memory_space<vmem>>, %arg36: memref<1x1xf32, #tpu.memory_space<vmem>>, %arg37: memref<1x1xf32, #tpu.memory_space<vmem>>) attributes {dimension_semantics = [], scalar_prefetch = 0 : i64, scratch_operands = 0 : i64, tpu.core_type = #tpu.core_type<tc>} {
    %c0 = arith.constant 0 : index
    %c0_0 = arith.constant 0 : index
    %0 = vector.load %arg1[%c0, %c0_0] : memref<64x4xf32, #tpu.memory_space<vmem>>, vector<64x4xf32>
    %c0_1 = arith.constant 0 : index
    %c0_2 = arith.constant 0 : index
    %1 = vector.load %arg3[%c0_1, %c0_2] : memref<4x32xf32, #tpu.memory_space<vmem>>, vector<4x32xf32>
    %cst = arith.constant dense<0.000000e+00> : vector<64x32xf32>
    %2 = tpu.matmul %0, %1, %cst {dimension_numbers = #tpu.dot_dimension_numbers<[1], [0], [0], [1], [0, 0, 1, 1], [], []>} : vector<64x4xf32>, vector<4x32xf32>, vector<64x32xf32> -> vector<64x32xf32>
    %c0_3 = arith.constant 0 : index
    %c0_4 = arith.constant 0 : index
    %3 = vector.load %arg4[%c0_3, %c0_4] : memref<1x32xf32, #tpu.memory_space<vmem>>, vector<1x32xf32>
    %4 = vector.broadcast %3 : vector<1x32xf32> to vector<64x32xf32>
    %5 = arith.addf %2, %4 : vector<64x32xf32>
    %c0_5 = arith.constant 0 : index
    %c0_6 = arith.constant 0 : index
    %6 = vector.load %arg5[%c0_5, %c0_6] : memref<64x32xf32, #tpu.memory_space<vmem>>, vector<64x32xf32>
    %7 = arith.addf %5, %6 : vector<64x32xf32>
    %c0_7 = arith.constant 0 : index
    %c0_8 = arith.constant 0 : index
    %8 = vector.load %arg2[%c0_7, %c0_8] : memref<64x64xf32, #tpu.memory_space<vmem>>, vector<64x64xf32>
    %c0_9 = arith.constant 0 : index
    %c0_10 = arith.constant 0 : index
    %c0_11 = arith.constant 0 : index
    %9 = vector.load %arg6[%c0_9, %c0_10, %c0_11] : memref<2x32x96xf32, #tpu.memory_space<vmem>>, vector<1x32x96xf32>
    %10 = vector.shape_cast %9 : vector<1x32x96xf32> to vector<32x96xf32>
    %c0_12 = arith.constant 0 : index
    %c0_13 = arith.constant 0 : index
    %c0_14 = arith.constant 0 : index
    %11 = vector.load %arg8[%c0_12, %c0_13, %c0_14] : memref<2x32x32xf32, #tpu.memory_space<vmem>>, vector<1x32x32xf32>
    %12 = vector.shape_cast %11 : vector<1x32x32xf32> to vector<32x32xf32>
    %cst_15 = arith.constant dense<0.000000e+00> : vector<64x96xf32>
    %13 = tpu.matmul %7, %10, %cst_15 {dimension_numbers = #tpu.dot_dimension_numbers<[1], [0], [0], [1], [0, 0, 1, 1], [], []>} : vector<64x32xf32>, vector<32x96xf32>, vector<64x96xf32> -> vector<64x96xf32>
    %c0_16 = arith.constant 0 : index
    %c0_17 = arith.constant 0 : index
    %c0_18 = arith.constant 0 : index
    %14 = vector.load %arg7[%c0_16, %c0_17, %c0_18] : memref<2x1x96xf32, #tpu.memory_space<vmem>>, vector<1x1x96xf32>
    %15 = vector.shape_cast %14 : vector<1x1x96xf32> to vector<1x96xf32>
    %16 = vector.broadcast %15 : vector<1x96xf32> to vector<64x96xf32>
    %17 = arith.addf %13, %16 : vector<64x96xf32>
    %cst_19 = arith.constant 0.000000e+00 : f32
    %18 = vector.broadcast %cst_19 : f32 to vector<64x32xf32>
    %19 = vector.extract_strided_slice %17 {offsets = [0, 0], sizes = [64, 8], strides = [1, 1]} : vector<64x96xf32> to vector<64x8xf32>
    %20 = vector.extract_strided_slice %17 {offsets = [0, 32], sizes = [64, 8], strides = [1, 1]} : vector<64x96xf32> to vector<64x8xf32>
    %21 = vector.extract_strided_slice %17 {offsets = [0, 64], sizes = [64, 8], strides = [1, 1]} : vector<64x96xf32> to vector<64x8xf32>
    %cst_20 = arith.constant dense<0.000000e+00> : vector<64x64xf32>
    %22 = tpu.matmul %19, %20, %cst_20 {dimension_numbers = #tpu.dot_dimension_numbers<[1], [1], [0], [0], [0, 0, 1, 0], [], []>} : vector<64x8xf32>, vector<64x8xf32>, vector<64x64xf32> -> vector<64x64xf32>
    %cst_21 = arith.constant 0.353553385 : f32
    %23 = vector.broadcast %cst_21 : f32 to vector<64x64xf32>
    %24 = arith.mulf %22, %23 : vector<64x64xf32>
    %25 = arith.addf %24, %8 : vector<64x64xf32>
    %cst_22 = arith.constant dense<0xFF800000> : vector<64xf32>
    %26 = vector.multi_reduction <maximumf>, %25, %cst_22 [1] : vector<64x64xf32> to vector<64xf32>
    %27 = vector.shape_cast %26 : vector<64xf32> to vector<64x1xf32>
    %28 = vector.broadcast %27 : vector<64x1xf32> to vector<64x64xf32>
    %29 = arith.subf %25, %28 : vector<64x64xf32>
    %30 = math.exp %29 : vector<64x64xf32>
    %cst_23 = arith.constant dense<0.000000e+00> : vector<64xf32>
    %31 = vector.multi_reduction <add>, %30, %cst_23 [1] : vector<64x64xf32> to vector<64xf32>
    %32 = vector.shape_cast %31 : vector<64xf32> to vector<64x1xf32>
    %33 = tpu.reciprocal %32 {approx = true} : vector<64x1xf32> -> vector<64x1xf32>
    %34 = vector.broadcast %33 : vector<64x1xf32> to vector<64x64xf32>
    %35 = arith.mulf %30, %34 : vector<64x64xf32>
    %cst_24 = arith.constant dense<0.000000e+00> : vector<64x8xf32>
    %36 = tpu.matmul %35, %21, %cst_24 {dimension_numbers = #tpu.dot_dimension_numbers<[1], [0], [0], [1], [0, 0, 1, 1], [], []>} : vector<64x64xf32>, vector<64x8xf32>, vector<64x8xf32> -> vector<64x8xf32>
    %37 = vector.extract_strided_slice %12 {offsets = [0, 0], sizes = [8, 32], strides = [1, 1]} : vector<32x32xf32> to vector<8x32xf32>
    %cst_25 = arith.constant dense<0.000000e+00> : vector<64x32xf32>
    %38 = tpu.matmul %36, %37, %cst_25 {dimension_numbers = #tpu.dot_dimension_numbers<[1], [0], [0], [1], [0, 0, 1, 1], [], []>} : vector<64x8xf32>, vector<8x32xf32>, vector<64x32xf32> -> vector<64x32xf32>
    %39 = arith.addf %18, %38 : vector<64x32xf32>
    %40 = vector.extract_strided_slice %17 {offsets = [0, 8], sizes = [64, 8], strides = [1, 1]} : vector<64x96xf32> to vector<64x8xf32>
    %41 = vector.extract_strided_slice %17 {offsets = [0, 40], sizes = [64, 8], strides = [1, 1]} : vector<64x96xf32> to vector<64x8xf32>
    %42 = vector.extract_strided_slice %17 {offsets = [0, 72], sizes = [64, 8], strides = [1, 1]} : vector<64x96xf32> to vector<64x8xf32>
    %cst_26 = arith.constant dense<0.000000e+00> : vector<64x64xf32>
    %43 = tpu.matmul %40, %41, %cst_26 {dimension_numbers = #tpu.dot_dimension_numbers<[1], [1], [0], [0], [0, 0, 1, 0], [], []>} : vector<64x8xf32>, vector<64x8xf32>, vector<64x64xf32> -> vector<64x64xf32>
    %cst_27 = arith.constant 0.353553385 : f32
    %44 = vector.broadcast %cst_27 : f32 to vector<64x64xf32>
    %45 = arith.mulf %43, %44 : vector<64x64xf32>
    %46 = arith.addf %45, %8 : vector<64x64xf32>
    %cst_28 = arith.constant dense<0xFF800000> : vector<64xf32>
    %47 = vector.multi_reduction <maximumf>, %46, %cst_28 [1] : vector<64x64xf32> to vector<64xf32>
    %48 = vector.shape_cast %47 : vector<64xf32> to vector<64x1xf32>
    %49 = vector.broadcast %48 : vector<64x1xf32> to vector<64x64xf32>
    %50 = arith.subf %46, %49 : vector<64x64xf32>
    %51 = math.exp %50 : vector<64x64xf32>
    %cst_29 = arith.constant dense<0.000000e+00> : vector<64xf32>
    %52 = vector.multi_reduction <add>, %51, %cst_29 [1] : vector<64x64xf32> to vector<64xf32>
    %53 = vector.shape_cast %52 : vector<64xf32> to vector<64x1xf32>
    %54 = tpu.reciprocal %53 {approx = true} : vector<64x1xf32> -> vector<64x1xf32>
    %55 = vector.broadcast %54 : vector<64x1xf32> to vector<64x64xf32>
    %56 = arith.mulf %51, %55 : vector<64x64xf32>
    %cst_30 = arith.constant dense<0.000000e+00> : vector<64x8xf32>
    %57 = tpu.matmul %56, %42, %cst_30 {dimension_numbers = #tpu.dot_dimension_numbers<[1], [0], [0], [1], [0, 0, 1, 1], [], []>} : vector<64x64xf32>, vector<64x8xf32>, vector<64x8xf32> -> vector<64x8xf32>
    %58 = vector.extract_strided_slice %12 {offsets = [8, 0], sizes = [8, 32], strides = [1, 1]} : vector<32x32xf32> to vector<8x32xf32>
    %cst_31 = arith.constant dense<0.000000e+00> : vector<64x32xf32>
    %59 = tpu.matmul %57, %58, %cst_31 {dimension_numbers = #tpu.dot_dimension_numbers<[1], [0], [0], [1], [0, 0, 1, 1], [], []>} : vector<64x8xf32>, vector<8x32xf32>, vector<64x32xf32> -> vector<64x32xf32>
    %60 = arith.addf %39, %59 : vector<64x32xf32>
    %61 = vector.extract_strided_slice %17 {offsets = [0, 16], sizes = [64, 8], strides = [1, 1]} : vector<64x96xf32> to vector<64x8xf32>
    %62 = vector.extract_strided_slice %17 {offsets = [0, 48], sizes = [64, 8], strides = [1, 1]} : vector<64x96xf32> to vector<64x8xf32>
    %63 = vector.extract_strided_slice %17 {offsets = [0, 80], sizes = [64, 8], strides = [1, 1]} : vector<64x96xf32> to vector<64x8xf32>
    %cst_32 = arith.constant dense<0.000000e+00> : vector<64x64xf32>
    %64 = tpu.matmul %61, %62, %cst_32 {dimension_numbers = #tpu.dot_dimension_numbers<[1], [1], [0], [0], [0, 0, 1, 0], [], []>} : vector<64x8xf32>, vector<64x8xf32>, vector<64x64xf32> -> vector<64x64xf32>
    %cst_33 = arith.constant 0.353553385 : f32
    %65 = vector.broadcast %cst_33 : f32 to vector<64x64xf32>
    %66 = arith.mulf %64, %65 : vector<64x64xf32>
    %67 = arith.addf %66, %8 : vector<64x64xf32>
    %cst_34 = arith.constant dense<0xFF800000> : vector<64xf32>
    %68 = vector.multi_reduction <maximumf>, %67, %cst_34 [1] : vector<64x64xf32> to vector<64xf32>
    %69 = vector.shape_cast %68 : vector<64xf32> to vector<64x1xf32>
    %70 = vector.broadcast %69 : vector<64x1xf32> to vector<64x64xf32>
    %71 = arith.subf %67, %70 : vector<64x64xf32>
    %72 = math.exp %71 : vector<64x64xf32>
    %cst_35 = arith.constant dense<0.000000e+00> : vector<64xf32>
    %73 = vector.multi_reduction <add>, %72, %cst_35 [1] : vector<64x64xf32> to vector<64xf32>
    %74 = vector.shape_cast %73 : vector<64xf32> to vector<64x1xf32>
    %75 = tpu.reciprocal %74 {approx = true} : vector<64x1xf32> -> vector<64x1xf32>
    %76 = vector.broadcast %75 : vector<64x1xf32> to vector<64x64xf32>
    %77 = arith.mulf %72, %76 : vector<64x64xf32>
    %cst_36 = arith.constant dense<0.000000e+00> : vector<64x8xf32>
    %78 = tpu.matmul %77, %63, %cst_36 {dimension_numbers = #tpu.dot_dimension_numbers<[1], [0], [0], [1], [0, 0, 1, 1], [], []>} : vector<64x64xf32>, vector<64x8xf32>, vector<64x8xf32> -> vector<64x8xf32>
    %79 = vector.extract_strided_slice %12 {offsets = [16, 0], sizes = [8, 32], strides = [1, 1]} : vector<32x32xf32> to vector<8x32xf32>
    %cst_37 = arith.constant dense<0.000000e+00> : vector<64x32xf32>
    %80 = tpu.matmul %78, %79, %cst_37 {dimension_numbers = #tpu.dot_dimension_numbers<[1], [0], [0], [1], [0, 0, 1, 1], [], []>} : vector<64x8xf32>, vector<8x32xf32>, vector<64x32xf32> -> vector<64x32xf32>
    %81 = arith.addf %60, %80 : vector<64x32xf32>
    %82 = vector.extract_strided_slice %17 {offsets = [0, 24], sizes = [64, 8], strides = [1, 1]} : vector<64x96xf32> to vector<64x8xf32>
    %83 = vector.extract_strided_slice %17 {offsets = [0, 56], sizes = [64, 8], strides = [1, 1]} : vector<64x96xf32> to vector<64x8xf32>
    %84 = vector.extract_strided_slice %17 {offsets = [0, 88], sizes = [64, 8], strides = [1, 1]} : vector<64x96xf32> to vector<64x8xf32>
    %cst_38 = arith.constant dense<0.000000e+00> : vector<64x64xf32>
    %85 = tpu.matmul %82, %83, %cst_38 {dimension_numbers = #tpu.dot_dimension_numbers<[1], [1], [0], [0], [0, 0, 1, 0], [], []>} : vector<64x8xf32>, vector<64x8xf32>, vector<64x64xf32> -> vector<64x64xf32>
    %cst_39 = arith.constant 0.353553385 : f32
    %86 = vector.broadcast %cst_39 : f32 to vector<64x64xf32>
    %87 = arith.mulf %85, %86 : vector<64x64xf32>
    %88 = arith.addf %87, %8 : vector<64x64xf32>
    %cst_40 = arith.constant dense<0xFF800000> : vector<64xf32>
    %89 = vector.multi_reduction <maximumf>, %88, %cst_40 [1] : vector<64x64xf32> to vector<64xf32>
    %90 = vector.shape_cast %89 : vector<64xf32> to vector<64x1xf32>
    %91 = vector.broadcast %90 : vector<64x1xf32> to vector<64x64xf32>
    %92 = arith.subf %88, %91 : vector<64x64xf32>
    %93 = math.exp %92 : vector<64x64xf32>
    %cst_41 = arith.constant dense<0.000000e+00> : vector<64xf32>
    %94 = vector.multi_reduction <add>, %93, %cst_41 [1] : vector<64x64xf32> to vector<64xf32>
    %95 = vector.shape_cast %94 : vector<64xf32> to vector<64x1xf32>
    %96 = tpu.reciprocal %95 {approx = true} : vector<64x1xf32> -> vector<64x1xf32>
    %97 = vector.broadcast %96 : vector<64x1xf32> to vector<64x64xf32>
    %98 = arith.mulf %93, %97 : vector<64x64xf32>
    %cst_42 = arith.constant dense<0.000000e+00> : vector<64x8xf32>
    %99 = tpu.matmul %98, %84, %cst_42 {dimension_numbers = #tpu.dot_dimension_numbers<[1], [0], [0], [1], [0, 0, 1, 1], [], []>} : vector<64x64xf32>, vector<64x8xf32>, vector<64x8xf32> -> vector<64x8xf32>
    %100 = vector.extract_strided_slice %12 {offsets = [24, 0], sizes = [8, 32], strides = [1, 1]} : vector<32x32xf32> to vector<8x32xf32>
    %cst_43 = arith.constant dense<0.000000e+00> : vector<64x32xf32>
    %101 = tpu.matmul %99, %100, %cst_43 {dimension_numbers = #tpu.dot_dimension_numbers<[1], [0], [0], [1], [0, 0, 1, 1], [], []>} : vector<64x8xf32>, vector<8x32xf32>, vector<64x32xf32> -> vector<64x32xf32>
    %102 = arith.addf %81, %101 : vector<64x32xf32>
    %c0_44 = arith.constant 0 : index
    %c0_45 = arith.constant 0 : index
    %c0_46 = arith.constant 0 : index
    %103 = vector.load %arg9[%c0_44, %c0_45, %c0_46] : memref<2x1x32xf32, #tpu.memory_space<vmem>>, vector<1x1x32xf32>
    %104 = vector.shape_cast %103 : vector<1x1x32xf32> to vector<1x32xf32>
    %105 = vector.broadcast %104 : vector<1x32xf32> to vector<64x32xf32>
    %106 = arith.addf %102, %105 : vector<64x32xf32>
    %107 = arith.addf %7, %106 : vector<64x32xf32>
    %c0_47 = arith.constant 0 : index
    %c0_48 = arith.constant 0 : index
    %c0_49 = arith.constant 0 : index
    %108 = vector.load %arg10[%c0_47, %c0_48, %c0_49] : memref<2x1x32xf32, #tpu.memory_space<vmem>>, vector<1x1x32xf32>
    %109 = vector.shape_cast %108 : vector<1x1x32xf32> to vector<1x32xf32>
    %c0_50 = arith.constant 0 : index
    %c0_51 = arith.constant 0 : index
    %c0_52 = arith.constant 0 : index
    %110 = vector.load %arg11[%c0_50, %c0_51, %c0_52] : memref<2x1x32xf32, #tpu.memory_space<vmem>>, vector<1x1x32xf32>
    %111 = vector.shape_cast %110 : vector<1x1x32xf32> to vector<1x32xf32>
    %cst_53 = arith.constant dense<0.000000e+00> : vector<64xf32>
    %112 = vector.multi_reduction <add>, %107, %cst_53 [1] : vector<64x32xf32> to vector<64xf32>
    %113 = vector.shape_cast %112 : vector<64xf32> to vector<64x1xf32>
    %cst_54 = arith.constant 3.200000e+01 : f32
    %114 = vector.broadcast %cst_54 : f32 to vector<64x1xf32>
    %115 = arith.divf %113, %114 : vector<64x1xf32>
    %116 = vector.broadcast %115 : vector<64x1xf32> to vector<64x32xf32>
    %117 = arith.subf %107, %116 : vector<64x32xf32>
    %118 = arith.mulf %117, %117 : vector<64x32xf32>
    %cst_55 = arith.constant dense<0.000000e+00> : vector<64xf32>
    %119 = vector.multi_reduction <add>, %118, %cst_55 [1] : vector<64x32xf32> to vector<64xf32>
    %120 = vector.shape_cast %119 : vector<64xf32> to vector<64x1xf32>
    %cst_56 = arith.constant 3.200000e+01 : f32
    %121 = vector.broadcast %cst_56 : f32 to vector<64x1xf32>
    %122 = arith.divf %120, %121 : vector<64x1xf32>
    %123 = vector.broadcast %115 : vector<64x1xf32> to vector<64x32xf32>
    %124 = arith.subf %107, %123 : vector<64x32xf32>
    %cst_57 = arith.constant 9.99999974E-6 : f32
    %125 = vector.broadcast %cst_57 : f32 to vector<64x1xf32>
    %126 = arith.addf %122, %125 : vector<64x1xf32>
    %127 = math.rsqrt %126 : vector<64x1xf32>
    %128 = vector.broadcast %127 : vector<64x1xf32> to vector<64x32xf32>
    %129 = arith.mulf %124, %128 : vector<64x32xf32>
    %130 = vector.broadcast %109 : vector<1x32xf32> to vector<64x32xf32>
    %131 = arith.mulf %129, %130 : vector<64x32xf32>
    %132 = vector.broadcast %111 : vector<1x32xf32> to vector<64x32xf32>
    %133 = arith.addf %131, %132 : vector<64x32xf32>
    %c0_58 = arith.constant 0 : index
    %c0_59 = arith.constant 0 : index
    %c0_60 = arith.constant 0 : index
    %134 = vector.load %arg14[%c0_58, %c0_59, %c0_60] : memref<2x32x64xf32, #tpu.memory_space<vmem>>, vector<1x32x64xf32>
    %135 = vector.shape_cast %134 : vector<1x32x64xf32> to vector<32x64xf32>
    %cst_61 = arith.constant dense<0.000000e+00> : vector<64x64xf32>
    %136 = tpu.matmul %133, %135, %cst_61 {dimension_numbers = #tpu.dot_dimension_numbers<[1], [0], [0], [1], [0, 0, 1, 1], [], []>} : vector<64x32xf32>, vector<32x64xf32>, vector<64x64xf32> -> vector<64x64xf32>
    %c0_62 = arith.constant 0 : index
    %c0_63 = arith.constant 0 : index
    %c0_64 = arith.constant 0 : index
    %137 = vector.load %arg15[%c0_62, %c0_63, %c0_64] : memref<2x1x64xf32, #tpu.memory_space<vmem>>, vector<1x1x64xf32>
    %138 = vector.shape_cast %137 : vector<1x1x64xf32> to vector<1x64xf32>
    %139 = vector.broadcast %138 : vector<1x64xf32> to vector<64x64xf32>
    %140 = arith.addf %136, %139 : vector<64x64xf32>
    %cst_65 = arith.constant 0.000000e+00 : f32
    %141 = vector.broadcast %cst_65 : f32 to vector<64x64xf32>
    %142 = arith.maximumf %140, %141 : vector<64x64xf32>
    %c0_66 = arith.constant 0 : index
    %c0_67 = arith.constant 0 : index
    %c0_68 = arith.constant 0 : index
    %143 = vector.load %arg16[%c0_66, %c0_67, %c0_68] : memref<2x64x32xf32, #tpu.memory_space<vmem>>, vector<1x64x32xf32>
    %144 = vector.shape_cast %143 : vector<1x64x32xf32> to vector<64x32xf32>
    %cst_69 = arith.constant dense<0.000000e+00> : vector<64x32xf32>
    %145 = tpu.matmul %142, %144, %cst_69 {dimension_numbers = #tpu.dot_dimension_numbers<[1], [0], [0], [1], [0, 0, 1, 1], [], []>} : vector<64x64xf32>, vector<64x32xf32>, vector<64x32xf32> -> vector<64x32xf32>
    %c0_70 = arith.constant 0 : index
    %c0_71 = arith.constant 0 : index
    %c0_72 = arith.constant 0 : index
    %146 = vector.load %arg17[%c0_70, %c0_71, %c0_72] : memref<2x1x32xf32, #tpu.memory_space<vmem>>, vector<1x1x32xf32>
    %147 = vector.shape_cast %146 : vector<1x1x32xf32> to vector<1x32xf32>
    %148 = vector.broadcast %147 : vector<1x32xf32> to vector<64x32xf32>
    %149 = arith.addf %145, %148 : vector<64x32xf32>
    %150 = arith.addf %133, %149 : vector<64x32xf32>
    %c0_73 = arith.constant 0 : index
    %c0_74 = arith.constant 0 : index
    %c0_75 = arith.constant 0 : index
    %151 = vector.load %arg12[%c0_73, %c0_74, %c0_75] : memref<2x1x32xf32, #tpu.memory_space<vmem>>, vector<1x1x32xf32>
    %152 = vector.shape_cast %151 : vector<1x1x32xf32> to vector<1x32xf32>
    %c0_76 = arith.constant 0 : index
    %c0_77 = arith.constant 0 : index
    %c0_78 = arith.constant 0 : index
    %153 = vector.load %arg13[%c0_76, %c0_77, %c0_78] : memref<2x1x32xf32, #tpu.memory_space<vmem>>, vector<1x1x32xf32>
    %154 = vector.shape_cast %153 : vector<1x1x32xf32> to vector<1x32xf32>
    %cst_79 = arith.constant dense<0.000000e+00> : vector<64xf32>
    %155 = vector.multi_reduction <add>, %150, %cst_79 [1] : vector<64x32xf32> to vector<64xf32>
    %156 = vector.shape_cast %155 : vector<64xf32> to vector<64x1xf32>
    %cst_80 = arith.constant 3.200000e+01 : f32
    %157 = vector.broadcast %cst_80 : f32 to vector<64x1xf32>
    %158 = arith.divf %156, %157 : vector<64x1xf32>
    %159 = vector.broadcast %158 : vector<64x1xf32> to vector<64x32xf32>
    %160 = arith.subf %150, %159 : vector<64x32xf32>
    %161 = arith.mulf %160, %160 : vector<64x32xf32>
    %cst_81 = arith.constant dense<0.000000e+00> : vector<64xf32>
    %162 = vector.multi_reduction <add>, %161, %cst_81 [1] : vector<64x32xf32> to vector<64xf32>
    %163 = vector.shape_cast %162 : vector<64xf32> to vector<64x1xf32>
    %cst_82 = arith.constant 3.200000e+01 : f32
    %164 = vector.broadcast %cst_82 : f32 to vector<64x1xf32>
    %165 = arith.divf %163, %164 : vector<64x1xf32>
    %166 = vector.broadcast %158 : vector<64x1xf32> to vector<64x32xf32>
    %167 = arith.subf %150, %166 : vector<64x32xf32>
    %cst_83 = arith.constant 9.99999974E-6 : f32
    %168 = vector.broadcast %cst_83 : f32 to vector<64x1xf32>
    %169 = arith.addf %165, %168 : vector<64x1xf32>
    %170 = math.rsqrt %169 : vector<64x1xf32>
    %171 = vector.broadcast %170 : vector<64x1xf32> to vector<64x32xf32>
    %172 = arith.mulf %167, %171 : vector<64x32xf32>
    %173 = vector.broadcast %152 : vector<1x32xf32> to vector<64x32xf32>
    %174 = arith.mulf %172, %173 : vector<64x32xf32>
    %175 = vector.broadcast %154 : vector<1x32xf32> to vector<64x32xf32>
    %176 = arith.addf %174, %175 : vector<64x32xf32>
    %c1 = arith.constant 1 : index
    %c0_84 = arith.constant 0 : index
    %c0_85 = arith.constant 0 : index
    %177 = vector.load %arg6[%c1, %c0_84, %c0_85] : memref<2x32x96xf32, #tpu.memory_space<vmem>>, vector<1x32x96xf32>
    %178 = vector.shape_cast %177 : vector<1x32x96xf32> to vector<32x96xf32>
    %c1_86 = arith.constant 1 : index
    %c0_87 = arith.constant 0 : index
    %c0_88 = arith.constant 0 : index
    %179 = vector.load %arg8[%c1_86, %c0_87, %c0_88] : memref<2x32x32xf32, #tpu.memory_space<vmem>>, vector<1x32x32xf32>
    %180 = vector.shape_cast %179 : vector<1x32x32xf32> to vector<32x32xf32>
    %cst_89 = arith.constant dense<0.000000e+00> : vector<64x96xf32>
    %181 = tpu.matmul %176, %178, %cst_89 {dimension_numbers = #tpu.dot_dimension_numbers<[1], [0], [0], [1], [0, 0, 1, 1], [], []>} : vector<64x32xf32>, vector<32x96xf32>, vector<64x96xf32> -> vector<64x96xf32>
    %c1_90 = arith.constant 1 : index
    %c0_91 = arith.constant 0 : index
    %c0_92 = arith.constant 0 : index
    %182 = vector.load %arg7[%c1_90, %c0_91, %c0_92] : memref<2x1x96xf32, #tpu.memory_space<vmem>>, vector<1x1x96xf32>
    %183 = vector.shape_cast %182 : vector<1x1x96xf32> to vector<1x96xf32>
    %184 = vector.broadcast %183 : vector<1x96xf32> to vector<64x96xf32>
    %185 = arith.addf %181, %184 : vector<64x96xf32>
    %cst_93 = arith.constant 0.000000e+00 : f32
    %186 = vector.broadcast %cst_93 : f32 to vector<64x32xf32>
    %187 = vector.extract_strided_slice %185 {offsets = [0, 0], sizes = [64, 8], strides = [1, 1]} : vector<64x96xf32> to vector<64x8xf32>
    %188 = vector.extract_strided_slice %185 {offsets = [0, 32], sizes = [64, 8], strides = [1, 1]} : vector<64x96xf32> to vector<64x8xf32>
    %189 = vector.extract_strided_slice %185 {offsets = [0, 64], sizes = [64, 8], strides = [1, 1]} : vector<64x96xf32> to vector<64x8xf32>
    %cst_94 = arith.constant dense<0.000000e+00> : vector<64x64xf32>
    %190 = tpu.matmul %187, %188, %cst_94 {dimension_numbers = #tpu.dot_dimension_numbers<[1], [1], [0], [0], [0, 0, 1, 0], [], []>} : vector<64x8xf32>, vector<64x8xf32>, vector<64x64xf32> -> vector<64x64xf32>
    %cst_95 = arith.constant 0.353553385 : f32
    %191 = vector.broadcast %cst_95 : f32 to vector<64x64xf32>
    %192 = arith.mulf %190, %191 : vector<64x64xf32>
    %193 = arith.addf %192, %8 : vector<64x64xf32>
    %cst_96 = arith.constant dense<0xFF800000> : vector<64xf32>
    %194 = vector.multi_reduction <maximumf>, %193, %cst_96 [1] : vector<64x64xf32> to vector<64xf32>
    %195 = vector.shape_cast %194 : vector<64xf32> to vector<64x1xf32>
    %196 = vector.broadcast %195 : vector<64x1xf32> to vector<64x64xf32>
    %197 = arith.subf %193, %196 : vector<64x64xf32>
    %198 = math.exp %197 : vector<64x64xf32>
    %cst_97 = arith.constant dense<0.000000e+00> : vector<64xf32>
    %199 = vector.multi_reduction <add>, %198, %cst_97 [1] : vector<64x64xf32> to vector<64xf32>
    %200 = vector.shape_cast %199 : vector<64xf32> to vector<64x1xf32>
    %201 = tpu.reciprocal %200 {approx = true} : vector<64x1xf32> -> vector<64x1xf32>
    %202 = vector.broadcast %201 : vector<64x1xf32> to vector<64x64xf32>
    %203 = arith.mulf %198, %202 : vector<64x64xf32>
    %cst_98 = arith.constant dense<0.000000e+00> : vector<64x8xf32>
    %204 = tpu.matmul %203, %189, %cst_98 {dimension_numbers = #tpu.dot_dimension_numbers<[1], [0], [0], [1], [0, 0, 1, 1], [], []>} : vector<64x64xf32>, vector<64x8xf32>, vector<64x8xf32> -> vector<64x8xf32>
    %205 = vector.extract_strided_slice %180 {offsets = [0, 0], sizes = [8, 32], strides = [1, 1]} : vector<32x32xf32> to vector<8x32xf32>
    %cst_99 = arith.constant dense<0.000000e+00> : vector<64x32xf32>
    %206 = tpu.matmul %204, %205, %cst_99 {dimension_numbers = #tpu.dot_dimension_numbers<[1], [0], [0], [1], [0, 0, 1, 1], [], []>} : vector<64x8xf32>, vector<8x32xf32>, vector<64x32xf32> -> vector<64x32xf32>
    %207 = arith.addf %186, %206 : vector<64x32xf32>
    %208 = vector.extract_strided_slice %185 {offsets = [0, 8], sizes = [64, 8], strides = [1, 1]} : vector<64x96xf32> to vector<64x8xf32>
    %209 = vector.extract_strided_slice %185 {offsets = [0, 40], sizes = [64, 8], strides = [1, 1]} : vector<64x96xf32> to vector<64x8xf32>
    %210 = vector.extract_strided_slice %185 {offsets = [0, 72], sizes = [64, 8], strides = [1, 1]} : vector<64x96xf32> to vector<64x8xf32>
    %cst_100 = arith.constant dense<0.000000e+00> : vector<64x64xf32>
    %211 = tpu.matmul %208, %209, %cst_100 {dimension_numbers = #tpu.dot_dimension_numbers<[1], [1], [0], [0], [0, 0, 1, 0], [], []>} : vector<64x8xf32>, vector<64x8xf32>, vector<64x64xf32> -> vector<64x64xf32>
    %cst_101 = arith.constant 0.353553385 : f32
    %212 = vector.broadcast %cst_101 : f32 to vector<64x64xf32>
    %213 = arith.mulf %211, %212 : vector<64x64xf32>
    %214 = arith.addf %213, %8 : vector<64x64xf32>
    %cst_102 = arith.constant dense<0xFF800000> : vector<64xf32>
    %215 = vector.multi_reduction <maximumf>, %214, %cst_102 [1] : vector<64x64xf32> to vector<64xf32>
    %216 = vector.shape_cast %215 : vector<64xf32> to vector<64x1xf32>
    %217 = vector.broadcast %216 : vector<64x1xf32> to vector<64x64xf32>
    %218 = arith.subf %214, %217 : vector<64x64xf32>
    %219 = math.exp %218 : vector<64x64xf32>
    %cst_103 = arith.constant dense<0.000000e+00> : vector<64xf32>
    %220 = vector.multi_reduction <add>, %219, %cst_103 [1] : vector<64x64xf32> to vector<64xf32>
    %221 = vector.shape_cast %220 : vector<64xf32> to vector<64x1xf32>
    %222 = tpu.reciprocal %221 {approx = true} : vector<64x1xf32> -> vector<64x1xf32>
    %223 = vector.broadcast %222 : vector<64x1xf32> to vector<64x64xf32>
    %224 = arith.mulf %219, %223 : vector<64x64xf32>
    %cst_104 = arith.constant dense<0.000000e+00> : vector<64x8xf32>
    %225 = tpu.matmul %224, %210, %cst_104 {dimension_numbers = #tpu.dot_dimension_numbers<[1], [0], [0], [1], [0, 0, 1, 1], [], []>} : vector<64x64xf32>, vector<64x8xf32>, vector<64x8xf32> -> vector<64x8xf32>
    %226 = vector.extract_strided_slice %180 {offsets = [8, 0], sizes = [8, 32], strides = [1, 1]} : vector<32x32xf32> to vector<8x32xf32>
    %cst_105 = arith.constant dense<0.000000e+00> : vector<64x32xf32>
    %227 = tpu.matmul %225, %226, %cst_105 {dimension_numbers = #tpu.dot_dimension_numbers<[1], [0], [0], [1], [0, 0, 1, 1], [], []>} : vector<64x8xf32>, vector<8x32xf32>, vector<64x32xf32> -> vector<64x32xf32>
    %228 = arith.addf %207, %227 : vector<64x32xf32>
    %229 = vector.extract_strided_slice %185 {offsets = [0, 16], sizes = [64, 8], strides = [1, 1]} : vector<64x96xf32> to vector<64x8xf32>
    %230 = vector.extract_strided_slice %185 {offsets = [0, 48], sizes = [64, 8], strides = [1, 1]} : vector<64x96xf32> to vector<64x8xf32>
    %231 = vector.extract_strided_slice %185 {offsets = [0, 80], sizes = [64, 8], strides = [1, 1]} : vector<64x96xf32> to vector<64x8xf32>
    %cst_106 = arith.constant dense<0.000000e+00> : vector<64x64xf32>
    %232 = tpu.matmul %229, %230, %cst_106 {dimension_numbers = #tpu.dot_dimension_numbers<[1], [1], [0], [0], [0, 0, 1, 0], [], []>} : vector<64x8xf32>, vector<64x8xf32>, vector<64x64xf32> -> vector<64x64xf32>
    %cst_107 = arith.constant 0.353553385 : f32
    %233 = vector.broadcast %cst_107 : f32 to vector<64x64xf32>
    %234 = arith.mulf %232, %233 : vector<64x64xf32>
    %235 = arith.addf %234, %8 : vector<64x64xf32>
    %cst_108 = arith.constant dense<0xFF800000> : vector<64xf32>
    %236 = vector.multi_reduction <maximumf>, %235, %cst_108 [1] : vector<64x64xf32> to vector<64xf32>
    %237 = vector.shape_cast %236 : vector<64xf32> to vector<64x1xf32>
    %238 = vector.broadcast %237 : vector<64x1xf32> to vector<64x64xf32>
    %239 = arith.subf %235, %238 : vector<64x64xf32>
    %240 = math.exp %239 : vector<64x64xf32>
    %cst_109 = arith.constant dense<0.000000e+00> : vector<64xf32>
    %241 = vector.multi_reduction <add>, %240, %cst_109 [1] : vector<64x64xf32> to vector<64xf32>
    %242 = vector.shape_cast %241 : vector<64xf32> to vector<64x1xf32>
    %243 = tpu.reciprocal %242 {approx = true} : vector<64x1xf32> -> vector<64x1xf32>
    %244 = vector.broadcast %243 : vector<64x1xf32> to vector<64x64xf32>
    %245 = arith.mulf %240, %244 : vector<64x64xf32>
    %cst_110 = arith.constant dense<0.000000e+00> : vector<64x8xf32>
    %246 = tpu.matmul %245, %231, %cst_110 {dimension_numbers = #tpu.dot_dimension_numbers<[1], [0], [0], [1], [0, 0, 1, 1], [], []>} : vector<64x64xf32>, vector<64x8xf32>, vector<64x8xf32> -> vector<64x8xf32>
    %247 = vector.extract_strided_slice %180 {offsets = [16, 0], sizes = [8, 32], strides = [1, 1]} : vector<32x32xf32> to vector<8x32xf32>
    %cst_111 = arith.constant dense<0.000000e+00> : vector<64x32xf32>
    %248 = tpu.matmul %246, %247, %cst_111 {dimension_numbers = #tpu.dot_dimension_numbers<[1], [0], [0], [1], [0, 0, 1, 1], [], []>} : vector<64x8xf32>, vector<8x32xf32>, vector<64x32xf32> -> vector<64x32xf32>
    %249 = arith.addf %228, %248 : vector<64x32xf32>
    %250 = vector.extract_strided_slice %185 {offsets = [0, 24], sizes = [64, 8], strides = [1, 1]} : vector<64x96xf32> to vector<64x8xf32>
    %251 = vector.extract_strided_slice %185 {offsets = [0, 56], sizes = [64, 8], strides = [1, 1]} : vector<64x96xf32> to vector<64x8xf32>
    %252 = vector.extract_strided_slice %185 {offsets = [0, 88], sizes = [64, 8], strides = [1, 1]} : vector<64x96xf32> to vector<64x8xf32>
    %cst_112 = arith.constant dense<0.000000e+00> : vector<64x64xf32>
    %253 = tpu.matmul %250, %251, %cst_112 {dimension_numbers = #tpu.dot_dimension_numbers<[1], [1], [0], [0], [0, 0, 1, 0], [], []>} : vector<64x8xf32>, vector<64x8xf32>, vector<64x64xf32> -> vector<64x64xf32>
    %cst_113 = arith.constant 0.353553385 : f32
    %254 = vector.broadcast %cst_113 : f32 to vector<64x64xf32>
    %255 = arith.mulf %253, %254 : vector<64x64xf32>
    %256 = arith.addf %255, %8 : vector<64x64xf32>
    %cst_114 = arith.constant dense<0xFF800000> : vector<64xf32>
    %257 = vector.multi_reduction <maximumf>, %256, %cst_114 [1] : vector<64x64xf32> to vector<64xf32>
    %258 = vector.shape_cast %257 : vector<64xf32> to vector<64x1xf32>
    %259 = vector.broadcast %258 : vector<64x1xf32> to vector<64x64xf32>
    %260 = arith.subf %256, %259 : vector<64x64xf32>
    %261 = math.exp %260 : vector<64x64xf32>
    %cst_115 = arith.constant dense<0.000000e+00> : vector<64xf32>
    %262 = vector.multi_reduction <add>, %261, %cst_115 [1] : vector<64x64xf32> to vector<64xf32>
    %263 = vector.shape_cast %262 : vector<64xf32> to vector<64x1xf32>
    %264 = tpu.reciprocal %263 {approx = true} : vector<64x1xf32> -> vector<64x1xf32>
    %265 = vector.broadcast %264 : vector<64x1xf32> to vector<64x64xf32>
    %266 = arith.mulf %261, %265 : vector<64x64xf32>
    %cst_116 = arith.constant dense<0.000000e+00> : vector<64x8xf32>
    %267 = tpu.matmul %266, %252, %cst_116 {dimension_numbers = #tpu.dot_dimension_numbers<[1], [0], [0], [1], [0, 0, 1, 1], [], []>} : vector<64x64xf32>, vector<64x8xf32>, vector<64x8xf32> -> vector<64x8xf32>
    %268 = vector.extract_strided_slice %180 {offsets = [24, 0], sizes = [8, 32], strides = [1, 1]} : vector<32x32xf32> to vector<8x32xf32>
    %cst_117 = arith.constant dense<0.000000e+00> : vector<64x32xf32>
    %269 = tpu.matmul %267, %268, %cst_117 {dimension_numbers = #tpu.dot_dimension_numbers<[1], [0], [0], [1], [0, 0, 1, 1], [], []>} : vector<64x8xf32>, vector<8x32xf32>, vector<64x32xf32> -> vector<64x32xf32>
    %270 = arith.addf %249, %269 : vector<64x32xf32>
    %c1_118 = arith.constant 1 : index
    %c0_119 = arith.constant 0 : index
    %c0_120 = arith.constant 0 : index
    %271 = vector.load %arg9[%c1_118, %c0_119, %c0_120] : memref<2x1x32xf32, #tpu.memory_space<vmem>>, vector<1x1x32xf32>
    %272 = vector.shape_cast %271 : vector<1x1x32xf32> to vector<1x32xf32>
    %273 = vector.broadcast %272 : vector<1x32xf32> to vector<64x32xf32>
    %274 = arith.addf %270, %273 : vector<64x32xf32>
    %275 = arith.addf %176, %274 : vector<64x32xf32>
    %c1_121 = arith.constant 1 : index
    %c0_122 = arith.constant 0 : index
    %c0_123 = arith.constant 0 : index
    %276 = vector.load %arg10[%c1_121, %c0_122, %c0_123] : memref<2x1x32xf32, #tpu.memory_space<vmem>>, vector<1x1x32xf32>
    %277 = vector.shape_cast %276 : vector<1x1x32xf32> to vector<1x32xf32>
    %c1_124 = arith.constant 1 : index
    %c0_125 = arith.constant 0 : index
    %c0_126 = arith.constant 0 : index
    %278 = vector.load %arg11[%c1_124, %c0_125, %c0_126] : memref<2x1x32xf32, #tpu.memory_space<vmem>>, vector<1x1x32xf32>
    %279 = vector.shape_cast %278 : vector<1x1x32xf32> to vector<1x32xf32>
    %cst_127 = arith.constant dense<0.000000e+00> : vector<64xf32>
    %280 = vector.multi_reduction <add>, %275, %cst_127 [1] : vector<64x32xf32> to vector<64xf32>
    %281 = vector.shape_cast %280 : vector<64xf32> to vector<64x1xf32>
    %cst_128 = arith.constant 3.200000e+01 : f32
    %282 = vector.broadcast %cst_128 : f32 to vector<64x1xf32>
    %283 = arith.divf %281, %282 : vector<64x1xf32>
    %284 = vector.broadcast %283 : vector<64x1xf32> to vector<64x32xf32>
    %285 = arith.subf %275, %284 : vector<64x32xf32>
    %286 = arith.mulf %285, %285 : vector<64x32xf32>
    %cst_129 = arith.constant dense<0.000000e+00> : vector<64xf32>
    %287 = vector.multi_reduction <add>, %286, %cst_129 [1] : vector<64x32xf32> to vector<64xf32>
    %288 = vector.shape_cast %287 : vector<64xf32> to vector<64x1xf32>
    %cst_130 = arith.constant 3.200000e+01 : f32
    %289 = vector.broadcast %cst_130 : f32 to vector<64x1xf32>
    %290 = arith.divf %288, %289 : vector<64x1xf32>
    %291 = vector.broadcast %283 : vector<64x1xf32> to vector<64x32xf32>
    %292 = arith.subf %275, %291 : vector<64x32xf32>
    %cst_131 = arith.constant 9.99999974E-6 : f32
    %293 = vector.broadcast %cst_131 : f32 to vector<64x1xf32>
    %294 = arith.addf %290, %293 : vector<64x1xf32>
    %295 = math.rsqrt %294 : vector<64x1xf32>
    %296 = vector.broadcast %295 : vector<64x1xf32> to vector<64x32xf32>
    %297 = arith.mulf %292, %296 : vector<64x32xf32>
    %298 = vector.broadcast %277 : vector<1x32xf32> to vector<64x32xf32>
    %299 = arith.mulf %297, %298 : vector<64x32xf32>
    %300 = vector.broadcast %279 : vector<1x32xf32> to vector<64x32xf32>
    %301 = arith.addf %299, %300 : vector<64x32xf32>
    %c1_132 = arith.constant 1 : index
    %c0_133 = arith.constant 0 : index
    %c0_134 = arith.constant 0 : index
    %302 = vector.load %arg14[%c1_132, %c0_133, %c0_134] : memref<2x32x64xf32, #tpu.memory_space<vmem>>, vector<1x32x64xf32>
    %303 = vector.shape_cast %302 : vector<1x32x64xf32> to vector<32x64xf32>
    %cst_135 = arith.constant dense<0.000000e+00> : vector<64x64xf32>
    %304 = tpu.matmul %301, %303, %cst_135 {dimension_numbers = #tpu.dot_dimension_numbers<[1], [0], [0], [1], [0, 0, 1, 1], [], []>} : vector<64x32xf32>, vector<32x64xf32>, vector<64x64xf32> -> vector<64x64xf32>
    %c1_136 = arith.constant 1 : index
    %c0_137 = arith.constant 0 : index
    %c0_138 = arith.constant 0 : index
    %305 = vector.load %arg15[%c1_136, %c0_137, %c0_138] : memref<2x1x64xf32, #tpu.memory_space<vmem>>, vector<1x1x64xf32>
    %306 = vector.shape_cast %305 : vector<1x1x64xf32> to vector<1x64xf32>
    %307 = vector.broadcast %306 : vector<1x64xf32> to vector<64x64xf32>
    %308 = arith.addf %304, %307 : vector<64x64xf32>
    %cst_139 = arith.constant 0.000000e+00 : f32
    %309 = vector.broadcast %cst_139 : f32 to vector<64x64xf32>
    %310 = arith.maximumf %308, %309 : vector<64x64xf32>
    %c1_140 = arith.constant 1 : index
    %c0_141 = arith.constant 0 : index
    %c0_142 = arith.constant 0 : index
    %311 = vector.load %arg16[%c1_140, %c0_141, %c0_142] : memref<2x64x32xf32, #tpu.memory_space<vmem>>, vector<1x64x32xf32>
    %312 = vector.shape_cast %311 : vector<1x64x32xf32> to vector<64x32xf32>
    %cst_143 = arith.constant dense<0.000000e+00> : vector<64x32xf32>
    %313 = tpu.matmul %310, %312, %cst_143 {dimension_numbers = #tpu.dot_dimension_numbers<[1], [0], [0], [1], [0, 0, 1, 1], [], []>} : vector<64x64xf32>, vector<64x32xf32>, vector<64x32xf32> -> vector<64x32xf32>
    %c1_144 = arith.constant 1 : index
    %c0_145 = arith.constant 0 : index
    %c0_146 = arith.constant 0 : index
    %314 = vector.load %arg17[%c1_144, %c0_145, %c0_146] : memref<2x1x32xf32, #tpu.memory_space<vmem>>, vector<1x1x32xf32>
    %315 = vector.shape_cast %314 : vector<1x1x32xf32> to vector<1x32xf32>
    %316 = vector.broadcast %315 : vector<1x32xf32> to vector<64x32xf32>
    %317 = arith.addf %313, %316 : vector<64x32xf32>
    %318 = arith.addf %301, %317 : vector<64x32xf32>
    %c1_147 = arith.constant 1 : index
    %c0_148 = arith.constant 0 : index
    %c0_149 = arith.constant 0 : index
    %319 = vector.load %arg12[%c1_147, %c0_148, %c0_149] : memref<2x1x32xf32, #tpu.memory_space<vmem>>, vector<1x1x32xf32>
    %320 = vector.shape_cast %319 : vector<1x1x32xf32> to vector<1x32xf32>
    %c1_150 = arith.constant 1 : index
    %c0_151 = arith.constant 0 : index
    %c0_152 = arith.constant 0 : index
    %321 = vector.load %arg13[%c1_150, %c0_151, %c0_152] : memref<2x1x32xf32, #tpu.memory_space<vmem>>, vector<1x1x32xf32>
    %322 = vector.shape_cast %321 : vector<1x1x32xf32> to vector<1x32xf32>
    %cst_153 = arith.constant dense<0.000000e+00> : vector<64xf32>
    %323 = vector.multi_reduction <add>, %318, %cst_153 [1] : vector<64x32xf32> to vector<64xf32>
    %324 = vector.shape_cast %323 : vector<64xf32> to vector<64x1xf32>
    %cst_154 = arith.constant 3.200000e+01 : f32
    %325 = vector.broadcast %cst_154 : f32 to vector<64x1xf32>
    %326 = arith.divf %324, %325 : vector<64x1xf32>
    %327 = vector.broadcast %326 : vector<64x1xf32> to vector<64x32xf32>
    %328 = arith.subf %318, %327 : vector<64x32xf32>
    %329 = arith.mulf %328, %328 : vector<64x32xf32>
    %cst_155 = arith.constant dense<0.000000e+00> : vector<64xf32>
    %330 = vector.multi_reduction <add>, %329, %cst_155 [1] : vector<64x32xf32> to vector<64xf32>
    %331 = vector.shape_cast %330 : vector<64xf32> to vector<64x1xf32>
    %cst_156 = arith.constant 3.200000e+01 : f32
    %332 = vector.broadcast %cst_156 : f32 to vector<64x1xf32>
    %333 = arith.divf %331, %332 : vector<64x1xf32>
    %334 = vector.broadcast %326 : vector<64x1xf32> to vector<64x32xf32>
    %335 = arith.subf %318, %334 : vector<64x32xf32>
    %cst_157 = arith.constant 9.99999974E-6 : f32
    %336 = vector.broadcast %cst_157 : f32 to vector<64x1xf32>
    %337 = arith.addf %333, %336 : vector<64x1xf32>
    %338 = math.rsqrt %337 : vector<64x1xf32>
    %339 = vector.broadcast %338 : vector<64x1xf32> to vector<64x32xf32>
    %340 = arith.mulf %335, %339 : vector<64x32xf32>
    %341 = vector.broadcast %320 : vector<1x32xf32> to vector<64x32xf32>
    %342 = arith.mulf %340, %341 : vector<64x32xf32>
    %343 = vector.broadcast %322 : vector<1x32xf32> to vector<64x32xf32>
    %344 = arith.addf %342, %343 : vector<64x32xf32>
    %c0_158 = arith.constant 0 : index
    %c0_159 = arith.constant 0 : index
    %345 = vector.load %arg0[%c0_158, %c0_159] : memref<4x1xi32, #tpu.memory_space<vmem>>, vector<4x1xi32>
    %c1_i32 = arith.constant 1 : i32
    %346 = vector.broadcast %c1_i32 : i32 to vector<4x1xi32>
    %347 = arith.maxsi %345, %346 : vector<4x1xi32>
    %348 = tpu.iota {dimensions = array<i32: 1>} : vector<4x64xi32>
    %349 = tpu.iota {dimensions = array<i32: 0>} : vector<4x64xi32>
    %c16_i32 = arith.constant 16 : i32
    %350 = vector.broadcast %c16_i32 : i32 to vector<4x64xi32>
    %351 = arith.muli %349, %350 : vector<4x64xi32>
    %352 = vector.broadcast %347 : vector<4x1xi32> to vector<4x64xi32>
    %353 = arith.addi %351, %352 : vector<4x64xi32>
    %c1_i32_160 = arith.constant 1 : i32
    %354 = vector.broadcast %c1_i32_160 : i32 to vector<4x64xi32>
    %355 = arith.subi %353, %354 : vector<4x64xi32>
    %356 = arith.cmpi eq, %348, %355 : vector<4x64xi32>
    %357 = arith.extui %356 : vector<4x64xi1> to vector<4x64xi32>
    %358 = arith.sitofp %357 : vector<4x64xi32> to vector<4x64xf32>
    %cst_161 = arith.constant dense<0.000000e+00> : vector<4x32xf32>
    %359 = tpu.matmul %358, %344, %cst_161 {dimension_numbers = #tpu.dot_dimension_numbers<[1], [0], [0], [1], [0, 0, 1, 1], [], []>} : vector<4x64xf32>, vector<64x32xf32>, vector<4x32xf32> -> vector<4x32xf32>
    %c0_162 = arith.constant 0 : index
    %c0_163 = arith.constant 0 : index
    %360 = vector.load %arg18[%c0_162, %c0_163] : memref<12x4xf32, #tpu.memory_space<vmem>>, vector<12x4xf32>
    %cst_164 = arith.constant dense<0.000000e+00> : vector<12x32xf32>
    %361 = tpu.matmul %360, %359, %cst_164 {dimension_numbers = #tpu.dot_dimension_numbers<[1], [0], [0], [1], [0, 0, 1, 1], [], []>} : vector<12x4xf32>, vector<4x32xf32>, vector<12x32xf32> -> vector<12x32xf32>
    %c0_165 = arith.constant 0 : index
    %c0_166 = arith.constant 0 : index
    %362 = vector.load %arg19[%c0_165, %c0_166] : memref<12x4xf32, #tpu.memory_space<vmem>>, vector<12x4xf32>
    %cst_167 = arith.constant dense<0.000000e+00> : vector<12x32xf32>
    %363 = tpu.matmul %362, %359, %cst_167 {dimension_numbers = #tpu.dot_dimension_numbers<[1], [0], [0], [1], [0, 0, 1, 1], [], []>} : vector<12x4xf32>, vector<4x32xf32>, vector<12x32xf32> -> vector<12x32xf32>
    %c0_168 = arith.constant 0 : index
    %c0_169 = arith.constant 0 : index
    %364 = vector.load %arg22[%c0_168, %c0_169] : memref<32x150xf32, #tpu.memory_space<vmem>>, vector<32x150xf32>
    %cst_170 = arith.constant dense<0.000000e+00> : vector<12x150xf32>
    %365 = tpu.matmul %361, %364, %cst_170 {dimension_numbers = #tpu.dot_dimension_numbers<[1], [0], [0], [1], [0, 0, 1, 1], [], []>} : vector<12x32xf32>, vector<32x150xf32>, vector<12x150xf32> -> vector<12x150xf32>
    %c0_171 = arith.constant 0 : index
    %c0_172 = arith.constant 0 : index
    %366 = vector.load %arg23[%c0_171, %c0_172] : memref<32x150xf32, #tpu.memory_space<vmem>>, vector<32x150xf32>
    %cst_173 = arith.constant dense<0.000000e+00> : vector<12x150xf32>
    %367 = tpu.matmul %363, %366, %cst_173 {dimension_numbers = #tpu.dot_dimension_numbers<[1], [0], [0], [1], [0, 0, 1, 1], [], []>} : vector<12x32xf32>, vector<32x150xf32>, vector<12x150xf32> -> vector<12x150xf32>
    %368 = arith.addf %365, %367 : vector<12x150xf32>
    %c0_174 = arith.constant 0 : index
    %c0_175 = arith.constant 0 : index
    %369 = vector.load %arg21[%c0_174, %c0_175] : memref<12x1xf32, #tpu.memory_space<vmem>>, vector<12x1xf32>
    %c0_176 = arith.constant 0 : index
    %c0_177 = arith.constant 0 : index
    %370 = vector.load %arg24[%c0_176, %c0_177] : memref<1x150xf32, #tpu.memory_space<vmem>>, vector<1x150xf32>
    %371 = vector.broadcast %369 : vector<12x1xf32> to vector<12x150xf32>
    %372 = vector.broadcast %370 : vector<1x150xf32> to vector<12x150xf32>
    %373 = arith.mulf %371, %372 : vector<12x150xf32>
    %374 = arith.addf %368, %373 : vector<12x150xf32>
    %c0_178 = arith.constant 0 : index
    %c0_179 = arith.constant 0 : index
    %375 = vector.load %arg25[%c0_178, %c0_179] : memref<1x150xf32, #tpu.memory_space<vmem>>, vector<1x150xf32>
    %376 = vector.broadcast %375 : vector<1x150xf32> to vector<12x150xf32>
    %377 = arith.addf %374, %376 : vector<12x150xf32>
    %cst_180 = arith.constant 0.000000e+00 : f32
    %378 = vector.broadcast %cst_180 : f32 to vector<12x150xf32>
    %379 = arith.maximumf %377, %378 : vector<12x150xf32>
    %c0_181 = arith.constant 0 : index
    %c0_182 = arith.constant 0 : index
    %380 = vector.load %arg26[%c0_181, %c0_182] : memref<150x150xf32, #tpu.memory_space<vmem>>, vector<150x150xf32>
    %cst_183 = arith.constant dense<0.000000e+00> : vector<12x150xf32>
    %381 = tpu.matmul %379, %380, %cst_183 {dimension_numbers = #tpu.dot_dimension_numbers<[1], [0], [0], [1], [0, 0, 1, 1], [], []>} : vector<12x150xf32>, vector<150x150xf32>, vector<12x150xf32> -> vector<12x150xf32>
    %c0_184 = arith.constant 0 : index
    %c0_185 = arith.constant 0 : index
    %382 = vector.load %arg27[%c0_184, %c0_185] : memref<1x150xf32, #tpu.memory_space<vmem>>, vector<1x150xf32>
    %383 = vector.broadcast %382 : vector<1x150xf32> to vector<12x150xf32>
    %384 = arith.addf %381, %383 : vector<12x150xf32>
    %cst_186 = arith.constant 0.000000e+00 : f32
    %385 = vector.broadcast %cst_186 : f32 to vector<12x150xf32>
    %386 = arith.maximumf %384, %385 : vector<12x150xf32>
    %c0_187 = arith.constant 0 : index
    %c0_188 = arith.constant 0 : index
    %387 = vector.load %arg28[%c0_187, %c0_188] : memref<150x150xf32, #tpu.memory_space<vmem>>, vector<150x150xf32>
    %cst_189 = arith.constant dense<0.000000e+00> : vector<12x150xf32>
    %388 = tpu.matmul %386, %387, %cst_189 {dimension_numbers = #tpu.dot_dimension_numbers<[1], [0], [0], [1], [0, 0, 1, 1], [], []>} : vector<12x150xf32>, vector<150x150xf32>, vector<12x150xf32> -> vector<12x150xf32>
    %c0_190 = arith.constant 0 : index
    %c0_191 = arith.constant 0 : index
    %389 = vector.load %arg29[%c0_190, %c0_191] : memref<1x150xf32, #tpu.memory_space<vmem>>, vector<1x150xf32>
    %390 = vector.broadcast %389 : vector<1x150xf32> to vector<12x150xf32>
    %391 = arith.addf %388, %390 : vector<12x150xf32>
    %cst_192 = arith.constant 0.000000e+00 : f32
    %392 = vector.broadcast %cst_192 : f32 to vector<12x150xf32>
    %393 = arith.maximumf %391, %392 : vector<12x150xf32>
    %c0_193 = arith.constant 0 : index
    %c0_194 = arith.constant 0 : index
    %394 = vector.load %arg30[%c0_193, %c0_194] : memref<150x64xf32, #tpu.memory_space<vmem>>, vector<150x64xf32>
    %cst_195 = arith.constant dense<0.000000e+00> : vector<12x64xf32>
    %395 = tpu.matmul %393, %394, %cst_195 {dimension_numbers = #tpu.dot_dimension_numbers<[1], [0], [0], [1], [0, 0, 1, 1], [], []>} : vector<12x150xf32>, vector<150x64xf32>, vector<12x64xf32> -> vector<12x64xf32>
    %c0_196 = arith.constant 0 : index
    %c0_197 = arith.constant 0 : index
    %396 = vector.load %arg31[%c0_196, %c0_197] : memref<1x64xf32, #tpu.memory_space<vmem>>, vector<1x64xf32>
    %397 = vector.broadcast %396 : vector<1x64xf32> to vector<12x64xf32>
    %398 = arith.addf %395, %397 : vector<12x64xf32>
    %cst_198 = arith.constant 0.000000e+00 : f32
    %399 = vector.broadcast %cst_198 : f32 to vector<12x64xf32>
    %400 = arith.maximumf %398, %399 : vector<12x64xf32>
    %c0_199 = arith.constant 0 : index
    %c0_200 = arith.constant 0 : index
    %401 = vector.load %arg20[%c0_199, %c0_200] : memref<4x12xf32, #tpu.memory_space<vmem>>, vector<4x12xf32>
    %cst_201 = arith.constant dense<0.000000e+00> : vector<4x64xf32>
    %402 = tpu.matmul %401, %400, %cst_201 {dimension_numbers = #tpu.dot_dimension_numbers<[1], [0], [0], [1], [0, 0, 1, 1], [], []>} : vector<4x12xf32>, vector<12x64xf32>, vector<4x64xf32> -> vector<4x64xf32>
    %c0_202 = arith.constant 0 : index
    %c0_203 = arith.constant 0 : index
    %403 = vector.load %arg32[%c0_202, %c0_203] : memref<32x100xf32, #tpu.memory_space<vmem>>, vector<32x100xf32>
    %cst_204 = arith.constant dense<0.000000e+00> : vector<4x100xf32>
    %404 = tpu.matmul %359, %403, %cst_204 {dimension_numbers = #tpu.dot_dimension_numbers<[1], [0], [0], [1], [0, 0, 1, 1], [], []>} : vector<4x32xf32>, vector<32x100xf32>, vector<4x100xf32> -> vector<4x100xf32>
    %c0_205 = arith.constant 0 : index
    %c0_206 = arith.constant 0 : index
    %405 = vector.load %arg33[%c0_205, %c0_206] : memref<64x100xf32, #tpu.memory_space<vmem>>, vector<64x100xf32>
    %cst_207 = arith.constant dense<0.000000e+00> : vector<4x100xf32>
    %406 = tpu.matmul %402, %405, %cst_207 {dimension_numbers = #tpu.dot_dimension_numbers<[1], [0], [0], [1], [0, 0, 1, 1], [], []>} : vector<4x64xf32>, vector<64x100xf32>, vector<4x100xf32> -> vector<4x100xf32>
    %407 = arith.addf %404, %406 : vector<4x100xf32>
    %c0_208 = arith.constant 0 : index
    %c0_209 = arith.constant 0 : index
    %408 = vector.load %arg34[%c0_208, %c0_209] : memref<1x100xf32, #tpu.memory_space<vmem>>, vector<1x100xf32>
    %409 = vector.broadcast %408 : vector<1x100xf32> to vector<4x100xf32>
    %410 = arith.addf %407, %409 : vector<4x100xf32>
    %cst_210 = arith.constant 0.000000e+00 : f32
    %411 = vector.broadcast %cst_210 : f32 to vector<4x100xf32>
    %412 = arith.maximumf %410, %411 : vector<4x100xf32>
    %c0_211 = arith.constant 0 : index
    %c0_212 = arith.constant 0 : index
    %413 = vector.load %arg35[%c0_211, %c0_212] : memref<100x1xf32, #tpu.memory_space<vmem>>, vector<100x1xf32>
    %cst_213 = arith.constant dense<0.000000e+00> : vector<4x1xf32>
    %414 = tpu.matmul %412, %413, %cst_213 {dimension_numbers = #tpu.dot_dimension_numbers<[1], [0], [0], [1], [0, 0, 1, 1], [], []>} : vector<4x100xf32>, vector<100x1xf32>, vector<4x1xf32> -> vector<4x1xf32>
    %c0_214 = arith.constant 0 : index
    %c0_215 = arith.constant 0 : index
    %415 = vector.load %arg36[%c0_214, %c0_215] : memref<1x1xf32, #tpu.memory_space<vmem>>, vector<1x1xf32>
    %416 = vector.broadcast %415 : vector<1x1xf32> to vector<4x1xf32>
    %417 = arith.addf %414, %416 : vector<4x1xf32>
    %cst_216 = arith.constant 0.000000e+00 : f32
    %418 = vector.broadcast %cst_216 : f32 to vector<4x1xf32>
    %419 = arith.subf %418, %417 : vector<4x1xf32>
    %420 = math.exp %419 : vector<4x1xf32>
    %cst_217 = arith.constant 1.000000e+00 : f32
    %421 = vector.broadcast %cst_217 : f32 to vector<4x1xf32>
    %422 = arith.addf %421, %420 : vector<4x1xf32>
    %423 = tpu.reciprocal %422 {approx = true} : vector<4x1xf32> -> vector<4x1xf32>
    %424 = vector.shape_cast %423 : vector<4x1xf32> to vector<1x4x1xf32>
    %cst_218 = arith.constant dense<0.000000e+00> : vector<1xf32>
    %425 = vector.multi_reduction <add>, %424, %cst_218 [1, 2] : vector<1x4x1xf32> to vector<1xf32>
    %426 = vector.shape_cast %425 : vector<1xf32> to vector<1x1x1xf32>
    %427 = vector.extract %426[0, 0, 0] : f32 from vector<1x1x1xf32>
    %428 = vector.broadcast %427 : f32 to vector<1x1xf32>
    %cst_219 = arith.constant 4.000000e+00 : f32
    %429 = vector.broadcast %cst_219 : f32 to vector<1x1xf32>
    %430 = arith.divf %428, %429 : vector<1x1xf32>
    %c0_220 = arith.constant 0 : index
    %c0_221 = arith.constant 0 : index
    %431 = vector.load %arg37[%c0_220, %c0_221] : memref<1x1xf32, #tpu.memory_space<vmem>>, vector<1x1xf32>
    tpu.vector_store %arg37[%c0_220, %c0_221], %430 {strides = array<i32>} : memref<1x1xf32, #tpu.memory_space<vmem>>, vector<1x1xf32>,
    return
  }
}

</mosaic_0001>

<bundles_post_ra>
// kernel: multi_object_forward.1
= control target key start
LH: loop header
LB: loop body
LE: loop exit
PB: predicated region body
PF: predicated region fallthrough
CT: control target
= control target key end

     0   :  { %s11303_s6 = smov 1   ;;  %s11304_s10 = smov 2   ;;  %s13760_s0 = inlined_call_operand.smem [shape: u32[38], index: -1, kind: input, shape index: {}] }
   0x1   :  { %s11389_s5 = sld [smem:[%s13760_s0]]   ;;  %s11305_s14 = smov 3  }
   0x2   :  { %s11394_s9 = sld [smem:[%s13760_s0 + %s11303_s6]]   ;;  %s11306_s18 = smov 4  }
   0x3   :  { %s11399_s13 = sld [smem:[%s13760_s0 + %s11304_s10]]   ;;  %s11307_s22 = smov 5  }
   0x4   :  { %s11404_s17 = sld [smem:[%s13760_s0 + %s11305_s14]]   ;;  %s11308_s26 = smov 6  }
   0x5   :  { %s11409_s21 = sld [smem:[%s13760_s0 + %s11306_s18]]   ;;  %s11309_s30 = smov 7  }
   0x6   :  { %s11414_s25 = sld [smem:[%s13760_s0 + %s11307_s22]]   ;;  %s11310_s4 = smov 8  }
   0x7   :  { %13789 = sst [smem:[#allocation45_spill]] %s11389_s5  ;;  %s11311_s10 = smov 9  }
   0x8   :  { %13790 = sst [smem:[#allocation46_spill]] %s11394_s9  ;;  %s11312_s15 = smov 10  }
   0x9   :  { %13791 = sst [smem:[#allocation47_spill]] %s11399_s13  ;;  %s11313_s20 = smov 11  }
   0xa   :  { %s11419_s29 = sld [smem:[%s13760_s0 + %s11308_s26]]   ;;  %s11314_s26 = smov 12  }
   0xb   :  { %s11424_s3 = sld [smem:[%s13760_s0 + %s11309_s30]]   ;;  %s11315_s1 = smov 13  }
   0xc   :  { %13792 = sst [smem:[#allocation48_spill]] %s11414_s25  ;;  %s11316_s7 = smov 14  }
   0xd   :  { %s11429_s8 = sld [smem:[%s13760_s0 + %s11310_s4]]   ;;  %s11318_s22 = smov 16  }
   0xe   :  { %s11434_s14 = sld [smem:[%s13760_s0 + %s11311_s10]]   ;;  %s11319_s28 = smov 17  }
   0xf   :  { %s11439_s19 = sld [smem:[%s13760_s0 + %s11312_s15]]   ;;  %s11317_s15 = smov 15  }
  0x10   :  { %13793 = sst [smem:[#allocation49_spill]] %s11419_s29 }
  0x11   :  { %s11444_s24 = sld [smem:[%s13760_s0 + %s11313_s20]]  }
  0x12   :  { %s11449_s30 = sld [smem:[%s13760_s0 + %s11314_s26]]  }
  0x13   :  { %13794 = sst [smem:[#allocation50_spill]] %s11429_s8 }
  0x14   :  { %s11454_s6 = sld [smem:[%s13760_s0 + %s11315_s1]]   ;;  %s11339_s1 = smov 37  }
  0x15   :  { %s11459_s12 = sld [smem:[%s13760_s0 + %s11316_s7]]   ;;  %s11320_s7 = smov 18  }
  0x16   :  { %s11464_s20 = sld [smem:[%s13760_s0 + %s11317_s15]]   ;;  %s11321_s15 = smov 19  }
  0x17   :  { %s11469_s27 = sld [smem:[%s13760_s0 + %s11318_s22]]   ;;  %s11322_s22 = smov 20  }
  0x18   :  { %s11474_s4 = sld [smem:[%s13760_s0 + %s11319_s28]]   ;;  %s11323_s28 = smov 21  }
  0x19   :  { %s11479_s5 = sld [smem:[%s13760_s0 + %s11320_s7]]   ;;  %s11324_s7 = smov 22  }
  0x1a   :  { %s11484_s8 = sld [smem:[%s13760_s0 + %s11321_s15]]   ;;  %s11325_s15 = smov 23  }
  0x1b   :  { %s11494_s13 = sld [smem:[%s13760_s0 + %s11323_s28]]   ;;  %s11327_s28 = smov 25  }
  0x1d   :  { %13795 = sst [smem:[#allocation51_spill]] %s11469_s27 }
  0x1e   :  { %13796 = sst [smem:[#allocation52_spill]] %s11474_s4 }
  0x1f   :  { %13797 = sst [smem:[#allocation53_spill]] %s11479_s5 }
  0x20   :  { %13798 = sst [smem:[#allocation54_spill]] %s11484_s8 }
  0x21   :  { %s11489_s27 = sld [smem:[%s13760_s0 + %s11322_s22]]   ;;  %s11326_s22 = smov 24  }
  0x22   :  { %13800 = sst [smem:[#allocation56_spill]] %s11494_s13 }
  0x23   :  { %s11499_s5 = sld [smem:[%s13760_s0 + %s11324_s7]]   ;;  %s11328_s7 = smov 26  }
  0x24   :  { %s11504_s8 = sld [smem:[%s13760_s0 + %s11325_s15]]   ;;  %s11329_s15 = smov 27  }
  0x25   :  { %s11514_s13 = sld [smem:[%s13760_s0 + %s11327_s28]]   ;;  %s11331_s28 = smov 29  }
  0x26   :  { %s11519_s25 = sld [smem:[%s13760_s0 + %s11328_s7]]   ;;  %s11332_s7 = smov 30  }
  0x27   :  { %13799 = sst [smem:[#allocation55_spill]] %s11489_s27 }
  0x28   :  { %s11509_s27 = sld [smem:[%s13760_s0 + %s11326_s22]]   ;;  %s11330_s22 = smov 28  }
  0x29   :  { %s11524_s29 = sld [smem:[%s13760_s0 + %s11329_s15]]   ;;  %s11333_s15 = smov 31  }
  0x2a   :  { %13801 = sst [smem:[#allocation57_spill]] %s11504_s8 }
  0x2b   :  { %s11534_s9 = sld [smem:[%s13760_s0 + %s11331_s28]]   ;;  %s11335_s28 = smov 33  }
  0x2c   :  { %13803 = sst [smem:[#allocation59_spill]] %s11519_s25 }
  0x2d   :  { %s11539_s25 = sld [smem:[%s13760_s0 + %s11332_s7]]   ;;  %s11336_s7 = smov 34  }
  0x2e   :  { %13802 = sst [smem:[#allocation58_spill]] %s11509_s27 }
  0x2f   :  { %13804 = sst [smem:[#allocation60_spill]] %s11524_s29 }
  0x30   :  { %s11529_s27 = sld [smem:[%s13760_s0 + %s11330_s22]]   ;;  %s11334_s22 = smov 32  }
  0x31   :  { %s11544_s29 = sld [smem:[%s13760_s0 + %s11333_s15]]   ;;  %s11337_s15 = smov 35  }
  0x32   :  { %s11554_s8 = sld [smem:[%s13760_s0 + %s11335_s28]]  }
  0x33   :  { %13806 = sst [smem:[#allocation62_spill]] %s11539_s25 }
  0x34   :  { %s11559_s25 = sld [smem:[%s13760_s0 + %s11336_s7]]  }
  0x35   :  { %s11572_s4 = sld [smem:[%s13760_s0 + %s11339_s1]]  }
  0x36   :  { %13805 = sst [smem:[#allocation61_spill]] %s11529_s27 }
  0x37   :  { %13807 = sst [smem:[#allocation63_spill]] %s11544_s29 }
  0x38   :  { %s11549_s27 = sld [smem:[%s13760_s0 + %s11334_s22]]   ;;  %s11338_s22 = smov 36  }
  0x39   :  { %s11564_s29 = sld [smem:[%s13760_s0 + %s11337_s15]]  }
  0x3e   :  { %13808 = sst [smem:[#allocation64_spill]] %s11549_s27 }
  0x3f   :  { %s7831_s27 = sld [smem:[%s13760_s0 + %s11338_s22]]  }
  0x45   :  { %v80_v0 = vstv %s7831_s27 }
  0x46   :  { %81 = vst [vmem:[#allocation2] sm:$0x1] %v80_v0 }
  0x47   :  { %82 = vsyncpa [#allocation4], 0 }
  0x48   :  { %83 = vsyncpa [#allocation7], 0 }
  0x49   :  { %84 = vsyncpa [#allocation10], 0 }
  0x4a   :  { %85 = vsyncpa [#allocation13], 0 }
  0x4b   :  { %86 = vsyncpa [#allocation16], 0 }
  0x4c   :  { %87 = vsyncpa [#allocation19], 0 }
  0x4d   :  { %88 = vsyncpa [#allocation22], 0 }
  0x4e   :  { %89 = vsyncpa [#allocation25], 0 }
  0x4f   :  { %90 = vsyncpa [#allocation28], 0 }
  0x50   :  { %91 = vsyncpa [#allocation31], 0 }
  0x51   :  { %92 = vsyncpa [#allocation5], 0  ;;  %s11340_s7 = smov [#allocation6]   ;;  %s10841_s0 = scalar_lea.hbm %s11409_s21, 16 }
  0x52   :  { %s115_s10 = sshll.u32 %s11340_s7, 4  ;;  %p10842_p0 = scmp.ne.s32.totalorder %s11409_s21, %s10841_s0  ;;  %s116_s10 = int_to_ptr.vmem [resolvable:$true] %s115_s10 }
  0x53   :  { %p10845_p1 = scmp.lt.u32.totalorder %s10841_s0, %s11409_s21 }
  0x55   :  { %p10847_p2 = pnand %p10845_p1, %p10842_p0 }
  0x57   :  { %10850 = shalt.err (!%p10847_p2)
}
  0x58   :  { %s10851_s27 = scalar_lea.vmem %s116_s10, 16  ;;  %s10855_s11 = scalar_lea.vmem %s116_s10, 32 }
  0x59   :  { %p10852_p3 = scmp.ne.s32.totalorder %s116_s10, %s10851_s27  ;;  %p10856_p4 = scmp.lt.s32.totalorder %s116_s10, %s116_s10 }
  0x5a   :  { %p10857_p5 = scmp.lt.s32.totalorder %s10855_s11, %s10851_s27 }
  0x5c   :  { %p10858_p6 = por %p10857_p5, %p10856_p4 }
  0x5e   :  { %p10859_p7 = pnand %p10858_p6, %p10852_p3 }
  0x60   :  { %10862 = shalt.err (!%p10859_p7)
}
  0x61   :  { %118 = dma.hbm_to_vmem [thread:$0]  %s11409_s21, 16, %s116_s10, [#allocation7]  }
  0x62   :  { %s11341_s15 = smov [#allocation9]   ;;  %s11342_s18 = smov [#allocation12]  }
  0x63   :  { %s142_s16 = sshll.u32 %s11341_s15, 4  ;;  %s166_s22 = sshll.u32 %s11342_s18, 4  ;;  %s143_s16 = int_to_ptr.vmem [resolvable:$true] %s142_s16  ;;  %s167_s22 = int_to_ptr.vmem [resolvable:$true] %s166_s22 }
  0x64   :  { %s10863_s23 = scalar_lea.hbm %s11434_s14, 32 }
  0x65   :  { %p10864_p8 = scmp.ne.s32.totalorder %s11434_s14, %s10863_s23  ;;  %p10867_p9 = scmp.lt.u32.totalorder %s10863_s23, %s11434_s14 }
  0x67   :  { %p10869_p10 = pnand %p10867_p9, %p10864_p8 }
  0x69   :  { %10872 = shalt.err (!%p10869_p10)
}
  0x6a   :  { %s10873_s26 = scalar_lea.vmem %s143_s16, 32  ;;  %p10878_p12 = scmp.lt.s32.totalorder %s143_s16, %s143_s16 }
  0x6b   :  { %p10874_p11 = scmp.ne.s32.totalorder %s143_s16, %s10873_s26  ;;  %p10879_p13 = scmp.lt.s32.totalorder %s10873_s26, %s10873_s26 }
  0x6d   :  { %p10880_p0 = por %p10879_p13, %p10878_p12 }
  0x6f   :  { %p10881_p1 = pnand %p10880_p0, %p10874_p11 }
  0x71   :  { %10884 = shalt.err (!%p10881_p1)
}
  0x72   :  { %s11343_s1 = smov 16   ;;  %s11344_s21 = smov 1  }
  0x73   :  { %148 = dma.hbm_to_vmem [thread:$0]  %s11434_s14, 32, %s143_s16, [#allocation10], %s11343_s1, %s11343_s1, %s11344_s21  }
  0x74   :  { %s10885_s28 = scalar_lea.hbm %s11444_s24, 32 }
  0x75   :  { %p10886_p2 = scmp.ne.s32.totalorder %s11444_s24, %s10885_s28  ;;  %p10889_p3 = scmp.lt.u32.totalorder %s10885_s28, %s11444_s24 }
  0x77   :  { %p10891_p4 = pnand %p10889_p3, %p10886_p2 }
  0x79   :  { %10894 = shalt.err (!%p10891_p4)
}
  0x7a   :  { %s10895_s2 = scalar_lea.vmem %s167_s22, 32  ;;  %p10900_p6 = scmp.lt.s32.totalorder %s167_s22, %s167_s22 }
  0x7b   :  { %p10896_p5 = scmp.ne.s32.totalorder %s167_s22, %s10895_s2  ;;  %p10901_p7 = scmp.lt.s32.totalorder %s10895_s2, %s10895_s2 }
  0x7d   :  { %p10902_p8 = por %p10901_p7, %p10900_p6 }
  0x7f   :  { %p10903_p9 = pnand %p10902_p8, %p10896_p5 }
  0x81   :  { %10906 = shalt.err (!%p10903_p9)
}
  0x82   :  { %172 = dma.hbm_to_vmem [thread:$0]  %s11444_s24, 32, %s167_s22, [#allocation13], %s11343_s1, %s11343_s1, %s11344_s21  }
  0x83   :  { %s11345_s14 = smov [#allocation15]   ;;  %s11346_s10 = smov [#allocation18]  }
  0x84   :  { %s190_s7 = sshll.u32 %s11345_s14, 4  ;;  %s214_s0 = sshll.u32 %s11346_s10, 4  ;;  %s191_s7 = int_to_ptr.vmem [resolvable:$true] %s190_s7  ;;  %s215_s0 = int_to_ptr.vmem [resolvable:$true] %s214_s0 }
  0x85   :  { %s10907_s27 = scalar_lea.hbm %s11454_s6, 32 }
  0x86   :  { %p10908_p10 = scmp.ne.s32.totalorder %s11454_s6, %s10907_s27  ;;  %p10911_p11 = scmp.lt.u32.totalorder %s10907_s27, %s11454_s6 }
  0x88   :  { %p10913_p12 = pnand %p10911_p11, %p10908_p10 }
  0x8a   :  { %10916 = shalt.err (!%p10913_p12)
}
  0x8b   :  { %s10917_s11 = scalar_lea.vmem %s191_s7, 32  ;;  %p10922_p0 = scmp.lt.s32.totalorder %s191_s7, %s191_s7 }
  0x8c   :  { %p10918_p13 = scmp.ne.s32.totalorder %s191_s7, %s10917_s11  ;;  %p10923_p1 = scmp.lt.s32.totalorder %s10917_s11, %s10917_s11 }
  0x8e   :  { %p10924_p2 = por %p10923_p1, %p10922_p0 }
  0x90   :  { %p10925_p3 = pnand %p10924_p2, %p10918_p13 }
  0x92   :  { %10928 = shalt.err (!%p10925_p3)
}
  0x93   :  { %196 = dma.hbm_to_vmem [thread:$0]  %s11454_s6, 32, %s191_s7, [#allocation16], %s11343_s1, %s11343_s1, %s11344_s21  }
  0x94   :  { %s10929_s24 = scalar_lea.hbm %s11464_s20, 32 }
  0x95   :  { %p10930_p4 = scmp.ne.s32.totalorder %s11464_s20, %s10929_s24  ;;  %p10933_p5 = scmp.lt.u32.totalorder %s10929_s24, %s11464_s20 }
  0x97   :  { %p10935_p6 = pnand %p10933_p5, %p10930_p4 }
  0x99   :  { %10938 = shalt.err (!%p10935_p6)
}
  0x9a   :  { %s10939_s15 = scalar_lea.vmem %s215_s0, 32  ;;  %p10944_p8 = scmp.lt.s32.totalorder %s215_s0, %s215_s0 }
  0x9b   :  { %p10940_p7 = scmp.ne.s32.totalorder %s215_s0, %s10939_s15  ;;  %p10945_p9 = scmp.lt.s32.totalorder %s10939_s15, %s10939_s15 }
  0x9d   :  { %p10946_p10 = por %p10945_p9, %p10944_p8 }
  0x9f   :  { %p10947_p11 = pnand %p10946_p10, %p10940_p7 }
  0xa1   :  { %10950 = shalt.err (!%p10947_p11)
}
  0xa2   :  { %220 = dma.hbm_to_vmem [thread:$0]  %s11464_s20, 32, %s215_s0, [#allocation19], %s11343_s1, %s11343_s1, %s11344_s21  }
  0xa3   :  { %s11347_s6 = smov [#allocation21]   ;;  %s10951_s18 = scalar_lea.hbm %s11499_s5, 1024 }
  0xa4   :  { %s248_s16 = sshll.u32 %s11347_s6, 4  ;;  %p10952_p12 = scmp.ne.s32.totalorder %s11499_s5, %s10951_s18  ;;  %s249_s16 = int_to_ptr.vmem [resolvable:$true] %s248_s16 }
  0xa5   :  { %p10955_p13 = scmp.lt.u32.totalorder %s10951_s18, %s11499_s5 }
  0xa7   :  { %p10957_p0 = pnand %p10955_p13, %p10952_p12 }
  0xa9   :  { %10960 = shalt.err (!%p10957_p0)
}
  0xaa   :  { %s10961_s22 = scalar_lea.vmem %s249_s16, 1024  ;;  %p10966_p2 = scmp.lt.s32.totalorder %s249_s16, %s249_s16 }
  0xab   :  { %p10962_p1 = scmp.ne.s32.totalorder %s249_s16, %s10961_s22  ;;  %p10967_p3 = scmp.lt.s32.totalorder %s10961_s22, %s10961_s22 }
  0xad   :  { %p10968_p4 = por %p10967_p3, %p10966_p2 }
  0xaf   :  { %p10969_p5 = pnand %p10968_p4, %p10962_p1 }
  0xb1   :  { %10972 = shalt.err (!%p10969_p5)
}
  0xb2   :  { %s11348_s23 = smov 256   ;;  %s11349_s20 = smov [#allocation24]  }
  0xb3   :  { %254 = dma.hbm_to_vmem [thread:$0]  %s11499_s5, 1024, %s249_s16, [#allocation22], %s11348_s23, %s11348_s23, %s11343_s1  }
  0xb4   :  { %s275_s26 = sshll.u32 %s11349_s20, 4  ;;  %s11350_s28 = smov [#allocation27]   ;;  %s276_s26 = int_to_ptr.vmem [resolvable:$true] %s275_s26 }
  0xb5   :  { %s299_s2 = sshll.u32 %s11350_s28, 4  ;;  %s10973_s14 = scalar_lea.hbm %s11514_s13, 32  ;;  %s300_s2 = int_to_ptr.vmem [resolvable:$true] %s299_s2 }
  0xb6   :  { %p10974_p6 = scmp.ne.s32.totalorder %s11514_s13, %s10973_s14  ;;  %p10977_p7 = scmp.lt.u32.totalorder %s10973_s14, %s11514_s13 }
  0xb8   :  { %p10979_p8 = pnand %p10977_p7, %p10974_p6 }
  0xba   :  { %10982 = shalt.err (!%p10979_p8)
}
  0xbb   :  { %s10983_s7 = scalar_lea.vmem %s276_s26, 32  ;;  %p10988_p10 = scmp.lt.s32.totalorder %s276_s26, %s276_s26 }
  0xbc   :  { %p10984_p9 = scmp.ne.s32.totalorder %s276_s26, %s10983_s7  ;;  %p10989_p11 = scmp.lt.s32.totalorder %s10983_s7, %s10983_s7 }
  0xbe   :  { %p10990_p12 = por %p10989_p11, %p10988_p10 }
  0xc0   :  { %p10991_p13 = pnand %p10990_p12, %p10984_p9 }
  0xc2   :  { %10994 = shalt.err (!%p10991_p13)
}
  0xc3   :  { %278 = dma.hbm_to_vmem [thread:$0]  %s11514_s13, 32, %s276_s26, [#allocation25]  }
  0xc4   :  { %s10995_s5 = scalar_lea.hbm %s11534_s9, 32 }
  0xc5   :  { %p10996_p0 = scmp.ne.s32.totalorder %s11534_s9, %s10995_s5  ;;  %p10999_p1 = scmp.lt.u32.totalorder %s10995_s5, %s11534_s9 }
  0xc7   :  { %p11001_p2 = pnand %p10999_p1, %p10996_p0 }
  0xc9   :  { %11004 = shalt.err (!%p11001_p2)
}
  0xca   :  { %s11005_s10 = scalar_lea.vmem %s300_s2, 32  ;;  %p11010_p4 = scmp.lt.s32.totalorder %s300_s2, %s300_s2 }
  0xcb   :  { %p11006_p3 = scmp.ne.s32.totalorder %s300_s2, %s11005_s10  ;;  %p11011_p5 = scmp.lt.s32.totalorder %s11005_s10, %s11005_s10 }
  0xcd   :  { %p11012_p6 = por %p11011_p5, %p11010_p4 }
  0xcf   :  { %p11013_p7 = pnand %p11012_p6, %p11006_p3 }
  0xd1   :  { %11016 = shalt.err (!%p11013_p7)
}
  0xd2   :  { %302 = dma.hbm_to_vmem [thread:$0]  %s11534_s9, 32, %s300_s2, [#allocation28]  }
  0xd3   :  { %s11351_s0 = smov [#allocation30]   ;;  %s11352_s27 = smov [#allocation3]  }
  0xd4   :  { %s324_s13 = sshll.u32 %s11351_s0, 4  ;;  %s105_s11 = sshll.u32 %s11352_s27, 4  ;;  %s325_s13 = int_to_ptr.vmem [resolvable:$true] %s324_s13  ;;  %s106_s11 = int_to_ptr.vmem [resolvable:$true] %s105_s11 }
  0xd5   :  { %s11017_s24 = scalar_lea.hbm %s11554_s8, 1024 }
  0xd6   :  { %p11018_p8 = scmp.ne.s32.totalorder %s11554_s8, %s11017_s24  ;;  %p11021_p9 = scmp.lt.u32.totalorder %s11017_s24, %s11554_s8 }
  0xd8   :  { %p11023_p10 = pnand %p11021_p9, %p11018_p8 }
  0xda   :  { %11026 = shalt.err (!%p11023_p10)
}
  0xdb   :  { %s11027_s15 = scalar_lea.vmem %s325_s13, 1024  ;;  %p11032_p12 = scmp.lt.s32.totalorder %s325_s13, %s325_s13 }
  0xdc   :  { %p11028_p11 = scmp.ne.s32.totalorder %s325_s13, %s11027_s15  ;;  %p11033_p13 = scmp.lt.s32.totalorder %s11027_s15, %s11027_s15 }
  0xde   :  { %p11034_p0 = por %p11033_p13, %p11032_p12 }
  0xe0   :  { %p11035_p1 = pnand %p11034_p0, %p11028_p11 }
  0xe2   :  { %11038 = shalt.err (!%p11035_p1)
}
  0xe3   :  { %s11353_s6 = smov 128   ;;  %s11354_s9 = smov 8  }
  0xe4   :  { %330 = dma.hbm_to_vmem [thread:$0]  %s11554_s8, 1024, %s325_s13, [#allocation31], %s11353_s6, %s11353_s6, %s11354_s9  }
  0xe5   :  { %s11039_s16 = scalar_lea.hbm %s11404_s17, 64 }
  0xe6   :  { %p11040_p2 = scmp.ne.s32.totalorder %s11404_s17, %s11039_s16  ;;  %p11043_p3 = scmp.lt.u32.totalorder %s11039_s16, %s11404_s17 }
  0xe8   :  { %p11045_p4 = pnand %p11043_p3, %p11040_p2 }
  0xea   :  { %11048 = shalt.err (!%p11045_p4)
}
  0xeb   :  { %s11049_s18 = scalar_lea.vmem %s106_s11, 64  ;;  %p11054_p6 = scmp.lt.s32.totalorder %s106_s11, %s106_s11 }
  0xec   :  { %p11050_p5 = scmp.ne.s32.totalorder %s106_s11, %s11049_s18  ;;  %p11055_p7 = scmp.lt.s32.totalorder %s11049_s18, %s11049_s18 }
  0xee   :  { %p11056_p8 = por %p11055_p7, %p11054_p6 }
  0xf0   :  { %p11057_p9 = pnand %p11056_p8, %p11050_p5 }
  0xf2   :  { %11060 = shalt.err (!%p11057_p9)
}
  0xf3   :  { %108 = dma.hbm_to_vmem [thread:$0]  %s11404_s17, 64, %s106_s11, [#allocation4]  }
  0xf4   :  { %s11355_s22 = smov [#allocation8]   ;;  %s11356_s20 = smov [#allocation11]  }
  0xf5   :  { %s128_s8 = sshll.u32 %s11355_s22, 4  ;;  %s154_s26 = sshll.u32 %s11356_s20, 4  ;;  %s129_s8 = int_to_ptr.vmem [resolvable:$true] %s128_s8  ;;  %s155_s26 = int_to_ptr.vmem [resolvable:$true] %s154_s26 }
  0xf6   :  { %s11061_s28 = scalar_lea.hbm %s11424_s3, 32 }
  0xf7   :  { %p11062_p10 = scmp.ne.s32.totalorder %s11424_s3, %s11061_s28  ;;  %p11065_p11 = scmp.lt.u32.totalorder %s11061_s28, %s11424_s3 }
  0xf9   :  { %p11067_p12 = pnand %p11065_p11, %p11062_p10 }
  0xfb   :  { %11070 = shalt.err (!%p11067_p12)
}
  0xfc   :  { %s11071_s2 = scalar_lea.vmem %s129_s8, 32  ;;  %p11076_p0 = scmp.lt.s32.totalorder %s129_s8, %s129_s8 }
  0xfd   :  { %p11072_p13 = scmp.ne.s32.totalorder %s129_s8, %s11071_s2  ;;  %p11077_p1 = scmp.lt.s32.totalorder %s11071_s2, %s11071_s2 }
  0xff   :  { %p11078_p2 = por %p11077_p1, %p11076_p0 }
 0x101   :  { %p11079_p3 = pnand %p11078_p2, %p11072_p13 }
 0x103   :  { %11082 = shalt.err (!%p11079_p3)
}
 0x104   :  { %134 = dma.hbm_to_vmem [thread:$0]  %s11424_s3, 32, %s129_s8, [#allocation7], %s11343_s1, %s11343_s1, %s11344_s21  }
 0x105   :  { %s11083_s17 = scalar_lea.hbm %s11439_s19, 32 }
 0x106   :  { %p11084_p4 = scmp.ne.s32.totalorder %s11439_s19, %s11083_s17  ;;  %p11087_p5 = scmp.lt.u32.totalorder %s11083_s17, %s11439_s19 }
 0x108   :  { %p11089_p6 = pnand %p11087_p5, %p11084_p4 }
 0x10a   :  { %11092 = shalt.err (!%p11089_p6)
}
 0x10b   :  { %s11093_s14 = scalar_lea.vmem %s155_s26, 32  ;;  %p11098_p8 = scmp.lt.s32.totalorder %s155_s26, %s155_s26 }
 0x10c   :  { %p11094_p7 = scmp.ne.s32.totalorder %s155_s26, %s11093_s14  ;;  %p11099_p9 = scmp.lt.s32.totalorder %s11093_s14, %s11093_s14 }
 0x10e   :  { %p11100_p10 = por %p11099_p9, %p11098_p8 }
 0x110   :  { %p11101_p11 = pnand %p11100_p10, %p11094_p7 }
 0x112   :  { %11104 = shalt.err (!%p11101_p11)
}
 0x113   :  { %160 = dma.hbm_to_vmem [thread:$0]  %s11439_s19, 32, %s155_s26, [#allocation10], %s11343_s1, %s11343_s1, %s11344_s21  }
 0x114   :  { %s11357_s3 = smov [#allocation14]   ;;  %s11358_s5 = smov [#allocation17]  }
 0x115   :  { %s178_s7 = sshll.u32 %s11357_s3, 4  ;;  %s202_s10 = sshll.u32 %s11358_s5, 4  ;;  %s179_s7 = int_to_ptr.vmem [resolvable:$true] %s178_s7  ;;  %s203_s10 = int_to_ptr.vmem [resolvable:$true] %s202_s10 }
 0x116   :  { %s11105_s0 = scalar_lea.hbm %s11449_s30, 32 }
 0x117   :  { %p11106_p12 = scmp.ne.s32.totalorder %s11449_s30, %s11105_s0  ;;  %p11109_p13 = scmp.lt.u32.totalorder %s11105_s0, %s11449_s30 }
 0x119   :  { %p11111_p0 = pnand %p11109_p13, %p11106_p12 }
 0x11b   :  { %11114 = shalt.err (!%p11111_p0)
}
 0x11c   :  { %s11115_s13 = scalar_lea.vmem %s179_s7, 32  ;;  %p11120_p2 = scmp.lt.s32.totalorder %s179_s7, %s179_s7 }
 0x11d   :  { %p11116_p1 = scmp.ne.s32.totalorder %s179_s7, %s11115_s13  ;;  %p11121_p3 = scmp.lt.s32.totalorder %s11115_s13, %s11115_s13 }
 0x11f   :  { %p11122_p4 = por %p11121_p3, %p11120_p2 }
 0x121   :  { %p11123_p5 = pnand %p11122_p4, %p11116_p1 }
 0x123   :  { %11126 = shalt.err (!%p11123_p5)
}
 0x124   :  { %184 = dma.hbm_to_vmem [thread:$0]  %s11449_s30, 32, %s179_s7, [#allocation13], %s11343_s1, %s11343_s1, %s11344_s21  }
 0x125   :  { %s11127_s19 = scalar_lea.hbm %s11459_s12, 1024 }
 0x126   :  { %p11128_p6 = scmp.ne.s32.totalorder %s11459_s12, %s11127_s19  ;;  %p11131_p7 = scmp.lt.u32.totalorder %s11127_s19, %s11459_s12 }
 0x128   :  { %p11133_p8 = pnand %p11131_p7, %p11128_p6 }
 0x12a   :  { %11136 = shalt.err (!%p11133_p8)
}
 0x12b   :  { %s11137_s27 = scalar_lea.vmem %s203_s10, 1024  ;;  %p11142_p10 = scmp.lt.s32.totalorder %s203_s10, %s203_s10 }
 0x12c   :  { %p11138_p9 = scmp.ne.s32.totalorder %s203_s10, %s11137_s27  ;;  %p11143_p11 = scmp.lt.s32.totalorder %s11137_s27, %s11137_s27 }
 0x12e   :  { %p11144_p12 = por %p11143_p11, %p11142_p10 }
 0x130   :  { %p11145_p13 = pnand %p11144_p12, %p11138_p9 }
 0x132   :  { %11148 = shalt.err (!%p11145_p13)
}
 0x133   :  { %s13809_s11 = sld [smem:[#allocation52_spill]]  ;;  %s11359_s30 = smov [#allocation20]  }
 0x134   :  { %208 = dma.hbm_to_vmem [thread:$0]  %s11459_s12, 1024, %s203_s10, [#allocation16], %s11353_s6, %s11353_s6, %s11354_s9  }
 0x135   :  { %s228_s24 = sshll.u32 %s11359_s30, 4  ;;  %s11360_s15 = smov [#allocation23]   ;;  %s229_s24 = int_to_ptr.vmem [resolvable:$true] %s228_s24 }
 0x136   :  { %s260_s16 = sshll.u32 %s11360_s15, 4  ;;  %s261_s16 = int_to_ptr.vmem [resolvable:$true] %s260_s16 }
 0x139   :  { %s11149_s18 = scalar_lea.hbm %s13809_s11, 32 }
 0x13a   :  { %p11150_p0 = scmp.ne.s32.totalorder %s13809_s11, %s11149_s18  ;;  %p11153_p1 = scmp.lt.u32.totalorder %s11149_s18, %s13809_s11 }
 0x13c   :  { %p11155_p2 = pnand %p11153_p1, %p11150_p0 }
 0x13e   :  { %11158 = shalt.err (!%p11155_p2)
}
 0x13f   :  { %s11159_s22 = scalar_lea.vmem %s229_s24, 32  ;;  %p11164_p4 = scmp.lt.s32.totalorder %s229_s24, %s229_s24 }
 0x140   :  { %p11160_p3 = scmp.ne.s32.totalorder %s229_s24, %s11159_s22  ;;  %p11165_p5 = scmp.lt.s32.totalorder %s11159_s22, %s11159_s22 }
 0x142   :  { %p11166_p6 = por %p11165_p5, %p11164_p4 }
 0x144   :  { %p11167_p7 = pnand %p11166_p6, %p11160_p3 }
 0x146   :  { %11170 = shalt.err (!%p11167_p7)
}
 0x147   :  { %s13810_s12 = sld [smem:[#allocation57_spill]] }
 0x148   :  { %234 = dma.hbm_to_vmem [thread:$0]  %s13809_s11, 32, %s229_s24, [#allocation19], %s11343_s1, %s11343_s1, %s11344_s21  }
 0x14d   :  { %s11171_s8 = scalar_lea.hbm %s13810_s12, 1024 }
 0x14e   :  { %p11172_p8 = scmp.ne.s32.totalorder %s13810_s12, %s11171_s8  ;;  %p11175_p9 = scmp.lt.u32.totalorder %s11171_s8, %s13810_s12 }
 0x150   :  { %p11177_p10 = pnand %p11175_p9, %p11172_p8 }
 0x152   :  { %11180 = shalt.err (!%p11177_p10)
}
 0x153   :  { %s11181_s20 = scalar_lea.vmem %s261_s16, 1024  ;;  %p11186_p12 = scmp.lt.s32.totalorder %s261_s16, %s261_s16 }
 0x154   :  { %p11182_p11 = scmp.ne.s32.totalorder %s261_s16, %s11181_s20  ;;  %p11187_p13 = scmp.lt.s32.totalorder %s11181_s20, %s11181_s20 }
 0x156   :  { %p11188_p0 = por %p11187_p13, %p11186_p12 }
 0x158   :  { %p11189_p1 = pnand %p11188_p0, %p11182_p11 }
 0x15a   :  { %11192 = shalt.err (!%p11189_p1)
}
 0x15b   :  { %s13811_s26 = sld [smem:[#allocation60_spill]]  ;;  %s11361_s21 = smov [#allocation26]  }
 0x15c   :  { %266 = dma.hbm_to_vmem [thread:$0]  %s13810_s12, 1024, %s261_s16, [#allocation22], %s11348_s23, %s11348_s23, %s11343_s1  }
 0x15d   :  { %s287_s28 = sshll.u32 %s11361_s21, 4  ;;  %s11362_s2 = smov [#allocation29]   ;;  %s288_s28 = int_to_ptr.vmem [resolvable:$true] %s287_s28 }
 0x15e   :  { %s312_s17 = sshll.u32 %s11362_s2, 4  ;;  %s313_s17 = int_to_ptr.vmem [resolvable:$true] %s312_s17 }
 0x161   :  { %s11193_s14 = scalar_lea.hbm %s13811_s26, 32 }
 0x162   :  { %p11194_p2 = scmp.ne.s32.totalorder %s13811_s26, %s11193_s14  ;;  %p11197_p3 = scmp.lt.u32.totalorder %s11193_s14, %s13811_s26 }
 0x164   :  { %p11199_p4 = pnand %p11197_p3, %p11194_p2 }
 0x166   :  { %11202 = shalt.err (!%p11199_p4)
}
 0x167   :  { %s11203_s3 = scalar_lea.vmem %s288_s28, 32  ;;  %p11208_p6 = scmp.lt.s32.totalorder %s288_s28, %s288_s28 }
 0x168   :  { %p11204_p5 = scmp.ne.s32.totalorder %s288_s28, %s11203_s3  ;;  %p11209_p7 = scmp.lt.s32.totalorder %s11203_s3, %s11203_s3 }
 0x16a   :  { %p11210_p8 = por %p11209_p7, %p11208_p6 }
 0x16c   :  { %p11211_p9 = pnand %p11210_p8, %p11204_p5 }
 0x16e   :  { %11214 = shalt.err (!%p11211_p9)
}
 0x16f   :  { %s13812_s7 = sld [smem:[#allocation64_spill]] }
 0x170   :  { %290 = dma.hbm_to_vmem [thread:$0]  %s13811_s26, 32, %s288_s28, [#allocation25]  }
 0x175   :  { %s11215_s1 = scalar_lea.hbm %s13812_s7, 512 }
 0x176   :  { %p11216_p10 = scmp.ne.s32.totalorder %s13812_s7, %s11215_s1  ;;  %p11219_p11 = scmp.lt.u32.totalorder %s11215_s1, %s13812_s7 }
 0x178   :  { %p11221_p12 = pnand %p11219_p11, %p11216_p10 }
 0x17a   :  { %11224 = shalt.err (!%p11221_p12)
}
 0x17b   :  { %s11225_s23 = scalar_lea.vmem %s313_s17, 512  ;;  %p11230_p0 = scmp.lt.s32.totalorder %s313_s17, %s313_s17 }
 0x17c   :  { %p11226_p13 = scmp.ne.s32.totalorder %s313_s17, %s11225_s23  ;;  %p11231_p1 = scmp.lt.s32.totalorder %s11225_s23, %s11225_s23 }
 0x17e   :  { %p11232_p2 = por %p11231_p1, %p11230_p0 }
 0x180   :  { %p11233_p3 = pnand %p11232_p2, %p11226_p13 }
 0x182   :  { %11236 = shalt.err (!%p11233_p3)
}
 0x183   :  { %318 = dma.hbm_to_vmem [thread:$0]  %s13812_s7, 512, %s313_s17, [#allocation28], %s11353_s6, %s11353_s6, %s11354_s9  }
 0x184   :  { %s11363_s5 = smov [#allocation32]   ;;  %s11237_s0 = scalar_lea.hbm %s11559_s25, 16 }
 0x185   :  { %s337_s10 = sshll.u32 %s11363_s5, 4  ;;  %p11238_p4 = scmp.ne.s32.totalorder %s11559_s25, %s11237_s0  ;;  %s338_s10 = int_to_ptr.vmem [resolvable:$true] %s337_s10 }
 0x186   :  { %p11241_p5 = scmp.lt.u32.totalorder %s11237_s0, %s11559_s25 }
 0x188   :  { %p11243_p6 = pnand %p11241_p5, %p11238_p4 }
 0x18a   :  { %11246 = shalt.err (!%p11243_p6)
}
 0x18b   :  { %s11247_s13 = scalar_lea.vmem %s338_s10, 16  ;;  %s11251_s19 = scalar_lea.vmem %s338_s10, 32 }
 0x18c   :  { %p11248_p7 = scmp.ne.s32.totalorder %s338_s10, %s11247_s13  ;;  %p11252_p8 = scmp.lt.s32.totalorder %s338_s10, %s338_s10 }
 0x18d   :  { %p11253_p9 = scmp.lt.s32.totalorder %s11251_s19, %s11247_s13 }
 0x18f   :  { %p11254_p10 = por %p11253_p9, %p11252_p8 }
 0x191   :  { %p11255_p11 = pnand %p11254_p10, %p11248_p7 }
 0x193   :  { %11258 = shalt.err (!%p11255_p11)
}
 0x194   :  { %340 = dma.hbm_to_vmem [thread:$0]  %s11559_s25, 16, %s338_s10, [#allocation31]  }
 0x195   :  { %11281 = dma.done.wait [#allocation4], 64  }
 0x196   :  { %11282 = vsyncadd [#allocation4], 4294967232 }
 0x197   :  { %11283 = dma.done.wait [#allocation7], 48  }
 0x198   :  { %11284 = vsyncadd [#allocation7], 4294967248 }
 0x199   :  { %11285 = dma.done.wait [#allocation10], 64  }
 0x19a   :  { %11286 = vsyncadd [#allocation10], 4294967232 }
 0x19b   :  { %11287 = dma.done.wait [#allocation13], 64  }
 0x19c   :  { %11288 = vsyncadd [#allocation13], 4294967232 }
 0x19d   :  { %11289 = dma.done.wait [#allocation16], 1056  }
 0x19e   :  { %11290 = vsyncadd [#allocation16], 4294966240 }
 0x19f   :  { %11291 = dma.done.wait [#allocation19], 64  }
 0x1a0   :  { %11292 = vsyncadd [#allocation19], 4294967232 }
 0x1a1   :  { %11293 = dma.done.wait [#allocation22], 2048  }
 0x1a2   :  { %11294 = vsyncadd [#allocation22], 4294965248 }
 0x1a3   :  { %11295 = dma.done.wait [#allocation25], 64  }
 0x1a4   :  { %11296 = vsyncadd [#allocation25], 4294967232 }
 0x1a5   :  { %11297 = dma.done.wait [#allocation28], 544  }
 0x1a6   :  { %11298 = vsyncadd [#allocation28], 4294966752 }
 0x1a7   :  { %11299 = dma.done.wait [#allocation31], 1040  }
 0x1a8   :  { %11300 = vsyncadd [#allocation31], 4294966256  ;;  %s13813_s25 = sld [smem:[#allocation46_spill]]  ;;  %s13814_s6 = sld [smem:[#allocation49_spill]]  ;;  %vm443_vm0 = vcmask 1043456   ;;  %vm418_vm1 = vcmask 31744  }
 0x1a9   :  { %v410_v1 = vld [vmem:[#allocation3] sm:$0xf]  ;;  %s13815_s9 = sld [smem:[#allocation48_spill]]  ;;  %v7833_v16 = vld [vmem:[#allocation6] ss:$0 sm:$0xff]  ;;  %vm591_vm2 = vcmask 261120  }
 0x1aa   :  { %8675 = vmatprep.subr.msk.mxu0 %vm443_vm0, %v410_v1  ;;  %v7843_v49 = vld [vmem:[#allocation8] ss:$0 sm:$0xff]  ;;  %vm745_vm3 = vcmask 64512   ;;  %s11364_s27 = smov 96   ;;  %s13824_s11 = sld [smem:[#allocation47_spill]]  ;;  %vm899_vm5 = vcmask 523264  }
 0x1ab   :  { %8676 = vmatpush3.msk.msra.mxu0 %vm443_vm0, %v410_v1  ;;  %vm11795_vm4 = vmpackc.low %vm745_vm3, %vm745_vm3  ;;  %s11365_s30 = smov 64   ;;  %s11366_s24 = smov 88   ;;  %vm11378_vm7 = vmmov 0   ;;  %vm7067_vm9 = vcmask 1045504   ;;  %vm7060_vm10 = vcmask 179200   ;;  %vm11379_vm11 = vmmov 1  }
 0x1ac   :  { %s11367_s15 = smov 120   ;;  %s11368_s16 = smov 80   ;;  %vm9993_vm12 = vmpackc.low %vm443_vm0, %vm11379_vm11  ;;  %vm7411_vm13 = vcmask 97280   ;;  %vm7674_vm14 = vcmask 818176   ;;  %vm7756_vm15 = vcmask 3072  }
 0x1ad   :  { %s11369_s18 = smov 112   ;;  %s11370_s22 = smov 56  }
 0x1ae   :  { %v402_v2 = vld [vmem:[%s13813_s25] sm:$0xff]  ;;  %v403_v3 = vld [vmem:[%s13813_s25 + $0x8] sm:$0xff]  ;;  %v404_v4 = vld [vmem:[%s13813_s25 + $0x10] sm:$0xff]  ;;  %s11371_s12 = smov 72   ;;  %s11372_s8 = smov 104  }
 0x1af   :  { %8677 = vmatprep.mubr.msk.f32.mxu0 %vm418_vm1, %v402_v2  ;;  %v576_v5 = vld [vmem:[%s13814_s6] sm:$0xff]  ;;  %v577_v6 = vld [vmem:[%s13814_s6 + $0x8] sm:$0xff]  ;;  %v405_v7 = vld [vmem:[%s13813_s25 + $0x18] sm:$0xff]  ;;  %s11373_s20 = smov 48   ;;  %s13825_s26 = sld [smem:[#allocation50_spill]] }
 0x1b0   :  { %8678 = vmatmul.mubr.msk.f32.vlgmr.msra.gmra.mrb[0].mxu0 %vm418_vm1, %v403_v3  ;;  %v9480_v8 = vpack.c.bf16 %v577_v6, %v576_v5  ;;  %v406_v9 = vld [vmem:[%s13813_s25 + $0x20] sm:$0xff]  ;;  %v407_v10 = vld [vmem:[%s13813_s25 + $0x28] sm:$0xff]  ;;  %v408_v11 = vld [vmem:[%s13813_s25 + $0x30] sm:$0xff]  ;;  %s11374_s21 = smov 40   ;;  %s13832_s28 = sld [smem:[#allocation51_spill]] }
 0x1b1   :  { %8680 = vmatprep.mubr.msk.f32.mxu0 %vm418_vm1, %v404_v4  ;;  %v409_v12 = vld [vmem:[%s13813_s25 + $0x38] sm:$0xff]  ;;  %v578_v13 = vld [vmem:[%s13814_s6 + $0x10] sm:$0xff]  ;;  %v552_v20 = vld [vmem:[%s13815_s9] sm:$0xff]  ;;  %s13845_s2 = sld [smem:[#allocation45_spill]]  ;;  %s13846_s17 = sld [smem:[#allocation56_spill]] }
 0x1b2   :  { %9481 = vmatprep.subr.bf16.mxu1 %v9480_v8  ;;  %v579_v14 = vld [vmem:[%s13814_s6 + $0x18] sm:$0xff]  ;;  %v553_v21 = vld [vmem:[%s13815_s9 + $0x8] sm:$0xff]  ;;  %v554_v29 = vld [vmem:[%s13815_s9 + $0x10] sm:$0xff]  ;;  %s13847_s14 = sld [smem:[#allocation53_spill]]  ;;  %s13848_s3 = sld [smem:[#allocation54_spill]] }
 0x1b3   :  { %9483 = vmatpush3.bf16.msra.mxu1 %v9480_v8  ;;  %v9484_v15 = vpack.c.bf16 %v579_v14, %v578_v13  ;;  %v555_v24 = vld [vmem:[%s13815_s9 + $0x18] sm:$0xff]  ;;  %v557_v34 = vld [vmem:[%s13815_s9 + $0x28] sm:$0xff]  ;;  %v556_v37 = vld [vmem:[%s13815_s9 + $0x20] sm:$0xff]  ;;  %s13849_s7 = sld [smem:[#allocation59_spill]]  ;;  %s13850_s1 = sld [smem:[#allocation61_spill]] }
 0x1b4   :  { %8681 = vmatmul.mubr.msk.f32.gmra.mrb[2].mxu0 %vm418_vm1, %v405_v7  ;;  %v559_v42 = vld [vmem:[%s13815_s9 + $0x38] sm:$0xff]  ;;  %v558_v45 = vld [vmem:[%s13815_s9 + $0x30] sm:$0xff]  ;;  %s13851_s23 = sld [smem:[#allocation58_spill]]  ;;  %s13852_s5 = sld [smem:[#allocation62_spill]] }
 0x1b5   :  { %8683 = vmatprep.mubr.msk.f32.mxu0 %vm418_vm1, %v406_v9  ;;  %9485 = vmatprep.subr.bf16.mxu1 %v9484_v15  ;;  %s13853_s10 = sld [smem:[#allocation63_spill]] }
 0x1b6   :  { %s13854_s0 = sld [smem:[#allocation55_spill]] }
 0x1b7   :  { %9487 = vmatpush3.bf16.msra.mxu1 %v9484_v15 }
 0x1b8   :  { %8684 = vmatmul.mubr.msk.f32.gmra.mrb[4].mxu0 %vm418_vm1, %v407_v10 }
 0x1b9   :  { %8686 = vmatprep.mubr.msk.f32.mxu0 %vm418_vm1, %v408_v11 }
 0x1bc   :  { %8687 = vmatmul.mubr.msk.f32.gmra.mrb[6].mxu0 %vm418_vm1, %v409_v12 }
 0x283   :  { %v8679_v17 = vpop.f32.mrb[0].mxu0 }
 0x284   :  { %v519_v18 = vadd.f32 %v8679_v17, %v7833_v16  ;;  %v513_v19 = vpop.f32.mrb[1].mxu0 }
 0x285   :  { %v514_v22 = vadd.f32 %v7833_v16, %v513_v19 }
 0x286   :  { %v11716_v26 = vadd.f32 %v553_v21, %v519_v18 }
 0x287   :  { %v8682_v23 = vpop.f32.mrb[2].mxu0  ;;  %v11714_v25 = vadd.f32 %v552_v20, %v514_v22 }
 0x288   :  { %v529_v27 = vadd.f32 %v8682_v23, %v7833_v16  ;;  %v523_v28 = vpop.f32.mrb[3].mxu0 }
 0x289   :  { %v524_v30 = vadd.f32 %v7833_v16, %v523_v28  ;;  %8697 = vmatprep.mubr.msk.f32.mxu1 %vm591_vm2, %v11714_v25 }
 0x28a   :  { %v11721_v31 = vadd.f32 %v555_v24, %v529_v27  ;;  %8698 = vmatmul.mubr.msk.f32.vlgmr.msra.gmra.mrb[0].mxu1 %vm591_vm2, %v11716_v26  ;;  %v11830_v24 = vld [vmem:[%s13824_s11 + $0x8] sm:$0xff] }
 0x28b   :  { %v11725_v32 = vadd.f32 %v554_v29, %v524_v30  ;;  %v8685_v33 = vpop.f32.mrb[4].mxu0  ;;  %v11833_v29 = vld [vmem:[%s13824_s11] sm:$0xff] }
 0x28c   :  { %13816 = vst [vmem:[#allocation65_spill] sm:$0xff] %v11721_v31  ;;  %v539_v35 = vadd.f32 %v8685_v33, %v7833_v16  ;;  %v533_v36 = vpop.f32.mrb[5].mxu0 }
 0x28d   :  { %13817 = vst [vmem:[#allocation66_spill] sm:$0xff] %v11725_v32  ;;  %8700 = vmatprep.mubr.msk.f32.mxu1 %vm591_vm2, %v11725_v32  ;;  %v534_v38 = vadd.f32 %v7833_v16, %v533_v36  ;;  %v11838_v36 = vld [vmem:[%s13824_s11 + $0x18] sm:$0xff] }
 0x28e   :  { %8701 = vmatmul.mubr.msk.f32.gmra.mrb[2].mxu1 %vm591_vm2, %v11721_v31  ;;  %v11733_v39 = vadd.f32 %v557_v34, %v539_v35 }
 0x28f   :  { %v11735_v40 = vadd.f32 %v556_v37, %v534_v38  ;;  %v8688_v41 = vpop.f32.mrb[6].mxu0 }
 0x290   :  { %13818 = vst [vmem:[#allocation67_spill] sm:$0xff] %v11733_v39  ;;  %v549_v43 = vadd.f32 %v8688_v41, %v7833_v16  ;;  %v543_v44 = vpop.f32.mrb[7].mxu0 }
 0x291   :  { %13819 = vst [vmem:[#allocation68_spill] sm:$0xff] %v11735_v40  ;;  %8703 = vmatprep.mubr.msk.f32.mxu1 %vm591_vm2, %v11735_v40  ;;  %v544_v46 = vadd.f32 %v7833_v16, %v543_v44 }
 0x292   :  { %8704 = vmatmul.mubr.msk.f32.gmra.mrb[4].mxu1 %vm591_vm2, %v11733_v39  ;;  %v11743_v47 = vadd.f32 %v559_v42, %v549_v43 }
 0x293   :  { %v11745_v48 = vadd.f32 %v558_v45, %v544_v46  ;;  %v11846_v45 = vld [vmem:[%s13824_s11 + $0x10] sm:$0xff] }
 0x294   :  { %13820 = vst [vmem:[#allocation69_spill] sm:$0xff] %v11743_v47 }
 0x295   :  { %13821 = vst [vmem:[#allocation70_spill] sm:$0xff] %v11745_v48  ;;  %8706 = vmatprep.mubr.msk.f32.mxu1 %vm591_vm2, %v11745_v48 }
 0x296   :  { %8707 = vmatmul.mubr.msk.f32.gmra.mrb[6].mxu1 %vm591_vm2, %v11743_v47 }
 0x35d   :  { %v8699_v50 = vpop.f32.mrb[0].mxu1 }
 0x35e   :  { %v11751_v51 = vadd.f32 %v8699_v50, %v7843_v49  ;;  %v682_v52 = vpop.f32.mrb[1].mxu1 }
 0x35f   :  { %v11753_v53 = vadd.f32 %v7843_v49, %v682_v52 }
 0x361   :  { %8725 = vmatprep.mubr.msk.f32.mxu0 %vm745_vm3, %v11753_v53  ;;  %v8702_v54 = vpop.f32.mrb[2].mxu1  ;;  %v11759_v55 = vpack.i.bf16 %v11751_v51, %v11753_v53 }
 0x362   :  { %v11761_v56 = vadd.f32 %v8702_v54, %v7843_v49  ;;  %v692_v57 = vpop.f32.mrb[3].mxu1 }
 0x363   :  { %v11763_v58 = vadd.f32 %v7843_v49, %v692_v57  ;;  %10172 = vrot.lane.b32.xlu0 %v11759_v55, %s11364_s27  ;;  %v11852_v57 = vld [vmem:[%s13824_s11 + $0x28] sm:$0xff] }
 0x365   :  { %v11769_v59 = vpack.i.bf16 %v11761_v56, %v11763_v58  ;;  %v8705_v60 = vpop.f32.mrb[4].mxu1 }
 0x366   :  { %v11771_v61 = vadd.f32 %v8705_v60, %v7843_v49  ;;  %v702_v62 = vpop.f32.mrb[5].mxu1 }
 0x367   :  { %10177 = vrot.lane.b32.xlu0 %v11769_v59, %s11364_s27  ;;  %v11775_v63 = vadd.f32 %v7843_v49, %v702_v62 }
 0x369   :  { %v11779_v0 = vpack.i.bf16 %v11771_v61, %v11775_v63  ;;  %v8708_v1 = vpop.f32.mrb[6].mxu1 }
 0x36a   :  { %v11781_v2 = vadd.f32 %v8708_v1, %v7843_v49  ;;  %v712_v3 = vpop.f32.mrb[7].mxu1 }
 0x36b   :  { %10182 = vrot.lane.b32.xlu1 %v11779_v0, %s11364_s27  ;;  %v11785_v4 = vadd.f32 %v7843_v49, %v712_v3 }
 0x36d   :  { %v11789_v5 = vpack.i.bf16 %v11781_v2, %v11785_v4 }
 0x36f   :  { %10187 = vrot.lane.b32.xlu1 %v11789_v5, %s11364_s27 }
 0x3d5   :  { %v10173_v6 = vpop.permute.xlu0 %10172 }
 0x3d6   :  { %v10175_v7 = vunpack.i.h.bf16 %v10173_v6  ;;  %v10174_v8 = vunpack.i.l.bf16 %v10173_v6 }
 0x3d8   :  { %v9488_v10 = vpack.c.bf16 %v10175_v7, %v10174_v8  ;;  %v11857_v7 = vld [vmem:[%s13824_s11 + $0x38] sm:$0xff] }
 0x3d9   :  { %v10178_v11 = vpop.permute.xlu0 %10177 }
 0x3da   :  { %v10180_v12 = vunpack.i.h.bf16 %v10178_v11  ;;  %v10179_v13 = vunpack.i.l.bf16 %v10178_v11  ;;  %9490 = vmatprep.subr.msk.bf16.mxu0 %vm11795_vm4, %v9488_v10 }
 0x3db   :  { %9493 = vmatpush3.bf16.xpose.msk.msra.mxu0 %vm11795_vm4, %v9488_v10 }
 0x3dc   :  { %v9494_v14 = vpack.c.bf16 %v10180_v12, %v10179_v13  ;;  %v11870_v13 = vld [vmem:[%s13824_s11 + $0x20] sm:$0xff] }
 0x3dd   :  { %v10183_v15 = vpop.permute.xlu1 %10182 }
 0x3de   :  { %9496 = vmatprep.subr.msk.bf16.mxu0 %vm11795_vm4, %v9494_v14  ;;  %v10185_v16 = vunpack.i.h.bf16 %v10183_v15  ;;  %v10184_v17 = vunpack.i.l.bf16 %v10183_v15 }
 0x3e0   :  { %v9500_v18 = vpack.c.bf16 %v10185_v16, %v10184_v17  ;;  %v11877_v17 = vld [vmem:[%s13824_s11 + $0x30] sm:$0xff] }
 0x3e1   :  { %v10188_v19 = vpop.permute.xlu1 %10187 }
 0x3e2   :  { %v10190_v20 = vunpack.i.h.bf16 %v10188_v19  ;;  %v10189_v21 = vunpack.i.l.bf16 %v10188_v19 }
 0x3e3   :  { %9499 = vmatpush3.bf16.xpose.msk.msra.mxu0 %vm11795_vm4, %v9494_v14 }
 0x3e4   :  { %9502 = vmatprep.subr.msk.bf16.mxu0 %vm11795_vm4, %v9500_v18  ;;  %v9506_v22 = vpack.c.bf16 %v10190_v20, %v10189_v21 }
 0x3eb   :  { %9505 = vmatpush3.bf16.xpose.msk.msra.mxu0 %vm11795_vm4, %v9500_v18 }
 0x3ec   :  { %9508 = vmatprep.subr.msk.bf16.mxu0 %vm11795_vm4, %v9506_v22 }
 0x3f3   :  { %9511 = vmatpush3.bf16.xpose.msk.msra.mxu0 %vm11795_vm4, %v9506_v22 }
 0x3fa   :  { %8726 = vmatmul.mubr.msk.f32.vlgmr.msra.gmra.mrb[8].mxu0 %vm745_vm3, %v11751_v51 }
 0x3fb   :  { %8728 = vmatprep.mubr.msk.f32.mxu0 %vm745_vm3, %v11763_v58 }
 0x3fe   :  { %8729 = vmatmul.mubr.msk.f32.gmra.mrb[10].mxu0 %vm745_vm3, %v11761_v56 }
 0x3ff   :  { %8731 = vmatprep.mubr.msk.f32.mxu0 %vm745_vm3, %v11775_v63 }
 0x402   :  { %8732 = vmatmul.mubr.msk.f32.gmra.mrb[12].mxu0 %vm745_vm3, %v11771_v61 }
 0x403   :  { %8734 = vmatprep.mubr.msk.f32.mxu0 %vm745_vm3, %v11785_v4 }
 0x406   :  { %8735 = vmatmul.mubr.msk.f32.gmra.mrb[14].mxu0 %vm745_vm3, %v11781_v2 }
 0x4cd   :  { %v8727_v23 = vpop.f32.mrb[8].mxu0 }
 0x4ce   :  { %v884_v27 = vmul.f32 0.35355338, %v8727_v23  ;;  %v844_v28 = vpop.f32.mrb[9].mxu0 }
 0x4cf   :  { %v883_v30 = vmul.f32 0.35355338, %v844_v28 }
 0x4d0   :  { %v892_v33 = vadd.f32 %v884_v27, %v11830_v24 }
 0x4d1   :  { %v8730_v34 = vpop.f32.mrb[10].mxu0  ;;  %v891_v35 = vadd.f32 %v883_v30, %v11833_v29 }
 0x4d2   :  { %v886_v37 = vmul.f32 0.35355338, %v8730_v34  ;;  %v854_v38 = vpop.f32.mrb[11].mxu0  ;;  %v903_v41 = vsel %vm899_vm5, %v892_v33, -inf }
 0x4d3   :  { %v885_v42 = vmul.f32 0.35355338, %v854_v38  ;;  %904 = vmax.xlane.f32.xlu1 %v903_v41  ;;  %v900_v43 = vsel %vm899_vm5, %v891_v35, -inf }
 0x4d4   :  { %901 = vmax.xlane.f32.xlu0 %v900_v43  ;;  %v11843_v44 = vadd.f32 %v886_v37, %v11838_v36 }
 0x4d5   :  { %v8733_v46 = vpop.f32.mrb[12].mxu0  ;;  %v893_v54 = vadd.f32 %v885_v42, %v11846_v45 }
 0x4d6   :  { %v864_v49 = vpop.f32.mrb[13].mxu0  ;;  %v909_v50 = vsel %vm899_vm5, %v11843_v44, -inf  ;;  %v888_v52 = vmul.f32 0.35355338, %v8733_v46 }
 0x4d7   :  { %v906_v3 = vsel %vm899_vm5, %v893_v54, -inf  ;;  %v887_v12 = vmul.f32 0.35355338, %v864_v49 }
 0x4d8   :  { %910 = vmax.xlane.f32.xlu0 %v909_v50  ;;  %v896_v6 = vadd.f32 %v888_v52, %v11852_v57 }
 0x4d9   :  { %v8736_v60 = vpop.f32.mrb[14].mxu0  ;;  %v895_v14 = vadd.f32 %v887_v12, %v11870_v13 }
 0x4da   :  { %v874_v62 = vpop.f32.mrb[15].mxu0  ;;  %v890_v1 = vmul.f32 0.35355338, %v8736_v60  ;;  %v915_v8 = vsel %vm899_vm5, %v896_v6, -inf }
 0x4db   :  { %v912_v15 = vsel %vm899_vm5, %v895_v14, -inf  ;;  %v889_v16 = vmul.f32 0.35355338, %v874_v62 }
 0x4dc   :  { %907 = vmax.xlane.f32.xlu0 %v906_v3  ;;  %v11861_v10 = vadd.f32 %v890_v1, %v11857_v7 }
 0x4dd   :  { %v11880_v18 = vadd.f32 %v889_v16, %v11877_v17 }
 0x4de   :  { %v921_v11 = vsel %vm899_vm5, %v11861_v10, -inf }
 0x4df   :  { %v918_v19 = vsel %vm899_vm5, %v11880_v18, -inf }
 0x4e0   :  { %916 = vmax.xlane.f32.xlu0 %v915_v8 }
 0x4e4   :  { %10192 = vrot.lane.b32.xlu1 %v11759_v55, %s11365_s30  ;;  %922 = vmax.xlane.f32.xlu0 %v921_v11 }
 0x4fa   :  { %10197 = vrot.lane.b32.xlu0 %v11769_v59, %s11365_s30 }
 0x508   :  { %913 = vmax.xlane.f32.xlu1 %v912_v15 }
 0x519   :  { %10202 = vrot.lane.b32.xlu1 %v11779_v0, %s11365_s30 }
 0x53d   :  { %919 = vmax.xlane.f32.xlu1 %v918_v19 }
 0x54e   :  { %10207 = vrot.lane.b32.xlu1 %v11789_v5, %s11365_s30 }
 0x560   :  { %v905_v20 = vpop.xlane.xlu1 %904 }
 0x561   :  { %v925_v21 = vsub.f32 %v892_v33, %v905_v20  ;;  %v902_v22 = vpop.xlane.xlu0 %901 }
 0x562   :  { %v924_v23 = vsub.f32 %v891_v35, %v902_v22 }
 0x563   :  { %v934_v27 = vmul.f32 1.442695, %v925_v21 }
 0x564   :  { %v932_v28 = vmul.f32 1.442695, %v924_v23  ;;  %v10193_v30 = vpop.permute.xlu1 %10192 }
 0x565   :  { %10493 = vpow2.f32 %v934_v27  ;;  %v10195_v34 = vunpack.i.h.bf16 %v10193_v30  ;;  %v10194_v37 = vunpack.i.l.bf16 %v10193_v30  ;;  %v911_v38 = vpop.xlane.xlu0 %910 }
 0x566   :  { %10495 = vpow2.f32 %v932_v28  ;;  %v927_v19 = vsub.f32 %v11843_v44, %v911_v38 }
 0x567   :  { %v9512_v41 = vpack.c.bf16 %v10195_v34, %v10194_v37 }
 0x568   :  { %v938_v21 = vmul.f32 1.442695, %v927_v19 }
 0x569   :  { %9513 = vmatprep.subr.bf16.mxu1 %v9512_v41  ;;  %v908_v42 = vpop.xlane.xlu0 %907 }
 0x56a   :  { %v926_v43 = vsub.f32 %v893_v54, %v908_v42  ;;  %9515 = vmatpush3.bf16.msra.mxu1 %v9512_v41 }
 0x56c   :  { %v936_v46 = vmul.f32 1.442695, %v926_v43 }
 0x56d   :  { %v917_v49 = vpop.xlane.xlu0 %916 }
 0x56e   :  { %10497 = vpow2.f32 %v936_v46  ;;  %v929_v50 = vsub.f32 %v896_v6, %v917_v49 }
 0x56f   :  { %v11886_v33 = vpop.eup %10493 }
 0x570   :  { %v11888_v35 = vpop.eup %10495  ;;  %v942_v52 = vmul.f32 1.442695, %v929_v50  ;;  %v951_v60 = vsel %vm899_vm5, %v11886_v33, 0.0 }
 0x571   :  { %952 = vadd.xlane.f32.xlu0 %v951_v60  ;;  %v923_v62 = vpop.xlane.xlu0 %922  ;;  %v948_v1 = vsel %vm899_vm5, %v11888_v35, 0.0 }
 0x572   :  { %10499 = vpow2.f32 %v942_v52  ;;  %949 = vadd.xlane.f32.xlu1 %v948_v1  ;;  %v931_v20 = vsub.f32 %v11861_v10, %v923_v62 }
 0x573   :  { %10501 = vpow2.f32 %v938_v21 }
 0x574   :  { %v946_v27 = vmul.f32 1.442695, %v931_v20 }
 0x575   :  { %v10198_v54 = vpop.permute.xlu0 %10197 }
 0x576   :  { %v10200_v3 = vunpack.i.h.bf16 %v10198_v54  ;;  %v10199_v8 = vunpack.i.l.bf16 %v10198_v54 }
 0x578   :  { %v11894_v11 = vpop.eup %10497  ;;  %v9516_v6 = vpack.c.bf16 %v10200_v3, %v10199_v8 }
 0x579   :  { %v954_v12 = vsel %vm899_vm5, %v11894_v11, 0.0 }
 0x57a   :  { %955 = vadd.xlane.f32.xlu0 %v954_v12  ;;  %9517 = vmatprep.subr.bf16.mxu1 %v9516_v6 }
 0x57b   :  { %9519 = vmatpush3.bf16.msra.mxu1 %v9516_v6 }
 0x57c   :  { %v11898_v15 = vpop.eup %10499 }
 0x57d   :  { %v963_v16 = vsel %vm899_vm5, %v11898_v15, 0.0  ;;  %v11906_v42 = vpop.eup %10501 }
 0x57e   :  { %964 = vadd.xlane.f32.xlu0 %v963_v16 }
 0x583   :  { %10212 = vrot.lane.b32.xlu1 %v11759_v55, %s11366_s24 }
 0x595   :  { %v914_v22 = vpop.xlane.xlu1 %913 }
 0x596   :  { %v928_v23 = vsub.f32 %v895_v14, %v914_v22  ;;  %v957_v14 = vsel %vm899_vm5, %v11906_v42, 0.0 }
 0x598   :  { %v940_v28 = vmul.f32 1.442695, %v928_v23 }
 0x599   :  { %v10203_v30 = vpop.permute.xlu1 %10202 }
 0x59a   :  { %10503 = vpow2.f32 %v940_v28  ;;  %v10205_v34 = vunpack.i.h.bf16 %v10203_v30  ;;  %v10204_v37 = vunpack.i.l.bf16 %v10203_v30 }
 0x59b   :  { %10505 = vpow2.f32 %v946_v27 }
 0x59c   :  { %v9520_v41 = vpack.c.bf16 %v10205_v34, %v10204_v37 }
 0x59e   :  { %9521 = vmatprep.subr.bf16.mxu1 %v9520_v41 }
 0x59f   :  { %9523 = vmatpush3.bf16.msra.mxu1 %v9520_v41 }
 0x5a4   :  { %v11908_v43 = vpop.eup %10503 }
 0x5a5   :  { %v960_v44 = vsel %vm899_vm5, %v11908_v43, 0.0  ;;  %v11912_v10 = vpop.eup %10505 }
 0x5a6   :  { %961 = vadd.xlane.f32.xlu0 %v960_v44  ;;  %v969_v38 = vsel %vm899_vm5, %v11912_v10, 0.0 }
 0x5a7   :  { %958 = vadd.xlane.f32.xlu1 %v957_v14 }
 0x5aa   :  { %970 = vadd.xlane.f32.xlu0 %v969_v38 }
 0x5b8   :  { %10222 = vrot.lane.b32.xlu1 %v11779_v0, %s11366_s24 }
 0x5bc   :  { %10227 = vrot.lane.b32.xlu1 %v11789_v5, %s11366_s24 }
 0x5c0   :  { %1141 = vrot.lane.b32.xlu1 %v11753_v53, %s11367_s15 }
 0x5c4   :  { %1143 = vrot.lane.b32.xlu1 %v11751_v51, %s11367_s15 }
 0x5c8   :  { %1147 = vrot.lane.b32.xlu1 %v11761_v56, %s11367_s15 }
 0x5ca   :  { %v920_v46 = vpop.xlane.xlu1 %919 }
 0x5cb   :  { %v930_v49 = vsub.f32 %v11880_v18, %v920_v46 }
 0x5cc   :  { %1151 = vrot.lane.b32.xlu1 %v11771_v61, %s11367_s15 }
 0x5cd   :  { %v944_v50 = vmul.f32 1.442695, %v930_v49 }
 0x5ce   :  { %v10208_v52 = vpop.permute.xlu1 %10207 }
 0x5cf   :  { %10507 = vpow2.f32 %v944_v50  ;;  %v10210_v60 = vunpack.i.h.bf16 %v10208_v52  ;;  %v10209_v62 = vunpack.i.l.bf16 %v10208_v52 }
 0x5d0   :  { %1155 = vrot.lane.b32.xlu1 %v11781_v2, %s11367_s15 }
 0x5d1   :  { %v9524_v1 = vpack.c.bf16 %v10210_v60, %v10209_v62 }
 0x5d3   :  { %9525 = vmatprep.subr.bf16.mxu1 %v9524_v1 }
 0x5d4   :  { %10237 = vrot.lane.b32.xlu1 %v11769_v59, %s11368_s16  ;;  %9527 = vmatpush3.bf16.msra.mxu1 %v9524_v1 }
 0x5d8   :  { %10247 = vrot.lane.b32.xlu1 %v11789_v5, %s11368_s16 }
 0x5d9   :  { %v11937_v18 = vpop.eup %10507 }
 0x5da   :  { %v966_v54 = vsel %vm899_vm5, %v11937_v18, 0.0 }
 0x5db   :  { %967 = vadd.xlane.f32.xlu0 %v966_v54 }
 0x5dc   :  { %1827 = vrot.lane.b32.xlu1 %v11751_v51, %s11369_s18 }
 0x5e0   :  { %1831 = vrot.lane.b32.xlu1 %v11761_v56, %s11369_s18 }
 0x5e4   :  { %1835 = vrot.lane.b32.xlu1 %v11771_v61, %s11369_s18 }
 0x5e8   :  { %1839 = vrot.lane.b32.xlu1 %v11781_v2, %s11369_s18 }
 0x5f1   :  { %10217 = vrot.lane.b32.xlu0 %v11769_v59, %s11366_s24 }
 0x5f5   :  { %1145 = vrot.lane.b32.xlu0 %v11763_v58, %s11367_s15 }
 0x5f9   :  { %1149 = vrot.lane.b32.xlu0 %v11775_v63, %s11367_s15 }
 0x5fd   :  { %1153 = vrot.lane.b32.xlu0 %v11785_v4, %s11367_s15 }
 0x5fe   :  { %v953_v3 = vpop.xlane.xlu0 %952 }
 0x5ff   :  { %10509 = vrcp.f32 %v953_v3  ;;  %v950_v8 = vpop.xlane.xlu1 %949 }
 0x600   :  { %10511 = vrcp.f32 %v950_v8 }
 0x601   :  { %10232 = vrot.lane.b32.xlu0 %v11759_v55, %s11368_s16 }
 0x603   :  { %v10213_v6 = vpop.permute.xlu1 %10212 }
 0x604   :  { %v10215_v12 = vunpack.i.h.bf16 %v10213_v6  ;;  %v10214_v16 = vunpack.i.l.bf16 %v10213_v6 }
 0x605   :  { %10242 = vrot.lane.b32.xlu0 %v11779_v0, %s11368_s16 }
 0x606   :  { %v9528_v19 = vpack.c.bf16 %v10215_v12, %v10214_v16 }
 0x607   :  { %v956_v20 = vpop.xlane.xlu0 %955 }
 0x608   :  { %10513 = vrcp.f32 %v956_v20  ;;  %9530 = vmatprep.subr.msk.bf16.mxu1 %vm11795_vm4, %v9528_v19 }
 0x609   :  { %v10510_v21 = vpop.eup %10509  ;;  %1825 = vrot.lane.b32.xlu0 %v11753_v53, %s11369_s18 }
 0x60a   :  { %v10512_v22 = vpop.eup %10511  ;;  %v981_v27 = vmul.f32 %v10510_v21, %v11886_v33 }
 0x60b   :  { %v980_v23 = vmul.f32 %v10512_v22, %v11888_v35  ;;  %v965_v33 = vpop.xlane.xlu0 %964 }
 0x60d   :  { %1829 = vrot.lane.b32.xlu0 %v11763_v58, %s11369_s18  ;;  %8753 = vmatprep.mubr.msk.f32.mxu1 %vm899_vm5, %v980_v23 }
 0x60e   :  { %8754 = vmatmul.mubr.msk.f32.vlgmr.msra.gmra.mrb[8].mxu1 %vm899_vm5, %v981_v27 }
 0x60f   :  { %9533 = vmatpush3.bf16.xpose.msk.msra.mxu1 %vm11795_vm4, %v9528_v19 }
 0x611   :  { %1833 = vrot.lane.b32.xlu0 %v11775_v63, %s11369_s18 }
 0x612   :  { %v10514_v28 = vpop.eup %10513 }
 0x613   :  { %v982_v30 = vmul.f32 %v10514_v28, %v11894_v11 }
 0x615   :  { %1837 = vrot.lane.b32.xlu0 %v11785_v4, %s11369_s18  ;;  %8756 = vmatprep.mubr.msk.f32.mxu1 %vm899_vm5, %v982_v30 }
 0x633   :  { %v962_v35 = vpop.xlane.xlu0 %961 }
 0x634   :  { %10515 = vrcp.f32 %v962_v35  ;;  %v959_v34 = vpop.xlane.xlu1 %958 }
 0x635   :  { %10517 = vrcp.f32 %v959_v34 }
 0x636   :  { %10519 = vrcp.f32 %v965_v33 }
 0x637   :  { %v971_v50 = vpop.xlane.xlu0 %970 }
 0x638   :  { %v10223_v46 = vpop.permute.xlu1 %10222  ;;  %10521 = vrcp.f32 %v971_v50 }
 0x639   :  { %v10225_v1 = vunpack.i.h.bf16 %v10223_v46  ;;  %v10224_v54 = vunpack.i.l.bf16 %v10223_v46 }
 0x63b   :  { %v9540_v16 = vpack.c.bf16 %v10225_v1, %v10224_v54 }
 0x63c   :  { %v10228_v49 = vpop.permute.xlu1 %10227 }
 0x63d   :  { %v10230_v22 = vunpack.i.h.bf16 %v10228_v49  ;;  %v10229_v23 = vunpack.i.l.bf16 %v10228_v49 }
 0x63e   :  { %v10516_v37 = vpop.eup %10515 }
 0x63f   :  { %v10518_v41 = vpop.eup %10517  ;;  %v984_v38 = vmul.f32 %v10516_v37, %v11908_v43  ;;  %v9546_v33 = vpack.c.bf16 %v10230_v22, %v10229_v23 }
 0x640   :  { %v983_v44 = vmul.f32 %v10518_v41, %v11906_v42  ;;  %v10520_v14 = vpop.eup %10519  ;;  %v1142_v52 = vpop.permute.xlu1 %1141 }
 0x641   :  { %v985_v11 = vmul.f32 %v10520_v14, %v11898_v15 }
 0x642   :  { %8757 = vmatmul.mubr.msk.f32.gmra.mrb[10].mxu1 %vm899_vm5, %v983_v44  ;;  %v10522_v15 = vpop.eup %10521 }
 0x643   :  { %8759 = vmatprep.mubr.msk.f32.mxu1 %vm899_vm5, %v984_v38  ;;  %v987_v27 = vmul.f32 %v10522_v15, %v11912_v10 }
 0x644   :  { %v1144_v62 = vpop.permute.xlu1 %1143 }
 0x646   :  { %8760 = vmatmul.mubr.msk.f32.gmra.mrb[12].mxu1 %vm899_vm5, %v985_v11 }
 0x648   :  { %v1148_v6 = vpop.permute.xlu1 %1147 }
 0x64c   :  { %v1152_v28 = vpop.permute.xlu1 %1151 }
 0x668   :  { %v968_v60 = vpop.xlane.xlu0 %967 }
 0x669   :  { %10523 = vrcp.f32 %v968_v60 }
 0x66c   :  { %v10218_v42 = vpop.permute.xlu0 %10217 }
 0x66d   :  { %v10220_v43 = vunpack.i.h.bf16 %v10218_v42  ;;  %v10219_v3 = vunpack.i.l.bf16 %v10218_v42 }
 0x66f   :  { %v9534_v8 = vpack.c.bf16 %v10220_v43, %v10219_v3 }
 0x670   :  { %v1146_v12 = vpop.permute.xlu0 %1145 }
 0x671   :  { %9536 = vmatprep.subr.msk.bf16.mxu1 %vm11795_vm4, %v9534_v8 }
 0x672   :  { %9539 = vmatpush3.bf16.xpose.msk.msra.mxu1 %vm11795_vm4, %v9534_v8 }
 0x673   :  { %v10524_v19 = vpop.eup %10523  ;;  %9542 = vmatprep.subr.msk.bf16.mxu1 %vm11795_vm4, %v9540_v16 }
 0x674   :  { %v1150_v20 = vpop.permute.xlu0 %1149  ;;  %v986_v21 = vmul.f32 %v10524_v19, %v11937_v18  ;;  %v1156_v18 = vpop.permute.xlu1 %1155 }
 0x676   :  { %8762 = vmatprep.mubr.msk.f32.mxu1 %vm899_vm5, %v986_v21 }
 0x677   :  { %8763 = vmatmul.mubr.msk.f32.gmra.mrb[14].mxu1 %vm899_vm5, %v987_v27 }
 0x678   :  { %v1154_v30 = vpop.permute.xlu0 %1153  ;;  %8781 = vmatprep.mubr.msk.f32.mxu1 %vm745_vm3, %v1142_v52  ;;  %v10238_v41 = vpop.permute.xlu1 %10237 }
 0x679   :  { %v10240_v44 = vunpack.i.h.bf16 %v10238_v41  ;;  %v10239_v14 = vunpack.i.l.bf16 %v10238_v41 }
 0x67a   :  { %9545 = vmatpush3.bf16.xpose.msk.msra.mxu1 %vm11795_vm4, %v9540_v16 }
 0x67b   :  { %9548 = vmatprep.subr.msk.bf16.mxu1 %vm11795_vm4, %v9546_v33  ;;  %v9574_v38 = vpack.c.bf16 %v10240_v44, %v10239_v14 }
 0x67c   :  { %v10233_v35 = vpop.permute.xlu0 %10232  ;;  %v10248_v52 = vpop.permute.xlu1 %10247 }
 0x67d   :  { %v10235_v34 = vunpack.i.h.bf16 %v10233_v35  ;;  %v10234_v37 = vunpack.i.l.bf16 %v10233_v35  ;;  %v10250_v60 = vunpack.i.h.bf16 %v10248_v52 }
 0x67f   :  { %v9568_v10 = vpack.c.bf16 %v10235_v34, %v10234_v37 }
 0x680   :  { %v10243_v11 = vpop.permute.xlu0 %10242  ;;  %v1828_v54 = vpop.permute.xlu1 %1827 }
 0x681   :  { %v10245_v46 = vunpack.i.h.bf16 %v10243_v11  ;;  %v10244_v49 = vunpack.i.l.bf16 %v10243_v11 }
 0x682   :  { %9551 = vmatpush3.bf16.xpose.msk.msra.mxu1 %vm11795_vm4, %v9546_v33 }
 0x683   :  { %9570 = vmatprep.subr.msk.bf16.mxu1 %vm11795_vm4, %v9568_v10  ;;  %v9580_v50 = vpack.c.bf16 %v10245_v46, %v10244_v49 }
 0x684   :  { %v1826_v42 = vpop.permute.xlu0 %1825  ;;  %v1832_v3 = vpop.permute.xlu1 %1831 }
 0x688   :  { %v1830_v43 = vpop.permute.xlu0 %1829 }
 0x689   :  { %8782 = vmatmul.mubr.msk.f32.vlgmr.msra.gmra.mrb[16].mxu1 %vm745_vm3, %v1144_v62  ;;  %v10249_v62 = vunpack.i.l.bf16 %v10248_v52 }
 0x68a   :  { %8784 = vmatprep.mubr.msk.f32.mxu1 %vm745_vm3, %v1146_v12  ;;  %9573 = vmatpush3.bf16.xpose.msk.msra.mxu1 %vm11795_vm4, %v9568_v10 }
 0x68b   :  { %9576 = vmatprep.subr.msk.bf16.mxu1 %vm11795_vm4, %v9574_v38  ;;  %v9586_v1 = vpack.c.bf16 %v10250_v60, %v10249_v62 }
 0x68c   :  { %v1834_v8 = vpop.permute.xlu0 %1833 }
 0x68d   :  { %8785 = vmatmul.mubr.msk.f32.gmra.mrb[18].mxu1 %vm745_vm3, %v1148_v6  ;;  %v1836_v6 = vpop.permute.xlu1 %1835 }
 0x68e   :  { %8787 = vmatprep.mubr.msk.f32.mxu1 %vm745_vm3, %v1150_v20 }
 0x690   :  { %v1838_v12 = vpop.permute.xlu0 %1837 }
 0x691   :  { %8788 = vmatmul.mubr.msk.f32.gmra.mrb[20].mxu1 %vm745_vm3, %v1152_v28  ;;  %v1840_v16 = vpop.permute.xlu1 %1839 }
 0x692   :  { %8790 = vmatprep.mubr.msk.f32.mxu1 %vm745_vm3, %v1154_v30  ;;  %9579 = vmatpush3.bf16.xpose.msk.msra.mxu1 %vm11795_vm4, %v9574_v38 }
 0x693   :  { %9582 = vmatprep.subr.msk.bf16.mxu1 %vm11795_vm4, %v9580_v50 }
 0x695   :  { %8791 = vmatmul.mubr.msk.f32.gmra.mrb[22].mxu1 %vm745_vm3, %v1156_v18 }
 0x696   :  { %8865 = vmatprep.mubr.msk.f32.mxu1 %vm745_vm3, %v1826_v42 }
 0x69a   :  { %9585 = vmatpush3.bf16.xpose.msk.msra.mxu1 %vm11795_vm4, %v9580_v50 }
 0x69b   :  { %9588 = vmatprep.subr.msk.bf16.mxu1 %vm11795_vm4, %v9586_v1 }
 0x6a2   :  { %9591 = vmatpush3.bf16.xpose.msk.msra.mxu1 %vm11795_vm4, %v9586_v1 }
 0x6a9   :  { %8866 = vmatmul.mubr.msk.f32.vlgmr.msra.gmra.mrb[24].mxu1 %vm745_vm3, %v1828_v54 }
 0x6aa   :  { %8868 = vmatprep.mubr.msk.f32.mxu1 %vm745_vm3, %v1830_v43 }
 0x6ad   :  { %8869 = vmatmul.mubr.msk.f32.gmra.mrb[26].mxu1 %vm745_vm3, %v1832_v3 }
 0x6ae   :  { %8871 = vmatprep.mubr.msk.f32.mxu1 %vm745_vm3, %v1834_v8 }
 0x6b1   :  { %8872 = vmatmul.mubr.msk.f32.gmra.mrb[28].mxu1 %vm745_vm3, %v1836_v6 }
 0x6b2   :  { %8874 = vmatprep.mubr.msk.f32.mxu1 %vm745_vm3, %v1838_v12 }
 0x6b5   :  { %8875 = vmatmul.mubr.msk.f32.gmra.mrb[30].mxu1 %vm745_vm3, %v1840_v16 }
 0x6e1   :  { %v12033_v15 = vpop.f32.mrb[8].mxu1 }
 0x6e2   :  { %v12035_v19 = vpop.f32.mrb[9].mxu1 }
 0x715   :  { %v12037_v20 = vpop.f32.mrb[10].mxu1 }
 0x716   :  { %v12039_v21 = vpop.f32.mrb[11].mxu1 }
 0x719   :  { %v12041_v22 = vpop.f32.mrb[12].mxu1 }
 0x71a   :  { %v12043_v23 = vpop.f32.mrb[13].mxu1 }
 0x74a   :  { %v12045_v27 = vpop.f32.mrb[14].mxu1 }
 0x74b   :  { %v12047_v28 = vpop.f32.mrb[15].mxu1 }
 0x75c   :  { %v8783_v30 = vpop.f32.mrb[16].mxu1 }
 0x75d   :  { %v1311_v33 = vmul.f32 0.35355338, %v8783_v30  ;;  %v1271_v18 = vpop.f32.mrb[17].mxu1 }
 0x75e   :  { %v1310_v35 = vmul.f32 0.35355338, %v1271_v18 }
 0x75f   :  { %v1319_v34 = vadd.f32 %v1311_v33, %v11830_v24 }
 0x760   :  { %v8786_v37 = vpop.f32.mrb[18].mxu1  ;;  %v1318_v10 = vadd.f32 %v1310_v35, %v11833_v29 }
 0x761   :  { %v1313_v41 = vmul.f32 0.35355338, %v8786_v37  ;;  %v1281_v44 = vpop.f32.mrb[19].mxu1  ;;  %v1329_v14 = vsel %vm899_vm5, %v1319_v34, -inf }
 0x762   :  { %v1312_v38 = vmul.f32 0.35355338, %v1281_v44  ;;  %1330 = vmax.xlane.f32.xlu1 %v1329_v14  ;;  %v1326_v11 = vsel %vm899_vm5, %v1318_v10, -inf }
 0x763   :  { %1327 = vmax.xlane.f32.xlu0 %v1326_v11  ;;  %v1321_v52 = vadd.f32 %v1313_v41, %v11838_v36 }
 0x764   :  { %v8789_v46 = vpop.f32.mrb[20].mxu1  ;;  %v1320_v49 = vadd.f32 %v1312_v38, %v11846_v45 }
 0x765   :  { %v1291_v50 = vpop.f32.mrb[21].mxu1  ;;  %v1315_v60 = vmul.f32 0.35355338, %v8789_v46  ;;  %v1335_v3 = vsel %vm899_vm5, %v1321_v52, -inf }
 0x766   :  { %v1314_v62 = vmul.f32 0.35355338, %v1291_v50  ;;  %v1332_v42 = vsel %vm899_vm5, %v1320_v49, -inf }
 0x767   :  { %1333 = vmax.xlane.f32.xlu0 %v1332_v42  ;;  %v1323_v16 = vadd.f32 %v1315_v60, %v11852_v57 }
 0x768   :  { %v8792_v1 = vpop.f32.mrb[22].mxu1  ;;  %v1322_v54 = vadd.f32 %v1314_v62, %v11870_v13 }
 0x769   :  { %v1301_v43 = vpop.f32.mrb[23].mxu1  ;;  %v1317_v8 = vmul.f32 0.35355338, %v8792_v1  ;;  %v1341_v33 = vsel %vm899_vm5, %v1323_v16, -inf }
 0x76a   :  { %v1316_v6 = vmul.f32 0.35355338, %v1301_v43  ;;  %v1338_v12 = vsel %vm899_vm5, %v1322_v54, -inf }
 0x76b   :  { %1336 = vmax.xlane.f32.xlu0 %v1335_v3  ;;  %1339 = vmax.xlane.f32.xlu1 %v1338_v12  ;;  %v1325_v35 = vadd.f32 %v1317_v8, %v11857_v7 }
 0x76c   :  { %v1324_v30 = vadd.f32 %v1316_v6, %v11877_v17 }
 0x76d   :  { %v1347_v37 = vsel %vm899_vm5, %v1325_v35, -inf }
 0x76e   :  { %v1344_v18 = vsel %vm899_vm5, %v1324_v30, -inf }
 0x76f   :  { %1342 = vmax.xlane.f32.xlu0 %v1341_v33  ;;  %1345 = vmax.xlane.f32.xlu1 %v1344_v18 }
 0x773   :  { %1348 = vmax.xlane.f32.xlu0 %v1347_v37 }
 0x77c   :  { %v12065_v41 = vpop.f32.mrb[24].mxu1 }
 0x77d   :  { %v12067_v44 = vpop.f32.mrb[25].mxu1 }
 0x780   :  { %v12069_v14 = vpop.f32.mrb[26].mxu1  ;;  %10252 = vrot.lane.b32.xlu1 %v11759_v55, %s11370_s22 }
 0x781   :  { %v12073_v38 = vpop.f32.mrb[27].mxu1 }
 0x784   :  { %v12075_v11 = vpop.f32.mrb[28].mxu1 }
 0x785   :  { %v12077_v46 = vpop.f32.mrb[29].mxu1 }
 0x788   :  { %v12079_v50 = vpop.f32.mrb[30].mxu1 }
 0x789   :  { %v12081_v60 = vpop.f32.mrb[31].mxu1 }
 0x7ef   :  { %v1331_v62 = vpop.xlane.xlu1 %1330 }
 0x7f0   :  { %v1351_v42 = vsub.f32 %v1319_v34, %v1331_v62  ;;  %v1328_v1 = vpop.xlane.xlu0 %1327 }
 0x7f1   :  { %v1350_v43 = vsub.f32 %v1318_v10, %v1328_v1 }
 0x7f2   :  { %v1360_v3 = vmul.f32 1.442695, %v1351_v42 }
 0x7f3   :  { %v1358_v8 = vmul.f32 1.442695, %v1350_v43 }
 0x7f4   :  { %10525 = vpow2.f32 %v1360_v3  ;;  %v1334_v6 = vpop.xlane.xlu0 %1333 }
 0x7f5   :  { %10527 = vpow2.f32 %v1358_v8  ;;  %v1352_v12 = vsub.f32 %v1320_v49, %v1334_v6 }
 0x7f7   :  { %v1362_v33 = vmul.f32 1.442695, %v1352_v12 }
 0x7f8   :  { %v1337_v18 = vpop.xlane.xlu0 %1336  ;;  %v1340_v37 = vpop.xlane.xlu1 %1339 }
 0x7f9   :  { %10529 = vpow2.f32 %v1362_v33  ;;  %v1353_v48 = vsub.f32 %v1321_v52, %v1337_v18  ;;  %v1354_v47 = vsub.f32 %v1322_v54, %v1340_v37 }
 0x7fb   :  { %v1364_v40 = vmul.f32 1.442695, %v1353_v48  ;;  %v1366_v39 = vmul.f32 1.442695, %v1354_v47 }
 0x7fc   :  { %v1343_v32 = vpop.xlane.xlu0 %1342  ;;  %v1346_v31 = vpop.xlane.xlu1 %1345 }
 0x7fd   :  { %10531 = vpow2.f32 %v1364_v40  ;;  %v1355_v34 = vsub.f32 %v1323_v16, %v1343_v32  ;;  %v1356_v1 = vsub.f32 %v1324_v30, %v1346_v31 }
 0x7fe   :  { %v12083_v62 = vpop.eup %10525  ;;  %10533 = vpow2.f32 %v1366_v39 }
 0x7ff   :  { %v12085_v10 = vpop.eup %10527  ;;  %v1368_v42 = vmul.f32 1.442695, %v1355_v34  ;;  %v1377_v49 = vsel %vm899_vm5, %v12083_v62, 0.0  ;;  %v1370_v39 = vmul.f32 1.442695, %v1356_v1 }
 0x800   :  { %1378 = vadd.xlane.f32.xlu0 %v1377_v49  ;;  %v1349_v43 = vpop.xlane.xlu0 %1348  ;;  %v10253_v52 = vpop.permute.xlu1 %10252  ;;  %v1374_v47 = vsel %vm899_vm5, %v12085_v10, 0.0 }
 0x801   :  { %10535 = vpow2.f32 %v1368_v42  ;;  %v1357_v48 = vsub.f32 %v1325_v35, %v1349_v43  ;;  %v10255_v40 = vunpack.i.h.bf16 %v10253_v52  ;;  %v10254_v32 = vunpack.i.l.bf16 %v10253_v52  ;;  %1375 = vadd.xlane.f32.xlu1 %v1374_v47 }
 0x803   :  { %v12091_v54 = vpop.eup %10529  ;;  %v1372_v16 = vmul.f32 1.442695, %v1357_v48  ;;  %v9552_v3 = vpack.c.bf16 %v10255_v40, %v10254_v32 }
 0x804   :  { %v1380_v31 = vsel %vm899_vm5, %v12091_v54, 0.0 }
 0x805   :  { %10537 = vpow2.f32 %v1372_v16  ;;  %1381 = vadd.xlane.f32.xlu1 %v1380_v31  ;;  %9553 = vmatprep.subr.bf16.mxu0 %v9552_v3 }
 0x806   :  { %9555 = vmatpush3.bf16.msra.mxu0 %v9552_v3  ;;  %10539 = vpow2.f32 %v1370_v39 }
 0x807   :  { %v12095_v30 = vpop.eup %10531 }
 0x808   :  { %v12097_v8 = vpop.eup %10533  ;;  %v1383_v35 = vsel %vm899_vm5, %v12095_v30, 0.0 }
 0x809   :  { %1384 = vadd.xlane.f32.xlu0 %v1383_v35  ;;  %v1386_v6 = vsel %vm899_vm5, %v12097_v8, 0.0 }
 0x80a   :  { %1387 = vadd.xlane.f32.xlu1 %v1386_v6 }
 0x80b   :  { %v12103_v12 = vpop.eup %10535 }
 0x80c   :  { %v1389_v33 = vsel %vm899_vm5, %v12103_v12, 0.0 }
 0x80d   :  { %1390 = vadd.xlane.f32.xlu0 %v1389_v33 }
 0x80f   :  { %v12107_v18 = vpop.eup %10537 }
 0x810   :  { %v1395_v37 = vsel %vm899_vm5, %v12107_v18, 0.0  ;;  %v12111_v34 = vpop.eup %10539 }
 0x811   :  { %1396 = vadd.xlane.f32.xlu0 %v1395_v37  ;;  %v1392_v42 = vsel %vm899_vm5, %v12111_v34, 0.0 }
 0x815   :  { %1393 = vadd.xlane.f32.xlu0 %v1392_v42 }
 0x81b   :  { %10262 = vrot.lane.b32.xlu1 %v11779_v0, %s11370_s22 }
 0x81f   :  { %10267 = vrot.lane.b32.xlu1 %v11789_v5, %s11370_s22 }
 0x823   :  { %10272 = vrot.lane.b32.xlu1 %v11759_v55, %s11371_s12 }
 0x827   :  { %10277 = vrot.lane.b32.xlu1 %v11769_v59, %s11371_s12 }
 0x82b   :  { %10287 = vrot.lane.b32.xlu1 %v11789_v5, %s11371_s12  ;;  %10257 = vrot.lane.b32.xlu0 %v11769_v59, %s11370_s22 }
 0x82f   :  { %2390 = vrot.lane.b32.xlu1 %v11751_v51, %s11372_s8  ;;  %10282 = vrot.lane.b32.xlu0 %v11779_v0, %s11371_s12  ;;  %v1994_v51 = vmul.f32 0.35355338, %v12067_v44 }
 0x833   :  { %2394 = vrot.lane.b32.xlu1 %v11761_v56, %s11372_s8  ;;  %2388 = vrot.lane.b32.xlu0 %v11753_v53, %s11372_s8  ;;  %v1995_v56 = vmul.f32 0.35355338, %v12065_v41  ;;  %v1996_v53 = vmul.f32 0.35355338, %v12073_v38  ;;  %v2000_v41 = vmul.f32 0.35355338, %v12081_v60 }
 0x835   :  { %v12153_v1 = vadd.f32 %v1995_v56, %v11830_v24  ;;  %v1999_v24 = vmul.f32 0.35355338, %v12075_v11 }
 0x837   :  { %2398 = vrot.lane.b32.xlu1 %v11771_v61, %s11372_s8  ;;  %2392 = vrot.lane.b32.xlu0 %v11763_v58, %s11372_s8  ;;  %v12149_v61 = vadd.f32 %v1994_v51, %v11833_v29  ;;  %v1998_v58 = vmul.f32 0.35355338, %v12077_v46  ;;  %v2013_v44 = vsel %vm899_vm5, %v12153_v1, -inf  ;;  %v12176_v46 = vadd.f32 %v2000_v41, %v11877_v17 }
 0x838   :  { %v12182_v11 = vadd.f32 %v1999_v24, %v11852_v57 }
 0x839   :  { %v12165_v29 = vadd.f32 %v1998_v58, %v11870_v13  ;;  %v2001_v13 = vmul.f32 0.35355338, %v12079_v50 }
 0x83a   :  { %v2025_v49 = vsel %vm899_vm5, %v12182_v11, -inf }
 0x83b   :  { %2402 = vrot.lane.b32.xlu1 %v11781_v2, %s11372_s8  ;;  %2396 = vrot.lane.b32.xlu0 %v11775_v63, %s11372_s8  ;;  %v1997_v2 = vmul.f32 0.35355338, %v12069_v14  ;;  %v2010_v63 = vsel %vm899_vm5, %v12149_v61, -inf  ;;  %v12189_v17 = vadd.f32 %v2001_v13, %v11857_v7 }
 0x83d   :  { %v12171_v38 = vadd.f32 %v1997_v2, %v11838_v36  ;;  %v2028_v36 = vsel %vm899_vm5, %v12176_v46, -inf  ;;  %v2031_v50 = vsel %vm899_vm5, %v12189_v17, -inf }
 0x83f   :  { %2400 = vrot.lane.b32.xlu0 %v11785_v4, %s11372_s8  ;;  %v12159_v4 = vadd.f32 %v1996_v53, %v11846_v45  ;;  %v2022_v45 = vsel %vm899_vm5, %v12165_v29, -inf  ;;  %v2019_v60 = vsel %vm899_vm5, %v12171_v38, -inf }
 0x841   :  { %v2016_v14 = vsel %vm899_vm5, %v12159_v4, -inf }
 0x85e   :  { %2011 = vmax.xlane.f32.xlu0 %v2010_v63 }
 0x85f   :  { %2014 = vmax.xlane.f32.xlu1 %v2013_v44 }
 0x862   :  { %2017 = vmax.xlane.f32.xlu0 %v2016_v14 }
 0x863   :  { %2023 = vmax.xlane.f32.xlu1 %v2022_v45 }
 0x866   :  { %2020 = vmax.xlane.f32.xlu0 %v2019_v60 }
 0x867   :  { %2029 = vmax.xlane.f32.xlu1 %v2028_v36 }
 0x86a   :  { %2026 = vmax.xlane.f32.xlu0 %v2025_v49 }
 0x86e   :  { %2032 = vmax.xlane.f32.xlu0 %v2031_v50 }
 0x878   :  { %10292 = vrot.lane.b32.xlu1 %v11759_v55, %s11373_s20 }
 0x88d   :  { %v1379_v43 = vpop.xlane.xlu0 %1378 }
 0x88e   :  { %v1376_v57 = vpop.xlane.xlu1 %1375 }
 0x88f   :  { %10541 = vrcp.f32 %v1376_v57 }
 0x890   :  { %10543 = vrcp.f32 %v1379_v43 }
 0x892   :  { %v1382_v52 = vpop.xlane.xlu1 %1381 }
 0x893   :  { %10545 = vrcp.f32 %v1382_v52 }
 0x896   :  { %v1385_v47 = vpop.xlane.xlu0 %1384 }
 0x897   :  { %v1388_v48 = vpop.xlane.xlu1 %1387  ;;  %10547 = vrcp.f32 %v1385_v47 }
 0x898   :  { %10549 = vrcp.f32 %v1388_v48 }
 0x899   :  { %v10542_v40 = vpop.eup %10541 }
 0x89a   :  { %v1391_v32 = vpop.xlane.xlu0 %1390  ;;  %v1406_v7 = vmul.f32 %v10542_v40, %v12085_v10  ;;  %v10544_v52 = vpop.eup %10543 }
 0x89b   :  { %v10263_v39 = vpop.permute.xlu1 %10262  ;;  %10551 = vrcp.f32 %v1391_v32 }
 0x89c   :  { %8809 = vmatprep.mubr.msk.f32.mxu0 %vm899_vm5, %v1406_v7  ;;  %v10265_v51 = vunpack.i.h.bf16 %v10263_v39  ;;  %v10264_v56 = vunpack.i.l.bf16 %v10263_v39  ;;  %v1407_v7 = vmul.f32 %v10544_v52, %v12083_v62 }
 0x89d   :  { %v10546_v47 = vpop.eup %10545 }
 0x89e   :  { %v1397_v16 = vpop.xlane.xlu0 %1396  ;;  %v9560_v13 = vpack.c.bf16 %v10265_v51, %v10264_v56  ;;  %v1408_v39 = vmul.f32 %v10546_v47, %v12091_v54 }
 0x89f   :  { %v10268_v3 = vpop.permute.xlu1 %10267 }
 0x8a0   :  { %v10270_v14 = vunpack.i.h.bf16 %v10268_v3  ;;  %v10269_v45 = vunpack.i.l.bf16 %v10268_v3 }
 0x8a1   :  { %v10548_v32 = vpop.eup %10547 }
 0x8a2   :  { %v1394_v31 = vpop.xlane.xlu0 %1393  ;;  %v9564_v50 = vpack.c.bf16 %v10270_v14, %v10269_v45  ;;  %v10550_v3 = vpop.eup %10549 }
 0x8a3   :  { %v10273_v35 = vpop.permute.xlu1 %10272  ;;  %10553 = vrcp.f32 %v1394_v31  ;;  %v1410_v62 = vmul.f32 %v10550_v3, %v12097_v8 }
 0x8a4   :  { %v10275_v6 = vunpack.i.h.bf16 %v10273_v35  ;;  %v10274_v33 = vunpack.i.l.bf16 %v10273_v35  ;;  %10555 = vrcp.f32 %v1397_v16  ;;  %v1409_v35 = vmul.f32 %v10548_v32, %v12095_v30 }
 0x8a5   :  { %v10552_v16 = vpop.eup %10551 }
 0x8a6   :  { %v9608_v37 = vpack.c.bf16 %v10275_v6, %v10274_v33  ;;  %v10258_v42 = vpop.permute.xlu0 %10257  ;;  %v1411_v54 = vmul.f32 %v10552_v16, %v12103_v12 }
 0x8a7   :  { %v10260_v53 = vunpack.i.h.bf16 %v10258_v42  ;;  %v10259_v58 = vunpack.i.l.bf16 %v10258_v42  ;;  %v10278_v2 = vpop.permute.xlu1 %10277 }
 0x8a8   :  { %v10280_v63 = vunpack.i.h.bf16 %v10278_v2  ;;  %v10279_v41 = vunpack.i.l.bf16 %v10278_v2  ;;  %9610 = vmatprep.subr.msk.bf16.mxu1 %vm11795_vm4, %v9608_v37 }
 0x8a9   :  { %9613 = vmatpush3.bf16.xpose.msk.msra.mxu1 %vm11795_vm4, %v9608_v37  ;;  %v9556_v10 = vpack.c.bf16 %v10260_v53, %v10259_v58 }
 0x8aa   :  { %v9614_v44 = vpack.c.bf16 %v10280_v63, %v10279_v41  ;;  %v10283_v24 = vpop.permute.xlu0 %10282 }
 0x8ab   :  { %9557 = vmatprep.subr.bf16.mxu0 %v9556_v10  ;;  %v10285_v60 = vunpack.i.h.bf16 %v10283_v24  ;;  %v10284_v36 = vunpack.i.l.bf16 %v10283_v24  ;;  %v10288_v43 = vpop.permute.xlu1 %10287 }
 0x8ac   :  { %9616 = vmatprep.subr.msk.bf16.mxu1 %vm11795_vm4, %v9614_v44  ;;  %9559 = vmatpush3.bf16.msra.mxu0 %v9556_v10  ;;  %v10290_v48 = vunpack.i.h.bf16 %v10288_v43  ;;  %v10289_v40 = vunpack.i.l.bf16 %v10288_v43 }
 0x8ad   :  { %9561 = vmatprep.subr.bf16.mxu0 %v9560_v13  ;;  %v9620_v57 = vpack.c.bf16 %v10285_v60, %v10284_v36  ;;  %v10554_v6 = vpop.eup %10553 }
 0x8ae   :  { %v2389_v49 = vpop.permute.xlu0 %2388  ;;  %v9626_v31 = vpack.c.bf16 %v10290_v48, %v10289_v40  ;;  %v10556_v33 = vpop.eup %10555  ;;  %v1412_v37 = vmul.f32 %v10554_v6, %v12111_v34  ;;  %v581_v6 = vld [vmem:[%s13825_s26 + $0x8] sm:$0xff] }
 0x8af   :  { %8935 = vmatprep.mubr.msk.f32.mxu1 %vm745_vm3, %v2389_v49  ;;  %v2391_v30 = vpop.permute.xlu1 %2390  ;;  %v1413_v8 = vmul.f32 %v10556_v33, %v12107_v18 }
 0x8b0   :  { %9563 = vmatpush3.bf16.msra.mxu0 %v9560_v13 }
 0x8b1   :  { %9619 = vmatpush3.bf16.xpose.msk.msra.mxu1 %vm11795_vm4, %v9614_v44  ;;  %9565 = vmatprep.subr.bf16.mxu0 %v9564_v50 }
 0x8b2   :  { %9622 = vmatprep.subr.msk.bf16.mxu1 %vm11795_vm4, %v9620_v57  ;;  %v2393_v42 = vpop.permute.xlu0 %2392 }
 0x8b3   :  { %v2395_v51 = vpop.permute.xlu1 %2394 }
 0x8b4   :  { %9567 = vmatpush3.bf16.msra.mxu0 %v9564_v50 }
 0x8b5   :  { %8821 = vmatprep.subr.mxu0 %v581_v6 }
 0x8b6   :  { %v2397_v12 = vpop.permute.xlu0 %2396 }
 0x8b7   :  { %8810 = vmatmul.mubr.msk.f32.vlgmr.msra.gmra.mrb[16].mxu0 %vm899_vm5, %v1407_v7  ;;  %v2399_v34 = vpop.permute.xlu1 %2398 }
 0x8b8   :  { %8812 = vmatprep.mubr.msk.f32.mxu0 %vm899_vm5, %v1408_v39  ;;  %8822 = vmatpush3.msra.mxu0 %v581_v6 }
 0x8b9   :  { %9625 = vmatpush3.bf16.xpose.msk.msra.mxu1 %vm11795_vm4, %v9620_v57 }
 0x8ba   :  { %9628 = vmatprep.subr.msk.bf16.mxu1 %vm11795_vm4, %v9626_v31  ;;  %v2401_v56 = vpop.permute.xlu0 %2400 }
 0x8bb   :  { %8813 = vmatmul.mubr.msk.f32.gmra.mrb[18].mxu0 %vm899_vm5, %v1409_v35  ;;  %v2403_v18 = vpop.permute.xlu1 %2402 }
 0x8bc   :  { %8815 = vmatprep.mubr.msk.f32.mxu0 %vm899_vm5, %v1410_v62 }
 0x8bf   :  { %8816 = vmatmul.mubr.msk.f32.gmra.mrb[20].mxu0 %vm899_vm5, %v1411_v54 }
 0x8c0   :  { %8818 = vmatprep.mubr.msk.f32.mxu0 %vm899_vm5, %v1412_v37  ;;  %v580_v37 = vld [vmem:[%s13825_s26] sm:$0xff] }
 0x8c1   :  { %9631 = vmatpush3.bf16.xpose.msk.msra.mxu1 %vm11795_vm4, %v9626_v31  ;;  %8835 = vmatprep.subr.mxu0 %v580_v37 }
 0x8c3   :  { %8819 = vmatmul.mubr.msk.f32.gmra.mrb[22].mxu0 %vm899_vm5, %v1413_v8 }
 0x8c8   :  { %8936 = vmatmul.mubr.msk.f32.vlgmr.msra.gmra.mrb[32].mxu1 %vm745_vm3, %v2391_v30 }
 0x8c9   :  { %8938 = vmatprep.mubr.msk.f32.mxu1 %vm745_vm3, %v2393_v42 }
 0x8cc   :  { %8939 = vmatmul.mubr.msk.f32.gmra.mrb[34].mxu1 %vm745_vm3, %v2395_v51 }
 0x8cd   :  { %8941 = vmatprep.mubr.msk.f32.mxu1 %vm745_vm3, %v2397_v12 }
 0x8d0   :  { %8942 = vmatmul.mubr.msk.f32.gmra.mrb[36].mxu1 %vm745_vm3, %v2399_v34 }
 0x8d1   :  { %8944 = vmatprep.mubr.msk.f32.mxu1 %vm745_vm3, %v2401_v56 }
 0x8d4   :  { %8945 = vmatmul.mubr.msk.f32.gmra.mrb[38].mxu1 %vm745_vm3, %v2403_v18 }
 0x8eb   :  { %v2012_v53 = vpop.xlane.xlu0 %2011 }
 0x8ec   :  { %v2034_v58 = vsub.f32 %v12149_v61, %v2012_v53  ;;  %v2015_v2 = vpop.xlane.xlu1 %2014 }
 0x8ed   :  { %v2035_v63 = vsub.f32 %v12153_v1, %v2015_v2 }
 0x8ee   :  { %v2042_v41 = vmul.f32 1.442695, %v2034_v58 }
 0x8ef   :  { %v2044_v10 = vmul.f32 1.442695, %v2035_v63  ;;  %v2018_v44 = vpop.xlane.xlu0 %2017 }
 0x8f0   :  { %10557 = vpow2.f32 %v2042_v41  ;;  %v2036_v24 = vsub.f32 %v12159_v4, %v2018_v44  ;;  %v2024_v14 = vpop.xlane.xlu1 %2023 }
 0x8f1   :  { %10559 = vpow2.f32 %v2044_v10  ;;  %v2038_v45 = vsub.f32 %v12165_v29, %v2024_v14 }
 0x8f2   :  { %v2046_v13 = vmul.f32 1.442695, %v2036_v24 }
 0x8f3   :  { %v2050_v60 = vmul.f32 1.442695, %v2038_v45  ;;  %v2021_v36 = vpop.xlane.xlu0 %2020 }
 0x8f4   :  { %10561 = vpow2.f32 %v2046_v13  ;;  %v2037_v49 = vsub.f32 %v12171_v38, %v2021_v36  ;;  %v2030_v50 = vpop.xlane.xlu1 %2029 }
 0x8f5   :  { %10563 = vpow2.f32 %v2050_v60  ;;  %v2040_v4 = vsub.f32 %v12176_v46, %v2030_v50 }
 0x8f6   :  { %v2048_v61 = vmul.f32 1.442695, %v2037_v49 }
 0x8f7   :  { %v2027_v1 = vpop.xlane.xlu0 %2026  ;;  %v2054_v7 = vmul.f32 1.442695, %v2040_v4  ;;  %v10817_v4 = vld [vmem:[%s13824_s11 + $0x8] sm:$0xff] }
 0x8f8   :  { %10565 = vpow2.f32 %v2048_v61  ;;  %v2039_v57 = vsub.f32 %v12182_v11, %v2027_v1  ;;  %v10293_v8 = vpop.permute.xlu1 %10292 }
 0x8f9   :  { %v10295_v42 = vunpack.i.h.bf16 %v10293_v8  ;;  %v10294_v51 = vunpack.i.l.bf16 %v10293_v8 }
 0x8fa   :  { %v12241_v43 = vpop.eup %10557  ;;  %v2052_v52 = vmul.f32 1.442695, %v2039_v57 }
 0x8fb   :  { %v12244_v47 = vpop.eup %10559  ;;  %v2033_v29 = vpop.xlane.xlu0 %2032  ;;  %v2058_v48 = vsel %vm899_vm5, %v12241_v43, 0.0  ;;  %v9592_v53 = vpack.c.bf16 %v10295_v42, %v10294_v51 }
 0x8fc   :  { %10567 = vpow2.f32 %v2052_v52  ;;  %v2041_v38 = vsub.f32 %v12189_v17, %v2033_v29  ;;  %2059 = vadd.xlane.f32.xlu1 %v2058_v48  ;;  %v2061_v40 = vsel %vm899_vm5, %v12244_v47, 0.0 }
 0x8fd   :  { %2062 = vadd.xlane.f32.xlu0 %v2061_v40 }
 0x8fe   :  { %v12251_v11 = vpop.eup %10561  ;;  %v2056_v46 = vmul.f32 1.442695, %v2041_v38 }
 0x8ff   :  { %v2064_v32 = vsel %vm899_vm5, %v12251_v11, 0.0  ;;  %v12255_v39 = vpop.eup %10563 }
 0x900   :  { %10569 = vpow2.f32 %v2056_v46  ;;  %2065 = vadd.xlane.f32.xlu1 %v2064_v32  ;;  %v2070_v31 = vsel %vm899_vm5, %v12255_v39, 0.0 }
 0x901   :  { %10571 = vpow2.f32 %v2054_v7 }
 0x902   :  { %v12257_v3 = vpop.eup %10565 }
 0x903   :  { %v2067_v17 = vsel %vm899_vm5, %v12257_v3, 0.0 }
 0x904   :  { %2068 = vadd.xlane.f32.xlu0 %v2067_v17  ;;  %2071 = vadd.xlane.f32.xlu1 %v2070_v31 }
 0x906   :  { %v12263_v35 = vpop.eup %10567 }
 0x907   :  { %v2073_v16 = vsel %vm899_vm5, %v12263_v35, 0.0 }
 0x908   :  { %2074 = vadd.xlane.f32.xlu0 %v2073_v16 }
 0x90a   :  { %v12267_v62 = vpop.eup %10569 }
 0x90b   :  { %v2079_v54 = vsel %vm899_vm5, %v12267_v62, 0.0  ;;  %v12272_v33 = vpop.eup %10571 }
 0x90c   :  { %2080 = vadd.xlane.f32.xlu0 %v2079_v54  ;;  %v2076_v30 = vsel %vm899_vm5, %v12272_v33, 0.0 }
 0x910   :  { %2077 = vadd.xlane.f32.xlu0 %v2076_v30 }
 0x915   :  { %10302 = vrot.lane.b32.xlu1 %v11779_v0, %s11373_s20 }
 0x919   :  { %10307 = vrot.lane.b32.xlu1 %v11789_v5, %s11373_s20 }
 0x926   :  { %10297 = vrot.lane.b32.xlu0 %v11769_v59, %s11373_s20 }
 0x989   :  { %v2060_v56 = vpop.xlane.xlu1 %2059 }
 0x98a   :  { %v8811_v12 = vpop.f32.mrb[16].mxu0  ;;  %v2063_v18 = vpop.xlane.xlu0 %2062  ;;  %10573 = vrcp.f32 %v2060_v56 }
 0x98b   :  { %v1528_v34 = vpop.f32.mrb[17].mxu0  ;;  %10575 = vrcp.f32 %v2063_v18 }
 0x98c   :  { %8823 = vmatprep.mubr.msk.f32.mxu0 %vm745_vm3, %v1528_v34 }
 0x98d   :  { %8824 = vmatmul.mubr.msk.f32.vlgmr.msra.gmra.mrb[24].mxu0 %vm745_vm3, %v8811_v12  ;;  %v2066_v41 = vpop.xlane.xlu1 %2065 }
 0x98e   :  { %8836 = vmatpush3.msra.mxu0 %v580_v37  ;;  %v8814_v58 = vpop.f32.mrb[18].mxu0  ;;  %v10820_v37 = vld [vmem:[%s13824_s11 + $0x10] sm:$0xff]  ;;  %10577 = vrcp.f32 %v2066_v41 }
 0x98f   :  { %9593 = vmatprep.subr.bf16.mxu0 %v9592_v53  ;;  %v1538_v2 = vpop.f32.mrb[19].mxu0 }
 0x990   :  { %8826 = vmatprep.mubr.msk.f32.mxu0 %vm745_vm3, %v1538_v2 }
 0x991   :  { %v12286_v63 = vpop.xlane.xlu0 %2068  ;;  %8827 = vmatmul.mubr.msk.f32.gmra.mrb[26].mxu0 %vm745_vm3, %v8814_v58  ;;  %v12293_v13 = vpop.xlane.xlu1 %2071  ;;  %v10821_v58 = vld [vmem:[%s13824_s11 + $0x28] sm:$0xff] }
 0x992   :  { %v8817_v10 = vpop.f32.mrb[20].mxu0  ;;  %10579 = vrcp.f32 %v12286_v63  ;;  %v10824_v63 = vld [vmem:[%s13824_s11 + $0x30] sm:$0xff] }
 0x993   :  { %v1548_v44 = vpop.f32.mrb[21].mxu0  ;;  %10581 = vrcp.f32 %v12293_v13 }
 0x994   :  { %8829 = vmatprep.mubr.msk.f32.mxu0 %vm745_vm3, %v1548_v44  ;;  %v10822_v44 = vld [vmem:[%s13824_s11 + $0x20] sm:$0xff] }
 0x995   :  { %v12290_v24 = vpop.xlane.xlu0 %2074  ;;  %8830 = vmatmul.mubr.msk.f32.gmra.mrb[28].mxu0 %vm745_vm3, %v8817_v10  ;;  %v10303_v57 = vpop.permute.xlu1 %10302 }
 0x996   :  { %v8820_v14 = vpop.f32.mrb[22].mxu0  ;;  %v10305_v6 = vunpack.i.h.bf16 %v10303_v57  ;;  %v10304_v54 = vunpack.i.l.bf16 %v10303_v57  ;;  %v10823_v57 = vld [vmem:[%s13824_s11 + $0x38] sm:$0xff]  ;;  %10583 = vrcp.f32 %v12290_v24 }
 0x997   :  { %v1558_v45 = vpop.f32.mrb[23].mxu0 }
 0x998   :  { %8832 = vmatprep.mubr.msk.f32.mxu0 %vm745_vm3, %v1558_v45  ;;  %v9600_v45 = vpack.c.bf16 %v10305_v6, %v10304_v54 }
 0x999   :  { %v12296_v60 = vpop.xlane.xlu0 %2080  ;;  %8833 = vmatmul.mubr.msk.f32.gmra.mrb[30].mxu0 %vm745_vm3, %v8820_v14  ;;  %v10308_v42 = vpop.permute.xlu1 %10307 }
 0x99a   :  { %8837 = vmatprep.mubr.msk.f32.mxu0 %vm745_vm3, %v12035_v19  ;;  %v10818_v19 = vld [vmem:[%s13824_s11] sm:$0xff]  ;;  %v10310_v2 = vunpack.i.h.bf16 %v10308_v42  ;;  %v10309_v10 = vunpack.i.l.bf16 %v10308_v42 }
 0x99b   :  { %v8937_v36 = vpop.f32.mrb[32].mxu1 }
 0x99c   :  { %v2558_v49 = vmul.f32 0.35355338, %v8937_v36  ;;  %v2518_v61 = vpop.f32.mrb[33].mxu1  ;;  %v9604_v13 = vpack.c.bf16 %v10310_v2, %v10309_v10 }
 0x99d   :  { %v2557_v50 = vmul.f32 0.35355338, %v2518_v61  ;;  %v12301_v1 = vpop.xlane.xlu0 %2077  ;;  %8838 = vmatmul.mubr.msk.f32.vlgmr.msra.gmra.mrb[24].mxu0 %vm745_vm3, %v12033_v15 }
 0x99e   :  { %v12306_v52 = vadd.f32 %v10817_v4, %v2558_v49  ;;  %9595 = vmatpush3.bf16.msra.mxu0 %v9592_v53  ;;  %8840 = vmatprep.mubr.msk.f32.mxu0 %vm745_vm3, %v12039_v21  ;;  %v10819_v21 = vld [vmem:[%s13824_s11 + $0x18] sm:$0xff]  ;;  %v10574_v53 = vpop.eup %10573  ;;  %10585 = vrcp.f32 %v12301_v1 }
 0x99f   :  { %v12311_v29 = vadd.f32 %v10818_v19, %v2557_v50  ;;  %v8940_v48 = vpop.f32.mrb[34].mxu1  ;;  %v2090_v50 = vmul.f32 %v10574_v53, %v12241_v43  ;;  %10587 = vrcp.f32 %v12296_v60 }
 0x9a0   :  { %v2560_v38 = vmul.f32 0.35355338, %v8940_v48  ;;  %v2528_v40 = vpop.f32.mrb[35].mxu1  ;;  %v2576_v7 = vsel %vm899_vm5, %v12306_v52, -inf }
 0x9a1   :  { %v2559_v15 = vmul.f32 0.35355338, %v2528_v40  ;;  %2577 = vmax.xlane.f32.xlu0 %v2576_v7  ;;  %v10298_v46 = vpop.permute.xlu0 %10297  ;;  %v2573_v32 = vsel %vm899_vm5, %v12311_v29, -inf  ;;  %8841 = vmatmul.mubr.msk.f32.gmra.mrb[26].mxu0 %vm745_vm3, %v12037_v20 }
 0x9a2   :  { %v12320_v17 = vadd.f32 %v10819_v21, %v2560_v38  ;;  %v10300_v31 = vunpack.i.h.bf16 %v10298_v46  ;;  %v10299_v16 = vunpack.i.l.bf16 %v10298_v46  ;;  %2574 = vmax.xlane.f32.xlu1 %v2573_v32  ;;  %8843 = vmatprep.mubr.msk.f32.mxu0 %vm745_vm3, %v12043_v23 }
 0x9a3   :  { %v12325_v30 = vadd.f32 %v10820_v37, %v2559_v15  ;;  %v8943_v8 = vpop.f32.mrb[36].mxu1 }
 0x9a4   :  { %v2562_v51 = vmul.f32 0.35355338, %v8943_v8  ;;  %v2538_v20 = vpop.f32.mrb[37].mxu1  ;;  %v2582_v12 = vsel %vm899_vm5, %v12320_v17, -inf  ;;  %v9596_v34 = vpack.c.bf16 %v10300_v31, %v10299_v16 }
 0x9a5   :  { %v2561_v56 = vmul.f32 0.35355338, %v2538_v20  ;;  %2583 = vmax.xlane.f32.xlu0 %v2582_v12  ;;  %v2579_v23 = vsel %vm899_vm5, %v12325_v30, -inf  ;;  %8844 = vmatmul.mubr.msk.f32.gmra.mrb[28].mxu0 %vm745_vm3, %v12041_v22 }
 0x9a6   :  { %v12334_v18 = vadd.f32 %v10821_v58, %v2562_v51  ;;  %2580 = vmax.xlane.f32.xlu1 %v2579_v23  ;;  %8846 = vmatprep.mubr.msk.f32.mxu0 %vm745_vm3, %v12047_v28 }
 0x9a7   :  { %v12339_v41 = vadd.f32 %v10822_v44, %v2561_v56  ;;  %9597 = vmatprep.subr.bf16.mxu0 %v9596_v34  ;;  %v8946_v14 = vpop.f32.mrb[38].mxu1 }
 0x9a8   :  { %v2564_v22 = vmul.f32 0.35355338, %v8946_v14  ;;  %9599 = vmatpush3.bf16.msra.mxu0 %v9596_v34  ;;  %v2548_v36 = vpop.f32.mrb[39].mxu1  ;;  %v2588_v49 = vsel %vm899_vm5, %v12334_v18, -inf }
 0x9a9   :  { %v2563_v28 = vmul.f32 0.35355338, %v2548_v36  ;;  %2589 = vmax.xlane.f32.xlu0 %v2588_v49  ;;  %9601 = vmatprep.subr.bf16.mxu0 %v9600_v45  ;;  %v2585_v61 = vsel %vm899_vm5, %v12339_v41, -inf }
 0x9aa   :  { %v12349_v4 = vadd.f32 %v10823_v57, %v2564_v22  ;;  %2586 = vmax.xlane.f32.xlu1 %v2585_v61  ;;  %8847 = vmatmul.mubr.msk.f32.gmra.mrb[30].mxu0 %vm745_vm3, %v12045_v27  ;;  %v10576_v27 = vpop.eup %10575 }
 0x9ab   :  { %v12354_v19 = vadd.f32 %v10824_v63, %v2563_v28  ;;  %8893 = vmatprep.mubr.msk.f32.mxu0 %vm899_vm5, %v2090_v50  ;;  %v10578_v38 = vpop.eup %10577  ;;  %v2091_v40 = vmul.f32 %v10576_v27, %v12244_v47 }
 0x9ac   :  { %9603 = vmatpush3.bf16.msra.mxu0 %v9600_v45  ;;  %v2594_v48 = vsel %vm899_vm5, %v12349_v4, -inf  ;;  %v10580_v24 = vpop.eup %10579  ;;  %v2092_v7 = vmul.f32 %v10578_v38, %v12251_v11 }
 0x9ad   :  { %2595 = vmax.xlane.f32.xlu0 %v2594_v48  ;;  %9605 = vmatprep.subr.bf16.mxu0 %v9604_v13  ;;  %v2591_v43 = vsel %vm899_vm5, %v12354_v19, -inf  ;;  %v10582_v15 = vpop.eup %10581  ;;  %v2093_v1 = vmul.f32 %v10580_v24, %v12257_v3 }
 0x9ae   :  { %2592 = vmax.xlane.f32.xlu1 %v2591_v43  ;;  %v10584_v46 = vpop.eup %10583  ;;  %v2094_v32 = vmul.f32 %v10582_v15, %v12255_v39  ;;  %v582_v39 = vld [vmem:[%s13825_s26 + $0x10] sm:$0xff] }
 0x9af   :  { %v10586_v21 = vpop.eup %10585  ;;  %v2095_v47 = vmul.f32 %v10584_v46, %v12263_v35 }
 0x9b0   :  { %9607 = vmatpush3.bf16.msra.mxu0 %v9604_v13  ;;  %v10588_v60 = vpop.eup %10587  ;;  %v2096_v11 = vmul.f32 %v10586_v21, %v12272_v33 }
 0x9b1   :  { %v2097_v31 = vmul.f32 %v10588_v60, %v12267_v62  ;;  %8905 = vmatprep.subr.mxu0 %v582_v39 }
 0x9b3   :  { %8894 = vmatmul.mubr.msk.f32.vlgmr.msra.gmra.mrb[32].mxu0 %vm899_vm5, %v2091_v40 }
 0x9b4   :  { %8896 = vmatprep.mubr.msk.f32.mxu0 %vm899_vm5, %v2092_v7  ;;  %8906 = vmatpush3.msra.mxu0 %v582_v39 }
 0x9b7   :  { %8897 = vmatmul.mubr.msk.f32.gmra.mrb[34].mxu0 %vm899_vm5, %v2093_v1 }
 0x9b8   :  { %8899 = vmatprep.mubr.msk.f32.mxu0 %vm899_vm5, %v2094_v32 }
 0x9bb   :  { %8900 = vmatmul.mubr.msk.f32.gmra.mrb[36].mxu0 %vm899_vm5, %v2095_v47 }
 0x9bc   :  { %8902 = vmatprep.mubr.msk.f32.mxu0 %vm899_vm5, %v2096_v11 }
 0x9bf   :  { %10312 = vrot.lane.b32.xlu1 %v11759_v55, %s11374_s21  ;;  %8903 = vmatmul.mubr.msk.f32.gmra.mrb[38].mxu0 %vm899_vm5, %v2097_v31 }
 0x9c3   :  { %10317 = vrot.lane.b32.xlu0 %v11769_v59, %s11374_s21 }
 0xa2e   :  { %v2578_v3 = vpop.xlane.xlu0 %2577 }
 0xa2f   :  { %v2598_v35 = vsub.f32 %v12306_v52, %v2578_v3  ;;  %v2575_v33 = vpop.xlane.xlu1 %2574 }
 0xa30   :  { %v2597_v16 = vsub.f32 %v12311_v29, %v2575_v33 }
 0xa31   :  { %v2607_v6 = vmul.f32 1.442695, %v2598_v35 }
 0xa32   :  { %v2605_v62 = vmul.f32 1.442695, %v2597_v16  ;;  %v2584_v54 = vpop.xlane.xlu0 %2583 }
 0xa33   :  { %10589 = vpow2.f32 %v2607_v6  ;;  %v2600_v55 = vsub.f32 %v12320_v17, %v2584_v54  ;;  %v2581_v37 = vpop.xlane.xlu1 %2580 }
 0xa34   :  { %10591 = vpow2.f32 %v2605_v62  ;;  %v2599_v8 = vsub.f32 %v12325_v30, %v2581_v37 }
 0xa35   :  { %v2611_v42 = vmul.f32 1.442695, %v2600_v55 }
 0xa36   :  { %v2609_v51 = vmul.f32 1.442695, %v2599_v8  ;;  %v2590_v20 = vpop.xlane.xlu0 %2589 }
 0xa37   :  { %10593 = vpow2.f32 %v2611_v42  ;;  %v2602_v59 = vsub.f32 %v12334_v18, %v2590_v20  ;;  %v2587_v52 = vpop.xlane.xlu1 %2586 }
 0xa38   :  { %10595 = vpow2.f32 %v2609_v51  ;;  %v2601_v29 = vsub.f32 %v12339_v41, %v2587_v52 }
 0xa39   :  { %v2615_v12 = vmul.f32 1.442695, %v2602_v59 }
 0xa3a   :  { %v2613_v34 = vmul.f32 1.442695, %v2601_v29  ;;  %v2596_v61 = vpop.xlane.xlu0 %2595 }
 0xa3b   :  { %10597 = vpow2.f32 %v2615_v12  ;;  %v2593_v56 = vpop.xlane.xlu1 %2592  ;;  %v2604_v50 = vsub.f32 %v12349_v4, %v2596_v61 }
 0xa3c   :  { %10599 = vpow2.f32 %v2613_v34  ;;  %v2603_v57 = vsub.f32 %v12354_v19, %v2593_v56 }
 0xa3d   :  { %v12389_v17 = vpop.eup %10589  ;;  %v2619_v63 = vmul.f32 1.442695, %v2604_v50  ;;  %v7980_v50 = vld [vmem:[#allocation9] ss:$0 sm:$0xff] }
 0xa3e   :  { %v12391_v23 = vpop.eup %10591  ;;  %v2624_v30 = vsel %vm899_vm5, %v12389_v17, 0.0  ;;  %v2617_v13 = vmul.f32 1.442695, %v2603_v57 }
 0xa3f   :  { %2625 = vadd.xlane.f32.xlu0 %v2624_v30  ;;  %v10313_v53 = vpop.permute.xlu1 %10312  ;;  %v2621_v58 = vsel %vm899_vm5, %v12391_v23, 0.0  ;;  %10601 = vpow2.f32 %v2619_v63 }
 0xa40   :  { %v10315_v18 = vunpack.i.h.bf16 %v10313_v53  ;;  %v10314_v2 = vunpack.i.l.bf16 %v10313_v53  ;;  %2622 = vadd.xlane.f32.xlu1 %v2621_v58  ;;  %10603 = vpow2.f32 %v2617_v13 }
 0xa41   :  { %v12397_v10 = vpop.eup %10593 }
 0xa42   :  { %v12399_v44 = vpop.eup %10595  ;;  %v2630_v41 = vsel %vm899_vm5, %v12397_v10, 0.0  ;;  %v9632_v14 = vpack.c.bf16 %v10315_v18, %v10314_v2 }
 0xa43   :  { %2631 = vadd.xlane.f32.xlu0 %v2630_v41  ;;  %v2627_v45 = vsel %vm899_vm5, %v12399_v44, 0.0 }
 0xa44   :  { %2628 = vadd.xlane.f32.xlu1 %v2627_v45  ;;  %9633 = vmatprep.subr.bf16.mxu0 %v9632_v14 }
 0xa45   :  { %v12405_v22 = vpop.eup %10597 }
 0xa46   :  { %v12407_v36 = vpop.eup %10599  ;;  %v2636_v49 = vsel %vm899_vm5, %v12405_v22, 0.0 }
 0xa47   :  { %2637 = vadd.xlane.f32.xlu0 %v2636_v49  ;;  %v2633_v28 = vsel %vm899_vm5, %v12407_v36, 0.0 }
 0xa48   :  { %2634 = vadd.xlane.f32.xlu1 %v2633_v28 }
 0xa49   :  { %v12419_v48 = vpop.eup %10601 }
 0xa4a   :  { %v12421_v43 = vpop.eup %10603  ;;  %v2642_v27 = vsel %vm899_vm5, %v12419_v48, 0.0 }
 0xa59   :  { %10322 = vrot.lane.b32.xlu1 %v11779_v0, %s11374_s21  ;;  %v2639_v0 = vsel %vm899_vm5, %v12421_v43, 0.0 }
 0xa5d   :  { %10327 = vrot.lane.b32.xlu0 %v11789_v5, %s11374_s21  ;;  %v10318_v5 = vpop.permute.xlu0 %10317 }
 0xa5e   :  { %v10320_v4 = vunpack.i.h.bf16 %v10318_v5  ;;  %v10319_v38 = vunpack.i.l.bf16 %v10318_v5 }
 0xa60   :  { %v9636_v24 = vpack.c.bf16 %v10320_v4, %v10319_v38 }
 0xa7c   :  { %2643 = vadd.xlane.f32.xlu0 %v2642_v27 }
 0xa7d   :  { %2640 = vadd.xlane.f32.xlu1 %v2639_v0 }
 0xa86   :  { %v8895_v19 = vpop.f32.mrb[32].mxu0 }
 0xa87   :  { %v2212_v40 = vpop.f32.mrb[33].mxu0 }
 0xa88   :  { %8907 = vmatprep.mubr.msk.f32.mxu0 %vm745_vm3, %v2212_v40 }
 0xa89   :  { %8908 = vmatmul.mubr.msk.f32.vlgmr.msra.gmra.mrb[24].mxu0 %vm745_vm3, %v8895_v19 }
 0xa8a   :  { %9635 = vmatpush3.bf16.msra.mxu0 %v9632_v14  ;;  %v8898_v7 = vpop.f32.mrb[34].mxu0 }
 0xa8b   :  { %9637 = vmatprep.subr.bf16.mxu0 %v9636_v24  ;;  %v2222_v15 = vpop.f32.mrb[35].mxu0 }
 0xa8c   :  { %8910 = vmatprep.mubr.msk.f32.mxu0 %vm745_vm3, %v2222_v15  ;;  %v13827_v15 = vld [vmem:[#allocation66_spill] sm:$0xff] }
 0xa8d   :  { %8911 = vmatmul.mubr.msk.f32.gmra.mrb[26].mxu0 %vm745_vm3, %v8898_v7 }
 0xa8e   :  { %9639 = vmatpush3.bf16.msra.mxu0 %v9636_v24  ;;  %v8901_v1 = vpop.f32.mrb[36].mxu0  ;;  %v13826_v24 = vld [vmem:[#allocation65_spill] sm:$0xff] }
 0xa8f   :  { %v2232_v46 = vpop.f32.mrb[37].mxu0 }
 0xa90   :  { %8913 = vmatprep.mubr.msk.f32.mxu0 %vm745_vm3, %v2232_v46 }
 0xa91   :  { %8914 = vmatmul.mubr.msk.f32.gmra.mrb[28].mxu0 %vm745_vm3, %v8901_v1 }
 0xa92   :  { %v8904_v32 = vpop.f32.mrb[38].mxu0 }
 0xa93   :  { %v2242_v21 = vpop.f32.mrb[39].mxu0 }
 0xa94   :  { %8916 = vmatprep.mubr.msk.f32.mxu0 %vm745_vm3, %v2242_v21 }
 0xa95   :  { %8917 = vmatmul.mubr.msk.f32.gmra.mrb[30].mxu0 %vm745_vm3, %v8904_v32 }
 0xacc   :  { %v2626_v47 = vpop.xlane.xlu0 %2625 }
 0xacd   :  { %v2623_v60 = vpop.xlane.xlu1 %2622 }
 0xace   :  { %10605 = vrcp.f32 %v2623_v60  ;;  %v13828_v60 = vld [vmem:[#allocation67_spill] sm:$0xff] }
 0xacf   :  { %10607 = vrcp.f32 %v2626_v47 }
 0xad0   :  { %v2632_v11 = vpop.xlane.xlu0 %2631 }
 0xad1   :  { %v2629_v31 = vpop.xlane.xlu1 %2628 }
 0xad2   :  { %10609 = vrcp.f32 %v2629_v31  ;;  %v13829_v31 = vld [vmem:[#allocation68_spill] sm:$0xff] }
 0xad3   :  { %10611 = vrcp.f32 %v2632_v11 }
 0xad4   :  { %v2638_v39 = vpop.xlane.xlu0 %2637 }
 0xad5   :  { %v2635_v3 = vpop.xlane.xlu1 %2634 }
 0xad6   :  { %10613 = vrcp.f32 %v2635_v3 }
 0xad7   :  { %10615 = vrcp.f32 %v2638_v39 }
 0xad8   :  { %v10606_v35 = vpop.eup %10605  ;;  %v10328_v33 = vpop.permute.xlu0 %10327 }
 0xad9   :  { %v10323_v16 = vpop.permute.xlu1 %10322  ;;  %v2653_v6 = vmul.f32 %v10606_v35, %v12391_v23  ;;  %v10330_v62 = vunpack.i.h.bf16 %v10328_v33  ;;  %v10329_v54 = vunpack.i.l.bf16 %v10328_v33  ;;  %v10608_v51 = vpop.eup %10607 }
 0xada   :  { %v10325_v55 = vunpack.i.h.bf16 %v10323_v16  ;;  %v10324_v37 = vunpack.i.l.bf16 %v10323_v16  ;;  %v2654_v59 = vmul.f32 %v10608_v51, %v12389_v17 }
 0xadb   :  { %8963 = vmatprep.mubr.msk.f32.mxu0 %vm899_vm5, %v2653_v6  ;;  %v9644_v42 = vpack.c.bf16 %v10330_v62, %v10329_v54  ;;  %v13830_v54 = vld [vmem:[#allocation69_spill] sm:$0xff] }
 0xadc   :  { %v9640_v8 = vpack.c.bf16 %v10325_v55, %v10324_v37  ;;  %v10610_v20 = vpop.eup %10609  ;;  %v13831_v37 = vld [vmem:[#allocation70_spill] sm:$0xff] }
 0xadd   :  { %v10612_v52 = vpop.eup %10611  ;;  %v2655_v29 = vmul.f32 %v10610_v20, %v12399_v44  ;;  %v583_v44 = vld [vmem:[%s13825_s26 + $0x18] sm:$0xff] }
 0xade   :  { %9641 = vmatprep.subr.bf16.mxu0 %v9640_v8  ;;  %v2656_v34 = vmul.f32 %v10612_v52, %v12397_v10 }
 0xadf   :  { %9643 = vmatpush3.bf16.msra.mxu0 %v9640_v8 }
 0xae0   :  { %9645 = vmatprep.subr.bf16.mxu0 %v9644_v42  ;;  %v10614_v12 = vpop.eup %10613 }
 0xae1   :  { %v10616_v56 = vpop.eup %10615  ;;  %v2657_v23 = vmul.f32 %v10614_v12, %v12407_v36 }
 0xae2   :  { %v2658_v17 = vmul.f32 %v10616_v56, %v12405_v22 }
 0xae3   :  { %9647 = vmatpush3.bf16.msra.mxu0 %v9644_v42 }
 0xae4   :  { %8975 = vmatprep.subr.mxu0 %v583_v44 }
 0xae6   :  { %8964 = vmatmul.mubr.msk.f32.vlgmr.msra.gmra.mrb[40].mxu0 %vm899_vm5, %v2654_v59 }
 0xae7   :  { %8966 = vmatprep.mubr.msk.f32.mxu0 %vm899_vm5, %v2655_v29  ;;  %8976 = vmatpush3.msra.mxu0 %v583_v44 }
 0xaea   :  { %8967 = vmatmul.mubr.msk.f32.gmra.mrb[42].mxu0 %vm899_vm5, %v2656_v34 }
 0xaeb   :  { %8969 = vmatprep.mubr.msk.f32.mxu0 %vm899_vm5, %v2657_v23 }
 0xaee   :  { %8970 = vmatmul.mubr.msk.f32.gmra.mrb[44].mxu0 %vm899_vm5, %v2658_v17 }
 0xb09   :  { %v2644_v30 = vpop.xlane.xlu0 %2643 }
 0xb0a   :  { %10617 = vrcp.f32 %v2644_v30  ;;  %v2641_v53 = vpop.xlane.xlu1 %2640 }
 0xb0b   :  { %10619 = vrcp.f32 %v2641_v53 }
 0xb14   :  { %v10618_v58 = vpop.eup %10617 }
 0xb15   :  { %v10620_v18 = vpop.eup %10619  ;;  %v2660_v10 = vmul.f32 %v10618_v58, %v12419_v48 }
 0xb16   :  { %v2659_v2 = vmul.f32 %v10620_v18, %v12421_v43 }
 0xb18   :  { %8972 = vmatprep.mubr.msk.f32.mxu0 %vm899_vm5, %v2659_v2 }
 0xb19   :  { %8973 = vmatmul.mubr.msk.f32.gmra.mrb[46].mxu0 %vm899_vm5, %v2660_v10 }
 0xbb9   :  { %v8965_v41 = vpop.f32.mrb[40].mxu0 }
 0xbba   :  { %v2775_v14 = vpop.f32.mrb[41].mxu0 }
 0xbbb   :  { %8977 = vmatprep.mubr.msk.f32.mxu0 %vm745_vm3, %v2775_v14 }
 0xbbc   :  { %8978 = vmatmul.mubr.msk.f32.vlgmr.msra.gmra.mrb[24].mxu0 %vm745_vm3, %v8965_v41 }
 0xbbd   :  { %v8968_v45 = vpop.f32.mrb[42].mxu0 }
 0xbbe   :  { %v2785_v22 = vpop.f32.mrb[43].mxu0 }
 0xbbf   :  { %8980 = vmatprep.mubr.msk.f32.mxu0 %vm745_vm3, %v2785_v22 }
 0xbc0   :  { %8981 = vmatmul.mubr.msk.f32.gmra.mrb[26].mxu0 %vm745_vm3, %v8968_v45 }
 0xbc1   :  { %v8971_v36 = vpop.f32.mrb[44].mxu0 }
 0xbc2   :  { %v2795_v49 = vpop.f32.mrb[45].mxu0 }
 0xbc3   :  { %8983 = vmatprep.mubr.msk.f32.mxu0 %vm745_vm3, %v2795_v49 }
 0xbc4   :  { %8984 = vmatmul.mubr.msk.f32.gmra.mrb[28].mxu0 %vm745_vm3, %v8971_v36 }
 0xbec   :  { %v8974_v28 = vpop.f32.mrb[46].mxu0 }
 0xbed   :  { %v2805_v61 = vpop.f32.mrb[47].mxu0 }
 0xbee   :  { %8986 = vmatprep.mubr.msk.f32.mxu0 %vm745_vm3, %v2805_v61 }
 0xbef   :  { %8987 = vmatmul.mubr.msk.f32.gmra.mrb[30].mxu0 %vm745_vm3, %v8974_v28 }
 0xc8f   :  { %v8979_v57 = vpop.f32.mrb[24].mxu0 }
 0xc90   :  { %v2959_v63 = vadd.f32 %v8979_v57, %v7980_v50  ;;  %v2904_v13 = vpop.f32.mrb[25].mxu0 }
 0xc91   :  { %v2958_v48 = vadd.f32 %v7980_v50, %v2904_v13 }
 0xc92   :  { %v2967_v43 = vadd.f32 %v2959_v63, %v11716_v26 }
 0xc93   :  { %v2966_v27 = vadd.f32 %v2958_v48, %v11714_v25  ;;  %v8982_v0 = vpop.f32.mrb[26].mxu0 }
 0xc94   :  { %v2961_v5 = vadd.f32 %v8982_v0, %v7980_v50  ;;  %v2914_v4 = vpop.f32.mrb[27].mxu0  ;;  %v2979_v38 = vsel %vm591_vm2, %v2967_v43, 0.0  ;;  %v3110_v0 = vld [vmem:[#allocation17 + $0x8] sm:$0xff] }
 0xc95   :  { %v2960_v19 = vadd.f32 %v7980_v50, %v2914_v4  ;;  %2980 = vadd.xlane.f32.xlu0 %v2979_v38  ;;  %v2976_v40 = vsel %vm591_vm2, %v2966_v27, 0.0  ;;  %v3111_v4 = vld [vmem:[#allocation17 + $0x10] sm:$0xff]  ;;  %v3112_v38 = vld [vmem:[#allocation17 + $0x18] sm:$0xff] }
 0xc96   :  { %v2969_v7 = vadd.f32 %v2961_v5, %v13826_v24  ;;  %2977 = vadd.xlane.f32.xlu1 %v2976_v40 }
 0xc97   :  { %v2968_v1 = vadd.f32 %v2960_v19, %v13827_v15  ;;  %v8985_v46 = vpop.f32.mrb[28].mxu0  ;;  %v9652_v19 = vpack.c.bf16 %v3112_v38, %v3111_v4 }
 0xc98   :  { %v2963_v32 = vadd.f32 %v8985_v46, %v7980_v50  ;;  %v2924_v21 = vpop.f32.mrb[29].mxu0  ;;  %v2985_v26 = vsel %vm591_vm2, %v2969_v7, 0.0 }
 0xc99   :  { %v2962_v25 = vadd.f32 %v7980_v50, %v2924_v21  ;;  %2986 = vadd.xlane.f32.xlu0 %v2985_v26  ;;  %v2982_v47 = vsel %vm591_vm2, %v2968_v1, 0.0 }
 0xc9a   :  { %v2971_v11 = vadd.f32 %v2963_v32, %v13828_v60  ;;  %2983 = vadd.xlane.f32.xlu1 %v2982_v47  ;;  %v3257_v47 = vld [vmem:[%s13832_s28] sm:$0xff]  ;;  %v3258_v60 = vld [vmem:[%s13832_s28 + $0x8] sm:$0xff] }
 0xc9b   :  { %v2970_v39 = vadd.f32 %v2962_v25, %v13829_v31 }
 0xc9c   :  { %v2991_v3 = vsel %vm591_vm2, %v2971_v11, 0.0 }
 0xc9d   :  { %2992 = vadd.xlane.f32.xlu0 %v2991_v3  ;;  %v2988_v35 = vsel %vm591_vm2, %v2970_v39, 0.0 }
 0xc9e   :  { %2989 = vadd.xlane.f32.xlu1 %v2988_v35 }
 0xcc2   :  { %v8988_v33 = vpop.f32.mrb[30].mxu0 }
 0xcc3   :  { %v2965_v16 = vadd.f32 %v8988_v33, %v7980_v50  ;;  %v2934_v6 = vpop.f32.mrb[31].mxu0 }
 0xcc4   :  { %v2964_v62 = vadd.f32 %v7980_v50, %v2934_v6 }
 0xcc5   :  { %v2973_v55 = vadd.f32 %v2965_v16, %v13830_v54 }
 0xcc6   :  { %v2972_v8 = vadd.f32 %v2964_v62, %v13831_v37 }
 0xcc7   :  { %v2997_v42 = vsel %vm591_vm2, %v2973_v55, 0.0 }
 0xcc8   :  { %2998 = vadd.xlane.f32.xlu0 %v2997_v42  ;;  %v2994_v51 = vsel %vm591_vm2, %v2972_v8, 0.0 }
 0xcc9   :  { %2995 = vadd.xlane.f32.xlu1 %v2994_v51 }
 0xd22   :  { %v2981_v20 = vpop.xlane.xlu0 %2980 }
 0xd23   :  { %v3002_v59 = vmul.f32 0.03125, %v2981_v20  ;;  %v2978_v52 = vpop.xlane.xlu1 %2977 }
 0xd24   :  { %v3001_v29 = vmul.f32 0.03125, %v2978_v52 }
 0xd25   :  { %v12476_v12 = vsub.f32 %v2967_v43, %v3002_v59 }
 0xd26   :  { %v12478_v34 = vsub.f32 %v2966_v27, %v3001_v29  ;;  %v2987_v56 = vpop.xlane.xlu0 %2986  ;;  %v3109_v27 = vld [vmem:[#allocation17] sm:$0xff] }
 0xd27   :  { %v3004_v23 = vmul.f32 0.03125, %v2987_v56  ;;  %v2984_v17 = vpop.xlane.xlu1 %2983  ;;  %v3018_v30 = vmul.f32 %v12476_v12, %v12476_v12  ;;  %v9648_v5 = vpack.c.bf16 %v3110_v0, %v3109_v27 }
 0xd28   :  { %v3003_v53 = vmul.f32 0.03125, %v2984_v17  ;;  %v3017_v58 = vmul.f32 %v12478_v34, %v12478_v34 }
 0xd29   :  { %v12484_v18 = vsub.f32 %v2969_v7, %v3004_v23  ;;  %v3028_v2 = vsel %vm591_vm2, %v3018_v30, 0.0  ;;  %9649 = vmatprep.subr.bf16.mxu1 %v9648_v5  ;;  %v7981_v23 = vld [vmem:[#allocation11] ss:$0 sm:$0xff] }
 0xd2a   :  { %v12487_v10 = vsub.f32 %v2968_v1, %v3003_v53  ;;  %v2993_v44 = vpop.xlane.xlu0 %2992  ;;  %3029 = vadd.xlane.f32.xlu0 %v3028_v2  ;;  %v3025_v41 = vsel %vm591_vm2, %v3017_v58, 0.0  ;;  %9651 = vmatpush3.bf16.msra.mxu1 %v9648_v5  ;;  %v7982_v2 = vld [vmem:[#allocation12] ss:$0 sm:$0xff] }
 0xd2b   :  { %v3006_v14 = vmul.f32 0.03125, %v2993_v44  ;;  %v2990_v45 = vpop.xlane.xlu1 %2989  ;;  %3026 = vadd.xlane.f32.xlu1 %v3025_v41  ;;  %v3020_v22 = vmul.f32 %v12484_v18, %v12484_v18  ;;  %9653 = vmatprep.subr.bf16.mxu1 %v9652_v19 }
 0xd2c   :  { %v3005_v36 = vmul.f32 0.03125, %v2990_v45  ;;  %v3019_v49 = vmul.f32 %v12487_v10, %v12487_v10  ;;  %v3260_v45 = vld [vmem:[%s13832_s28 + $0x18] sm:$0xff] }
 0xd2d   :  { %v12494_v28 = vsub.f32 %v2971_v11, %v3006_v14  ;;  %v3034_v61 = vsel %vm591_vm2, %v3020_v22, 0.0  ;;  %v9656_v11 = vpack.c.bf16 %v3258_v60, %v3257_v47  ;;  %v3259_v14 = vld [vmem:[%s13832_s28 + $0x10] sm:$0xff] }
 0xd2e   :  { %v12497_v50 = vsub.f32 %v2970_v39, %v3005_v36  ;;  %3035 = vadd.xlane.f32.xlu0 %v3034_v61  ;;  %v3031_v57 = vsel %vm591_vm2, %v3019_v49, 0.0  ;;  %9655 = vmatpush3.bf16.msra.mxu1 %v9652_v19 }
 0xd2f   :  { %3032 = vadd.xlane.f32.xlu1 %v3031_v57  ;;  %v3022_v63 = vmul.f32 %v12494_v28, %v12494_v28  ;;  %9657 = vmatprep.subr.bf16.mxu1 %v9656_v11 }
 0xd30   :  { %v3021_v13 = vmul.f32 %v12497_v50, %v12497_v50 }
 0xd31   :  { %v3040_v48 = vsel %vm591_vm2, %v3022_v63, 0.0  ;;  %v9660_v63 = vpack.c.bf16 %v3260_v45, %v3259_v14 }
 0xd32   :  { %3041 = vadd.xlane.f32.xlu0 %v3040_v48  ;;  %v3037_v43 = vsel %vm591_vm2, %v3021_v13, 0.0  ;;  %v3261_v48 = vld [vmem:[%s13832_s28 + $0x20] sm:$0xff] }
 0xd33   :  { %3038 = vadd.xlane.f32.xlu1 %v3037_v43  ;;  %v3262_v43 = vld [vmem:[%s13832_s28 + $0x28] sm:$0xff] }
 0xd34   :  { %v9664_v38 = vpack.c.bf16 %v3262_v43, %v3261_v48 }
 0xd55   :  { %v2999_v40 = vpop.xlane.xlu0 %2998 }
 0xd56   :  { %v3008_v24 = vmul.f32 0.03125, %v2999_v40  ;;  %v2996_v7 = vpop.xlane.xlu1 %2995 }
 0xd57   :  { %v3007_v15 = vmul.f32 0.03125, %v2996_v7 }
 0xd58   :  { %v12506_v1 = vsub.f32 %v2973_v55, %v3008_v24 }
 0xd59   :  { %v12508_v46 = vsub.f32 %v2972_v8, %v3007_v15 }
 0xd5a   :  { %v3024_v32 = vmul.f32 %v12506_v1, %v12506_v1 }
 0xd5b   :  { %v3023_v21 = vmul.f32 %v12508_v46, %v12508_v46 }
 0xd5c   :  { %v3046_v26 = vsel %vm591_vm2, %v3024_v32, 0.0 }
 0xd5d   :  { %3047 = vadd.xlane.f32.xlu0 %v3046_v26  ;;  %v3043_v25 = vsel %vm591_vm2, %v3023_v21, 0.0 }
 0xd5e   :  { %3044 = vadd.xlane.f32.xlu1 %v3043_v25 }
 0xdb7   :  { %v3030_v31 = vpop.xlane.xlu0 %3029 }
 0xdb8   :  { %v3050_v39 = vmul.f32 0.03125, %v3030_v31  ;;  %v3027_v3 = vpop.xlane.xlu1 %3026 }
 0xdb9   :  { %v3049_v35 = vmul.f32 0.03125, %v3027_v3 }
 0xdba   :  { %v3058_v33 = vadd.f32 1e-05, %v3050_v39 }
 0xdbb   :  { %v3057_v16 = vadd.f32 1e-05, %v3049_v35  ;;  %v3036_v6 = vpop.xlane.xlu0 %3035  ;;  %v3263_v35 = vld [vmem:[%s13832_s28 + $0x30] sm:$0xff] }
 0xdbc   :  { %10621 = vrsqrt.f32 %v3058_v33  ;;  %v3052_v62 = vmul.f32 0.03125, %v3036_v6  ;;  %v3033_v54 = vpop.xlane.xlu1 %3032  ;;  %v3264_v33 = vld [vmem:[%s13832_s28 + $0x38] sm:$0xff] }
 0xdbd   :  { %10623 = vrsqrt.f32 %v3057_v16  ;;  %v3051_v55 = vmul.f32 0.03125, %v3033_v54  ;;  %v9668_v16 = vpack.c.bf16 %v3264_v33, %v3263_v35 }
 0xdbe   :  { %v3060_v37 = vadd.f32 1e-05, %v3052_v62 }
 0xdbf   :  { %v3059_v8 = vadd.f32 1e-05, %v3051_v55  ;;  %v3042_v42 = vpop.xlane.xlu0 %3041 }
 0xdc0   :  { %10625 = vrsqrt.f32 %v3060_v37  ;;  %v3054_v51 = vmul.f32 0.03125, %v3042_v42  ;;  %v3039_v20 = vpop.xlane.xlu1 %3038 }
 0xdc1   :  { %10627 = vrsqrt.f32 %v3059_v8  ;;  %v3053_v59 = vmul.f32 0.03125, %v3039_v20 }
 0xdc2   :  { %v3062_v52 = vadd.f32 1e-05, %v3054_v51 }
 0xdc3   :  { %v3061_v29 = vadd.f32 1e-05, %v3053_v59 }
 0xdc4   :  { %10629 = vrsqrt.f32 %v3062_v52 }
 0xdc5   :  { %10631 = vrsqrt.f32 %v3061_v29 }
 0xdc6   :  { %v10622_v56 = vpop.eup %10621 }
 0xdc7   :  { %v10624_v17 = vpop.eup %10623  ;;  %v3074_v30 = vmul.f32 %v10622_v56, %v12476_v12 }
 0xdc8   :  { %v3073_v53 = vmul.f32 %v10624_v17, %v12478_v34 }
 0xdc9   :  { %v3088_v58 = vmul.f32 %v7981_v23, %v3074_v30 }
 0xdca   :  { %v10626_v44 = vpop.eup %10625  ;;  %v3087_v41 = vmul.f32 %v7981_v23, %v3073_v53 }
 0xdcb   :  { %v10628_v22 = vpop.eup %10627  ;;  %v3076_v36 = vmul.f32 %v10626_v44, %v12484_v18  ;;  %v12526_v57 = vadd.f32 %v7982_v2, %v3088_v58 }
 0xdcc   :  { %v12523_v49 = vadd.f32 %v7982_v2, %v3087_v41  ;;  %v3075_v61 = vmul.f32 %v10628_v22, %v12487_v10  ;;  %v7992_v22 = vld [vmem:[#allocation20] ss:$0 sm:$0xff] }
 0xdcd   :  { %v3090_v12 = vmul.f32 %v7981_v23, %v3076_v36 }
 0xdce   :  { %v10630_v34 = vpop.eup %10629  ;;  %8997 = vmatprep.mubr.msk.f32.mxu1 %vm591_vm2, %v12523_v49  ;;  %v3089_v13 = vmul.f32 %v7981_v23, %v3075_v61 }
 0xdcf   :  { %v10632_v27 = vpop.eup %10631  ;;  %8998 = vmatmul.mubr.msk.f32.vlgmr.msra.gmra.mrb[40].mxu1 %vm591_vm2, %v12526_v57  ;;  %v3078_v18 = vmul.f32 %v10630_v34, %v12494_v28  ;;  %v12538_v5 = vadd.f32 %v7982_v2, %v3090_v12 }
 0xdd0   :  { %v12535_v0 = vadd.f32 %v7982_v2, %v3089_v13  ;;  %v3077_v10 = vmul.f32 %v10632_v27, %v12497_v50  ;;  %9659 = vmatpush3.bf16.msra.mxu1 %v9656_v11 }
 0xdd1   :  { %v3092_v4 = vmul.f32 %v7981_v23, %v3078_v18  ;;  %9661 = vmatprep.subr.bf16.mxu1 %v9660_v63 }
 0xdd2   :  { %9000 = vmatprep.mubr.msk.f32.mxu1 %vm591_vm2, %v12535_v0  ;;  %v3091_v19 = vmul.f32 %v7981_v23, %v3077_v10 }
 0xdd3   :  { %9001 = vmatmul.mubr.msk.f32.gmra.mrb[42].mxu1 %vm591_vm2, %v12538_v5  ;;  %v12546_v28 = vadd.f32 %v7982_v2, %v3092_v4 }
 0xdd4   :  { %v12544_v40 = vadd.f32 %v7982_v2, %v3091_v19  ;;  %9663 = vmatpush3.bf16.msra.mxu1 %v9660_v63 }
 0xdd5   :  { %9665 = vmatprep.subr.bf16.mxu1 %v9664_v38 }
 0xdd6   :  { %9003 = vmatprep.mubr.msk.f32.mxu1 %vm591_vm2, %v12544_v40 }
 0xdd7   :  { %9004 = vmatmul.mubr.msk.f32.gmra.mrb[44].mxu1 %vm591_vm2, %v12546_v28 }
 0xdd8   :  { %9667 = vmatpush3.bf16.msra.mxu1 %v9664_v38 }
 0xdd9   :  { %9669 = vmatprep.subr.bf16.mxu1 %v9668_v16 }
 0xddc   :  { %9671 = vmatpush3.bf16.msra.mxu1 %v9668_v16 }
 0xdea   :  { %v3048_v50 = vpop.xlane.xlu0 %3047 }
 0xdeb   :  { %v3056_v24 = vmul.f32 0.03125, %v3048_v50  ;;  %v3045_v7 = vpop.xlane.xlu1 %3044 }
 0xdec   :  { %v3055_v15 = vmul.f32 0.03125, %v3045_v7 }
 0xded   :  { %v3064_v32 = vadd.f32 1e-05, %v3056_v24 }
 0xdee   :  { %v3063_v21 = vadd.f32 1e-05, %v3055_v15 }
 0xdef   :  { %10633 = vrsqrt.f32 %v3064_v32 }
 0xdf0   :  { %10635 = vrsqrt.f32 %v3063_v21 }
 0xdf9   :  { %v10634_v26 = vpop.eup %10633 }
 0xdfa   :  { %v10636_v25 = vpop.eup %10635  ;;  %v3080_v47 = vmul.f32 %v10634_v26, %v12506_v1  ;;  %v7983_v1 = vld [vmem:[#allocation18] ss:$0 sm:$0xff] }
 0xdfb   :  { %v3079_v60 = vmul.f32 %v10636_v25, %v12508_v46 }
 0xdfc   :  { %v3094_v11 = vmul.f32 %v7981_v23, %v3080_v47 }
 0xdfd   :  { %v3093_v31 = vmul.f32 %v7981_v23, %v3079_v60 }
 0xdfe   :  { %v12556_v3 = vadd.f32 %v7982_v2, %v3094_v11 }
 0xdff   :  { %v12554_v39 = vadd.f32 %v7982_v2, %v3093_v31 }
 0xe01   :  { %9006 = vmatprep.mubr.msk.f32.mxu1 %vm591_vm2, %v12554_v39 }
 0xe02   :  { %9007 = vmatmul.mubr.msk.f32.gmra.mrb[46].mxu1 %vm591_vm2, %v12556_v3 }
 0xea2   :  { %v8999_v6 = vpop.f32.mrb[40].mxu1 }
 0xea3   :  { %v3216_v46 = vadd.f32 %v8999_v6, %v7983_v1  ;;  %v3210_v62 = vpop.f32.mrb[41].mxu1 }
 0xea4   :  { %v3211_v54 = vadd.f32 %v7983_v1, %v3210_v62 }
 0xea5   :  { %v3250_v8 = vmax.f32 %v3216_v46, 0.0 }
 0xea6   :  { %v3249_v55 = vmax.f32 %v3211_v54, 0.0  ;;  %v9002_v37 = vpop.f32.mrb[42].mxu1 }
 0xea7   :  { %v3226_v42 = vadd.f32 %v9002_v37, %v7983_v1  ;;  %v3220_v51 = vpop.f32.mrb[43].mxu1 }
 0xea8   :  { %v3221_v20 = vadd.f32 %v7983_v1, %v3220_v51  ;;  %9025 = vmatprep.mubr.msk.f32.mxu1 %vm899_vm5, %v3249_v55 }
 0xea9   :  { %9026 = vmatmul.mubr.msk.f32.vlgmr.msra.gmra.mrb[48].mxu1 %vm899_vm5, %v3250_v8  ;;  %v3252_v29 = vmax.f32 %v3226_v42, 0.0 }
 0xeaa   :  { %v3251_v59 = vmax.f32 %v3221_v20, 0.0  ;;  %v9005_v52 = vpop.f32.mrb[44].mxu1 }
 0xeab   :  { %v3236_v56 = vadd.f32 %v9005_v52, %v7983_v1  ;;  %v3230_v23 = vpop.f32.mrb[45].mxu1 }
 0xeac   :  { %v3231_v17 = vadd.f32 %v7983_v1, %v3230_v23  ;;  %9028 = vmatprep.mubr.msk.f32.mxu1 %vm899_vm5, %v3251_v59 }
 0xead   :  { %9029 = vmatmul.mubr.msk.f32.gmra.mrb[50].mxu1 %vm899_vm5, %v3252_v29  ;;  %v3254_v53 = vmax.f32 %v3236_v56, 0.0 }
 0xeae   :  { %v3253_v30 = vmax.f32 %v3231_v17, 0.0 }
 0xeb0   :  { %9031 = vmatprep.mubr.msk.f32.mxu1 %vm899_vm5, %v3253_v30 }
 0xeb1   :  { %9032 = vmatmul.mubr.msk.f32.gmra.mrb[52].mxu1 %vm899_vm5, %v3254_v53 }
 0xed5   :  { %v9008_v58 = vpop.f32.mrb[46].mxu1 }
 0xed6   :  { %v3246_v2 = vadd.f32 %v9008_v58, %v7983_v1  ;;  %v3240_v44 = vpop.f32.mrb[47].mxu1 }
 0xed7   :  { %v3241_v41 = vadd.f32 %v7983_v1, %v3240_v44 }
 0xed8   :  { %v3256_v45 = vmax.f32 %v3246_v2, 0.0 }
 0xed9   :  { %v3255_v14 = vmax.f32 %v3241_v41, 0.0 }
 0xedb   :  { %9034 = vmatprep.mubr.msk.f32.mxu1 %vm899_vm5, %v3255_v14 }
 0xedc   :  { %9035 = vmatmul.mubr.msk.f32.gmra.mrb[54].mxu1 %vm899_vm5, %v3256_v45 }
 0xf7c   :  { %v9027_v36 = vpop.f32.mrb[48].mxu1 }
 0xf7d   :  { %v3368_v61 = vadd.f32 %v9027_v36, %v7992_v22  ;;  %v3362_v12 = vpop.f32.mrb[49].mxu1  ;;  %v8004_v36 = vld [vmem:[%s13814_s6 + $0x28] sm:$0xff] }
 0xf7e   :  { %v3363_v63 = vadd.f32 %v7992_v22, %v3362_v12  ;;  %v8005_v12 = vld [vmem:[%s13814_s6 + $0x30] sm:$0xff] }
 0xf7f   :  { %v3402_v34 = vadd.f32 %v3368_v61, %v12526_v57 }
 0xf80   :  { %v3401_v13 = vadd.f32 %v3363_v63, %v12523_v49  ;;  %v9030_v48 = vpop.f32.mrb[50].mxu1  ;;  %v8006_v63 = vld [vmem:[%s13814_s6 + $0x38] sm:$0xff] }
 0xf81   :  { %v3378_v43 = vadd.f32 %v9030_v48, %v7992_v22  ;;  %v3372_v27 = vpop.f32.mrb[51].mxu1  ;;  %v3414_v18 = vsel %vm591_vm2, %v3402_v34, 0.0 }
 0xf82   :  { %v3373_v10 = vadd.f32 %v7992_v22, %v3372_v27  ;;  %3415 = vadd.xlane.f32.xlu0 %v3414_v18  ;;  %v3411_v4 = vsel %vm591_vm2, %v3401_v13, 0.0 }
 0xf83   :  { %v3404_v38 = vadd.f32 %v3378_v43, %v12538_v5  ;;  %3412 = vadd.xlane.f32.xlu1 %v3411_v4 }
 0xf84   :  { %v3403_v19 = vadd.f32 %v3373_v10, %v12535_v0  ;;  %v9033_v50 = vpop.f32.mrb[52].mxu1 }
 0xf85   :  { %v3388_v24 = vadd.f32 %v9033_v50, %v7992_v22  ;;  %v3382_v7 = vpop.f32.mrb[53].mxu1  ;;  %v3420_v57 = vsel %vm591_vm2, %v3404_v38, 0.0 }
 0xf86   :  { %v3383_v49 = vadd.f32 %v7992_v22, %v3382_v7  ;;  %3421 = vadd.xlane.f32.xlu0 %v3420_v57  ;;  %v3417_v15 = vsel %vm591_vm2, %v3403_v19, 0.0 }
 0xf87   :  { %v3406_v32 = vadd.f32 %v3388_v24, %v12546_v28  ;;  %3418 = vadd.xlane.f32.xlu1 %v3417_v15 }
 0xf88   :  { %v3405_v21 = vadd.f32 %v3383_v49, %v12544_v40 }
 0xf89   :  { %v3426_v26 = vsel %vm591_vm2, %v3406_v32, 0.0 }
 0xf8a   :  { %3427 = vadd.xlane.f32.xlu0 %v3426_v26  ;;  %v3423_v5 = vsel %vm591_vm2, %v3405_v21, 0.0 }
 0xf8b   :  { %3424 = vadd.xlane.f32.xlu1 %v3423_v5 }
 0xfaf   :  { %v9036_v0 = vpop.f32.mrb[54].mxu1 }
 0xfb0   :  { %v3398_v25 = vadd.f32 %v9036_v0, %v7992_v22  ;;  %v3392_v47 = vpop.f32.mrb[55].mxu1 }
 0xfb1   :  { %v3393_v60 = vadd.f32 %v7992_v22, %v3392_v47  ;;  %v8003_v22 = vld [vmem:[%s13814_s6 + $0x20] sm:$0xff] }
 0xfb2   :  { %v3408_v11 = vadd.f32 %v3398_v25, %v12556_v3  ;;  %v9672_v61 = vpack.c.bf16 %v8004_v36, %v8003_v22 }
 0xfb3   :  { %v3407_v31 = vadd.f32 %v3393_v60, %v12554_v39 }
 0xfb4   :  { %v3432_v35 = vsel %vm591_vm2, %v3408_v11, 0.0  ;;  %9673 = vmatprep.subr.bf16.mxu0 %v9672_v61 }
 0xfb5   :  { %3433 = vadd.xlane.f32.xlu0 %v3432_v35  ;;  %v3429_v28 = vsel %vm591_vm2, %v3407_v31, 0.0  ;;  %9675 = vmatpush3.bf16.msra.mxu0 %v9672_v61 }
 0xfb6   :  { %3430 = vadd.xlane.f32.xlu1 %v3429_v28 }
0x100f   :  { %v3416_v40 = vpop.xlane.xlu0 %3415 }
0x1010   :  { %v3436_v33 = vmul.f32 0.03125, %v3416_v40  ;;  %v3413_v16 = vpop.xlane.xlu1 %3412 }
0x1011   :  { %v3435_v1 = vmul.f32 0.03125, %v3413_v16  ;;  %v8001_v16 = vld [vmem:[#allocation14] ss:$0 sm:$0xff] }
0x1012   :  { %v12588_v6 = vsub.f32 %v3402_v34, %v3436_v33  ;;  %v9676_v34 = vpack.c.bf16 %v8006_v63, %v8005_v12 }
0x1013   :  { %v12590_v46 = vsub.f32 %v3401_v13, %v3435_v1  ;;  %v3422_v62 = vpop.xlane.xlu0 %3421 }
0x1014   :  { %v3438_v54 = vmul.f32 0.03125, %v3422_v62  ;;  %v3419_v55 = vpop.xlane.xlu1 %3418  ;;  %v3452_v39 = vmul.f32 %v12588_v6, %v12588_v6  ;;  %9677 = vmatprep.subr.bf16.mxu0 %v9676_v34 }
0x1015   :  { %v3437_v3 = vmul.f32 0.03125, %v3419_v55  ;;  %v3451_v37 = vmul.f32 %v12590_v46, %v12590_v46  ;;  %9679 = vmatpush3.bf16.msra.mxu0 %v9676_v34 }
0x1016   :  { %v12596_v8 = vsub.f32 %v3404_v38, %v3438_v54  ;;  %v3462_v42 = vsel %vm591_vm2, %v3452_v39, 0.0  ;;  %v8002_v39 = vld [vmem:[#allocation15] ss:$0 sm:$0xff] }
0x1017   :  { %v12599_v51 = vsub.f32 %v3403_v19, %v3437_v3  ;;  %v3428_v20 = vpop.xlane.xlu0 %3427  ;;  %3463 = vadd.xlane.f32.xlu0 %v3462_v42  ;;  %v3459_v59 = vsel %vm591_vm2, %v3451_v37, 0.0 }
0x1018   :  { %v3440_v52 = vmul.f32 0.03125, %v3428_v20  ;;  %v3425_v29 = vpop.xlane.xlu1 %3424  ;;  %3460 = vadd.xlane.f32.xlu1 %v3459_v59  ;;  %v3454_v56 = vmul.f32 %v12596_v8, %v12596_v8 }
0x1019   :  { %v3439_v23 = vmul.f32 0.03125, %v3425_v29  ;;  %v3453_v17 = vmul.f32 %v12599_v51, %v12599_v51 }
0x101a   :  { %v12606_v30 = vsub.f32 %v3406_v32, %v3440_v52  ;;  %v3468_v53 = vsel %vm591_vm2, %v3454_v56, 0.0 }
0x101b   :  { %v12609_v58 = vsub.f32 %v3405_v21, %v3439_v23  ;;  %3469 = vadd.xlane.f32.xlu0 %v3468_v53  ;;  %v3465_v2 = vsel %vm591_vm2, %v3453_v17, 0.0 }
0x101c   :  { %3466 = vadd.xlane.f32.xlu1 %v3465_v2  ;;  %v3456_v44 = vmul.f32 %v12606_v30, %v12606_v30 }
0x101d   :  { %v3455_v41 = vmul.f32 %v12609_v58, %v12609_v58 }
0x101e   :  { %v3474_v14 = vsel %vm591_vm2, %v3456_v44, 0.0 }
0x101f   :  { %3475 = vadd.xlane.f32.xlu0 %v3474_v14  ;;  %v3471_v45 = vsel %vm591_vm2, %v3455_v41, 0.0 }
0x1020   :  { %3472 = vadd.xlane.f32.xlu1 %v3471_v45 }
0x1042   :  { %v3434_v13 = vpop.xlane.xlu0 %3433 }
0x1043   :  { %v3442_v48 = vmul.f32 0.03125, %v3434_v13  ;;  %v3431_v43 = vpop.xlane.xlu1 %3430 }
0x1044   :  { %v3441_v27 = vmul.f32 0.03125, %v3431_v43 }
0x1045   :  { %v12622_v18 = vsub.f32 %v3408_v11, %v3442_v48 }
0x1046   :  { %v12624_v10 = vsub.f32 %v3407_v31, %v3441_v27 }
0x1047   :  { %v3458_v4 = vmul.f32 %v12622_v18, %v12622_v18 }
0x1048   :  { %v3457_v38 = vmul.f32 %v12624_v10, %v12624_v10 }
0x1049   :  { %v3480_v19 = vsel %vm591_vm2, %v3458_v4, 0.0 }
0x104a   :  { %3481 = vadd.xlane.f32.xlu0 %v3480_v19  ;;  %v3477_v50 = vsel %vm591_vm2, %v3457_v38, 0.0  ;;  %v8011_v38 = vld [vmem:[#allocation8 + $0x1] ss:$0 sm:$0xff] }
0x104b   :  { %3478 = vadd.xlane.f32.xlu1 %v3477_v50 }
0x10a4   :  { %v3464_v24 = vpop.xlane.xlu0 %3463 }
0x10a5   :  { %v3484_v7 = vmul.f32 0.03125, %v3464_v24  ;;  %v3461_v57 = vpop.xlane.xlu1 %3460 }
0x10a6   :  { %v3483_v49 = vmul.f32 0.03125, %v3461_v57 }
0x10a7   :  { %v3492_v15 = vadd.f32 1e-05, %v3484_v7 }
0x10a8   :  { %v3491_v32 = vadd.f32 1e-05, %v3483_v49  ;;  %v3470_v21 = vpop.xlane.xlu0 %3469 }
0x10a9   :  { %10637 = vrsqrt.f32 %v3492_v15  ;;  %v3486_v26 = vmul.f32 0.03125, %v3470_v21  ;;  %v3467_v5 = vpop.xlane.xlu1 %3466 }
0x10aa   :  { %10639 = vrsqrt.f32 %v3491_v32  ;;  %v3485_v0 = vmul.f32 0.03125, %v3467_v5 }
0x10ab   :  { %v3494_v25 = vadd.f32 1e-05, %v3486_v26 }
0x10ac   :  { %v3493_v47 = vadd.f32 1e-05, %v3485_v0  ;;  %v3476_v60 = vpop.xlane.xlu0 %3475 }
0x10ad   :  { %10641 = vrsqrt.f32 %v3494_v25  ;;  %v3488_v11 = vmul.f32 0.03125, %v3476_v60  ;;  %v3473_v31 = vpop.xlane.xlu1 %3472 }
0x10ae   :  { %10643 = vrsqrt.f32 %v3493_v47  ;;  %v3487_v35 = vmul.f32 0.03125, %v3473_v31 }
0x10af   :  { %v3496_v28 = vadd.f32 1e-05, %v3488_v11 }
0x10b0   :  { %v3495_v40 = vadd.f32 1e-05, %v3487_v35 }
0x10b1   :  { %10645 = vrsqrt.f32 %v3496_v28 }
0x10b2   :  { %10647 = vrsqrt.f32 %v3495_v40 }
0x10b3   :  { %v10638_v33 = vpop.eup %10637 }
0x10b4   :  { %v10640_v1 = vpop.eup %10639  ;;  %v3508_v62 = vmul.f32 %v10638_v33, %v12588_v6 }
0x10b5   :  { %v3507_v54 = vmul.f32 %v10640_v1, %v12590_v46 }
0x10b6   :  { %v3522_v55 = vmul.f32 %v8001_v16, %v3508_v62 }
0x10b7   :  { %v10642_v3 = vpop.eup %10641  ;;  %v3521_v37 = vmul.f32 %v8001_v16, %v3507_v54 }
0x10b8   :  { %v10644_v42 = vpop.eup %10643  ;;  %v3510_v20 = vmul.f32 %v10642_v3, %v12596_v8  ;;  %v12638_v29 = vadd.f32 %v8002_v39, %v3522_v55 }
0x10b9   :  { %v12635_v59 = vadd.f32 %v8002_v39, %v3521_v37  ;;  %v3509_v52 = vmul.f32 %v10644_v42, %v12599_v51 }
0x10ba   :  { %v3524_v56 = vmul.f32 %v8001_v16, %v3510_v20 }
0x10bb   :  { %v10646_v23 = vpop.eup %10645  ;;  %9045 = vmatprep.mubr.msk.f32.mxu0 %vm591_vm2, %v12635_v59  ;;  %v3523_v6 = vmul.f32 %v8001_v16, %v3509_v52 }
0x10bc   :  { %v10648_v46 = vpop.eup %10647  ;;  %9046 = vmatmul.mubr.msk.f32.vlgmr.msra.gmra.mrb[48].mxu0 %vm591_vm2, %v12638_v29  ;;  %v3512_v17 = vmul.f32 %v10646_v23, %v12606_v30  ;;  %v12648_v2 = vadd.f32 %v8002_v39, %v3524_v56 }
0x10bd   :  { %v12645_v53 = vadd.f32 %v8002_v39, %v3523_v6  ;;  %v3511_v8 = vmul.f32 %v10648_v46, %v12609_v58 }
0x10be   :  { %13834 = vst [vmem:[#allocation66_spill] sm:$0xff] %v12648_v2  ;;  %v3526_v51 = vmul.f32 %v8001_v16, %v3512_v17 }
0x10bf   :  { %13833 = vst [vmem:[#allocation65_spill] sm:$0xff] %v12645_v53  ;;  %9048 = vmatprep.mubr.msk.f32.mxu0 %vm591_vm2, %v12645_v53  ;;  %v3525_v44 = vmul.f32 %v8001_v16, %v3511_v8 }
0x10c0   :  { %9049 = vmatmul.mubr.msk.f32.gmra.mrb[50].mxu0 %vm591_vm2, %v12648_v2  ;;  %v12656_v14 = vadd.f32 %v8002_v39, %v3526_v51  ;;  %v12745_v51 = vld [vmem:[%s13824_s11 + $0x8] sm:$0xff] }
0x10c1   :  { %v12654_v41 = vadd.f32 %v8002_v39, %v3525_v44 }
0x10c2   :  { %13836 = vst [vmem:[#allocation68_spill] sm:$0xff] %v12656_v14 }
0x10c3   :  { %13835 = vst [vmem:[#allocation67_spill] sm:$0xff] %v12654_v41  ;;  %9051 = vmatprep.mubr.msk.f32.mxu0 %vm591_vm2, %v12654_v41 }
0x10c4   :  { %9052 = vmatmul.mubr.msk.f32.gmra.mrb[52].mxu0 %vm591_vm2, %v12656_v14 }
0x10d7   :  { %v3482_v30 = vpop.xlane.xlu0 %3481 }
0x10d8   :  { %v3490_v58 = vmul.f32 0.03125, %v3482_v30  ;;  %v3479_v45 = vpop.xlane.xlu1 %3478  ;;  %v12749_v30 = vld [vmem:[%s13824_s11] sm:$0xff] }
0x10d9   :  { %v3489_v22 = vmul.f32 0.03125, %v3479_v45 }
0x10da   :  { %v3498_v36 = vadd.f32 1e-05, %v3490_v58 }
0x10db   :  { %v3497_v61 = vadd.f32 1e-05, %v3489_v22 }
0x10dc   :  { %10649 = vrsqrt.f32 %v3498_v36 }
0x10dd   :  { %10651 = vrsqrt.f32 %v3497_v61 }
0x10e6   :  { %v10650_v12 = vpop.eup %10649 }
0x10e7   :  { %v10652_v63 = vpop.eup %10651  ;;  %v3514_v34 = vmul.f32 %v10650_v12, %v12622_v18 }
0x10e8   :  { %v3513_v13 = vmul.f32 %v10652_v63, %v12624_v10 }
0x10e9   :  { %v3528_v48 = vmul.f32 %v8001_v16, %v3514_v34  ;;  %v12755_v34 = vld [vmem:[%s13824_s11 + $0x18] sm:$0xff] }
0x10ea   :  { %v3527_v43 = vmul.f32 %v8001_v16, %v3513_v13 }
0x10eb   :  { %v12666_v4 = vadd.f32 %v8002_v39, %v3528_v48 }
0x10ec   :  { %v12664_v27 = vadd.f32 %v8002_v39, %v3527_v43 }
0x10ed   :  { %13838 = vst [vmem:[#allocation70_spill] sm:$0xff] %v12666_v4 }
0x10ee   :  { %13837 = vst [vmem:[#allocation69_spill] sm:$0xff] %v12664_v27  ;;  %9054 = vmatprep.mubr.msk.f32.mxu0 %vm591_vm2, %v12664_v27 }
0x10ef   :  { %9055 = vmatmul.mubr.msk.f32.gmra.mrb[54].mxu0 %vm591_vm2, %v12666_v4 }
0x118f   :  { %v9047_v19 = vpop.f32.mrb[48].mxu0 }
0x1190   :  { %v12672_v50 = vadd.f32 %v9047_v19, %v8011_v38  ;;  %v3651_v24 = vpop.f32.mrb[49].mxu0  ;;  %v12763_v19 = vld [vmem:[%s13824_s11 + $0x10] sm:$0xff] }
0x1191   :  { %v12674_v18 = vadd.f32 %v8011_v38, %v3651_v24 }
0x1193   :  { %v9050_v10 = vpop.f32.mrb[50].mxu0  ;;  %9073 = vmatprep.mubr.msk.f32.mxu1 %vm745_vm3, %v12674_v18  ;;  %v12680_v7 = vpack.i.bf16 %v12672_v50, %v12674_v18 }
0x1194   :  { %v12682_v57 = vadd.f32 %v9050_v10, %v8011_v38  ;;  %v3661_v49 = vpop.f32.mrb[51].mxu0 }
0x1195   :  { %v12684_v15 = vadd.f32 %v8011_v38, %v3661_v49  ;;  %10332 = vrot.lane.b32.xlu1 %v12680_v7, %s11364_s27 }
0x1197   :  { %v9053_v32 = vpop.f32.mrb[52].mxu0  ;;  %v12690_v21 = vpack.i.bf16 %v12682_v57, %v12684_v15 }
0x1198   :  { %v12692_v26 = vadd.f32 %v9053_v32, %v8011_v38  ;;  %v3671_v5 = vpop.f32.mrb[53].mxu0 }
0x1199   :  { %v12694_v0 = vadd.f32 %v8011_v38, %v3671_v5  ;;  %10337 = vrot.lane.b32.xlu0 %v12690_v21, %s11364_s27  ;;  %v12767_v5 = vld [vmem:[%s13824_s11 + $0x28] sm:$0xff] }
0x119b   :  { %v12700_v25 = vpack.i.bf16 %v12692_v26, %v12694_v0 }
0x119d   :  { %10342 = vrot.lane.b32.xlu1 %v12700_v25, %s11364_s27 }
0x11c2   :  { %v9056_v47 = vpop.f32.mrb[54].mxu0 }
0x11c3   :  { %v12704_v60 = vadd.f32 %v9056_v47, %v8011_v38  ;;  %v3681_v11 = vpop.f32.mrb[55].mxu0 }
0x11c4   :  { %v12706_v31 = vadd.f32 %v8011_v38, %v3681_v11 }
0x11c6   :  { %v12710_v35 = vpack.i.bf16 %v12704_v60, %v12706_v31 }
0x11c8   :  { %10347 = vrot.lane.b32.xlu1 %v12710_v35, %s11364_s27 }
0x1207   :  { %v10333_v28 = vpop.permute.xlu1 %10332 }
0x1208   :  { %v10335_v40 = vunpack.i.h.bf16 %v10333_v28  ;;  %v10334_v33 = vunpack.i.l.bf16 %v10333_v28 }
0x120a   :  { %v9680_v16 = vpack.c.bf16 %v10335_v40, %v10334_v33  ;;  %v12772_v40 = vld [vmem:[%s13824_s11 + $0x38] sm:$0xff] }
0x120b   :  { %v10338_v1 = vpop.permute.xlu0 %10337 }
0x120c   :  { %v10340_v62 = vunpack.i.h.bf16 %v10338_v1  ;;  %v10339_v54 = vunpack.i.l.bf16 %v10338_v1  ;;  %9682 = vmatprep.subr.msk.bf16.mxu1 %vm11795_vm4, %v9680_v16 }
0x120d   :  { %9685 = vmatpush3.bf16.xpose.msk.msra.mxu1 %vm11795_vm4, %v9680_v16 }
0x120e   :  { %v9686_v55 = vpack.c.bf16 %v10340_v62, %v10339_v54  ;;  %v12785_v54 = vld [vmem:[%s13824_s11 + $0x20] sm:$0xff] }
0x120f   :  { %v10343_v39 = vpop.permute.xlu1 %10342 }
0x1210   :  { %v10345_v3 = vunpack.i.h.bf16 %v10343_v39  ;;  %v10344_v37 = vunpack.i.l.bf16 %v10343_v39  ;;  %9688 = vmatprep.subr.msk.bf16.mxu1 %vm11795_vm4, %v9686_v55 }
0x1212   :  { %v9692_v42 = vpack.c.bf16 %v10345_v3, %v10344_v37  ;;  %v12792_v37 = vld [vmem:[%s13824_s11 + $0x30] sm:$0xff] }
0x1215   :  { %9691 = vmatpush3.bf16.xpose.msk.msra.mxu1 %vm11795_vm4, %v9686_v55 }
0x1216   :  { %9694 = vmatprep.subr.msk.bf16.mxu1 %vm11795_vm4, %v9692_v42 }
0x121d   :  { %9697 = vmatpush3.bf16.xpose.msk.msra.mxu1 %vm11795_vm4, %v9692_v42 }
0x123a   :  { %v10348_v20 = vpop.permute.xlu1 %10347 }
0x123b   :  { %v10350_v52 = vunpack.i.h.bf16 %v10348_v20  ;;  %v10349_v56 = vunpack.i.l.bf16 %v10348_v20 }
0x123d   :  { %v9698_v23 = vpack.c.bf16 %v10350_v52, %v10349_v56 }
0x123f   :  { %9700 = vmatprep.subr.msk.bf16.mxu1 %vm11795_vm4, %v9698_v23 }
0x1240   :  { %9703 = vmatpush3.bf16.xpose.msk.msra.mxu1 %vm11795_vm4, %v9698_v23 }
0x1247   :  { %9074 = vmatmul.mubr.msk.f32.vlgmr.msra.gmra.mrb[56].mxu1 %vm745_vm3, %v12672_v50 }
0x1248   :  { %9076 = vmatprep.mubr.msk.f32.mxu1 %vm745_vm3, %v12684_v15 }
0x124b   :  { %9077 = vmatmul.mubr.msk.f32.gmra.mrb[58].mxu1 %vm745_vm3, %v12682_v57 }
0x124c   :  { %9079 = vmatprep.mubr.msk.f32.mxu1 %vm745_vm3, %v12694_v0 }
0x124f   :  { %9080 = vmatmul.mubr.msk.f32.gmra.mrb[60].mxu1 %vm745_vm3, %v12692_v26 }
0x1250   :  { %9082 = vmatprep.mubr.msk.f32.mxu1 %vm745_vm3, %v12706_v31 }
0x1253   :  { %9083 = vmatmul.mubr.msk.f32.gmra.mrb[62].mxu1 %vm745_vm3, %v12704_v60 }
0x131a   :  { %v9075_v6 = vpop.f32.mrb[56].mxu1 }
0x131b   :  { %v3852_v46 = vmul.f32 0.35355338, %v9075_v6  ;;  %v3812_v17 = vpop.f32.mrb[57].mxu1 }
0x131c   :  { %v3851_v8 = vmul.f32 0.35355338, %v3812_v17 }
0x131d   :  { %v3860_v44 = vadd.f32 %v12745_v51, %v3852_v46 }
0x131e   :  { %v3859_v58 = vadd.f32 %v12749_v30, %v3851_v8  ;;  %v9078_v45 = vpop.f32.mrb[58].mxu1 }
0x131f   :  { %v3854_v22 = vmul.f32 0.35355338, %v9078_v45  ;;  %v3822_v36 = vpop.f32.mrb[59].mxu1  ;;  %v3870_v61 = vsel %vm899_vm5, %v3860_v44, -inf }
0x1320   :  { %v3853_v12 = vmul.f32 0.35355338, %v3822_v36  ;;  %3871 = vmax.xlane.f32.xlu1 %v3870_v61  ;;  %v3867_v63 = vsel %vm899_vm5, %v3859_v58, -inf }
0x1321   :  { %v12758_v13 = vadd.f32 %v12755_v34, %v3854_v22  ;;  %3868 = vmax.xlane.f32.xlu0 %v3867_v63 }
0x1322   :  { %v9081_v48 = vpop.f32.mrb[60].mxu1  ;;  %v3861_v24 = vadd.f32 %v12763_v19, %v3853_v12 }
0x1323   :  { %v3832_v43 = vpop.f32.mrb[61].mxu1  ;;  %v3876_v38 = vsel %vm899_vm5, %v12758_v13, -inf  ;;  %v3856_v10 = vmul.f32 0.35355338, %v9081_v48 }
0x1324   :  { %v3873_v28 = vsel %vm899_vm5, %v3861_v24, -inf  ;;  %v3855_v62 = vmul.f32 0.35355338, %v3832_v43 }
0x1325   :  { %3877 = vmax.xlane.f32.xlu0 %v3876_v38  ;;  %v3864_v47 = vadd.f32 %v12767_v5, %v3856_v10 }
0x1326   :  { %v9084_v49 = vpop.f32.mrb[62].mxu1  ;;  %v3863_v55 = vadd.f32 %v12785_v54, %v3855_v62 }
0x1327   :  { %v3842_v32 = vpop.f32.mrb[63].mxu1  ;;  %v3858_v11 = vmul.f32 0.35355338, %v9084_v49  ;;  %v3882_v16 = vsel %vm899_vm5, %v3864_v47, -inf }
0x1328   :  { %v3879_v39 = vsel %vm899_vm5, %v3863_v55, -inf  ;;  %v3857_v3 = vmul.f32 0.35355338, %v3842_v32 }
0x1329   :  { %3874 = vmax.xlane.f32.xlu0 %v3873_v28  ;;  %v12775_v33 = vadd.f32 %v12772_v40, %v3858_v11 }
0x132a   :  { %v12795_v42 = vadd.f32 %v12792_v37, %v3857_v3 }
0x132b   :  { %v3888_v1 = vsel %vm899_vm5, %v12775_v33, -inf }
0x132c   :  { %v3885_v20 = vsel %vm899_vm5, %v12795_v42, -inf }
0x132d   :  { %3883 = vmax.xlane.f32.xlu0 %v3882_v16 }
0x1331   :  { %10352 = vrot.lane.b32.xlu1 %v12680_v7, %s11365_s30  ;;  %3889 = vmax.xlane.f32.xlu0 %v3888_v1 }
0x1347   :  { %10357 = vrot.lane.b32.xlu0 %v12690_v21, %s11365_s30 }
0x1355   :  { %3880 = vmax.xlane.f32.xlu1 %v3879_v39 }
0x1366   :  { %10362 = vrot.lane.b32.xlu1 %v12700_v25, %s11365_s30 }
0x138a   :  { %3886 = vmax.xlane.f32.xlu1 %v3885_v20 }
0x139b   :  { %10367 = vrot.lane.b32.xlu1 %v12710_v35, %s11365_s30 }
0x13ad   :  { %v3872_v52 = vpop.xlane.xlu1 %3871 }
0x13ae   :  { %v3892_v56 = vsub.f32 %v3860_v44, %v3872_v52  ;;  %v3869_v23 = vpop.xlane.xlu0 %3868 }
0x13af   :  { %v3891_v6 = vsub.f32 %v3859_v58, %v3869_v23 }
0x13b0   :  { %v3901_v46 = vmul.f32 1.442695, %v3892_v56 }
0x13b1   :  { %v3899_v17 = vmul.f32 1.442695, %v3891_v6  ;;  %v10353_v8 = vpop.permute.xlu1 %10352 }
0x13b2   :  { %10653 = vpow2.f32 %v3901_v46  ;;  %v10355_v45 = vunpack.i.h.bf16 %v10353_v8  ;;  %v10354_v22 = vunpack.i.l.bf16 %v10353_v8  ;;  %v3878_v36 = vpop.xlane.xlu0 %3877 }
0x13b3   :  { %10655 = vpow2.f32 %v3899_v17  ;;  %v3894_v20 = vsub.f32 %v12758_v13, %v3878_v36 }
0x13b4   :  { %v9704_v61 = vpack.c.bf16 %v10355_v45, %v10354_v22 }
0x13b5   :  { %v3905_v56 = vmul.f32 1.442695, %v3894_v20 }
0x13b6   :  { %9705 = vmatprep.subr.bf16.mxu0 %v9704_v61  ;;  %v3875_v12 = vpop.xlane.xlu0 %3874 }
0x13b7   :  { %v3893_v63 = vsub.f32 %v3861_v24, %v3875_v12  ;;  %9707 = vmatpush3.bf16.msra.mxu0 %v9704_v61 }
0x13b9   :  { %v3903_v48 = vmul.f32 1.442695, %v3893_v63 }
0x13ba   :  { %v3884_v43 = vpop.xlane.xlu0 %3883 }
0x13bb   :  { %10657 = vpow2.f32 %v3903_v48  ;;  %v3896_v38 = vsub.f32 %v3864_v47, %v3884_v43 }
0x13bc   :  { %v12801_v44 = vpop.eup %10653 }
0x13bd   :  { %v12803_v58 = vpop.eup %10655  ;;  %v3909_v10 = vmul.f32 1.442695, %v3896_v38  ;;  %v3918_v49 = vsel %vm899_vm5, %v12801_v44, 0.0 }
0x13be   :  { %3919 = vadd.xlane.f32.xlu0 %v3918_v49  ;;  %v3890_v32 = vpop.xlane.xlu0 %3889  ;;  %v3915_v11 = vsel %vm899_vm5, %v12803_v58, 0.0 }
0x13bf   :  { %10659 = vpow2.f32 %v3909_v10  ;;  %3916 = vadd.xlane.f32.xlu1 %v3915_v11  ;;  %v3898_v52 = vsub.f32 %v12775_v33, %v3890_v32 }
0x13c0   :  { %10661 = vpow2.f32 %v3905_v56 }
0x13c1   :  { %v3913_v46 = vmul.f32 1.442695, %v3898_v52 }
0x13c2   :  { %v10358_v24 = vpop.permute.xlu0 %10357 }
0x13c3   :  { %v10360_v28 = vunpack.i.h.bf16 %v10358_v24  ;;  %v10359_v16 = vunpack.i.l.bf16 %v10358_v24 }
0x13c5   :  { %v12809_v1 = vpop.eup %10657  ;;  %v9708_v47 = vpack.c.bf16 %v10360_v28, %v10359_v16 }
0x13c6   :  { %v3921_v62 = vsel %vm899_vm5, %v12809_v1, 0.0 }
0x13c7   :  { %3922 = vadd.xlane.f32.xlu0 %v3921_v62  ;;  %9709 = vmatprep.subr.bf16.mxu0 %v9708_v47 }
0x13c8   :  { %9711 = vmatpush3.bf16.msra.mxu0 %v9708_v47 }
0x13c9   :  { %v12813_v39 = vpop.eup %10659 }
0x13ca   :  { %v3930_v3 = vsel %vm899_vm5, %v12813_v39, 0.0  ;;  %v12821_v12 = vpop.eup %10661 }
0x13cb   :  { %3931 = vadd.xlane.f32.xlu0 %v3930_v3 }
0x13d0   :  { %10372 = vrot.lane.b32.xlu1 %v12680_v7, %s11366_s24 }
0x13e2   :  { %v3881_v23 = vpop.xlane.xlu1 %3880 }
0x13e3   :  { %v3895_v6 = vsub.f32 %v3863_v55, %v3881_v23  ;;  %v3924_v55 = vsel %vm899_vm5, %v12821_v12, 0.0 }
0x13e5   :  { %v3907_v17 = vmul.f32 1.442695, %v3895_v6 }
0x13e6   :  { %v10363_v8 = vpop.permute.xlu1 %10362 }
0x13e7   :  { %10663 = vpow2.f32 %v3907_v17  ;;  %v10365_v45 = vunpack.i.h.bf16 %v10363_v8  ;;  %v10364_v22 = vunpack.i.l.bf16 %v10363_v8 }
0x13e8   :  { %10665 = vpow2.f32 %v3913_v46 }
0x13e9   :  { %v9712_v61 = vpack.c.bf16 %v10365_v45, %v10364_v22 }
0x13eb   :  { %9713 = vmatprep.subr.bf16.mxu0 %v9712_v61 }
0x13ec   :  { %9715 = vmatpush3.bf16.msra.mxu0 %v9712_v61 }
0x13f1   :  { %v12823_v63 = vpop.eup %10663 }
0x13f2   :  { %v3927_v13 = vsel %vm899_vm5, %v12823_v63, 0.0  ;;  %v12827_v33 = vpop.eup %10665 }
0x13f3   :  { %3928 = vadd.xlane.f32.xlu0 %v3927_v13  ;;  %v3936_v36 = vsel %vm899_vm5, %v12827_v33, 0.0 }
0x13f4   :  { %3925 = vadd.xlane.f32.xlu1 %v3924_v55 }
0x13f7   :  { %3937 = vadd.xlane.f32.xlu0 %v3936_v36 }
0x1405   :  { %10382 = vrot.lane.b32.xlu1 %v12700_v25, %s11366_s24 }
0x1409   :  { %10387 = vrot.lane.b32.xlu1 %v12710_v35, %s11366_s24 }
0x140d   :  { %4108 = vrot.lane.b32.xlu1 %v12674_v18, %s11367_s15 }
0x1411   :  { %4110 = vrot.lane.b32.xlu1 %v12672_v50, %s11367_s15 }
0x1415   :  { %4114 = vrot.lane.b32.xlu1 %v12682_v57, %s11367_s15 }
0x1417   :  { %v3887_v48 = vpop.xlane.xlu1 %3886 }
0x1418   :  { %v3897_v43 = vsub.f32 %v12795_v42, %v3887_v48 }
0x1419   :  { %4118 = vrot.lane.b32.xlu1 %v12692_v26, %s11367_s15 }
0x141a   :  { %v3911_v38 = vmul.f32 1.442695, %v3897_v43 }
0x141b   :  { %v10368_v10 = vpop.permute.xlu1 %10367 }
0x141c   :  { %10667 = vpow2.f32 %v3911_v38  ;;  %v10370_v49 = vunpack.i.h.bf16 %v10368_v10  ;;  %v10369_v32 = vunpack.i.l.bf16 %v10368_v10 }
0x141d   :  { %4122 = vrot.lane.b32.xlu1 %v12704_v60, %s11367_s15 }
0x141e   :  { %v9716_v11 = vpack.c.bf16 %v10370_v49, %v10369_v32 }
0x1420   :  { %9717 = vmatprep.subr.bf16.mxu0 %v9716_v11 }
0x1421   :  { %10397 = vrot.lane.b32.xlu1 %v12690_v21, %s11368_s16  ;;  %9719 = vmatpush3.bf16.msra.mxu0 %v9716_v11 }
0x1425   :  { %10407 = vrot.lane.b32.xlu1 %v12710_v35, %s11368_s16 }
0x1426   :  { %v12852_v42 = vpop.eup %10667 }
0x1427   :  { %v3933_v24 = vsel %vm899_vm5, %v12852_v42, 0.0 }
0x1428   :  { %3934 = vadd.xlane.f32.xlu0 %v3933_v24 }
0x1429   :  { %4794 = vrot.lane.b32.xlu1 %v12672_v50, %s11369_s18 }
0x142d   :  { %4798 = vrot.lane.b32.xlu1 %v12682_v57, %s11369_s18 }
0x1431   :  { %4802 = vrot.lane.b32.xlu1 %v12692_v26, %s11369_s18 }
0x1435   :  { %4806 = vrot.lane.b32.xlu1 %v12704_v60, %s11369_s18 }
0x143e   :  { %10377 = vrot.lane.b32.xlu0 %v12690_v21, %s11366_s24 }
0x1442   :  { %4112 = vrot.lane.b32.xlu0 %v12684_v15, %s11367_s15 }
0x1446   :  { %4116 = vrot.lane.b32.xlu0 %v12694_v0, %s11367_s15 }
0x144a   :  { %4120 = vrot.lane.b32.xlu0 %v12706_v31, %s11367_s15 }
0x144b   :  { %v3920_v28 = vpop.xlane.xlu0 %3919 }
0x144c   :  { %10669 = vrcp.f32 %v3920_v28  ;;  %v3917_v16 = vpop.xlane.xlu1 %3916 }
0x144d   :  { %10671 = vrcp.f32 %v3917_v16 }
0x144e   :  { %10392 = vrot.lane.b32.xlu0 %v12680_v7, %s11368_s16 }
0x1450   :  { %v10373_v47 = vpop.permute.xlu1 %10372 }
0x1451   :  { %v10375_v62 = vunpack.i.h.bf16 %v10373_v47  ;;  %v10374_v3 = vunpack.i.l.bf16 %v10373_v47 }
0x1452   :  { %10402 = vrot.lane.b32.xlu0 %v12700_v25, %s11368_s16 }
0x1453   :  { %v9720_v20 = vpack.c.bf16 %v10375_v62, %v10374_v3 }
0x1454   :  { %v3923_v52 = vpop.xlane.xlu0 %3922 }
0x1455   :  { %10673 = vrcp.f32 %v3923_v52  ;;  %9722 = vmatprep.subr.msk.bf16.mxu0 %vm11795_vm4, %v9720_v20 }
0x1456   :  { %v10670_v56 = vpop.eup %10669  ;;  %4792 = vrot.lane.b32.xlu0 %v12674_v18, %s11369_s18 }
0x1457   :  { %v10672_v23 = vpop.eup %10671  ;;  %v3948_v46 = vmul.f32 %v10670_v56, %v12801_v44 }
0x1458   :  { %v3947_v6 = vmul.f32 %v10672_v23, %v12803_v58  ;;  %v3932_v44 = vpop.xlane.xlu0 %3931 }
0x145a   :  { %4796 = vrot.lane.b32.xlu0 %v12684_v15, %s11369_s18  ;;  %9101 = vmatprep.mubr.msk.f32.mxu0 %vm899_vm5, %v3947_v6 }
0x145b   :  { %9102 = vmatmul.mubr.msk.f32.vlgmr.msra.gmra.mrb[56].mxu0 %vm899_vm5, %v3948_v46 }
0x145c   :  { %9725 = vmatpush3.bf16.xpose.msk.msra.mxu0 %vm11795_vm4, %v9720_v20 }
0x145e   :  { %4800 = vrot.lane.b32.xlu0 %v12694_v0, %s11369_s18 }
0x145f   :  { %v10674_v17 = vpop.eup %10673 }
0x1460   :  { %v3949_v8 = vmul.f32 %v10674_v17, %v12809_v1 }
0x1462   :  { %4804 = vrot.lane.b32.xlu0 %v12706_v31, %s11369_s18  ;;  %9104 = vmatprep.mubr.msk.f32.mxu0 %vm899_vm5, %v3949_v8 }
0x1480   :  { %v3929_v58 = vpop.xlane.xlu0 %3928 }
0x1481   :  { %10675 = vrcp.f32 %v3929_v58  ;;  %v3926_v45 = vpop.xlane.xlu1 %3925 }
0x1482   :  { %10677 = vrcp.f32 %v3926_v45 }
0x1483   :  { %10679 = vrcp.f32 %v3932_v44 }
0x1484   :  { %v3938_v38 = vpop.xlane.xlu0 %3937 }
0x1485   :  { %v10383_v48 = vpop.permute.xlu1 %10382  ;;  %10681 = vrcp.f32 %v3938_v38 }
0x1486   :  { %v10385_v11 = vunpack.i.h.bf16 %v10383_v48  ;;  %v10384_v24 = vunpack.i.l.bf16 %v10383_v48 }
0x1488   :  { %v9732_v3 = vpack.c.bf16 %v10385_v11, %v10384_v24 }
0x1489   :  { %v10388_v43 = vpop.permute.xlu1 %10387 }
0x148a   :  { %v10390_v23 = vunpack.i.h.bf16 %v10388_v43  ;;  %v10389_v6 = vunpack.i.l.bf16 %v10388_v43 }
0x148b   :  { %v10676_v22 = vpop.eup %10675 }
0x148c   :  { %v10678_v61 = vpop.eup %10677  ;;  %v3951_v36 = vmul.f32 %v10676_v22, %v12823_v63  ;;  %v9738_v44 = vpack.c.bf16 %v10390_v23, %v10389_v6 }
0x148d   :  { %v3950_v13 = vmul.f32 %v10678_v61, %v12821_v12  ;;  %v10680_v55 = vpop.eup %10679  ;;  %v4109_v10 = vpop.permute.xlu1 %4108 }
0x148e   :  { %v3952_v1 = vmul.f32 %v10680_v55, %v12813_v39 }
0x148f   :  { %9105 = vmatmul.mubr.msk.f32.gmra.mrb[58].mxu0 %vm899_vm5, %v3950_v13  ;;  %v10682_v39 = vpop.eup %10681 }
0x1490   :  { %9107 = vmatprep.mubr.msk.f32.mxu0 %vm899_vm5, %v3951_v36  ;;  %v3954_v46 = vmul.f32 %v10682_v39, %v12827_v33 }
0x1491   :  { %v4111_v32 = vpop.permute.xlu1 %4110 }
0x1493   :  { %9108 = vmatmul.mubr.msk.f32.gmra.mrb[60].mxu0 %vm899_vm5, %v3952_v1 }
0x1495   :  { %v4115_v47 = vpop.permute.xlu1 %4114 }
0x1499   :  { %v4119_v17 = vpop.permute.xlu1 %4118 }
0x14b5   :  { %v3935_v49 = vpop.xlane.xlu0 %3934 }
0x14b6   :  { %10683 = vrcp.f32 %v3935_v49 }
0x14b9   :  { %v10378_v12 = vpop.permute.xlu0 %10377 }
0x14ba   :  { %v10380_v63 = vunpack.i.h.bf16 %v10378_v12  ;;  %v10379_v28 = vunpack.i.l.bf16 %v10378_v12 }
0x14bc   :  { %v9726_v16 = vpack.c.bf16 %v10380_v63, %v10379_v28 }
0x14bd   :  { %v4113_v62 = vpop.permute.xlu0 %4112 }
0x14be   :  { %9728 = vmatprep.subr.msk.bf16.mxu0 %vm11795_vm4, %v9726_v16 }
0x14bf   :  { %9731 = vmatpush3.bf16.xpose.msk.msra.mxu0 %vm11795_vm4, %v9726_v16 }
0x14c0   :  { %v10684_v20 = vpop.eup %10683  ;;  %9734 = vmatprep.subr.msk.bf16.mxu0 %vm11795_vm4, %v9732_v3 }
0x14c1   :  { %v4117_v52 = vpop.permute.xlu0 %4116  ;;  %v3953_v56 = vmul.f32 %v10684_v20, %v12852_v42  ;;  %v4123_v42 = vpop.permute.xlu1 %4122 }
0x14c3   :  { %9110 = vmatprep.mubr.msk.f32.mxu0 %vm899_vm5, %v3953_v56 }
0x14c4   :  { %9111 = vmatmul.mubr.msk.f32.gmra.mrb[62].mxu0 %vm899_vm5, %v3954_v46 }
0x14c5   :  { %v4121_v8 = vpop.permute.xlu0 %4120  ;;  %9129 = vmatprep.mubr.msk.f32.mxu0 %vm745_vm3, %v4109_v10  ;;  %v10398_v61 = vpop.permute.xlu1 %10397 }
0x14c6   :  { %v10400_v13 = vunpack.i.h.bf16 %v10398_v61  ;;  %v10399_v55 = vunpack.i.l.bf16 %v10398_v61 }
0x14c7   :  { %9737 = vmatpush3.bf16.xpose.msk.msra.mxu0 %vm11795_vm4, %v9732_v3 }
0x14c8   :  { %9740 = vmatprep.subr.msk.bf16.mxu0 %vm11795_vm4, %v9738_v44  ;;  %v9766_v36 = vpack.c.bf16 %v10400_v13, %v10399_v55 }
0x14c9   :  { %v10393_v58 = vpop.permute.xlu0 %10392  ;;  %v10408_v10 = vpop.permute.xlu1 %10407 }
0x14ca   :  { %v10395_v45 = vunpack.i.h.bf16 %v10393_v58  ;;  %v10394_v22 = vunpack.i.l.bf16 %v10393_v58  ;;  %v10410_v49 = vunpack.i.h.bf16 %v10408_v10 }
0x14cc   :  { %v9760_v33 = vpack.c.bf16 %v10395_v45, %v10394_v22 }
0x14cd   :  { %v10403_v1 = vpop.permute.xlu0 %10402  ;;  %v4795_v24 = vpop.permute.xlu1 %4794 }
0x14ce   :  { %v10405_v48 = vunpack.i.h.bf16 %v10403_v1  ;;  %v10404_v43 = vunpack.i.l.bf16 %v10403_v1 }
0x14cf   :  { %9743 = vmatpush3.bf16.xpose.msk.msra.mxu0 %vm11795_vm4, %v9738_v44 }
0x14d0   :  { %9762 = vmatprep.subr.msk.bf16.mxu0 %vm11795_vm4, %v9760_v33  ;;  %v9772_v38 = vpack.c.bf16 %v10405_v48, %v10404_v43 }
0x14d1   :  { %v4793_v12 = vpop.permute.xlu0 %4792  ;;  %v4799_v28 = vpop.permute.xlu1 %4798 }
0x14d5   :  { %v4797_v63 = vpop.permute.xlu0 %4796 }
0x14d6   :  { %9130 = vmatmul.mubr.msk.f32.vlgmr.msra.gmra.mrb[64].mxu0 %vm745_vm3, %v4111_v32  ;;  %v10409_v32 = vunpack.i.l.bf16 %v10408_v10 }
0x14d7   :  { %9132 = vmatprep.mubr.msk.f32.mxu0 %vm745_vm3, %v4113_v62  ;;  %9765 = vmatpush3.bf16.xpose.msk.msra.mxu0 %vm11795_vm4, %v9760_v33 }
0x14d8   :  { %9768 = vmatprep.subr.msk.bf16.mxu0 %vm11795_vm4, %v9766_v36  ;;  %v9778_v11 = vpack.c.bf16 %v10410_v49, %v10409_v32 }
0x14d9   :  { %v4801_v16 = vpop.permute.xlu0 %4800 }
0x14da   :  { %9133 = vmatmul.mubr.msk.f32.gmra.mrb[66].mxu0 %vm745_vm3, %v4115_v47  ;;  %v4803_v47 = vpop.permute.xlu1 %4802 }
0x14db   :  { %9135 = vmatprep.mubr.msk.f32.mxu0 %vm745_vm3, %v4117_v52 }
0x14dd   :  { %v4805_v62 = vpop.permute.xlu0 %4804 }
0x14de   :  { %9136 = vmatmul.mubr.msk.f32.gmra.mrb[68].mxu0 %vm745_vm3, %v4119_v17  ;;  %v4807_v3 = vpop.permute.xlu1 %4806 }
0x14df   :  { %9138 = vmatprep.mubr.msk.f32.mxu0 %vm745_vm3, %v4121_v8  ;;  %9771 = vmatpush3.bf16.xpose.msk.msra.mxu0 %vm11795_vm4, %v9766_v36 }
0x14e0   :  { %9774 = vmatprep.subr.msk.bf16.mxu0 %vm11795_vm4, %v9772_v38 }
0x14e2   :  { %9139 = vmatmul.mubr.msk.f32.gmra.mrb[70].mxu0 %vm745_vm3, %v4123_v42 }
0x14e3   :  { %9213 = vmatprep.mubr.msk.f32.mxu0 %vm745_vm3, %v4793_v12 }
0x14e7   :  { %9777 = vmatpush3.bf16.xpose.msk.msra.mxu0 %vm11795_vm4, %v9772_v38 }
0x14e8   :  { %9780 = vmatprep.subr.msk.bf16.mxu0 %vm11795_vm4, %v9778_v11 }
0x14ef   :  { %9783 = vmatpush3.bf16.xpose.msk.msra.mxu0 %vm11795_vm4, %v9778_v11 }
0x14f6   :  { %9214 = vmatmul.mubr.msk.f32.vlgmr.msra.gmra.mrb[72].mxu0 %vm745_vm3, %v4795_v24 }
0x14f7   :  { %9216 = vmatprep.mubr.msk.f32.mxu0 %vm745_vm3, %v4797_v63 }
0x14fa   :  { %9217 = vmatmul.mubr.msk.f32.gmra.mrb[74].mxu0 %vm745_vm3, %v4799_v28 }
0x14fb   :  { %9219 = vmatprep.mubr.msk.f32.mxu0 %vm745_vm3, %v4801_v16 }
0x14fe   :  { %9220 = vmatmul.mubr.msk.f32.gmra.mrb[76].mxu0 %vm745_vm3, %v4803_v47 }
0x14ff   :  { %9222 = vmatprep.mubr.msk.f32.mxu0 %vm745_vm3, %v4805_v62 }
0x1502   :  { %9223 = vmatmul.mubr.msk.f32.gmra.mrb[78].mxu0 %vm745_vm3, %v4807_v3 }
0x152e   :  { %v12948_v39 = vpop.f32.mrb[56].mxu0 }
0x152f   :  { %v12950_v20 = vpop.f32.mrb[57].mxu0 }
0x1562   :  { %v12952_v52 = vpop.f32.mrb[58].mxu0 }
0x1563   :  { %v12954_v56 = vpop.f32.mrb[59].mxu0 }
0x1566   :  { %v12956_v23 = vpop.f32.mrb[60].mxu0 }
0x1567   :  { %v12958_v6 = vpop.f32.mrb[61].mxu0 }
0x1597   :  { %v12960_v46 = vpop.f32.mrb[62].mxu0 }
0x1598   :  { %v12962_v17 = vpop.f32.mrb[63].mxu0 }
0x15a9   :  { %v9131_v8 = vpop.f32.mrb[64].mxu0 }
0x15aa   :  { %v4278_v44 = vmul.f32 0.35355338, %v9131_v8  ;;  %v4238_v42 = vpop.f32.mrb[65].mxu0 }
0x15ab   :  { %v4277_v58 = vmul.f32 0.35355338, %v4238_v42 }
0x15ac   :  { %v4286_v45 = vadd.f32 %v12745_v51, %v4278_v44 }
0x15ad   :  { %v4285_v22 = vadd.f32 %v12749_v30, %v4277_v58  ;;  %v9134_v33 = vpop.f32.mrb[66].mxu0 }
0x15ae   :  { %v4280_v61 = vmul.f32 0.35355338, %v9134_v33  ;;  %v4248_v13 = vpop.f32.mrb[67].mxu0  ;;  %v4296_v55 = vsel %vm899_vm5, %v4286_v45, -inf }
0x15af   :  { %v4279_v36 = vmul.f32 0.35355338, %v4248_v13  ;;  %4297 = vmax.xlane.f32.xlu1 %v4296_v55  ;;  %v4293_v1 = vsel %vm899_vm5, %v4285_v22, -inf }
0x15b0   :  { %4294 = vmax.xlane.f32.xlu0 %v4293_v1  ;;  %v4288_v38 = vadd.f32 %v12755_v34, %v4280_v61 }
0x15b1   :  { %v4287_v48 = vadd.f32 %v12763_v19, %v4279_v36  ;;  %v9137_v43 = vpop.f32.mrb[68].mxu0 }
0x15b2   :  { %v4258_v10 = vpop.f32.mrb[69].mxu0  ;;  %v4282_v49 = vmul.f32 0.35355338, %v9137_v43  ;;  %v4302_v28 = vsel %vm899_vm5, %v4288_v38, -inf }
0x15b3   :  { %v4281_v32 = vmul.f32 0.35355338, %v4258_v10  ;;  %v4299_v12 = vsel %vm899_vm5, %v4287_v48, -inf }
0x15b4   :  { %4300 = vmax.xlane.f32.xlu0 %v4299_v12  ;;  %v4290_v16 = vadd.f32 %v12767_v5, %v4282_v49 }
0x15b5   :  { %v4289_v11 = vadd.f32 %v12785_v54, %v4281_v32  ;;  %v9140_v24 = vpop.f32.mrb[70].mxu0 }
0x15b6   :  { %v4268_v63 = vpop.f32.mrb[71].mxu0  ;;  %v4284_v47 = vmul.f32 0.35355338, %v9140_v24  ;;  %v4308_v42 = vsel %vm899_vm5, %v4290_v16, -inf }
0x15b7   :  { %v4283_v62 = vmul.f32 0.35355338, %v4268_v63  ;;  %v4305_v3 = vsel %vm899_vm5, %v4289_v11, -inf }
0x15b8   :  { %4303 = vmax.xlane.f32.xlu0 %v4302_v28  ;;  %4306 = vmax.xlane.f32.xlu1 %v4305_v3  ;;  %v4292_v44 = vadd.f32 %v12772_v40, %v4284_v47 }
0x15b9   :  { %v4291_v8 = vadd.f32 %v12792_v37, %v4283_v62 }
0x15ba   :  { %v4314_v33 = vsel %vm899_vm5, %v4292_v44, -inf }
0x15bb   :  { %v4311_v58 = vsel %vm899_vm5, %v4291_v8, -inf }
0x15bc   :  { %4309 = vmax.xlane.f32.xlu0 %v4308_v42  ;;  %4312 = vmax.xlane.f32.xlu1 %v4311_v58 }
0x15c0   :  { %4315 = vmax.xlane.f32.xlu0 %v4314_v33 }
0x15c9   :  { %v12980_v61 = vpop.f32.mrb[72].mxu0 }
0x15ca   :  { %v12982_v13 = vpop.f32.mrb[73].mxu0 }
0x15cd   :  { %v12984_v55 = vpop.f32.mrb[74].mxu0  ;;  %10412 = vrot.lane.b32.xlu1 %v12680_v7, %s11370_s22 }
0x15ce   :  { %v12988_v36 = vpop.f32.mrb[75].mxu0 }
0x15d1   :  { %v12990_v1 = vpop.f32.mrb[76].mxu0 }
0x15d2   :  { %v12992_v43 = vpop.f32.mrb[77].mxu0 }
0x15d5   :  { %v12994_v10 = vpop.f32.mrb[78].mxu0 }
0x15d6   :  { %v12996_v49 = vpop.f32.mrb[79].mxu0 }
0x163c   :  { %v4298_v32 = vpop.xlane.xlu1 %4297 }
0x163d   :  { %v4318_v12 = vsub.f32 %v4286_v45, %v4298_v32  ;;  %v4295_v24 = vpop.xlane.xlu0 %4294 }
0x163e   :  { %v4317_v63 = vsub.f32 %v4285_v22, %v4295_v24 }
0x163f   :  { %v4327_v28 = vmul.f32 1.442695, %v4318_v12 }
0x1640   :  { %v4325_v47 = vmul.f32 1.442695, %v4317_v63 }
0x1641   :  { %10685 = vpow2.f32 %v4327_v28  ;;  %v4301_v62 = vpop.xlane.xlu0 %4300 }
0x1642   :  { %10687 = vpow2.f32 %v4325_v47  ;;  %v4319_v3 = vsub.f32 %v4287_v48, %v4301_v62 }
0x1644   :  { %v4329_v42 = vmul.f32 1.442695, %v4319_v3 }
0x1645   :  { %v4304_v58 = vpop.xlane.xlu0 %4303  ;;  %v4307_v33 = vpop.xlane.xlu1 %4306 }
0x1646   :  { %10689 = vpow2.f32 %v4329_v42  ;;  %v4320_v27 = vsub.f32 %v4288_v38, %v4304_v58  ;;  %v4321_v4 = vsub.f32 %v4289_v11, %v4307_v33 }
0x1648   :  { %v4331_v41 = vmul.f32 1.442695, %v4320_v27  ;;  %v4333_v14 = vmul.f32 1.442695, %v4321_v4 }
0x1649   :  { %v4310_v53 = vpop.xlane.xlu0 %4309  ;;  %v4313_v2 = vpop.xlane.xlu1 %4312 }
0x164a   :  { %10691 = vpow2.f32 %v4331_v41  ;;  %v4322_v45 = vsub.f32 %v4290_v16, %v4310_v53  ;;  %v4323_v24 = vsub.f32 %v4291_v8, %v4313_v2 }
0x164b   :  { %v12998_v32 = vpop.eup %10685  ;;  %10693 = vpow2.f32 %v4333_v14 }
0x164c   :  { %v13000_v22 = vpop.eup %10687  ;;  %v4335_v12 = vmul.f32 1.442695, %v4322_v45  ;;  %v4344_v48 = vsel %vm899_vm5, %v12998_v32, 0.0  ;;  %v4337_v14 = vmul.f32 1.442695, %v4323_v24 }
0x164d   :  { %4345 = vadd.xlane.f32.xlu0 %v4344_v48  ;;  %v4316_v63 = vpop.xlane.xlu0 %4315  ;;  %v10413_v38 = vpop.permute.xlu1 %10412  ;;  %v4341_v27 = vsel %vm899_vm5, %v13000_v22, 0.0  ;;  %v4964_v24 = vmul.f32 0.35355338, %v12984_v55  ;;  %v4966_v55 = vmul.f32 0.35355338, %v12990_v1 }
0x164e   :  { %10695 = vpow2.f32 %v4335_v12  ;;  %v4324_v4 = vsub.f32 %v4292_v44, %v4316_v63  ;;  %v10415_v41 = vunpack.i.h.bf16 %v10413_v38  ;;  %v10414_v53 = vunpack.i.l.bf16 %v10413_v38  ;;  %4342 = vadd.xlane.f32.xlu1 %v4341_v27 }
0x1650   :  { %v13006_v11 = vpop.eup %10689  ;;  %v4339_v16 = vmul.f32 1.442695, %v4324_v4  ;;  %v9744_v28 = vpack.c.bf16 %v10415_v41, %v10414_v53 }
0x1651   :  { %v4347_v2 = vsel %vm899_vm5, %v13006_v11, 0.0 }
0x1652   :  { %10697 = vpow2.f32 %v4339_v16  ;;  %4348 = vadd.xlane.f32.xlu1 %v4347_v2  ;;  %9745 = vmatprep.subr.bf16.mxu1 %v9744_v28 }
0x1653   :  { %9747 = vmatpush3.bf16.msra.mxu1 %v9744_v28  ;;  %10699 = vpow2.f32 %v4337_v14 }
0x1654   :  { %v13010_v8 = vpop.eup %10691 }
0x1655   :  { %v13012_v47 = vpop.eup %10693  ;;  %v4350_v44 = vsel %vm899_vm5, %v13010_v8, 0.0 }
0x1656   :  { %4351 = vadd.xlane.f32.xlu0 %v4350_v44  ;;  %v4353_v62 = vsel %vm899_vm5, %v13012_v47, 0.0 }
0x1657   :  { %4354 = vadd.xlane.f32.xlu1 %v4353_v62 }
0x1658   :  { %v13018_v3 = vpop.eup %10695 }
0x1659   :  { %v4356_v42 = vsel %vm899_vm5, %v13018_v3, 0.0 }
0x165a   :  { %4357 = vadd.xlane.f32.xlu0 %v4356_v42 }
0x165c   :  { %v13022_v58 = vpop.eup %10697 }
0x165d   :  { %v4362_v33 = vsel %vm899_vm5, %v13022_v58, 0.0  ;;  %v13026_v45 = vpop.eup %10699 }
0x165e   :  { %4363 = vadd.xlane.f32.xlu0 %v4362_v33  ;;  %v4359_v12 = vsel %vm899_vm5, %v13026_v45, 0.0 }
0x1662   :  { %4360 = vadd.xlane.f32.xlu0 %v4359_v12 }
0x1668   :  { %10422 = vrot.lane.b32.xlu1 %v12700_v25, %s11370_s22 }
0x166c   :  { %10427 = vrot.lane.b32.xlu1 %v12710_v35, %s11370_s22 }
0x1670   :  { %10432 = vrot.lane.b32.xlu1 %v12680_v7, %s11371_s12 }
0x1674   :  { %10437 = vrot.lane.b32.xlu1 %v12690_v21, %s11371_s12 }
0x1678   :  { %10447 = vrot.lane.b32.xlu1 %v12710_v35, %s11371_s12  ;;  %10417 = vrot.lane.b32.xlu0 %v12690_v21, %s11370_s22 }
0x167c   :  { %5357 = vrot.lane.b32.xlu1 %v12672_v50, %s11372_s8  ;;  %10442 = vrot.lane.b32.xlu0 %v12700_v25, %s11371_s12  ;;  %v4961_v50 = vmul.f32 0.35355338, %v12982_v13 }
0x1680   :  { %5361 = vrot.lane.b32.xlu1 %v12682_v57, %s11372_s8  ;;  %5355 = vrot.lane.b32.xlu0 %v12674_v18, %s11372_s8  ;;  %v4962_v57 = vmul.f32 0.35355338, %v12980_v61  ;;  %v13063_v18 = vadd.f32 %v12749_v30, %v4961_v50  ;;  %v4967_v30 = vmul.f32 0.35355338, %v12996_v49  ;;  %v4968_v49 = vmul.f32 0.35355338, %v12994_v10 }
0x1684   :  { %5365 = vrot.lane.b32.xlu1 %v12692_v26, %s11372_s8  ;;  %5359 = vrot.lane.b32.xlu0 %v12684_v15, %s11372_s8  ;;  %v4963_v26 = vmul.f32 0.35355338, %v12988_v36  ;;  %v13067_v15 = vadd.f32 %v12745_v51, %v4962_v57  ;;  %v13083_v51 = vadd.f32 %v12755_v34, %v4964_v24  ;;  %v13089_v36 = vadd.f32 %v12792_v37, %v4967_v30 }
0x1685   :  { %v13102_v37 = vadd.f32 %v12772_v40, %v4968_v49 }
0x1686   :  { %v4980_v13 = vsel %vm899_vm5, %v13067_v15, -inf  ;;  %v4986_v34 = vsel %vm899_vm5, %v13083_v51, -inf  ;;  %v4995_v1 = vsel %vm899_vm5, %v13089_v36, -inf }
0x1688   :  { %5369 = vrot.lane.b32.xlu1 %v12704_v60, %s11372_s8  ;;  %5363 = vrot.lane.b32.xlu0 %v12694_v0, %s11372_s8  ;;  %v4965_v60 = vmul.f32 0.35355338, %v12992_v43  ;;  %v13072_v0 = vadd.f32 %v12763_v19, %v4963_v26  ;;  %v13094_v43 = vadd.f32 %v12767_v5, %v4966_v55  ;;  %v4998_v5 = vsel %vm899_vm5, %v13102_v37, -inf }
0x168a   :  { %v13077_v61 = vadd.f32 %v12785_v54, %v4965_v60  ;;  %v4983_v19 = vsel %vm899_vm5, %v13072_v0, -inf  ;;  %v4992_v48 = vsel %vm899_vm5, %v13094_v43, -inf }
0x168c   :  { %5367 = vrot.lane.b32.xlu0 %v12706_v31, %s11372_s8  ;;  %v4977_v31 = vsel %vm899_vm5, %v13063_v18, -inf  ;;  %v4989_v54 = vsel %vm899_vm5, %v13077_v61, -inf }
0x16ab   :  { %4978 = vmax.xlane.f32.xlu0 %v4977_v31 }
0x16ac   :  { %4981 = vmax.xlane.f32.xlu1 %v4980_v13 }
0x16af   :  { %4984 = vmax.xlane.f32.xlu0 %v4983_v19 }
0x16b0   :  { %4990 = vmax.xlane.f32.xlu1 %v4989_v54 }
0x16b3   :  { %4987 = vmax.xlane.f32.xlu0 %v4986_v34 }
0x16b4   :  { %4996 = vmax.xlane.f32.xlu1 %v4995_v1 }
0x16b7   :  { %4993 = vmax.xlane.f32.xlu0 %v4992_v48 }
0x16bb   :  { %4999 = vmax.xlane.f32.xlu0 %v4998_v5 }
0x16c5   :  { %10452 = vrot.lane.b32.xlu1 %v12680_v7, %s11373_s20 }
0x16da   :  { %v4346_v63 = vpop.xlane.xlu0 %4345 }
0x16db   :  { %v4343_v10 = vpop.xlane.xlu1 %4342 }
0x16dc   :  { %10701 = vrcp.f32 %v4343_v10 }
0x16dd   :  { %10703 = vrcp.f32 %v4346_v63 }
0x16df   :  { %v4349_v38 = vpop.xlane.xlu1 %4348 }
0x16e0   :  { %10705 = vrcp.f32 %v4349_v38 }
0x16e3   :  { %v4352_v27 = vpop.xlane.xlu0 %4351 }
0x16e4   :  { %v4355_v4 = vpop.xlane.xlu1 %4354  ;;  %10707 = vrcp.f32 %v4352_v27 }
0x16e5   :  { %10709 = vrcp.f32 %v4355_v4 }
0x16e6   :  { %v10702_v41 = vpop.eup %10701 }
0x16e7   :  { %v4358_v40 = vpop.xlane.xlu0 %4357  ;;  %v4373_v53 = vmul.f32 %v10702_v41, %v13000_v22  ;;  %v10704_v38 = vpop.eup %10703 }
0x16e8   :  { %v10423_v14 = vpop.permute.xlu1 %10422  ;;  %10711 = vrcp.f32 %v4358_v40 }
0x16e9   :  { %9157 = vmatprep.mubr.msk.f32.mxu1 %vm899_vm5, %v4373_v53  ;;  %v10425_v50 = vunpack.i.h.bf16 %v10423_v14  ;;  %v10424_v57 = vunpack.i.l.bf16 %v10423_v14  ;;  %v4374_v53 = vmul.f32 %v10704_v38, %v12998_v32 }
0x16ea   :  { %v10706_v27 = vpop.eup %10705 }
0x16eb   :  { %v4364_v16 = vpop.xlane.xlu0 %4363  ;;  %v9752_v19 = vpack.c.bf16 %v10425_v50, %v10424_v57  ;;  %v4375_v14 = vmul.f32 %v10706_v27, %v13006_v11 }
0x16ec   :  { %v10428_v28 = vpop.permute.xlu1 %10427 }
0x16ed   :  { %v10430_v54 = vunpack.i.h.bf16 %v10428_v28  ;;  %v10429_v49 = vunpack.i.l.bf16 %v10428_v28 }
0x16ee   :  { %v10708_v40 = vpop.eup %10707 }
0x16ef   :  { %v4361_v2 = vpop.xlane.xlu0 %4360  ;;  %v9756_v5 = vpack.c.bf16 %v10430_v54, %v10429_v49  ;;  %v10710_v28 = vpop.eup %10709 }
0x16f0   :  { %v10433_v44 = vpop.permute.xlu1 %10432  ;;  %10713 = vrcp.f32 %v4361_v2  ;;  %v4377_v32 = vmul.f32 %v10710_v28, %v13012_v47 }
0x16f1   :  { %v10435_v62 = vunpack.i.h.bf16 %v10433_v44  ;;  %v10434_v42 = vunpack.i.l.bf16 %v10433_v44  ;;  %10715 = vrcp.f32 %v4364_v16  ;;  %v4376_v44 = vmul.f32 %v10708_v40, %v13010_v8 }
0x16f2   :  { %v10712_v16 = vpop.eup %10711 }
0x16f3   :  { %v9800_v33 = vpack.c.bf16 %v10435_v62, %v10434_v42  ;;  %v10418_v12 = vpop.permute.xlu0 %10417  ;;  %v4378_v11 = vmul.f32 %v10712_v16, %v13018_v3 }
0x16f4   :  { %v10420_v26 = vunpack.i.h.bf16 %v10418_v12  ;;  %v10419_v60 = vunpack.i.l.bf16 %v10418_v12  ;;  %v10438_v24 = vpop.permute.xlu1 %10437 }
0x16f5   :  { %v10440_v31 = vunpack.i.h.bf16 %v10438_v24  ;;  %v10439_v30 = vunpack.i.l.bf16 %v10438_v24  ;;  %9802 = vmatprep.subr.msk.bf16.mxu0 %vm11795_vm4, %v9800_v33 }
0x16f6   :  { %v9748_v22 = vpack.c.bf16 %v10420_v26, %v10419_v60  ;;  %9805 = vmatpush3.bf16.xpose.msk.msra.mxu0 %vm11795_vm4, %v9800_v33 }
0x16f7   :  { %v9806_v13 = vpack.c.bf16 %v10440_v31, %v10439_v30  ;;  %v10443_v55 = vpop.permute.xlu0 %10442 }
0x16f8   :  { %9749 = vmatprep.subr.bf16.mxu1 %v9748_v22  ;;  %v10445_v34 = vunpack.i.h.bf16 %v10443_v55  ;;  %v10444_v1 = vunpack.i.l.bf16 %v10443_v55  ;;  %v10448_v63 = vpop.permute.xlu1 %10447 }
0x16f9   :  { %9808 = vmatprep.subr.msk.bf16.mxu0 %vm11795_vm4, %v9806_v13  ;;  %9751 = vmatpush3.bf16.msra.mxu1 %v9748_v22  ;;  %v10450_v4 = vunpack.i.h.bf16 %v10448_v63  ;;  %v10449_v41 = vunpack.i.l.bf16 %v10448_v63 }
0x16fa   :  { %9753 = vmatprep.subr.bf16.mxu1 %v9752_v19  ;;  %v9812_v10 = vpack.c.bf16 %v10445_v34, %v10444_v1  ;;  %v10714_v62 = vpop.eup %10713 }
0x16fb   :  { %v5356_v48 = vpop.permute.xlu0 %5355  ;;  %v9818_v2 = vpack.c.bf16 %v10450_v4, %v10449_v41  ;;  %v10716_v42 = vpop.eup %10715  ;;  %v4379_v33 = vmul.f32 %v10714_v62, %v13026_v45 }
0x16fc   :  { %9283 = vmatprep.mubr.msk.f32.mxu0 %vm745_vm3, %v5356_v48  ;;  %v5358_v8 = vpop.permute.xlu1 %5357  ;;  %v4380_v47 = vmul.f32 %v10716_v42, %v13022_v58  ;;  %v8007_v42 = vld [vmem:[%s13825_s26 + $0x20] sm:$0xff] }
0x16fd   :  { %9755 = vmatpush3.bf16.msra.mxu1 %v9752_v19 }
0x16fe   :  { %9811 = vmatpush3.bf16.xpose.msk.msra.mxu0 %vm11795_vm4, %v9806_v13  ;;  %9757 = vmatprep.subr.bf16.mxu1 %v9756_v5 }
0x16ff   :  { %9814 = vmatprep.subr.msk.bf16.mxu0 %vm11795_vm4, %v9812_v10  ;;  %v5360_v12 = vpop.permute.xlu0 %5359 }
0x1700   :  { %v5362_v50 = vpop.permute.xlu1 %5361 }
0x1701   :  { %9759 = vmatpush3.bf16.msra.mxu1 %v9756_v5 }
0x1703   :  { %v5364_v3 = vpop.permute.xlu0 %5363 }
0x1704   :  { %9158 = vmatmul.mubr.msk.f32.vlgmr.msra.gmra.mrb[64].mxu1 %vm899_vm5, %v4374_v53  ;;  %v5366_v45 = vpop.permute.xlu1 %5365 }
0x1705   :  { %9160 = vmatprep.mubr.msk.f32.mxu1 %vm899_vm5, %v4375_v14 }
0x1706   :  { %9817 = vmatpush3.bf16.xpose.msk.msra.mxu0 %vm11795_vm4, %v9812_v10 }
0x1707   :  { %9820 = vmatprep.subr.msk.bf16.mxu0 %vm11795_vm4, %v9818_v2  ;;  %v5368_v57 = vpop.permute.xlu0 %5367 }
0x1708   :  { %9161 = vmatmul.mubr.msk.f32.gmra.mrb[66].mxu1 %vm899_vm5, %v4376_v44  ;;  %v5370_v9 = vpop.permute.xlu1 %5369 }
0x1709   :  { %9163 = vmatprep.mubr.msk.f32.mxu1 %vm899_vm5, %v4377_v32  ;;  %v8008_v32 = vld [vmem:[%s13825_s26 + $0x28] sm:$0xff] }
0x170a   :  { %9169 = vmatprep.subr.mxu1 %v8008_v32 }
0x170b   :  { %9170 = vmatpush3.msra.mxu1 %v8008_v32 }
0x170c   :  { %9164 = vmatmul.mubr.msk.f32.gmra.mrb[68].mxu1 %vm899_vm5, %v4378_v11  ;;  %9183 = vmatprep.subr.mxu1 %v8007_v42 }
0x170d   :  { %9166 = vmatprep.mubr.msk.f32.mxu1 %vm899_vm5, %v4379_v33 }
0x170e   :  { %9823 = vmatpush3.bf16.xpose.msk.msra.mxu0 %vm11795_vm4, %v9818_v2 }
0x1710   :  { %9167 = vmatmul.mubr.msk.f32.gmra.mrb[70].mxu1 %vm899_vm5, %v4380_v47 }
0x1715   :  { %9284 = vmatmul.mubr.msk.f32.vlgmr.msra.gmra.mrb[80].mxu0 %vm745_vm3, %v5358_v8 }
0x1716   :  { %9286 = vmatprep.mubr.msk.f32.mxu0 %vm745_vm3, %v5360_v12 }
0x1719   :  { %9287 = vmatmul.mubr.msk.f32.gmra.mrb[82].mxu0 %vm745_vm3, %v5362_v50 }
0x171a   :  { %9289 = vmatprep.mubr.msk.f32.mxu0 %vm745_vm3, %v5364_v3 }
0x171d   :  { %9290 = vmatmul.mubr.msk.f32.gmra.mrb[84].mxu0 %vm745_vm3, %v5366_v45 }
0x171e   :  { %9292 = vmatprep.mubr.msk.f32.mxu0 %vm745_vm3, %v5368_v57 }
0x1721   :  { %9293 = vmatmul.mubr.msk.f32.gmra.mrb[86].mxu0 %vm745_vm3, %v5370_v9 }
0x1738   :  { %v4979_v58 = vpop.xlane.xlu0 %4978 }
0x1739   :  { %v5001_v26 = vsub.f32 %v13063_v18, %v4979_v58  ;;  %v4982_v60 = vpop.xlane.xlu1 %4981 }
0x173a   :  { %v5002_v24 = vsub.f32 %v13067_v15, %v4982_v60 }
0x173b   :  { %v5009_v31 = vmul.f32 1.442695, %v5001_v26 }
0x173c   :  { %v5011_v30 = vmul.f32 1.442695, %v5002_v24  ;;  %v4985_v22 = vpop.xlane.xlu0 %4984 }
0x173d   :  { %10717 = vpow2.f32 %v5009_v31  ;;  %v5003_v13 = vsub.f32 %v13072_v0, %v4985_v22  ;;  %v4991_v55 = vpop.xlane.xlu1 %4990 }
0x173e   :  { %10719 = vpow2.f32 %v5011_v30  ;;  %v5005_v19 = vsub.f32 %v13077_v61, %v4991_v55 }
0x173f   :  { %v5013_v54 = vmul.f32 1.442695, %v5003_v13 }
0x1740   :  { %v5017_v49 = vmul.f32 1.442695, %v5005_v19  ;;  %v4988_v34 = vpop.xlane.xlu0 %4987 }
0x1741   :  { %10721 = vpow2.f32 %v5013_v54  ;;  %v5004_v1 = vsub.f32 %v13083_v51, %v4988_v34  ;;  %v4997_v48 = vpop.xlane.xlu1 %4996 }
0x1742   :  { %10723 = vpow2.f32 %v5017_v49  ;;  %v5007_v0 = vsub.f32 %v13089_v36, %v4997_v48 }
0x1743   :  { %v5015_v18 = vmul.f32 1.442695, %v5004_v1 }
0x1744   :  { %v4994_v15 = vpop.xlane.xlu0 %4993  ;;  %v5021_v41 = vmul.f32 1.442695, %v5007_v0 }
0x1745   :  { %10725 = vpow2.f32 %v5015_v18  ;;  %v5006_v5 = vsub.f32 %v13094_v43, %v4994_v15  ;;  %v10453_v8 = vpop.permute.xlu1 %10452 }
0x1746   :  { %v10455_v47 = vunpack.i.h.bf16 %v10453_v8  ;;  %v10454_v12 = vunpack.i.l.bf16 %v10453_v8 }
0x1747   :  { %v13156_v10 = vpop.eup %10717  ;;  %v5019_v63 = vmul.f32 1.442695, %v5006_v5  ;;  %v10833_v5 = vld [vmem:[%s13824_s11 + $0x8] sm:$0xff] }
0x1748   :  { %v13159_v38 = vpop.eup %10719  ;;  %v5000_v61 = vpop.xlane.xlu0 %4999  ;;  %v5025_v27 = vsel %vm899_vm5, %v13156_v10, 0.0  ;;  %v9784_v57 = vpack.c.bf16 %v10455_v47, %v10454_v12 }
0x1749   :  { %10727 = vpow2.f32 %v5019_v63  ;;  %v5008_v51 = vsub.f32 %v13102_v37, %v5000_v61  ;;  %5026 = vadd.xlane.f32.xlu1 %v5025_v27  ;;  %v5028_v4 = vsel %vm899_vm5, %v13159_v38, 0.0 }
0x174a   :  { %5029 = vadd.xlane.f32.xlu0 %v5028_v4 }
0x174b   :  { %v13166_v43 = vpop.eup %10721  ;;  %v5023_v36 = vmul.f32 1.442695, %v5008_v51 }
0x174c   :  { %v5031_v53 = vsel %vm899_vm5, %v13166_v43, 0.0  ;;  %v13170_v40 = vpop.eup %10723 }
0x174d   :  { %10729 = vpow2.f32 %v5023_v36  ;;  %5032 = vadd.xlane.f32.xlu1 %v5031_v53  ;;  %v5037_v28 = vsel %vm899_vm5, %v13170_v40, 0.0 }
0x174e   :  { %10731 = vpow2.f32 %v5021_v41 }
0x174f   :  { %v13172_v14 = vpop.eup %10725 }
0x1750   :  { %v5034_v37 = vsel %vm899_vm5, %v13172_v14, 0.0 }
0x1751   :  { %5035 = vadd.xlane.f32.xlu0 %v5034_v37  ;;  %5038 = vadd.xlane.f32.xlu1 %v5037_v28 }
0x1753   :  { %v13178_v2 = vpop.eup %10727 }
0x1754   :  { %v5040_v44 = vsel %vm899_vm5, %v13178_v2, 0.0 }
0x1755   :  { %5041 = vadd.xlane.f32.xlu0 %v5040_v44 }
0x1757   :  { %v13182_v16 = vpop.eup %10729 }
0x1758   :  { %v5046_v62 = vsel %vm899_vm5, %v13182_v16, 0.0  ;;  %v13187_v11 = vpop.eup %10731 }
0x1759   :  { %5047 = vadd.xlane.f32.xlu0 %v5046_v62  ;;  %v5043_v33 = vsel %vm899_vm5, %v13187_v11, 0.0  ;;  %v10836_v62 = vld [vmem:[%s13824_s11 + $0x10] sm:$0xff] }
0x175d   :  { %5044 = vadd.xlane.f32.xlu0 %v5043_v33 }
0x1762   :  { %10462 = vrot.lane.b32.xlu1 %v12700_v25, %s11373_s20 }
0x1766   :  { %10467 = vrot.lane.b32.xlu1 %v12710_v35, %s11373_s20 }
0x1773   :  { %10457 = vrot.lane.b32.xlu0 %v12690_v21, %s11373_s20 }
0x17d6   :  { %v5027_v45 = vpop.xlane.xlu1 %5026 }
0x17d7   :  { %v9159_v50 = vpop.f32.mrb[64].mxu1  ;;  %v5030_v9 = vpop.xlane.xlu0 %5029  ;;  %10733 = vrcp.f32 %v5027_v45 }
0x17d8   :  { %v4495_v3 = vpop.f32.mrb[65].mxu1  ;;  %10735 = vrcp.f32 %v5030_v9 }
0x17d9   :  { %9171 = vmatprep.mubr.msk.f32.mxu1 %vm745_vm3, %v4495_v3 }
0x17da   :  { %9172 = vmatmul.mubr.msk.f32.vlgmr.msra.gmra.mrb[72].mxu1 %vm745_vm3, %v9159_v50  ;;  %v5033_v24 = vpop.xlane.xlu1 %5032 }
0x17db   :  { %9184 = vmatpush3.msra.mxu1 %v8007_v42  ;;  %v9162_v58 = vpop.f32.mrb[66].mxu1  ;;  %10737 = vrcp.f32 %v5033_v24  ;;  %v10838_v24 = vld [vmem:[%s13824_s11 + $0x20] sm:$0xff] }
0x17dc   :  { %9785 = vmatprep.subr.bf16.mxu1 %v9784_v57  ;;  %v4505_v26 = vpop.f32.mrb[67].mxu1 }
0x17dd   :  { %9174 = vmatprep.mubr.msk.f32.mxu1 %vm745_vm3, %v4505_v26 }
0x17de   :  { %v13201_v60 = vpop.xlane.xlu0 %5035  ;;  %9175 = vmatmul.mubr.msk.f32.gmra.mrb[74].mxu1 %vm745_vm3, %v9162_v58  ;;  %v13208_v19 = vpop.xlane.xlu1 %5038 }
0x17df   :  { %v9165_v31 = vpop.f32.mrb[68].mxu1  ;;  %10739 = vrcp.f32 %v13201_v60 }
0x17e0   :  { %v4515_v30 = vpop.f32.mrb[69].mxu1  ;;  %10741 = vrcp.f32 %v13208_v19 }
0x17e1   :  { %9177 = vmatprep.mubr.msk.f32.mxu1 %vm745_vm3, %v4515_v30  ;;  %v10734_v45 = vpop.eup %10733 }
0x17e2   :  { %v13205_v22 = vpop.xlane.xlu0 %5041  ;;  %9178 = vmatmul.mubr.msk.f32.gmra.mrb[76].mxu1 %vm745_vm3, %v9165_v31  ;;  %v10463_v15 = vpop.permute.xlu1 %10462 }
0x17e3   :  { %v9168_v13 = vpop.f32.mrb[70].mxu1  ;;  %v10465_v44 = vunpack.i.h.bf16 %v10463_v15  ;;  %v10464_v32 = vunpack.i.l.bf16 %v10463_v15  ;;  %10743 = vrcp.f32 %v13205_v22 }
0x17e4   :  { %v4525_v55 = vpop.f32.mrb[71].mxu1 }
0x17e5   :  { %9180 = vmatprep.mubr.msk.f32.mxu1 %vm745_vm3, %v4525_v55  ;;  %v9792_v58 = vpack.c.bf16 %v10465_v44, %v10464_v32 }
0x17e6   :  { %v13211_v54 = vpop.xlane.xlu0 %5047  ;;  %9181 = vmatmul.mubr.msk.f32.gmra.mrb[78].mxu1 %vm745_vm3, %v9168_v13  ;;  %v10468_v8 = vpop.permute.xlu1 %10467 }
0x17e7   :  { %9185 = vmatprep.mubr.msk.f32.mxu1 %vm745_vm3, %v12950_v20  ;;  %v10834_v20 = vld [vmem:[%s13824_s11] sm:$0xff]  ;;  %v10470_v26 = vunpack.i.h.bf16 %v10468_v8  ;;  %v10469_v31 = vunpack.i.l.bf16 %v10468_v8 }
0x17e8   :  { %v9285_v49 = vpop.f32.mrb[80].mxu0 }
0x17e9   :  { %v5525_v34 = vmul.f32 0.35355338, %v9285_v49  ;;  %v5485_v1 = vpop.f32.mrb[81].mxu0  ;;  %v9796_v60 = vpack.c.bf16 %v10470_v26, %v10469_v31 }
0x17ea   :  { %v5524_v18 = vmul.f32 0.35355338, %v5485_v1  ;;  %v13216_v48 = vpop.xlane.xlu0 %5044  ;;  %9186 = vmatmul.mubr.msk.f32.vlgmr.msra.gmra.mrb[72].mxu1 %vm745_vm3, %v12948_v39  ;;  %v5057_v1 = vmul.f32 %v10734_v45, %v13156_v10 }
0x17eb   :  { %v13221_v0 = vadd.f32 %v10833_v5, %v5525_v34  ;;  %9787 = vmatpush3.bf16.msra.mxu1 %v9784_v57  ;;  %9188 = vmatprep.mubr.msk.f32.mxu1 %vm745_vm3, %v12954_v56  ;;  %v10835_v56 = vld [vmem:[%s13824_s11 + $0x18] sm:$0xff]  ;;  %v10837_v57 = vld [vmem:[%s13824_s11 + $0x28] sm:$0xff]  ;;  %v10840_v5 = vld [vmem:[%s13824_s11 + $0x30] sm:$0xff]  ;;  %10745 = vrcp.f32 %v13216_v48 }
0x17ec   :  { %v13226_v63 = vadd.f32 %v10834_v20, %v5524_v18  ;;  %v9288_v61 = vpop.f32.mrb[82].mxu0  ;;  %v10839_v18 = vld [vmem:[%s13824_s11 + $0x38] sm:$0xff]  ;;  %10747 = vrcp.f32 %v13211_v54 }
0x17ed   :  { %v5527_v27 = vmul.f32 0.35355338, %v9288_v61  ;;  %v5495_v51 = vpop.f32.mrb[83].mxu0  ;;  %v5543_v4 = vsel %vm899_vm5, %v13221_v0, -inf }
0x17ee   :  { %v5526_v39 = vmul.f32 0.35355338, %v5495_v51  ;;  %5544 = vmax.xlane.f32.xlu0 %v5543_v4  ;;  %v10458_v41 = vpop.permute.xlu0 %10457  ;;  %v5540_v36 = vsel %vm899_vm5, %v13226_v63, -inf  ;;  %9189 = vmatmul.mubr.msk.f32.gmra.mrb[74].mxu1 %vm745_vm3, %v12952_v52 }
0x17ef   :  { %v13235_v53 = vadd.f32 %v10835_v56, %v5527_v27  ;;  %v10460_v37 = vunpack.i.h.bf16 %v10458_v41  ;;  %v10459_v28 = vunpack.i.l.bf16 %v10458_v41  ;;  %5541 = vmax.xlane.f32.xlu1 %v5540_v36  ;;  %9191 = vmatprep.mubr.msk.f32.mxu1 %vm745_vm3, %v12958_v6 }
0x17f0   :  { %v13240_v42 = vadd.f32 %v10836_v62, %v5526_v39  ;;  %v9291_v33 = vpop.f32.mrb[84].mxu0 }
0x17f1   :  { %v9788_v47 = vpack.c.bf16 %v10460_v37, %v10459_v28  ;;  %v5529_v52 = vmul.f32 0.35355338, %v9291_v33  ;;  %v5505_v12 = vpop.f32.mrb[85].mxu0  ;;  %v5549_v50 = vsel %vm899_vm5, %v13235_v53, -inf }
0x17f2   :  { %v5528_v3 = vmul.f32 0.35355338, %v5505_v12  ;;  %5550 = vmax.xlane.f32.xlu0 %v5549_v50  ;;  %v5546_v6 = vsel %vm899_vm5, %v13240_v42, -inf  ;;  %9192 = vmatmul.mubr.msk.f32.gmra.mrb[76].mxu1 %vm745_vm3, %v12956_v23 }
0x17f3   :  { %v13249_v9 = vadd.f32 %v10837_v57, %v5529_v52  ;;  %5547 = vmax.xlane.f32.xlu1 %v5546_v6  ;;  %9194 = vmatprep.mubr.msk.f32.mxu1 %vm745_vm3, %v12962_v17 }
0x17f4   :  { %v13254_v30 = vadd.f32 %v10838_v24, %v5528_v3  ;;  %9789 = vmatprep.subr.bf16.mxu1 %v9788_v47  ;;  %v9294_v13 = vpop.f32.mrb[86].mxu0 }
0x17f5   :  { %v5531_v23 = vmul.f32 0.35355338, %v9294_v13  ;;  %9791 = vmatpush3.bf16.msra.mxu1 %v9788_v47  ;;  %v5515_v55 = vpop.f32.mrb[87].mxu0  ;;  %v5555_v49 = vsel %vm899_vm5, %v13249_v9, -inf }
0x17f6   :  { %v5530_v17 = vmul.f32 0.35355338, %v5515_v55  ;;  %5556 = vmax.xlane.f32.xlu0 %v5555_v49  ;;  %9793 = vmatprep.subr.bf16.mxu1 %v9792_v58  ;;  %v5552_v34 = vsel %vm899_vm5, %v13254_v30, -inf }
0x17f7   :  { %v13264_v15 = vadd.f32 %v10839_v18, %v5531_v23  ;;  %5553 = vmax.xlane.f32.xlu1 %v5552_v34  ;;  %9195 = vmatmul.mubr.msk.f32.gmra.mrb[78].mxu1 %vm745_vm3, %v12960_v46  ;;  %v10736_v46 = vpop.eup %10735 }
0x17f8   :  { %v13269_v20 = vadd.f32 %v10840_v5, %v5530_v17  ;;  %9241 = vmatprep.mubr.msk.f32.mxu1 %vm899_vm5, %v5057_v1  ;;  %v10738_v61 = vpop.eup %10737  ;;  %v5058_v27 = vmul.f32 %v10736_v46, %v13159_v38 }
0x17f9   :  { %9795 = vmatpush3.bf16.msra.mxu1 %v9792_v58  ;;  %v5561_v19 = vsel %vm899_vm5, %v13264_v15, -inf  ;;  %v10740_v22 = vpop.eup %10739  ;;  %v5059_v51 = vmul.f32 %v10738_v61, %v13166_v43 }
0x17fa   :  { %5562 = vmax.xlane.f32.xlu0 %v5561_v19  ;;  %9797 = vmatprep.subr.bf16.mxu1 %v9796_v60  ;;  %v5558_v10 = vsel %vm899_vm5, %v13269_v20, -inf  ;;  %v10742_v4 = vpop.eup %10741  ;;  %v5060_v48 = vmul.f32 %v10740_v22, %v13172_v14 }
0x17fb   :  { %5559 = vmax.xlane.f32.xlu1 %v5558_v10  ;;  %v10744_v39 = vpop.eup %10743  ;;  %v5061_v41 = vmul.f32 %v10742_v4, %v13170_v40  ;;  %v8009_v40 = vld [vmem:[%s13825_s26 + $0x30] sm:$0xff] }
0x17fc   :  { %v10746_v36 = vpop.eup %10745  ;;  %v5062_v38 = vmul.f32 %v10744_v39, %v13178_v2 }
0x17fd   :  { %9799 = vmatpush3.bf16.msra.mxu1 %v9796_v60  ;;  %v10748_v54 = vpop.eup %10747  ;;  %v5063_v43 = vmul.f32 %v10746_v36, %v13187_v11 }
0x17fe   :  { %v5064_v56 = vmul.f32 %v10748_v54, %v13182_v16  ;;  %9253 = vmatprep.subr.mxu1 %v8009_v40 }
0x1800   :  { %9242 = vmatmul.mubr.msk.f32.vlgmr.msra.gmra.mrb[80].mxu1 %vm899_vm5, %v5058_v27 }
0x1801   :  { %9244 = vmatprep.mubr.msk.f32.mxu1 %vm899_vm5, %v5059_v51  ;;  %9254 = vmatpush3.msra.mxu1 %v8009_v40 }
0x1804   :  { %9245 = vmatmul.mubr.msk.f32.gmra.mrb[82].mxu1 %vm899_vm5, %v5060_v48 }
0x1805   :  { %9247 = vmatprep.mubr.msk.f32.mxu1 %vm899_vm5, %v5061_v41 }
0x1808   :  { %9248 = vmatmul.mubr.msk.f32.gmra.mrb[84].mxu1 %vm899_vm5, %v5062_v38 }
0x1809   :  { %9250 = vmatprep.mubr.msk.f32.mxu1 %vm899_vm5, %v5063_v43 }
0x180c   :  { %10472 = vrot.lane.b32.xlu1 %v12680_v7, %s11374_s21  ;;  %9251 = vmatmul.mubr.msk.f32.gmra.mrb[86].mxu1 %vm899_vm5, %v5064_v56 }
0x187b   :  { %v5545_v14 = vpop.xlane.xlu0 %5544 }
0x187c   :  { %v5565_v2 = vsub.f32 %v13221_v0, %v5545_v14  ;;  %v5542_v37 = vpop.xlane.xlu1 %5541 }
0x187d   :  { %v5564_v11 = vsub.f32 %v13226_v63, %v5542_v37 }
0x187e   :  { %v5574_v28 = vmul.f32 1.442695, %v5565_v2 }
0x187f   :  { %v5572_v44 = vmul.f32 1.442695, %v5564_v11  ;;  %v5551_v32 = vpop.xlane.xlu0 %5550 }
0x1880   :  { %10749 = vpow2.f32 %v5574_v28  ;;  %v5567_v16 = vsub.f32 %v13235_v53, %v5551_v32  ;;  %v5548_v62 = vpop.xlane.xlu1 %5547 }
0x1881   :  { %10751 = vpow2.f32 %v5572_v44  ;;  %v5566_v7 = vsub.f32 %v13240_v42, %v5548_v62 }
0x1882   :  { %v5578_v33 = vmul.f32 1.442695, %v5567_v16 }
0x1883   :  { %v5576_v8 = vmul.f32 1.442695, %v5566_v7  ;;  %v5557_v47 = vpop.xlane.xlu0 %5556 }
0x1884   :  { %10753 = vpow2.f32 %v5578_v33  ;;  %v5569_v52 = vsub.f32 %v13249_v9, %v5557_v47  ;;  %v5554_v0 = vpop.xlane.xlu1 %5553 }
0x1885   :  { %10755 = vpow2.f32 %v5576_v8  ;;  %v5568_v63 = vsub.f32 %v13254_v30, %v5554_v0 }
0x1886   :  { %v5582_v12 = vmul.f32 1.442695, %v5569_v52 }
0x1887   :  { %v5580_v50 = vmul.f32 1.442695, %v5568_v63  ;;  %v5563_v3 = vpop.xlane.xlu0 %5562 }
0x1888   :  { %10757 = vpow2.f32 %v5582_v12  ;;  %v5571_v53 = vsub.f32 %v13264_v15, %v5563_v3  ;;  %v5560_v6 = vpop.xlane.xlu1 %5559 }
0x1889   :  { %10759 = vpow2.f32 %v5580_v50  ;;  %v5570_v42 = vsub.f32 %v13269_v20, %v5560_v6 }
0x188a   :  { %v13304_v45 = vpop.eup %10749  ;;  %v5586_v57 = vmul.f32 1.442695, %v5571_v53 }
0x188b   :  { %v10752_v58 = vpop.eup %10751  ;;  %v5584_v26 = vmul.f32 1.442695, %v5570_v42  ;;  %v5591_v9 = vsel %vm899_vm5, %v13304_v45, 0.0 }
0x188c   :  { %10761 = vpow2.f32 %v5586_v57  ;;  %5592 = vadd.xlane.f32.xlu0 %v5591_v9  ;;  %v10473_v31 = vpop.permute.xlu1 %10472  ;;  %v5588_v24 = vsel %vm899_vm5, %v10752_v58, 0.0  ;;  %v8010_v9 = vld [vmem:[%s13825_s26 + $0x38] sm:$0xff] }
0x188d   :  { %v10475_v30 = vunpack.i.h.bf16 %v10473_v31  ;;  %v10474_v13 = vunpack.i.l.bf16 %v10473_v31  ;;  %5589 = vadd.xlane.f32.xlu1 %v5588_v24  ;;  %10763 = vpow2.f32 %v5584_v26 }
0x188e   :  { %v13309_v23 = vpop.eup %10753 }
0x188f   :  { %v13311_v55 = vpop.eup %10755  ;;  %v9824_v49 = vpack.c.bf16 %v10475_v30, %v10474_v13  ;;  %v5597_v17 = vsel %vm899_vm5, %v13309_v23, 0.0 }
0x1890   :  { %5598 = vadd.xlane.f32.xlu0 %v5597_v17  ;;  %v5594_v34 = vsel %vm899_vm5, %v13311_v55, 0.0 }
0x1891   :  { %5595 = vadd.xlane.f32.xlu1 %v5594_v34  ;;  %9825 = vmatprep.subr.bf16.mxu0 %v9824_v49  ;;  %v8148_v34 = vld [vmem:[#allocation9 + $0x1] ss:$0 sm:$0xff] }
0x1892   :  { %v13317_v1 = vpop.eup %10757  ;;  %10031 = vmatprep.subr.bf16.mxu1 %v9824_v49  ;;  %9827 = vmatpush3.bf16.msra.mxu0 %v9824_v49 }
0x1893   :  { %v13319_v18 = vpop.eup %10759  ;;  %v5603_v15 = vsel %vm899_vm5, %v13317_v1, 0.0 }
0x1894   :  { %5604 = vadd.xlane.f32.xlu0 %v5603_v15  ;;  %v5600_v60 = vsel %vm899_vm5, %v13319_v18, 0.0 }
0x1895   :  { %5601 = vadd.xlane.f32.xlu1 %v5600_v60 }
0x1896   :  { %v13325_v5 = vpop.eup %10761 }
0x1897   :  { %v5609_v20 = vsel %vm899_vm5, %v13325_v5, 0.0  ;;  %v10764_v19 = vpop.eup %10763 }
0x1898   :  { %5610 = vadd.xlane.f32.xlu0 %v5609_v20  ;;  %v5606_v10 = vsel %vm899_vm5, %v10764_v19, 0.0 }
0x189c   :  { %5607 = vadd.xlane.f32.xlu0 %v5606_v10 }
0x18a6   :  { %10482 = vrot.lane.b32.xlu1 %v12700_v25, %s11374_s21 }
0x18aa   :  { %10487 = vrot.lane.b32.xlu1 %v12710_v35, %s11374_s21 }
0x18b2   :  { %10477 = vrot.lane.b32.xlu0 %v12690_v21, %s11374_s21 }
0x18d3   :  { %v9243_v46 = vpop.f32.mrb[80].mxu1 }
0x18d4   :  { %v5179_v61 = vpop.f32.mrb[81].mxu1 }
0x18d5   :  { %9255 = vmatprep.mubr.msk.f32.mxu1 %vm745_vm3, %v5179_v61 }
0x18d6   :  { %9256 = vmatmul.mubr.msk.f32.vlgmr.msra.gmra.mrb[72].mxu1 %vm745_vm3, %v9243_v46 }
0x18d7   :  { %10035 = vmatpush3.bf16.msra.mxu1 %v9824_v49  ;;  %v9246_v27 = vpop.f32.mrb[82].mxu1 }
0x18d8   :  { %v5189_v22 = vpop.f32.mrb[83].mxu1 }
0x18d9   :  { %9258 = vmatprep.mubr.msk.f32.mxu1 %vm745_vm3, %v5189_v22 }
0x18da   :  { %9259 = vmatmul.mubr.msk.f32.gmra.mrb[74].mxu1 %vm745_vm3, %v9246_v27 }
0x18db   :  { %v9249_v25 = vpop.f32.mrb[84].mxu1 }
0x18dc   :  { %v5199_v51 = vpop.f32.mrb[85].mxu1 }
0x18dd   :  { %9261 = vmatprep.mubr.msk.f32.mxu1 %vm745_vm3, %v5199_v51 }
0x18de   :  { %9262 = vmatmul.mubr.msk.f32.gmra.mrb[76].mxu1 %vm745_vm3, %v9249_v25  ;;  %v13839_v25 = vld [vmem:[#allocation66_spill] sm:$0xff] }
0x18df   :  { %v9252_v21 = vpop.f32.mrb[86].mxu1 }
0x18e0   :  { %v5209_v35 = vpop.f32.mrb[87].mxu1 }
0x18e1   :  { %9264 = vmatprep.mubr.msk.f32.mxu1 %vm745_vm3, %v5209_v35 }
0x18e2   :  { %9265 = vmatmul.mubr.msk.f32.gmra.mrb[78].mxu1 %vm745_vm3, %v9252_v21  ;;  %v13840_v21 = vld [vmem:[#allocation65_spill] sm:$0xff] }
0x1919   :  { %v5593_v4 = vpop.xlane.xlu0 %5592 }
0x191a   :  { %v5590_v48 = vpop.xlane.xlu1 %5589 }
0x191b   :  { %10765 = vrcp.f32 %v5590_v48 }
0x191d   :  { %v5599_v39 = vpop.xlane.xlu0 %5598 }
0x191e   :  { %v5596_v41 = vpop.xlane.xlu1 %5595 }
0x1921   :  { %v5605_v36 = vpop.xlane.xlu0 %5604 }
0x1922   :  { %v5602_v38 = vpop.xlane.xlu1 %5601 }
0x1925   :  { %v10766_v54 = vpop.eup %10765  ;;  %v5611_v43 = vpop.xlane.xlu0 %5610 }
0x1926   :  { %v5620_v56 = vmul.f32 %v10766_v54, %v10752_v58  ;;  %v10483_v40 = vpop.permute.xlu1 %10482  ;;  %v13842_v54 = vld [vmem:[#allocation67_spill] sm:$0xff] }
0x1927   :  { %v10485_v37 = vunpack.i.h.bf16 %v10483_v40  ;;  %v10484_v11 = vunpack.i.l.bf16 %v10483_v40 }
0x1928   :  { %9311 = vmatprep.mubr.msk.f32.mxu0 %vm899_vm5, %v5620_v56 }
0x1929   :  { %v5608_v14 = vpop.xlane.xlu0 %5607  ;;  %v9832_v62 = vpack.c.bf16 %v10485_v37, %v10484_v11 }
0x192a   :  { %10767 = vrcp.f32 %v5608_v14  ;;  %v10488_v32 = vpop.permute.xlu1 %10487 }
0x192b   :  { %10769 = vrcp.f32 %v5593_v4  ;;  %v10490_v7 = vunpack.i.h.bf16 %v10488_v32  ;;  %v10489_v33 = vunpack.i.l.bf16 %v10488_v32  ;;  %v13844_v32 = vld [vmem:[#allocation69_spill] sm:$0xff] }
0x192c   :  { %10771 = vrcp.f32 %v5611_v43 }
0x192d   :  { %v10478_v2 = vpop.permute.xlu0 %10477  ;;  %10773 = vrcp.f32 %v5596_v41  ;;  %v9836_v52 = vpack.c.bf16 %v10490_v7, %v10489_v33 }
0x192e   :  { %v10480_v28 = vunpack.i.h.bf16 %v10478_v2  ;;  %v10479_v44 = vunpack.i.l.bf16 %v10478_v2  ;;  %10775 = vrcp.f32 %v5599_v39 }
0x192f   :  { %10777 = vrcp.f32 %v5602_v38 }
0x1930   :  { %v9828_v16 = vpack.c.bf16 %v10480_v28, %v10479_v44  ;;  %10779 = vrcp.f32 %v5605_v36  ;;  %v13841_v36 = vld [vmem:[#allocation68_spill] sm:$0xff]  ;;  %v13843_v28 = vld [vmem:[#allocation70_spill] sm:$0xff] }
0x1932   :  { %9829 = vmatprep.subr.bf16.mxu0 %v9828_v16  ;;  %10032 = vmatprep.subr.bf16.mxu1 %v9828_v16 }
0x1933   :  { %9831 = vmatpush3.bf16.msra.mxu0 %v9828_v16  ;;  %10036 = vmatpush3.bf16.msra.mxu1 %v9828_v16 }
0x1934   :  { %v10768_v8 = vpop.eup %10767  ;;  %9833 = vmatprep.subr.bf16.mxu0 %v9832_v62  ;;  %10033 = vmatprep.subr.bf16.mxu1 %v9832_v62 }
0x1935   :  { %v5626_v47 = vmul.f32 %v10768_v8, %v10764_v19  ;;  %v10770_v0 = vpop.eup %10769 }
0x1936   :  { %v10772_v63 = vpop.eup %10771  ;;  %v5621_v50 = vmul.f32 %v10770_v0, %v13304_v45 }
0x1937   :  { %9835 = vmatpush3.bf16.msra.mxu0 %v9832_v62  ;;  %10037 = vmatpush3.bf16.msra.mxu1 %v9832_v62  ;;  %v10774_v12 = vpop.eup %10773  ;;  %v5627_v3 = vmul.f32 %v10772_v63, %v13325_v5 }
0x1938   :  { %9320 = vmatprep.mubr.msk.f32.mxu1 %vm899_vm5, %v5626_v47  ;;  %9837 = vmatprep.subr.bf16.mxu0 %v9836_v52  ;;  %v10776_v53 = vpop.eup %10775  ;;  %v5622_v6 = vmul.f32 %v10774_v12, %v13311_v55 }
0x1939   :  { %10034 = vmatprep.subr.bf16.mxu1 %v9836_v52  ;;  %v10778_v42 = vpop.eup %10777  ;;  %v5623_v57 = vmul.f32 %v10776_v53, %v13309_v23 }
0x193a   :  { %v10780_v58 = vpop.eup %10779  ;;  %v5624_v26 = vmul.f32 %v10778_v42, %v13319_v18 }
0x193b   :  { %9839 = vmatpush3.bf16.msra.mxu0 %v9836_v52  ;;  %10038 = vmatpush3.bf16.msra.mxu1 %v9836_v52  ;;  %v5625_v45 = vmul.f32 %v10780_v58, %v13317_v1 }
0x193c   :  { %9323 = vmatprep.subr.mxu1 %v8010_v9 }
0x193e   :  { %9312 = vmatmul.mubr.msk.f32.vlgmr.msra.gmra.mrb[88].mxu0 %vm899_vm5, %v5621_v50  ;;  %9321 = vmatmul.mubr.msk.f32.vlgmr.msra.gmra.mrb[88].mxu1 %vm899_vm5, %v5627_v3 }
0x193f   :  { %9314 = vmatprep.mubr.msk.f32.mxu0 %vm899_vm5, %v5622_v6  ;;  %9324 = vmatpush3.msra.mxu1 %v8010_v9 }
0x1942   :  { %9315 = vmatmul.mubr.msk.f32.gmra.mrb[90].mxu0 %vm899_vm5, %v5623_v57 }
0x1943   :  { %9317 = vmatprep.mubr.msk.f32.mxu0 %vm899_vm5, %v5624_v26 }
0x1946   :  { %9318 = vmatmul.mubr.msk.f32.gmra.mrb[92].mxu0 %vm899_vm5, %v5625_v45 }
0x1a11   :  { %v9313_v31 = vpop.f32.mrb[88].mxu0  ;;  %v9322_v24 = vpop.f32.mrb[88].mxu1 }
0x1a12   :  { %v5742_v30 = vpop.f32.mrb[89].mxu0  ;;  %v5772_v13 = vpop.f32.mrb[89].mxu1 }
0x1a13   :  { %9325 = vmatprep.mubr.msk.f32.mxu1 %vm745_vm3, %v5742_v30 }
0x1a14   :  { %9326 = vmatmul.mubr.msk.f32.vlgmr.msra.gmra.mrb[72].mxu1 %vm745_vm3, %v9313_v31 }
0x1a15   :  { %v9316_v23 = vpop.f32.mrb[90].mxu0 }
0x1a16   :  { %v5752_v55 = vpop.f32.mrb[91].mxu0 }
0x1a17   :  { %9328 = vmatprep.mubr.msk.f32.mxu1 %vm745_vm3, %v5752_v55 }
0x1a18   :  { %9329 = vmatmul.mubr.msk.f32.gmra.mrb[74].mxu1 %vm745_vm3, %v9316_v23 }
0x1a19   :  { %v9319_v49 = vpop.f32.mrb[92].mxu0 }
0x1a1a   :  { %v5762_v17 = vpop.f32.mrb[93].mxu0 }
0x1a1b   :  { %9331 = vmatprep.mubr.msk.f32.mxu1 %vm745_vm3, %v5762_v17 }
0x1a1c   :  { %9332 = vmatmul.mubr.msk.f32.gmra.mrb[76].mxu1 %vm745_vm3, %v9319_v49 }
0x1a1d   :  { %9334 = vmatprep.mubr.msk.f32.mxu1 %vm745_vm3, %v5772_v13 }
0x1a20   :  { %9335 = vmatmul.mubr.msk.f32.gmra.mrb[78].mxu1 %vm745_vm3, %v9322_v24 }
0x1ae7   :  { %v9327_v1 = vpop.f32.mrb[72].mxu1 }
0x1ae8   :  { %v5927_v18 = vadd.f32 %v9327_v1, %v8148_v34  ;;  %v5871_v15 = vpop.f32.mrb[73].mxu1 }
0x1ae9   :  { %v5926_v60 = vadd.f32 %v8148_v34, %v5871_v15 }
0x1aea   :  { %v5935_v5 = vadd.f32 %v5927_v18, %v12638_v29 }
0x1aeb   :  { %v5934_v20 = vadd.f32 %v5926_v60, %v12635_v59  ;;  %v9330_v19 = vpop.f32.mrb[74].mxu1 }
0x1aec   :  { %v5929_v10 = vadd.f32 %v9330_v19, %v8148_v34  ;;  %v5881_v46 = vpop.f32.mrb[75].mxu1  ;;  %v5949_v61 = vsel %vm591_vm2, %v5935_v5, 0.0 }
0x1aed   :  { %v5928_v27 = vadd.f32 %v8148_v34, %v5881_v46  ;;  %5950 = vadd.xlane.f32.xlu0 %v5949_v61  ;;  %v5946_v22 = vsel %vm591_vm2, %v5934_v20, 0.0 }
0x1aee   :  { %v5937_v51 = vadd.f32 %v5929_v10, %v13839_v25  ;;  %5947 = vadd.xlane.f32.xlu1 %v5946_v22 }
0x1aef   :  { %v5936_v35 = vadd.f32 %v5928_v27, %v13840_v21  ;;  %v9333_v4 = vpop.f32.mrb[76].mxu1  ;;  %v6079_v21 = vld [vmem:[#allocation17 + $0x20] sm:$0xff] }
0x1af0   :  { %v5931_v48 = vadd.f32 %v9333_v4, %v8148_v34  ;;  %v5891_v39 = vpop.f32.mrb[77].mxu1  ;;  %v5955_v29 = vsel %vm591_vm2, %v5937_v51, 0.0 }
0x1af1   :  { %v5930_v59 = vadd.f32 %v8148_v34, %v5891_v39  ;;  %5956 = vadd.xlane.f32.xlu0 %v5955_v29  ;;  %v5952_v41 = vsel %vm591_vm2, %v5936_v35, 0.0  ;;  %v6082_v39 = vld [vmem:[#allocation17 + $0x38] sm:$0xff] }
0x1af2   :  { %v5939_v38 = vadd.f32 %v5931_v48, %v13841_v36  ;;  %5953 = vadd.xlane.f32.xlu1 %v5952_v41  ;;  %v6081_v48 = vld [vmem:[#allocation17 + $0x30] sm:$0xff] }
0x1af3   :  { %v5938_v43 = vadd.f32 %v5930_v59, %v13842_v54  ;;  %v9336_v56 = vpop.f32.mrb[78].mxu1  ;;  %v9844_v29 = vpack.c.bf16 %v6082_v39, %v6081_v48  ;;  %v8160_v59 = vld [vmem:[%s13832_s28 + $0x40] sm:$0xff]  ;;  %v8161_v41 = vld [vmem:[%s13832_s28 + $0x48] sm:$0xff] }
0x1af4   :  { %v5933_v40 = vadd.f32 %v9336_v56, %v8148_v34  ;;  %v5901_v14 = vpop.f32.mrb[79].mxu1  ;;  %v5961_v2 = vsel %vm591_vm2, %v5939_v38, 0.0  ;;  %v9848_v36 = vpack.c.bf16 %v8161_v41, %v8160_v59 }
0x1af5   :  { %v5932_v37 = vadd.f32 %v8148_v34, %v5901_v14  ;;  %5962 = vadd.xlane.f32.xlu0 %v5961_v2  ;;  %v5958_v11 = vsel %vm591_vm2, %v5938_v43, 0.0 }
0x1af6   :  { %v5941_v44 = vadd.f32 %v5933_v40, %v13843_v28  ;;  %5959 = vadd.xlane.f32.xlu1 %v5958_v11 }
0x1af7   :  { %v5940_v16 = vadd.f32 %v5932_v37, %v13844_v32 }
0x1af8   :  { %v5967_v62 = vsel %vm591_vm2, %v5941_v44, 0.0 }
0x1af9   :  { %5968 = vadd.xlane.f32.xlu0 %v5967_v62  ;;  %v5964_v7 = vsel %vm591_vm2, %v5940_v16, 0.0 }
0x1afa   :  { %5965 = vadd.xlane.f32.xlu1 %v5964_v7 }
0x1b7a   :  { %v5951_v33 = vpop.xlane.xlu0 %5950 }
0x1b7b   :  { %v5971_v8 = vmul.f32 0.03125, %v5951_v33  ;;  %v5948_v47 = vpop.xlane.xlu1 %5947 }
0x1b7c   :  { %v5970_v52 = vmul.f32 0.03125, %v5948_v47 }
0x1b7d   :  { %v13383_v0 = vsub.f32 %v5935_v5, %v5971_v8 }
0x1b7e   :  { %v13385_v63 = vsub.f32 %v5934_v20, %v5970_v52  ;;  %v5957_v12 = vpop.xlane.xlu0 %5956 }
0x1b7f   :  { %v5973_v50 = vmul.f32 0.03125, %v5957_v12  ;;  %v5954_v3 = vpop.xlane.xlu1 %5953  ;;  %v5987_v53 = vmul.f32 %v13383_v0, %v13383_v0 }
0x1b80   :  { %v5972_v6 = vmul.f32 0.03125, %v5954_v3  ;;  %v5986_v42 = vmul.f32 %v13385_v63, %v13385_v63 }
0x1b81   :  { %v13391_v57 = vsub.f32 %v5937_v51, %v5973_v50  ;;  %v5997_v58 = vsel %vm591_vm2, %v5987_v53, 0.0 }
0x1b82   :  { %v13394_v26 = vsub.f32 %v5936_v35, %v5972_v6  ;;  %v5963_v45 = vpop.xlane.xlu0 %5962  ;;  %5998 = vadd.xlane.f32.xlu0 %v5997_v58  ;;  %v5994_v9 = vsel %vm591_vm2, %v5986_v42, 0.0  ;;  %v6080_v35 = vld [vmem:[#allocation17 + $0x28] sm:$0xff]  ;;  %v8149_v6 = vld [vmem:[#allocation11 + $0x1] ss:$0 sm:$0xff] }
0x1b83   :  { %v5975_v31 = vmul.f32 0.03125, %v5963_v45  ;;  %v5960_v24 = vpop.xlane.xlu1 %5959  ;;  %5995 = vadd.xlane.f32.xlu1 %v5994_v9  ;;  %v5989_v30 = vmul.f32 %v13391_v57, %v13391_v57  ;;  %v9840_v4 = vpack.c.bf16 %v6080_v35, %v6079_v21 }
0x1b84   :  { %v5974_v13 = vmul.f32 0.03125, %v5960_v24  ;;  %v5988_v23 = vmul.f32 %v13394_v26, %v13394_v26  ;;  %v8150_v24 = vld [vmem:[#allocation12 + $0x1] ss:$0 sm:$0xff] }
0x1b85   :  { %v13401_v55 = vsub.f32 %v5939_v38, %v5975_v31  ;;  %v6003_v49 = vsel %vm591_vm2, %v5989_v30, 0.0  ;;  %9841 = vmatprep.subr.bf16.mxu0 %v9840_v4 }
0x1b86   :  { %v13404_v17 = vsub.f32 %v5938_v43, %v5974_v13  ;;  %6004 = vadd.xlane.f32.xlu0 %v6003_v49  ;;  %v5969_v34 = vpop.xlane.xlu0 %5968  ;;  %v6000_v1 = vsel %vm591_vm2, %v5988_v23, 0.0  ;;  %9843 = vmatpush3.bf16.msra.mxu0 %v9840_v4  ;;  %v8162_v49 = vld [vmem:[%s13832_s28 + $0x50] sm:$0xff] }
0x1b87   :  { %v5977_v18 = vmul.f32 0.03125, %v5969_v34  ;;  %6001 = vadd.xlane.f32.xlu1 %v6000_v1  ;;  %v5966_v15 = vpop.xlane.xlu1 %5965  ;;  %v5991_v60 = vmul.f32 %v13401_v55, %v13401_v55  ;;  %9845 = vmatprep.subr.bf16.mxu0 %v9844_v29  ;;  %v8163_v34 = vld [vmem:[%s13832_s28 + $0x58] sm:$0xff] }
0x1b88   :  { %v5976_v5 = vmul.f32 0.03125, %v5966_v15  ;;  %v5990_v20 = vmul.f32 %v13404_v17, %v13404_v17 }
0x1b89   :  { %v13411_v19 = vsub.f32 %v5941_v44, %v5977_v18  ;;  %v6009_v10 = vsel %vm591_vm2, %v5991_v60, 0.0 }
0x1b8a   :  { %v13414_v46 = vsub.f32 %v5940_v16, %v5976_v5  ;;  %6010 = vadd.xlane.f32.xlu0 %v6009_v10  ;;  %v6006_v61 = vsel %vm591_vm2, %v5990_v20, 0.0  ;;  %9847 = vmatpush3.bf16.msra.mxu0 %v9844_v29 }
0x1b8b   :  { %6007 = vadd.xlane.f32.xlu1 %v6006_v61  ;;  %v5993_v27 = vmul.f32 %v13411_v19, %v13411_v19  ;;  %9849 = vmatprep.subr.bf16.mxu0 %v9848_v36  ;;  %v8164_v61 = vld [vmem:[%s13832_s28 + $0x60] sm:$0xff] }
0x1b8c   :  { %v5992_v22 = vmul.f32 %v13414_v46, %v13414_v46 }
0x1b8d   :  { %v6015_v25 = vsel %vm591_vm2, %v5993_v27, 0.0  ;;  %v8165_v27 = vld [vmem:[%s13832_s28 + $0x68] sm:$0xff] }
0x1b8e   :  { %6016 = vadd.xlane.f32.xlu0 %v6015_v25  ;;  %v6012_v51 = vsel %vm591_vm2, %v5992_v22, 0.0  ;;  %v9856_v35 = vpack.c.bf16 %v8165_v27, %v8164_v61 }
0x1b8f   :  { %6013 = vadd.xlane.f32.xlu1 %v6012_v51 }
0x1c0f   :  { %v5999_v38 = vpop.xlane.xlu0 %5998 }
0x1c10   :  { %v6019_v54 = vmul.f32 0.03125, %v5999_v38  ;;  %v5996_v43 = vpop.xlane.xlu1 %5995 }
0x1c11   :  { %v6018_v56 = vmul.f32 0.03125, %v5996_v43 }
0x1c12   :  { %v6027_v40 = vadd.f32 1e-05, %v6019_v54  ;;  %v8167_v54 = vld [vmem:[%s13832_s28 + $0x78] sm:$0xff] }
0x1c13   :  { %v6026_v14 = vadd.f32 1e-05, %v6018_v56  ;;  %v6005_v2 = vpop.xlane.xlu0 %6004  ;;  %v8151_v56 = vld [vmem:[#allocation18 + $0x1] ss:$0 sm:$0xff] }
0x1c14   :  { %10781 = vrsqrt.f32 %v6027_v40  ;;  %v6021_v37 = vmul.f32 0.03125, %v6005_v2  ;;  %v6002_v11 = vpop.xlane.xlu1 %6001 }
0x1c15   :  { %10783 = vrsqrt.f32 %v6026_v14  ;;  %v6020_v28 = vmul.f32 0.03125, %v6002_v11 }
0x1c16   :  { %v6029_v44 = vadd.f32 1e-05, %v6021_v37 }
0x1c17   :  { %v6028_v32 = vadd.f32 1e-05, %v6020_v28  ;;  %v6011_v16 = vpop.xlane.xlu0 %6010 }
0x1c18   :  { %10785 = vrsqrt.f32 %v6029_v44  ;;  %v6023_v62 = vmul.f32 0.03125, %v6011_v16  ;;  %v6008_v7 = vpop.xlane.xlu1 %6007 }
0x1c19   :  { %10787 = vrsqrt.f32 %v6028_v32  ;;  %v6022_v33 = vmul.f32 0.03125, %v6008_v7 }
0x1c1a   :  { %v6031_v8 = vadd.f32 1e-05, %v6023_v62 }
0x1c1b   :  { %v6030_v47 = vadd.f32 1e-05, %v6022_v33  ;;  %v6017_v52 = vpop.xlane.xlu0 %6016 }
0x1c1c   :  { %10789 = vrsqrt.f32 %v6031_v8  ;;  %v6025_v12 = vmul.f32 0.03125, %v6017_v52  ;;  %v6014_v50 = vpop.xlane.xlu1 %6013 }
0x1c1d   :  { %10791 = vrsqrt.f32 %v6030_v47  ;;  %v6024_v3 = vmul.f32 0.03125, %v6014_v50 }
0x1c1e   :  { %v10782_v53 = vpop.eup %10781  ;;  %v6033_v42 = vadd.f32 1e-05, %v6025_v12 }
0x1c1f   :  { %v10784_v58 = vpop.eup %10783  ;;  %v6043_v45 = vmul.f32 %v10782_v53, %v13383_v0  ;;  %v6032_v9 = vadd.f32 1e-05, %v6024_v3 }
0x1c20   :  { %10793 = vrsqrt.f32 %v6033_v42  ;;  %v6042_v31 = vmul.f32 %v10784_v58, %v13385_v63  ;;  %v9852_v63 = vpack.c.bf16 %v8163_v34, %v8162_v49 }
0x1c21   :  { %v6057_v30 = vmul.f32 %v8149_v6, %v6043_v45  ;;  %10795 = vrsqrt.f32 %v6032_v9 }
0x1c22   :  { %v10786_v13 = vpop.eup %10785  ;;  %v6056_v23 = vmul.f32 %v8149_v6, %v6042_v31  ;;  %v8168_v31 = vld [vmem:[#allocation20 + $0x1] ss:$0 sm:$0xff] }
0x1c23   :  { %v10788_v1 = vpop.eup %10787  ;;  %v6045_v18 = vmul.f32 %v10786_v13, %v13391_v57  ;;  %v13433_v60 = vadd.f32 %v8150_v24, %v6057_v30 }
0x1c24   :  { %v13430_v15 = vadd.f32 %v8150_v24, %v6056_v23  ;;  %v6044_v0 = vmul.f32 %v10788_v1, %v13394_v26 }
0x1c25   :  { %v6059_v5 = vmul.f32 %v8149_v6, %v6045_v18 }
0x1c26   :  { %v10790_v20 = vpop.eup %10789  ;;  %9345 = vmatprep.mubr.msk.f32.mxu0 %vm591_vm2, %v13430_v15  ;;  %v6058_v10 = vmul.f32 %v8149_v6, %v6044_v0 }
0x1c27   :  { %v10792_v22 = vpop.eup %10791  ;;  %9346 = vmatmul.mubr.msk.f32.vlgmr.msra.gmra.mrb[94].mxu0 %vm591_vm2, %v13433_v60  ;;  %v6047_v57 = vmul.f32 %v10790_v20, %v13401_v55  ;;  %v13445_v51 = vadd.f32 %v8150_v24, %v6059_v5 }
0x1c28   :  { %v13442_v25 = vadd.f32 %v8150_v24, %v6058_v10  ;;  %v6046_v26 = vmul.f32 %v10792_v22, %v13404_v17  ;;  %9851 = vmatpush3.bf16.msra.mxu0 %v9848_v36 }
0x1c29   :  { %v6061_v21 = vmul.f32 %v8149_v6, %v6047_v57  ;;  %9853 = vmatprep.subr.bf16.mxu0 %v9852_v63 }
0x1c2a   :  { %v10794_v4 = vpop.eup %10793  ;;  %9348 = vmatprep.mubr.msk.f32.mxu0 %vm591_vm2, %v13442_v25  ;;  %v6060_v48 = vmul.f32 %v8149_v6, %v6046_v26 }
0x1c2b   :  { %v10796_v39 = vpop.eup %10795  ;;  %9349 = vmatmul.mubr.msk.f32.gmra.mrb[96].mxu0 %vm591_vm2, %v13445_v51  ;;  %v6049_v55 = vmul.f32 %v10794_v4, %v13411_v19  ;;  %v13455_v59 = vadd.f32 %v8150_v24, %v6061_v21 }
0x1c2c   :  { %v13452_v17 = vadd.f32 %v8150_v24, %v6060_v48  ;;  %v6048_v29 = vmul.f32 %v10796_v39, %v13414_v46  ;;  %9855 = vmatpush3.bf16.msra.mxu0 %v9852_v63  ;;  %v8166_v46 = vld [vmem:[%s13832_s28 + $0x70] sm:$0xff] }
0x1c2d   :  { %v6063_v41 = vmul.f32 %v8149_v6, %v6049_v55  ;;  %9857 = vmatprep.subr.bf16.mxu0 %v9856_v35  ;;  %v9860_v43 = vpack.c.bf16 %v8167_v54, %v8166_v46 }
0x1c2e   :  { %9351 = vmatprep.mubr.msk.f32.mxu0 %vm591_vm2, %v13452_v17  ;;  %v6062_v36 = vmul.f32 %v8149_v6, %v6048_v29 }
0x1c2f   :  { %9352 = vmatmul.mubr.msk.f32.gmra.mrb[98].mxu0 %vm591_vm2, %v13455_v59  ;;  %v13463_v19 = vadd.f32 %v8150_v24, %v6063_v41 }
0x1c30   :  { %v13461_v38 = vadd.f32 %v8150_v24, %v6062_v36  ;;  %9859 = vmatpush3.bf16.msra.mxu0 %v9856_v35 }
0x1c31   :  { %9861 = vmatprep.subr.bf16.mxu0 %v9860_v43 }
0x1c32   :  { %9354 = vmatprep.mubr.msk.f32.mxu0 %vm591_vm2, %v13461_v38 }
0x1c33   :  { %9355 = vmatmul.mubr.msk.f32.gmra.mrb[100].mxu0 %vm591_vm2, %v13463_v19 }
0x1c34   :  { %9863 = vmatpush3.bf16.msra.mxu0 %v9860_v43 }
0x1cfa   :  { %v9347_v40 = vpop.f32.mrb[94].mxu0 }
0x1cfb   :  { %v6187_v14 = vadd.f32 %v9347_v40, %v8151_v56  ;;  %v6181_v2 = vpop.f32.mrb[95].mxu0 }
0x1cfc   :  { %v6182_v37 = vadd.f32 %v8151_v56, %v6181_v2 }
0x1cfd   :  { %v6221_v44 = vmax.f32 %v6187_v14, 0.0 }
0x1cfe   :  { %v6220_v11 = vmax.f32 %v6182_v37, 0.0  ;;  %v9350_v28 = vpop.f32.mrb[96].mxu0 }
0x1cff   :  { %v6197_v32 = vadd.f32 %v9350_v28, %v8151_v56  ;;  %v6191_v16 = vpop.f32.mrb[97].mxu0 }
0x1d00   :  { %v6192_v62 = vadd.f32 %v8151_v56, %v6191_v16  ;;  %9373 = vmatprep.mubr.msk.f32.mxu0 %vm899_vm5, %v6220_v11 }
0x1d01   :  { %9374 = vmatmul.mubr.msk.f32.vlgmr.msra.gmra.mrb[102].mxu0 %vm899_vm5, %v6221_v44  ;;  %v6223_v8 = vmax.f32 %v6197_v32, 0.0 }
0x1d02   :  { %v6222_v7 = vmax.f32 %v6192_v62, 0.0  ;;  %v9353_v33 = vpop.f32.mrb[98].mxu0 }
0x1d03   :  { %v6207_v47 = vadd.f32 %v9353_v33, %v8151_v56  ;;  %v6201_v52 = vpop.f32.mrb[99].mxu0 }
0x1d04   :  { %v6202_v12 = vadd.f32 %v8151_v56, %v6201_v52  ;;  %9376 = vmatprep.mubr.msk.f32.mxu0 %vm899_vm5, %v6222_v7 }
0x1d05   :  { %9377 = vmatmul.mubr.msk.f32.gmra.mrb[104].mxu0 %vm899_vm5, %v6223_v8  ;;  %v6225_v53 = vmax.f32 %v6207_v47, 0.0 }
0x1d06   :  { %v6224_v50 = vmax.f32 %v6202_v12, 0.0  ;;  %v9356_v3 = vpop.f32.mrb[100].mxu0 }
0x1d07   :  { %v6217_v6 = vadd.f32 %v9356_v3, %v8151_v56  ;;  %v6211_v42 = vpop.f32.mrb[101].mxu0 }
0x1d08   :  { %v6212_v58 = vadd.f32 %v8151_v56, %v6211_v42  ;;  %9379 = vmatprep.mubr.msk.f32.mxu0 %vm899_vm5, %v6224_v50 }
0x1d09   :  { %9380 = vmatmul.mubr.msk.f32.gmra.mrb[106].mxu0 %vm899_vm5, %v6225_v53  ;;  %v6227_v9 = vmax.f32 %v6217_v6, 0.0 }
0x1d0a   :  { %v6226_v45 = vmax.f32 %v6212_v58, 0.0 }
0x1d0c   :  { %9382 = vmatprep.mubr.msk.f32.mxu0 %vm899_vm5, %v6226_v45 }
0x1d0d   :  { %9383 = vmatmul.mubr.msk.f32.gmra.mrb[108].mxu0 %vm899_vm5, %v6227_v9 }
0x1dd4   :  { %v9375_v24 = vpop.f32.mrb[102].mxu0 }
0x1dd5   :  { %v6341_v30 = vadd.f32 %v9375_v24, %v8168_v31  ;;  %v6335_v13 = vpop.f32.mrb[103].mxu0 }
0x1dd6   :  { %v6336_v23 = vadd.f32 %v8168_v31, %v6335_v13 }
0x1dd7   :  { %v6375_v49 = vadd.f32 %v6341_v30, %v13433_v60 }
0x1dd8   :  { %v6374_v34 = vadd.f32 %v6336_v23, %v13430_v15  ;;  %v9378_v1 = vpop.f32.mrb[104].mxu0 }
0x1dd9   :  { %v6351_v18 = vadd.f32 %v9378_v1, %v8168_v31  ;;  %v6345_v0 = vpop.f32.mrb[105].mxu0  ;;  %v6389_v5 = vsel %vm591_vm2, %v6375_v49, 0.0 }
0x1dda   :  { %v6346_v63 = vadd.f32 %v8168_v31, %v6345_v0  ;;  %6390 = vadd.xlane.f32.xlu0 %v6389_v5  ;;  %v6386_v20 = vsel %vm591_vm2, %v6374_v34, 0.0  ;;  %v6518_v5 = vld [vmem:[%s13845_s2] sm:$0xf] }
0x1ddb   :  { %v6377_v10 = vadd.f32 %v6351_v18, %v13445_v51  ;;  %6387 = vadd.xlane.f32.xlu1 %v6386_v20  ;;  %vm6519_vm6 = vcmp.gt.s32.totalorder %v6518_v5, 1  ;;  %v6959_v20 = vld [vmem:[%s13846_s17 + $0x8] sm:$0xf] }
0x1ddc   :  { %v6376_v61 = vadd.f32 %v6346_v63, %v13442_v25  ;;  %v9381_v27 = vpop.f32.mrb[106].mxu0  ;;  %v6520_v63 = vsel %vm6519_vm6, %v6518_v5, 1 }
0x1ddd   :  { %v6361_v22 = vadd.f32 %v9381_v27, %v8168_v31  ;;  %v6355_v57 = vpop.f32.mrb[107].mxu0  ;;  %v6395_v60 = vsel %vm591_vm2, %v6377_v10, 0.0 }
0x1dde   :  { %v6356_v15 = vadd.f32 %v8168_v31, %v6355_v57  ;;  %6396 = vadd.xlane.f32.xlu0 %v6395_v60  ;;  %v6392_v26 = vsel %vm591_vm2, %v6376_v61, 0.0 }
0x1ddf   :  { %v6379_v21 = vadd.f32 %v6361_v22, %v13455_v59  ;;  %6393 = vadd.xlane.f32.xlu1 %v6392_v26 }
0x1de0   :  { %v6378_v35 = vadd.f32 %v6356_v15, %v13452_v17  ;;  %v9384_v4 = vpop.f32.mrb[108].mxu0  ;;  %v11375_v17 = vmov 0  }
0x1de1   :  { %v6371_v48 = vadd.f32 %v9384_v4, %v8168_v31  ;;  %v6365_v51 = vpop.f32.mrb[109].mxu0  ;;  %v6401_v39 = vsel %vm591_vm2, %v6379_v21, 0.0  ;;  %10491 = vset.pattern.permute.xlu1 %v11375_v17  ;;  %10492 = vset.pattern.permute.xlu0 %v11375_v17 }
0x1de2   :  { %v6366_v25 = vadd.f32 %v8168_v31, %v6365_v51  ;;  %6402 = vadd.xlane.f32.xlu0 %v6401_v39  ;;  %v6398_v55 = vsel %vm591_vm2, %v6378_v35, 0.0 }
0x1de3   :  { %v6381_v29 = vadd.f32 %v6371_v48, %v13463_v19  ;;  %6399 = vadd.xlane.f32.xlu1 %v6398_v55 }
0x1de4   :  { %v6380_v41 = vadd.f32 %v6366_v25, %v13461_v38 }
0x1de5   :  { %v6407_v36 = vsel %vm591_vm2, %v6381_v29, 0.0 }
0x1de6   :  { %6408 = vadd.xlane.f32.xlu0 %v6407_v36  ;;  %v6404_v59 = vsel %vm591_vm2, %v6380_v41, 0.0 }
0x1de7   :  { %6405 = vadd.xlane.f32.xlu1 %v6404_v59 }
0x1e67   :  { %v6391_v46 = vpop.xlane.xlu0 %6390 }
0x1e68   :  { %v6411_v54 = vmul.f32 0.03125, %v6391_v46  ;;  %v6388_v43 = vpop.xlane.xlu1 %6387 }
0x1e69   :  { %v6410_v56 = vmul.f32 0.03125, %v6388_v43 }
0x1e6a   :  { %v13495_v40 = vsub.f32 %v6375_v49, %v6411_v54 }
0x1e6b   :  { %v13497_v14 = vsub.f32 %v6374_v34, %v6410_v56  ;;  %v6397_v19 = vpop.xlane.xlu0 %6396 }
0x1e6c   :  { %v6413_v2 = vmul.f32 0.03125, %v6397_v19  ;;  %v6394_v38 = vpop.xlane.xlu1 %6393  ;;  %v6427_v37 = vmul.f32 %v13495_v40, %v13495_v40 }
0x1e6d   :  { %v6412_v11 = vmul.f32 0.03125, %v6394_v38  ;;  %v6426_v28 = vmul.f32 %v13497_v14, %v13497_v14 }
0x1e6e   :  { %v13503_v44 = vsub.f32 %v6377_v10, %v6413_v2  ;;  %v6437_v32 = vsel %vm591_vm2, %v6427_v37, 0.0  ;;  %v11376_v10 = vmov 0.0|0.0   ;;  %v8177_v2 = vld [vmem:[#allocation14 + $0x1] ss:$0 sm:$0xff] }
0x1e6f   :  { %v13506_v16 = vsub.f32 %v6376_v61, %v6412_v11  ;;  %v6403_v62 = vpop.xlane.xlu0 %6402  ;;  %6438 = vadd.xlane.f32.xlu0 %v6437_v32  ;;  %v6434_v7 = vsel %vm591_vm2, %v6426_v28, 0.0  ;;  %9864 = vmatprep.subr.bf16.mxu1 %v11376_v10  ;;  %v11377_v61 = vmov 0.0   ;;  %v6521_v28 = vlaneseq }
0x1e70   :  { %v6415_v33 = vmul.f32 0.03125, %v6403_v62  ;;  %v6400_v8 = vpop.xlane.xlu1 %6399  ;;  %6435 = vadd.xlane.f32.xlu1 %v6434_v7  ;;  %v6429_v47 = vmul.f32 %v13503_v44, %v13503_v44  ;;  %6862 = vmatprep.mubr.f32.mxu0 %v11377_v61  ;;  %v8178_v62 = vld [vmem:[#allocation15 + $0x1] ss:$0 sm:$0xff] }
0x1e71   :  { %v6414_v52 = vmul.f32 0.03125, %v6400_v8  ;;  %v6428_v12 = vmul.f32 %v13506_v16, %v13506_v16  ;;  %9401 = vmatprep.mubr.msk.f32.mxu1 %vm11378_vm7, %v11377_v61 }
0x1e72   :  { %v13513_v50 = vsub.f32 %v6379_v21, %v6415_v33  ;;  %v6443_v3 = vsel %vm591_vm2, %v6429_v47, 0.0 }
0x1e73   :  { %v13516_v53 = vsub.f32 %v6378_v35, %v6414_v52  ;;  %6444 = vadd.xlane.f32.xlu0 %v6443_v3  ;;  %v6409_v6 = vpop.xlane.xlu0 %6408  ;;  %v6440_v42 = vsel %vm591_vm2, %v6428_v12, 0.0  ;;  %v13544_v3 = vshrl.u32 %v6521_v28, 7 }
0x1e74   :  { %v6417_v58 = vmul.f32 0.03125, %v6409_v6  ;;  %6441 = vadd.xlane.f32.xlu1 %v6440_v42  ;;  %v6406_v45 = vpop.xlane.xlu1 %6405  ;;  %v6431_v9 = vmul.f32 %v13513_v50, %v13513_v50 }
0x1e75   :  { %v6416_v31 = vmul.f32 0.03125, %v6406_v45  ;;  %v6430_v24 = vmul.f32 %v13516_v53, %v13516_v53 }
0x1e76   :  { %v13523_v30 = vsub.f32 %v6381_v29, %v6417_v58  ;;  %v6449_v13 = vsel %vm591_vm2, %v6431_v9, 0.0  ;;  %v6525_v58 = vmul.u32 16, %v13544_v3 }
0x1e77   :  { %v13526_v23 = vsub.f32 %v6380_v41, %v6416_v31  ;;  %6450 = vadd.xlane.f32.xlu0 %v6449_v13  ;;  %v6446_v49 = vsel %vm591_vm2, %v6430_v24, 0.0 }
0x1e78   :  { %6447 = vadd.xlane.f32.xlu1 %v6446_v49  ;;  %v6433_v34 = vmul.f32 %v13523_v30, %v13523_v30 }
0x1e79   :  { %v6432_v1 = vmul.f32 %v13526_v23, %v13526_v23 }
0x1e7a   :  { %v6455_v18 = vsel %vm591_vm2, %v6433_v34, 0.0 }
0x1e7b   :  { %6456 = vadd.xlane.f32.xlu0 %v6455_v18  ;;  %v6452_v0 = vsel %vm591_vm2, %v6432_v1, 0.0 }
0x1e7c   :  { %6453 = vadd.xlane.f32.xlu1 %v6452_v0 }
0x1e8d   :  { %6527 = vperm.xlu1 %10491, %v6520_v63  }
0x1e91   :  { %6968 = vperm.xlu1 %10491, %v6959_v20  }
0x1efc   :  { %v6439_v27 = vpop.xlane.xlu0 %6438 }
0x1efd   :  { %v6459_v22 = vmul.f32 0.03125, %v6439_v27  ;;  %v6436_v57 = vpop.xlane.xlu1 %6435 }
0x1efe   :  { %v6458_v60 = vmul.f32 0.03125, %v6436_v57 }
0x1eff   :  { %v6467_v15 = vadd.f32 1e-05, %v6459_v22 }
0x1f00   :  { %v6466_v26 = vadd.f32 1e-05, %v6458_v60  ;;  %v6445_v21 = vpop.xlane.xlu0 %6444 }
0x1f01   :  { %10797 = vrsqrt.f32 %v6467_v15  ;;  %v6461_v35 = vmul.f32 0.03125, %v6445_v21  ;;  %v6442_v4 = vpop.xlane.xlu1 %6441 }
0x1f02   :  { %10799 = vrsqrt.f32 %v6466_v26  ;;  %v6460_v48 = vmul.f32 0.03125, %v6442_v4  ;;  %v6607_v4 = vld [vmem:[%s13847_s14] sm:$0xff] }
0x1f03   :  { %v6469_v51 = vadd.f32 1e-05, %v6461_v35 }
0x1f04   :  { %v6468_v39 = vadd.f32 1e-05, %v6460_v48  ;;  %v6451_v25 = vpop.xlane.xlu0 %6450  ;;  %v6785_v48 = vld [vmem:[#allocation23 + $0x8] sm:$0xff] }
0x1f05   :  { %10801 = vrsqrt.f32 %v6469_v51  ;;  %v6463_v55 = vmul.f32 0.03125, %v6451_v25  ;;  %v6448_v29 = vpop.xlane.xlu1 %6447  ;;  %v6787_v51 = vld [vmem:[#allocation23 + $0x18] sm:$0xff] }
0x1f06   :  { %10803 = vrsqrt.f32 %v6468_v39  ;;  %v6462_v41 = vmul.f32 0.03125, %v6448_v29  ;;  %v6784_v39 = vld [vmem:[#allocation23] sm:$0xff]  ;;  %v9876_v25 = vpack.c.bf16 %v6787_v51, %v6785_v48  ;;  %v7039_v51 = vld [vmem:[%s13849_s7 + $0xe8] sm:$0xff] }
0x1f07   :  { %v6471_v36 = vadd.f32 1e-05, %v6463_v55  ;;  %v6786_v55 = vld [vmem:[#allocation23 + $0x10] sm:$0xff]  ;;  %v7036_v48 = vld [vmem:[%s13849_s7 + $0xd0] sm:$0xff] }
0x1f08   :  { %v6470_v59 = vadd.f32 1e-05, %v6462_v41  ;;  %v6457_v17 = vpop.xlane.xlu0 %6456  ;;  %v9878_v29 = vpack.c.bf16 %v6786_v55, %v6784_v39  ;;  %9877 = vmatprep.subr.bf16.mxu0 %v9876_v25  ;;  %v7041_v39 = vld [vmem:[%s13849_s7 + $0xf8] sm:$0xff] }
0x1f09   :  { %10805 = vrsqrt.f32 %v6471_v36  ;;  %v6465_v46 = vmul.f32 0.03125, %v6457_v17  ;;  %v6454_v54 = vpop.xlane.xlu1 %6453  ;;  %v6608_v36 = vld [vmem:[%s13847_s14 + $0x8] sm:$0xf]  ;;  %v6693_v17 = vld [vmem:[%s13848_s3] sm:$0xff]  ;;  %v9920_v55 = vpack.c.bf16 %v7041_v39, %v7039_v51 }
0x1f0a   :  { %10807 = vrsqrt.f32 %v6470_v59  ;;  %v6464_v43 = vmul.f32 0.03125, %v6454_v54  ;;  %9879 = vmatpush1.bf16.msra.mxu0 %v9878_v29  ;;  %v6789_v54 = vld [vmem:[#allocation23 + $0x28] sm:$0xff] }
0x1f0b   :  { %v10798_v56 = vpop.eup %10797  ;;  %v6473_v19 = vadd.f32 1e-05, %v6465_v46  ;;  %v6694_v46 = vld [vmem:[%s13848_s3 + $0x8] sm:$0xf]  ;;  %v7175_v39 = vld [vmem:[%s13850_s1 + $0xa0] sm:$0xff] }
0x1f0c   :  { %v10800_v38 = vpop.eup %10799  ;;  %v6483_v37 = vmul.f32 %v10798_v56, %v13495_v40  ;;  %v6472_v11 = vadd.f32 1e-05, %v6464_v43  ;;  %v6791_v43 = vld [vmem:[#allocation23 + $0x38] sm:$0xff] }
0x1f0d   :  { %v6482_v32 = vmul.f32 %v10800_v38, %v13497_v14  ;;  %10809 = vrsqrt.f32 %v6473_v19  ;;  %v6528_v34 = vpop.permute.xlu1 %6527  ;;  %v9880_v56 = vpack.c.bf16 %v6791_v43, %v6789_v54  ;;  %v6788_v19 = vld [vmem:[#allocation23 + $0x20] sm:$0xff]  ;;  %v6783_v54 = vld [vmem:[#allocation21 + $0x38] sm:$0xff] }
0x1f0e   :  { %10811 = vrsqrt.f32 %v6472_v11  ;;  %v6497_v7 = vmul.f32 %v8177_v2, %v6483_v37  ;;  %v6529_v1 = vadd.s32 %v6528_v34, %v6525_v58  ;;  %v6777_v37 = vld [vmem:[#allocation21 + $0x8] sm:$0xff]  ;;  %v6779_v11 = vld [vmem:[#allocation21 + $0x18] sm:$0xff] }
0x1f0f   :  { %v10802_v33 = vpop.eup %10801  ;;  %v6496_v8 = vmul.f32 %v8177_v2, %v6482_v32  ;;  %9881 = vmatprep.subr.bf16.mxu0 %v9880_v56  ;;  %v6958_v32 = vld [vmem:[%s13846_s17] sm:$0xff] }
0x1f10   :  { %v10804_v47 = vpop.eup %10803  ;;  %v6485_v52 = vmul.f32 %v10802_v33, %v13503_v44  ;;  %v6511_v12 = vadd.f32 %v8178_v62, %v6497_v7  ;;  %v8179_v57 = vadd.s32 4294967295, %v6529_v1  ;;  %v7013_v7 = vld [vmem:[%s13849_s7 + $0x18] sm:$0xff]  ;;  %6963 = vperm.xlu0 %10492, %v6958_v32   ;;  %v7040_v32 = vld [vmem:[%s13849_s7 + $0xf0] sm:$0xff] }
0x1f11   :  { %v6484_v6 = vmul.f32 %v10804_v47, %v13506_v16  ;;  %v6510_v42 = vadd.f32 %v8178_v62, %v6496_v8  ;;  %v7010_v8 = vld [vmem:[%s13849_s7] sm:$0xff]  ;;  %v7012_v47 = vld [vmem:[%s13849_s7 + $0x10] sm:$0xff] }
0x1f12   :  { %v6499_v40 = vmul.f32 %v8177_v2, %v6485_v52  ;;  %v7015_v52 = vld [vmem:[%s13849_s7 + $0x28] sm:$0xff] }
0x1f13   :  { %v10806_v45 = vpop.eup %10805  ;;  %v9865_v14 = vpack.c.bf16 %v6511_v12, %v6510_v42  ;;  %v6498_v9 = vmul.f32 %v8177_v2, %v6484_v6  ;;  %v9894_v12 = vpack.c.bf16 %v7012_v47, %v7010_v8  ;;  %v7017_v6 = vld [vmem:[%s13849_s7 + $0x38] sm:$0xff]  ;;  %v7014_v42 = vld [vmem:[%s13849_s7 + $0x20] sm:$0xff] }
0x1f14   :  { %v10808_v31 = vpop.eup %10807  ;;  %v6487_v24 = vmul.f32 %v10806_v45, %v13513_v50  ;;  %v6513_v13 = vadd.f32 %v8178_v62, %v6499_v40  ;;  %v7016_v40 = vld [vmem:[%s13849_s7 + $0x30] sm:$0xff]  ;;  %v9896_v58 = vpack.c.bf16 %v7017_v6, %v7015_v52  ;;  %v7019_v45 = vld [vmem:[%s13849_s7 + $0x48] sm:$0xff]  ;;  %v7042_v47 = vld [vmem:[%s13849_s7 + $0x100] sm:$0xff] }
0x1f15   :  { %v6486_v49 = vmul.f32 %v10808_v31, %v13516_v53  ;;  %9866 = vmatpush3.bf16.msra.mxu1 %v9865_v14  ;;  %v6512_v44 = vadd.f32 %v8178_v62, %v6498_v9  ;;  %v6522_v53 = vand.u32 127, %v6521_v28  ;;  %v9884_v28 = vpack.c.bf16 %v6779_v11, %v6777_v37  ;;  %v7021_v14 = vld [vmem:[%s13849_s7 + $0x58] sm:$0xff]  ;;  %v7044_v52 = vld [vmem:[%s13849_s7 + $0x110] sm:$0xff]  ;;  %v7047_v6 = vld [vmem:[%s13849_s7 + $0x128] sm:$0x3f] }
0x1f16   :  { %9867 = vmatprep.subr.bf16.mxu1 %v11376_v10  ;;  %v6501_v16 = vmul.f32 %v8177_v2, %v6487_v24  ;;  %v9898_v9 = vpack.c.bf16 %v7016_v40, %v7014_v42  ;;  %v9900_v31 = vpack.c.bf16 %v7021_v14, %v7019_v45  ;;  %v7018_v24 = vld [vmem:[%s13849_s7 + $0x40] sm:$0xff]  ;;  %v7156_v40 = vld [vmem:[%s13850_s1 + $0x8] sm:$0xff] }
0x1f17   :  { %v10810_v18 = vpop.eup %10809  ;;  %v9868_v0 = vpack.c.bf16 %v6513_v13, %v6512_v44  ;;  %v6500_v5 = vmul.f32 %v8177_v2, %v6486_v49  ;;  %vm6531_vm8 = vcmp.eq.s32.totalorder %v6522_v53, %v8179_v57  ;;  %v7020_v13 = vld [vmem:[%s13849_s7 + $0x50] sm:$0xff]  ;;  %v7023_v49 = vld [vmem:[%s13849_s7 + $0x68] sm:$0xff]  ;;  %v7025_v44 = vld [vmem:[%s13849_s7 + $0x78] sm:$0xff] }
0x1f18   :  { %v10812_v63 = vpop.eup %10811  ;;  %v6489_v20 = vmul.f32 %v10810_v18, %v13523_v30  ;;  %v6515_v27 = vadd.f32 %v8178_v62, %v6501_v16  ;;  %v9902_v34 = vpack.c.bf16 %v7020_v13, %v7018_v24  ;;  %v9904_v1 = vpack.c.bf16 %v7025_v44, %v7023_v49  ;;  %v7022_v16 = vld [vmem:[%s13849_s7 + $0x60] sm:$0xff]  ;;  %v7024_v18 = vld [vmem:[%s13849_s7 + $0x70] sm:$0xff]  ;;  %v7033_v53 = vld [vmem:[%s13849_s7 + $0xb8] sm:$0xff] }
0x1f19   :  { %v6488_v22 = vmul.f32 %v10812_v63, %v13526_v23  ;;  %9869 = vmatpush3.bf16.msra.mxu1 %v9868_v0  ;;  %v6514_v50 = vadd.f32 %v8178_v62, %v6500_v5  ;;  %v8180_v23 = vsel %vm6531_vm8, 1.0, %v11377_v61  ;;  %v7027_v0 = vld [vmem:[%s13849_s7 + $0x88] sm:$0xff]  ;;  %v7029_v5 = vld [vmem:[%s13849_s7 + $0x98] sm:$0xff]  ;;  %v9906_v63 = vpack.c.bf16 %v7024_v18, %v7022_v16  ;;  %v7046_v42 = vld [vmem:[%s13849_s7 + $0x120] sm:$0x3f] }
0x1f1a   :  { %9870 = vmatprep.subr.bf16.mxu1 %v11376_v10  ;;  %v6503_v60 = vmul.f32 %v8177_v2, %v6489_v20  ;;  %v9908_v20 = vpack.c.bf16 %v7029_v5, %v7027_v0  ;;  %v7155_v45 = vld [vmem:[%s13850_s1] sm:$0xff]  ;;  %v7162_v24 = vld [vmem:[%s13850_s1 + $0x38] sm:$0xff] }
0x1f1b   :  { %v9871_v15 = vpack.c.bf16 %v6515_v27, %v6514_v50  ;;  %v6502_v26 = vmul.f32 %v8177_v2, %v6488_v22  ;;  %v6790_v2 = vld [vmem:[#allocation23 + $0x30] sm:$0xff]  ;;  %v7028_v22 = vld [vmem:[%s13849_s7 + $0x90] sm:$0xff]  ;;  %v7166_v16 = vld [vmem:[%s13850_s1 + $0x58] sm:$0xff] }
0x1f1c   :  { %v6517_v21 = vadd.f32 %v8178_v62, %v6503_v60  ;;  %v9882_v38 = vpack.c.bf16 %v6790_v2, %v6788_v19  ;;  %v7026_v27 = vld [vmem:[%s13849_s7 + $0x80] sm:$0xff]  ;;  %v7031_v50 = vld [vmem:[%s13849_s7 + $0xa8] sm:$0xff]  ;;  %v6780_v2 = vld [vmem:[#allocation21 + $0x20] sm:$0xff] }
0x1f1d   :  { %9872 = vmatpush3.bf16.msra.mxu1 %v9871_v15  ;;  %v6516_v35 = vadd.f32 %v8178_v62, %v6502_v26  ;;  %v7011_v62 = vld [vmem:[%s13849_s7 + $0x8] sm:$0xff]  ;;  %v9910_v57 = vpack.c.bf16 %v7028_v22, %v7026_v27  ;;  %v9912_v60 = vpack.c.bf16 %v7033_v53, %v7031_v50  ;;  %v7030_v15 = vld [vmem:[%s13849_s7 + $0xa0] sm:$0xff]  ;;  %v7032_v26 = vld [vmem:[%s13849_s7 + $0xb0] sm:$0xff] }
0x1f1e   :  { %9873 = vmatprep.subr.bf16.mxu1 %v11376_v10  ;;  %9883 = vmatpush1.bf16.msra.mxu0 %v9882_v38  ;;  %v9892_v33 = vpack.c.bf16 %v7013_v7, %v7011_v62  ;;  %v6782_v38 = vld [vmem:[#allocation21 + $0x30] sm:$0xff]  ;;  %v7170_v27 = vld [vmem:[%s13850_s1 + $0x78] sm:$0xff] }
0x1f1f   :  { %v9874_v30 = vpack.c.bf16 %v6517_v21, %v6516_v35  ;;  %9885 = vmatprep.subr.bf16.mxu0 %v9884_v28  ;;  %v7035_v21 = vld [vmem:[%s13849_s7 + $0xc8] sm:$0xff]  ;;  %v7037_v35 = vld [vmem:[%s13849_s7 + $0xd8] sm:$0xff]  ;;  %v9890_v11 = vpack.c.bf16 %v6782_v38, %v6780_v2  ;;  %v7038_v28 = vld [vmem:[%s13849_s7 + $0xe0] sm:$0xff] }
0x1f20   :  { %v9922_v62 = vpack.c.bf16 %v7040_v32, %v7038_v28  ;;  %v7043_v7 = vld [vmem:[%s13849_s7 + $0x108] sm:$0xff]  ;;  %v7159_v44 = vld [vmem:[%s13850_s1 + $0x20] sm:$0xff]  ;;  %v7185_v38 = vld [vmem:[%s13850_s1 + $0xf0] sm:$0xff]  ;;  %v13660_v28 = vsub.s32 1, %v13544_v3 }
0x1f21   :  { %9875 = vmatpush3.bf16.msra.mxu1 %v9874_v30  ;;  %v9914_v30 = vpack.c.bf16 %v7032_v26, %v7030_v15  ;;  %v7163_v5 = vld [vmem:[%s13850_s1 + $0x40] sm:$0xff]  ;;  %v7174_v15 = vld [vmem:[%s13850_s1 + $0x98] sm:$0xff] }
0x1f22   :  { %v7167_v53 = vld [vmem:[%s13850_s1 + $0x60] sm:$0xff] }
0x1f23   :  { %v7183_v2 = vld [vmem:[%s13850_s1 + $0xe0] sm:$0xff] }
0x1f24   :  { %9402 = vmatmul.mubr.msk.f32.vlgmr.msra.gmra.mrb[90].mxu1 %vm899_vm5, %v8180_v23  ;;  %v9916_v23 = vpack.c.bf16 %v7037_v35, %v7035_v21  ;;  %v7171_v35 = vld [vmem:[%s13850_s1 + $0x80] sm:$0xff] }
0x1f25   :  { %9406 = vmatprep.mubr.msk.f32.mxu1 %vm418_vm1, %v6607_v4  ;;  %v7034_v4 = vld [vmem:[%s13849_s7 + $0xc0] sm:$0xff] }
0x1f26   :  { %v9918_v25 = vpack.c.bf16 %v7036_v48, %v7034_v4  ;;  %v7178_v4 = vld [vmem:[%s13850_s1 + $0xb8] sm:$0xff]  ;;  %v6960_v32 = vld [vmem:[%s13851_s23] sm:$0x3] }
0x1ff7   :  { %v13559_v41 = vpop.f32.mrb[90].mxu1 }
0x1ff8   :  { %v9403_v59 = vpop.f32.mrb[91].mxu1  ;;  %9404 = vmatprep.subr.msk.mxu1 %vm443_vm0, %v13559_v41 }
0x1ff9   :  { %9405 = vmatpush3.msk.msra.mxu1 %vm443_vm0, %v13559_v41  ;;  %v6778_v59 = vld [vmem:[#allocation21 + $0x10] sm:$0xff] }
0x1ffa   :  { %9407 = vmatmul.mubr.msk.f32.vlgmr.msra.gmra.mrb[92].mxu1 %vm418_vm1, %v6608_v36  ;;  %9409 = vmatprep.subr.msk.mxu1 %vm443_vm0, %v13559_v41  ;;  %v6776_v36 = vld [vmem:[#allocation21] sm:$0xff] }
0x1ffb   :  { %9410 = vmatpush3.msk.msra.mxu1 %vm443_vm0, %v13559_v41  ;;  %9411 = vmatprep.mubr.msk.f32.mxu1 %vm418_vm1, %v6693_v17  ;;  %v9886_v43 = vpack.c.bf16 %v6778_v59, %v6776_v36 }
0x1ffc   :  { %9893 = vmatprep.subr.bf16.mxu1 %v9892_v33  ;;  %v7045_v33 = vld [vmem:[%s13849_s7 + $0x118] sm:$0xff] }
0x1ffd   :  { %v9924_v8 = vpack.c.bf16 %v7045_v33, %v7043_v7  ;;  %v6979_v33 = vrot.slane %v6960_v32, %v13660_v28 }
0x1ffe   :  { %9412 = vmatmul.mubr.msk.f32.vlgmr.msra.gmra.mrb[94].mxu1 %vm418_vm1, %v6694_v46  ;;  %v6781_v46 = vld [vmem:[#allocation21 + $0x28] sm:$0xff] }
0x1fff   :  { %9895 = vmatpush1.bf16.msra.mxu1 %v9894_v12  ;;  %v9888_v19 = vpack.c.bf16 %v6783_v54, %v6781_v46  ;;  %v9926_v12 = vpack.c.bf16 %v7044_v52, %v7042_v47  ;;  %v7181_v46 = vld [vmem:[%s13850_s1 + $0xd0] sm:$0xff]  ;;  %v7184_v54 = vld [vmem:[%s13850_s1 + $0xe8] sm:$0xff] }
0x2000   :  { %9897 = vmatprep.subr.bf16.mxu1 %v9896_v58  ;;  %v7158_v58 = vld [vmem:[%s13850_s1 + $0x18] sm:$0xff] }
0x2001   :  { %v9928_v14 = vpack.c.bf16 %v7158_v58, %v7156_v40 }
0x2003   :  { %9899 = vmatpush1.bf16.msra.mxu1 %v9898_v9  ;;  %v7157_v9 = vld [vmem:[%s13850_s1 + $0x10] sm:$0xff] }
0x2004   :  { %9901 = vmatprep.subr.bf16.mxu1 %v9900_v31  ;;  %v7160_v31 = vld [vmem:[%s13850_s1 + $0x28] sm:$0xff]  ;;  %v9930_v13 = vpack.c.bf16 %v7157_v9, %v7155_v45 }
0x2005   :  { %v9932_v49 = vpack.c.bf16 %v7162_v24, %v7160_v31 }
0x2007   :  { %9903 = vmatpush1.bf16.msra.mxu1 %v9902_v34  ;;  %v7161_v34 = vld [vmem:[%s13850_s1 + $0x30] sm:$0xff] }
0x2008   :  { %9905 = vmatprep.subr.bf16.mxu1 %v9904_v1  ;;  %v7164_v1 = vld [vmem:[%s13850_s1 + $0x48] sm:$0xff]  ;;  %v9934_v18 = vpack.c.bf16 %v7161_v34, %v7159_v44 }
0x2009   :  { %v9936_v0 = vpack.c.bf16 %v7166_v16, %v7164_v1 }
0x200b   :  { %9907 = vmatpush1.bf16.msra.mxu1 %v9906_v63  ;;  %v7165_v63 = vld [vmem:[%s13850_s1 + $0x50] sm:$0xff] }
0x200c   :  { %9909 = vmatprep.subr.bf16.mxu1 %v9908_v20  ;;  %v7168_v20 = vld [vmem:[%s13850_s1 + $0x68] sm:$0xff]  ;;  %v9938_v22 = vpack.c.bf16 %v7165_v63, %v7163_v5 }
0x200d   :  { %v9940_v50 = vpack.c.bf16 %v7170_v27, %v7168_v20  ;;  %v7188_v20 = vld [vmem:[%s13850_s1 + $0x108] sm:$0xff]  ;;  %v7190_v27 = vld [vmem:[%s13850_s1 + $0x118] sm:$0xff] }
0x200f   :  { %9911 = vmatpush1.bf16.msra.mxu1 %v9910_v57  ;;  %v7169_v57 = vld [vmem:[%s13850_s1 + $0x70] sm:$0xff] }
0x2010   :  { %9913 = vmatprep.subr.bf16.mxu1 %v9912_v60  ;;  %v7172_v60 = vld [vmem:[%s13850_s1 + $0x88] sm:$0xff]  ;;  %v9942_v26 = vpack.c.bf16 %v7169_v57, %v7167_v53  ;;  %v7189_v53 = vld [vmem:[%s13850_s1 + $0x110] sm:$0xff] }
0x2011   :  { %v9944_v21 = vpack.c.bf16 %v7174_v15, %v7172_v60  ;;  %v7192_v60 = vld [vmem:[%s13850_s1 + $0x128] sm:$0x3f]  ;;  %v7191_v15 = vld [vmem:[%s13850_s1 + $0x120] sm:$0x3f] }
0x2013   :  { %9915 = vmatpush1.bf16.msra.mxu1 %v9914_v30  ;;  %v7173_v30 = vld [vmem:[%s13850_s1 + $0x90] sm:$0xff] }
0x2014   :  { %9917 = vmatprep.subr.bf16.mxu1 %v9916_v23  ;;  %v7176_v23 = vld [vmem:[%s13850_s1 + $0xa8] sm:$0xff]  ;;  %v9946_v48 = vpack.c.bf16 %v7173_v30, %v7171_v35  ;;  %v7300_v35 = vld [vmem:[%s13852_s5 + $0x10] sm:$0xff] }
0x2015   :  { %v9948_v51 = vpack.c.bf16 %v7178_v4, %v7176_v23  ;;  %v7301_v23 = vld [vmem:[%s13852_s5 + $0x18] sm:$0xff] }
0x2016   :  { %v9968_v4 = vpack.c.bf16 %v7301_v23, %v7300_v35 }
0x2017   :  { %9919 = vmatpush1.bf16.msra.mxu1 %v9918_v25  ;;  %v7177_v25 = vld [vmem:[%s13850_s1 + $0xb0] sm:$0xff] }
0x2018   :  { %9921 = vmatprep.subr.bf16.mxu1 %v9920_v55  ;;  %v7180_v55 = vld [vmem:[%s13850_s1 + $0xc8] sm:$0xff]  ;;  %v9950_v36 = vpack.c.bf16 %v7177_v25, %v7175_v39  ;;  %v7304_v25 = vld [vmem:[%s13852_s5 + $0x30] sm:$0xff] }
0x201b   :  { %9923 = vmatpush1.bf16.msra.mxu1 %v9922_v62  ;;  %v6964_v62 = vpop.permute.xlu0 %6963 }
0x201c   :  { %9925 = vmatprep.subr.bf16.mxu1 %v9924_v8  ;;  %v6990_v8 = vld [vmem:[#allocation24] sm:$0x3]  ;;  %v6983_v52 = vmul.f32 %v6979_v33, %v6964_v62 }
0x201d   :  { %v6999_v40 = vrot.slane %v6990_v8, %v13660_v28 }
0x201f   :  { %9927 = vmatpush1.bf16.msra.mxu1 %v9926_v12 }
0x2020   :  { %8192 = vmatprep.subr.msk.mxu1 %vm7067_vm9, %v7047_v6  ;;  %v6969_v6 = vpop.permute.xlu1 %6968 }
0x2021   :  { %v6985_v31 = vmul.f32 %v6979_v33, %v6969_v6 }
0x2023   :  { %8193 = vmatpush1.msk.msra.mxu1 %vm7067_vm9, %v7046_v42 }
0x2024   :  { %9964 = vmatprep.subr.bf16.mxu1 %v11376_v10 }
0x20cd   :  { %v9408_v29 = vpop.f32.mrb[92].mxu1 }
0x20ce   :  { %v6684_v17 = vpop.f32.mrb[93].mxu1 }
0x20d1   :  { %v9413_v56 = vpop.f32.mrb[94].mxu1 }
0x20d2   :  { %v6767_v37 = vpop.f32.mrb[95].mxu1 }
0x20d3   :  { %8188 = vmatmul.mubr.msk.f32.vlgmr.msra.gmra.mrb[110].mxu0 %vm591_vm2, %v6767_v37  ;;  %v9958_v37 = vpack.c.bf16 %v7185_v38, %v7183_v2  ;;  %v7312_v38 = vld [vmem:[%s13852_s5 + $0x70] sm:$0xff] }
0x20d4   :  { %9887 = vmatpush1.bf16.msra.mxu0 %v9886_v43  ;;  %6868 = vmatprep.mubr.f32.mxu0 %v11377_v61  ;;  %v7186_v43 = vld [vmem:[%s13850_s1 + $0xf8] sm:$0xff] }
0x20d5   :  { %9889 = vmatprep.subr.bf16.mxu0 %v9888_v19  ;;  %v9956_v19 = vpack.c.bf16 %v7186_v43, %v7184_v54  ;;  %v7309_v54 = vld [vmem:[%s13852_s5 + $0x58] sm:$0xff] }
0x20d7   :  { %8189 = vmatmul.mubr.msk.f32.gmra.mrb[112].mxu0 %vm591_vm2, %v9413_v56 }
0x20d8   :  { %9891 = vmatpush1.bf16.msra.mxu0 %v9890_v11  ;;  %6945 = vmatprep.mubr.f32.mxu0 %v11377_v61  ;;  %v13657_v11 = vsub.s32 0, %v13544_v3 }
0x20d9   :  { %9929 = vmatprep.subr.bf16.mxu0 %v9928_v14 }
0x20da   :  { %v6975_v7 = vrot.slane %v6960_v32, %v13657_v11  ;;  %v6995_v12 = vrot.slane %v6990_v8, %v13657_v11 }
0x20db   :  { %8190 = vmatmul.mubr.msk.f32.vlgmr.msra.gmra.mrb[110].mxu0 %vm591_vm2, %v6684_v17  ;;  %v7179_v17 = vld [vmem:[%s13850_s1 + $0xc0] sm:$0xff] }
0x20dc   :  { %6951 = vmatprep.mubr.f32.mxu0 %v11377_v61  ;;  %9931 = vmatpush1.bf16.msra.mxu0 %v9930_v13  ;;  %v9954_v56 = vpack.c.bf16 %v7181_v46, %v7179_v17  ;;  %v6982_v47 = vmul.f32 %v6975_v7, %v6964_v62  ;;  %v6984_v3 = vmul.f32 %v6975_v7, %v6969_v6  ;;  %v7308_v46 = vld [vmem:[%s13852_s5 + $0x50] sm:$0xff]  ;;  %v7048_v62 = vld [vmem:[#allocation26] sm:$0x3] }
0x20dd   :  { %9933 = vmatprep.subr.bf16.mxu0 %v9932_v49  ;;  %v9980_v43 = vpack.c.bf16 %v7309_v54, %v7308_v46  ;;  %v7053_v7 = vrot.slane %v7048_v62, %v13657_v11  ;;  %v7057_v33 = vrot.slane %v7048_v62, %v13660_v28  ;;  %v7497_v46 = vld [vmem:[#allocation30 + $0x28] sm:$0xff]  ;;  %v7657_v62 = vld [vmem:[%s11564_s29 + $0x18] sm:$0xff] }
0x20df   :  { %8191 = vmatmul.mubr.msk.f32.gmra.mrb[112].mxu0 %vm591_vm2, %v9408_v29  ;;  %v7182_v29 = vld [vmem:[%s13850_s1 + $0xd8] sm:$0xff] }
0x20e0   :  { %9935 = vmatpush1.bf16.msra.mxu0 %v9934_v18  ;;  %v9952_v59 = vpack.c.bf16 %v7182_v29, %v7180_v55  ;;  %v7305_v55 = vld [vmem:[%s13852_s5 + $0x38] sm:$0xff] }
0x20e1   :  { %9937 = vmatprep.subr.bf16.mxu0 %v9936_v0  ;;  %v9974_v29 = vpack.c.bf16 %v7305_v55, %v7304_v25  ;;  %v7410_v25 = vld [vmem:[%s13854_s0] sm:$0xf] }
0x20e4   :  { %9939 = vmatpush1.bf16.msra.mxu0 %v9938_v22  ;;  %v9960_v22 = vpack.c.bf16 %v7190_v27, %v7188_v20 }
0x20e5   :  { %9941 = vmatprep.subr.bf16.mxu0 %v9940_v50  ;;  %v7187_v50 = vld [vmem:[%s13850_s1 + $0x100] sm:$0xff] }
0x20e6   :  { %v9962_v57 = vpack.c.bf16 %v7189_v53, %v7187_v50 }
0x20e8   :  { %9943 = vmatpush1.bf16.msra.mxu0 %v9942_v26  ;;  %v7298_v26 = vld [vmem:[%s13852_s5] sm:$0xff] }
0x20e9   :  { %9945 = vmatprep.subr.bf16.mxu0 %v9944_v21  ;;  %v7299_v21 = vld [vmem:[%s13852_s5 + $0x8] sm:$0xff] }
0x20ea   :  { %v9965_v30 = vpack.c.bf16 %v7299_v21, %v7298_v26 }
0x20ec   :  { %9947 = vmatpush1.bf16.msra.mxu0 %v9946_v48  ;;  %v7302_v48 = vld [vmem:[%s13852_s5 + $0x20] sm:$0xff] }
0x20ed   :  { %9949 = vmatprep.subr.bf16.mxu0 %v9948_v51  ;;  %v7303_v51 = vld [vmem:[%s13852_s5 + $0x28] sm:$0xff] }
0x20ee   :  { %v9971_v39 = vpack.c.bf16 %v7303_v51, %v7302_v48  ;;  %v7492_v48 = vld [vmem:[#allocation30] sm:$0xff]  ;;  %v7493_v51 = vld [vmem:[#allocation30 + $0x8] sm:$0xff] }
0x20ef   :  { %v9996_v55 = vpack.c.bf16 %v7493_v51, %v7492_v48 }
0x20f0   :  { %9951 = vmatpush1.bf16.msra.mxu0 %v9950_v36  ;;  %v7306_v36 = vld [vmem:[%s13852_s5 + $0x40] sm:$0xff] }
0x20f1   :  { %9953 = vmatprep.subr.bf16.mxu0 %v9952_v59  ;;  %v7307_v59 = vld [vmem:[%s13852_s5 + $0x48] sm:$0xff] }
0x20f2   :  { %v9977_v17 = vpack.c.bf16 %v7307_v59, %v7306_v36  ;;  %v7495_v36 = vld [vmem:[#allocation30 + $0x18] sm:$0xff] }
0x20f4   :  { %9955 = vmatpush1.bf16.msra.mxu0 %v9954_v56  ;;  %v7310_v56 = vld [vmem:[%s13852_s5 + $0x60] sm:$0xff] }
0x20f5   :  { %9957 = vmatprep.subr.bf16.mxu0 %v9956_v19  ;;  %v7311_v19 = vld [vmem:[%s13852_s5 + $0x68] sm:$0xff] }
0x20f6   :  { %v9983_v2 = vpack.c.bf16 %v7311_v19, %v7310_v56  ;;  %v7499_v56 = vld [vmem:[#allocation30 + $0x38] sm:$0xff] }
0x20f8   :  { %9959 = vmatpush1.bf16.msra.mxu0 %v9958_v37  ;;  %v7313_v37 = vld [vmem:[%s13852_s5 + $0x78] sm:$0xff] }
0x20f9   :  { %9961 = vmatprep.subr.bf16.mxu0 %v9960_v22  ;;  %v9986_v32 = vpack.c.bf16 %v7313_v37, %v7312_v38  ;;  %v7655_v38 = vld [vmem:[%s11564_s29 + $0x8] sm:$0xff]  ;;  %v7656_v37 = vld [vmem:[%s11564_s29 + $0x10] sm:$0xff] }
0x20fc   :  { %9963 = vmatpush1.bf16.msra.mxu0 %v9962_v57 }
0x20fd   :  { %8196 = vmatprep.subr.msk.mxu0 %vm7067_vm9, %v7192_v60 }
0x2100   :  { %8197 = vmatpush1.msk.msra.mxu0 %vm7067_vm9, %v7191_v15 }
0x2101   :  { %9991 = vmatprep.subr.bf16.mxu0 %v11376_v10 }
0x21ae   :  { %v6947_v42 = vpop.f32.mrb[110].mxu0 }
0x21af   :  { %v6986_v58 = vadd.f32 %v6982_v47, %v6947_v42  ;;  %v6949_v45 = vpop.f32.mrb[111].mxu0 }
0x21b0   :  { %v6987_v14 = vadd.f32 %v6983_v52, %v6949_v45 }
0x21b1   :  { %v7002_v9 = vadd.f32 %v6995_v12, %v6986_v58 }
0x21b2   :  { %v7003_v24 = vadd.f32 %v6999_v40, %v6987_v14  ;;  %v6953_v13 = vpop.f32.mrb[112].mxu0 }
0x21b3   :  { %v6988_v49 = vadd.f32 %v6984_v3, %v6953_v13  ;;  %v6955_v44 = vpop.f32.mrb[113].mxu0  ;;  %v7006_v16 = vmax.f32 %v7002_v9, 0.0 }
0x21b4   :  { %v7007_v34 = vmax.f32 %v7003_v24, 0.0  ;;  %v6989_v1 = vadd.f32 %v6985_v31, %v6955_v44  ;;  %v7314_v31 = vld [vmem:[%s13852_s5 + $0x80] sm:$0xff]  ;;  %v7315_v24 = vld [vmem:[%s13852_s5 + $0x88] sm:$0xff]  ;;  %v7193_v44 = vld [vmem:[#allocation27] sm:$0x3] }
0x21b5   :  { %v7004_v18 = vadd.f32 %v6995_v12, %v6988_v49  ;;  %v9989_v13 = vpack.c.bf16 %v7315_v24, %v7314_v31  ;;  %v7316_v49 = vld [vmem:[%s13852_s5 + $0x90] sm:$0x3f]  ;;  %v7662_v24 = vld [vmem:[%s11564_s29 + $0x40] sm:$0xff] }
0x21b6   :  { %v7005_v0 = vadd.f32 %v6999_v40, %v6989_v1  ;;  %8194 = vmatprep.mubr.msk.f32.mxu1 %vm7060_vm10, %v7007_v34  ;;  %v7198_v34 = vrot.slane %v7193_v44, %v13657_v11  ;;  %v7202_v1 = vrot.slane %v7193_v44, %v13660_v28  ;;  %v8200_v11 = vld [vmem:[%s13853_s10] ss:$0 sm:$0xff]  ;;  %v7664_v44 = vld [vmem:[%s11564_s29 + $0x50] sm:$0xff] }
0x21b7   :  { %7139 = vmatmul.mubr.f32.vlgmr.msra.gmra.mrb[96].mxu1 %v7006_v16  ;;  %v7008_v63 = vmax.f32 %v7004_v18, 0.0 }
0x21b8   :  { %v7009_v5 = vmax.f32 %v7005_v0, 0.0  ;;  %9966 = vmatpush1.bf16.msra.mxu1 %v9965_v30 }
0x21b9   :  { %9967 = vmatprep.subr.bf16.mxu1 %v11376_v10 }
0x21ba   :  { %8195 = vmatprep.mubr.msk.f32.mxu1 %vm7060_vm10, %v7009_v5 }
0x21bb   :  { %7145 = vmatmul.mubr.f32.gmra.mrb[98].mxu1 %v7008_v63 }
0x21bc   :  { %9969 = vmatpush1.bf16.msra.mxu1 %v9968_v4 }
0x21bd   :  { %9970 = vmatprep.subr.bf16.mxu1 %v11376_v10 }
0x21c0   :  { %9972 = vmatpush1.bf16.msra.mxu1 %v9971_v39 }
0x21c1   :  { %9973 = vmatprep.subr.bf16.mxu1 %v11376_v10 }
0x21c4   :  { %9975 = vmatpush1.bf16.msra.mxu1 %v9974_v29  ;;  %v7494_v29 = vld [vmem:[#allocation30 + $0x10] sm:$0xff] }
0x21c5   :  { %9976 = vmatprep.subr.bf16.mxu1 %v11376_v10  ;;  %v9999_v59 = vpack.c.bf16 %v7495_v36, %v7494_v29 }
0x21c8   :  { %9978 = vmatpush1.bf16.msra.mxu1 %v9977_v17  ;;  %v7496_v17 = vld [vmem:[#allocation30 + $0x20] sm:$0xff] }
0x21c9   :  { %9979 = vmatprep.subr.bf16.mxu1 %v11376_v10  ;;  %v10002_v54 = vpack.c.bf16 %v7497_v46, %v7496_v17 }
0x21cc   :  { %9981 = vmatpush1.bf16.msra.mxu1 %v9980_v43  ;;  %v7498_v43 = vld [vmem:[#allocation30 + $0x30] sm:$0xff] }
0x21cd   :  { %9982 = vmatprep.subr.bf16.mxu1 %v11376_v10  ;;  %v10005_v19 = vpack.c.bf16 %v7499_v56, %v7498_v43 }
0x21d0   :  { %9984 = vmatpush1.bf16.msra.mxu1 %v9983_v2  ;;  %v7654_v2 = vld [vmem:[%s11564_s29] sm:$0xff] }
0x21d1   :  { %9985 = vmatprep.subr.bf16.mxu1 %v11376_v10 }
0x21d4   :  { %9987 = vmatpush1.bf16.msra.mxu1 %v9986_v32  ;;  %v10014_v32 = vpack.c.bf16 %v7655_v38, %v7654_v2 }
0x21d5   :  { %9988 = vmatprep.subr.bf16.mxu1 %v11376_v10 }
0x21d8   :  { %9990 = vmatpush1.bf16.msra.mxu1 %v9989_v13  ;;  %v7663_v13 = vld [vmem:[%s11564_s29 + $0x48] sm:$0xff] }
0x21d9   :  { %7369 = vmatprep.subr.mxu1 %v11377_v61 }
0x21dc   :  { %8201 = vmatpush1.msk.msra.mxu1 %vm7067_vm9, %v7316_v49  ;;  %v10026_v49 = vpack.c.bf16 %v7663_v13, %v7662_v24 }
0x21dd   :  { %10013 = vmatprep.subr.bf16.mxu1 %v11376_v10 }
0x228a   :  { %v7140_v8 = vpop.f32.mrb[96].mxu1 }
0x228b   :  { %v7141_v47 = vadd.f32 %v7140_v8, %v7053_v7  ;;  %v7142_v52 = vpop.f32.mrb[97].mxu1  ;;  %v7659_v8 = vld [vmem:[%s11564_s29 + $0x28] sm:$0xff] }
0x228c   :  { %v7143_v12 = vadd.f32 %v7142_v52, %v7057_v33  ;;  %v7660_v52 = vld [vmem:[%s11564_s29 + $0x30] sm:$0xff] }
0x228d   :  { %v7151_v40 = vmax.f32 %v7141_v47, 0.0 }
0x228e   :  { %v7152_v6 = vmax.f32 %v7143_v12, 0.0  ;;  %v7146_v42 = vpop.f32.mrb[98].mxu1  ;;  %v7661_v12 = vld [vmem:[%s11564_s29 + $0x38] sm:$0xff] }
0x228f   :  { %v7147_v58 = vadd.f32 %v7146_v42, %v7053_v7  ;;  %v7148_v45 = vpop.f32.mrb[99].mxu1  ;;  %v10017_v7 = vpack.c.bf16 %v7657_v62, %v7656_v37  ;;  %v7488_v42 = vld [vmem:[#allocation29] sm:$0xff] }
0x2290   :  { %v7149_v14 = vadd.f32 %v7148_v45, %v7057_v33  ;;  %8198 = vmatprep.mubr.msk.f32.mxu0 %vm7060_vm10, %v7152_v6  ;;  %v7658_v33 = vld [vmem:[%s11564_s29 + $0x20] sm:$0xff]  ;;  %v10023_v6 = vpack.c.bf16 %v7661_v12, %v7660_v52  ;;  %v7490_v45 = vld [vmem:[#allocation29 + $0x10] sm:$0xff] }
0x2291   :  { %7282 = vmatmul.mubr.f32.vlgmr.msra.gmra.mrb[114].mxu0 %v7151_v40  ;;  %v7153_v9 = vmax.f32 %v7147_v58, 0.0  ;;  %v10020_v47 = vpack.c.bf16 %v7659_v8, %v7658_v33  ;;  %v7489_v40 = vld [vmem:[#allocation29 + $0x8] sm:$0xff] }
0x2292   :  { %v7154_v3 = vmax.f32 %v7149_v14, 0.0  ;;  %v10008_v58 = vpack.c.bf16 %v7489_v40, %v7488_v42  ;;  %v7491_v14 = vld [vmem:[#allocation29 + $0x18] sm:$0xff] }
0x2293   :  { %v10011_v31 = vpack.c.bf16 %v7491_v14, %v7490_v45 }
0x2294   :  { %8199 = vmatprep.mubr.msk.f32.mxu0 %vm7060_vm10, %v7154_v3 }
0x2295   :  { %7288 = vmatmul.mubr.f32.gmra.mrb[116].mxu0 %v7153_v9 }
0x2296   :  { %9418 = vmatprep.mubr.msk.f32.mxu0 %vm11378_vm7, %v11377_v61 }
0x2364   :  { %v7283_v16 = vpop.f32.mrb[114].mxu0 }
0x2365   :  { %v7284_v18 = vadd.f32 %v7283_v16, %v7198_v34  ;;  %v7285_v0 = vpop.f32.mrb[115].mxu0  ;;  %v7666_v16 = vld [vmem:[%s11564_s29 + $0x60] sm:$0xf] }
0x2366   :  { %v7286_v5 = vadd.f32 %v7285_v0, %v7202_v1 }
0x2367   :  { %v7294_v27 = vmax.f32 %v7284_v18, 0.0 }
0x2368   :  { %v7295_v63 = vmax.f32 %v7286_v5, 0.0  ;;  %v7289_v20 = vpop.f32.mrb[116].mxu0 }
0x2369   :  { %v7290_v22 = vadd.f32 %v7289_v20, %v7198_v34  ;;  %v7291_v50 = vpop.f32.mrb[117].mxu0  ;;  %v7665_v34 = vld [vmem:[%s11564_s29 + $0x58] sm:$0xff]  ;;  %s11380_s29 = smov [#allocation33]  }
0x236a   :  { %v7292_v53 = vadd.f32 %v7291_v50, %v7202_v1  ;;  %8202 = vmatprep.mubr.msk.f32.mxu1 %vm7060_vm10, %v7295_v63  ;;  %v10029_v1 = vpack.c.bf16 %v7665_v34, %v7664_v44  ;;  %v8208_v63 = vld [vmem:[#allocation32] ss:$0 sm:$0xff]  ;;  %s7778_s13 = sshll.u32 %s11380_s29, 4  ;;  %s7779_s13 = int_to_ptr.vmem [resolvable:$true] %s7778_s13 }
0x236b   :  { %7398 = vmatmul.mubr.f32.vlgmr.msra.gmra.mrb[100].mxu1 %v7294_v27  ;;  %v7296_v60 = vmax.f32 %v7290_v22, 0.0  ;;  %s11259_s25 = scalar_lea.vmem %s7779_s13, 16  ;;  %s11263_s6 = scalar_lea.vmem %s7779_s13, 32 }
0x236c   :  { %v7297_v57 = vmax.f32 %v7292_v53, 0.0  ;;  %10015 = vmatpush3.bf16.msra.mxu1 %v10014_v32  ;;  %p11260_p12 = scmp.ne.s32.totalorder %s7779_s13, %s11259_s25  ;;  %p11264_p13 = scmp.lt.s32.totalorder %s7779_s13, %s7779_s13 }
0x236d   :  { %10016 = vmatprep.subr.bf16.mxu1 %v11376_v10  ;;  %p11265_p0 = scmp.lt.s32.totalorder %s11263_s6, %s11259_s25 }
0x236e   :  { %8203 = vmatprep.mubr.msk.f32.mxu1 %vm7060_vm10, %v7297_v57 }
0x236f   :  { %7403 = vmatmul.mubr.f32.gmra.mrb[102].mxu1 %v7296_v60  ;;  %p11266_p1 = por %p11265_p0, %p11264_p13 }
0x2370   :  { %9477 = vmatprep.mubr.msk.f32.mxu1 %vm11378_vm7, %v11377_v61  ;;  %10018 = vmatpush3.bf16.msra.mxu1 %v10017_v7 }
0x2371   :  { %10019 = vmatprep.subr.bf16.mxu1 %v11376_v10  ;;  %p11267_p2 = pnand %p11266_p1, %p11260_p12 }
0x2374   :  { %10021 = vmatpush3.bf16.msra.mxu1 %v10020_v47 }
0x2375   :  { %10022 = vmatprep.subr.bf16.mxu1 %v11376_v10 }
0x2378   :  { %10024 = vmatpush3.bf16.msra.mxu1 %v10023_v6 }
0x2379   :  { %10025 = vmatprep.subr.bf16.mxu1 %v11376_v10 }
0x237c   :  { %10027 = vmatpush3.bf16.msra.mxu1 %v10026_v49 }
0x237d   :  { %10028 = vmatprep.subr.bf16.mxu1 %v11376_v10 }
0x2380   :  { %10030 = vmatpush3.bf16.msra.mxu1 %v10029_v1 }
0x2381   :  { %9475 = vmatprep.subr.mxu1 %v11377_v61 }
0x2384   :  { %9476 = vmatpush3.msk.msra.mxu1 %vm443_vm0, %v7666_v16  ;;  %vm7770_vm0 = vcmask 0  }
0x243e   :  { %v7399_v28 = vpop.f32.mrb[100].mxu1 }
0x243f   :  { %v7401_v15 = vpop.f32.mrb[101].mxu1  ;;  %v7400_v26 = vadd.f32 %v8200_v11, %v7399_v28 }
0x2441   :  { %v7408_v23 = vmax.f32 %v7400_v26, 0.0 }
0x2442   :  { %v7404_v21 = vpop.f32.mrb[102].mxu1 }
0x2443   :  { %v7405_v35 = vadd.f32 %v8200_v11, %v7404_v21  ;;  %v7406_v30 = vpop.f32.mrb[103].mxu1 }
0x2445   :  { %v7409_v4 = vmax.f32 %v7405_v35, 0.0 }
0x2447   :  { %v9992_v39 = vpack.c.bf16 %v7409_v4, %v7408_v23 }
0x2449   :  { %9994 = vmatpush3.bf16.msk.msra.mxu0 %vm9993_vm12, %v9992_v39 }
0x244a   :  { %9995 = vmatprep.subr.bf16.mxu0 %v11376_v10 }
0x244c   :  { %9419 = vmatmul.mubr.msk.f32.vlgmr.msra.gmra.mrb[118].mxu0 %vm7411_vm13, %v7410_v25 }
0x244d   :  { %9997 = vmatpush3.bf16.msra.mxu0 %v9996_v55  ;;  %9437 = vmatprep.mubr.msk.f32.mxu0 %vm11378_vm7, %v11377_v61 }
0x244e   :  { %9998 = vmatprep.subr.bf16.mxu0 %v11376_v10 }
0x2451   :  { %10000 = vmatpush3.bf16.msra.mxu0 %v9999_v59 }
0x2452   :  { %10001 = vmatprep.subr.bf16.mxu0 %v11376_v10 }
0x2455   :  { %10003 = vmatpush3.bf16.msra.mxu0 %v10002_v54 }
0x2456   :  { %10004 = vmatprep.subr.bf16.mxu0 %v11376_v10 }
0x2459   :  { %10006 = vmatpush3.bf16.msra.mxu0 %v10005_v19 }
0x245a   :  { %10007 = vmatprep.subr.bf16.mxu0 %v11376_v10 }
0x251f   :  { %v7484_v3 = vpop.f32.mrb[118].mxu0 }
0x2520   :  { %9438 = vmatmul.mubr.msk.f32.vlgmr.msra.gmra.mrb[120].mxu0 %vm899_vm5, %v7484_v3  ;;  %v9420_v9 = vpop.f32.mrb[119].mxu0 }
0x2521   :  { %10009 = vmatpush3.bf16.msra.mxu0 %v10008_v58  ;;  %9448 = vmatprep.mubr.msk.f32.mxu0 %vm11378_vm7, %v11377_v61 }
0x2522   :  { %10010 = vmatprep.subr.bf16.mxu0 %v11376_v10  ;;  %v8209_v10 = vld [vmem:[#allocation2] ss:$0 sm:$0xff] }
0x2525   :  { %10012 = vmatpush3.bf16.msra.mxu0 %v10011_v31 }
0x2528   :  { %9449 = vmatmul.mubr.msk.f32.vlgmr.msra.gmra.mrb[122].mxu0 %vm591_vm2, %v13559_v41 }
0x25f3   :  { %v7569_v18 = vpop.f32.mrb[120].mxu0 }
0x25f4   :  { %v9439_v0 = vpop.f32.mrb[121].mxu0 }
0x25fb   :  { %v7641_v5 = vpop.f32.mrb[122].mxu0 }
0x25fc   :  { %v7642_v41 = vadd.f32 %v7641_v5, %v7569_v18  ;;  %v9450_v20 = vpop.f32.mrb[123].mxu0 }
0x25fe   :  { %v7652_v27 = vadd.f32 %v8208_v63, %v7642_v41 }
0x2600   :  { %v7653_v22 = vmax.f32 %v7652_v27, 0.0 }
0x2602   :  { %9478 = vmatmul.mubr.msk.f32.vlgmr.msra.gmra.mrb[104].mxu1 %vm7674_vm14, %v7653_v22 }
0x26d5   :  { %v7747_v50 = vpop.f32.mrb[104].mxu1 }
0x26d6   :  { %v7748_v53 = vadd.f32 %v8209_v10, %v7747_v50  ;;  %v9479_v57 = vpop.f32.mrb[105].mxu1 }
0x26d8   :  { %v7751_v60 = vsub.f32 0.0, %v7748_v53 }
0x26da   :  { %v7752_v11 = vmul.f32 1.442695, %v7751_v60 }
0x26dc   :  { %10813 = vpow2.f32 %v7752_v11 }
0x26e6   :  { %v10814_v61 = vpop.eup %10813 }
0x26e7   :  { %v7754_v28 = vadd.f32 1.0, %v10814_v61 }
0x26e9   :  { %10815 = vrcp.f32 %v7754_v28 }
0x26f3   :  { %v10816_v15 = vpop.eup %10815 }
0x26f4   :  { %v7757_v26 = vsel %vm7756_vm15, %v10816_v15, 0.0 }
0x26f5   :  { %7758 = vadd.xlane.f32.xlu1 %v7757_v26 }
0x2782   :  { %v7759_v21 = vpop.xlane.xlu1 %7758 }
0x2783   :  { %v7760_v35 = vrot.slane %v7759_v21, 4 }
0x2785   :  { %v7761_v30 = vadd.f32 %v7760_v35, %v7759_v21 }
0x2787   :  { %v7762_v23 = vrot.slane %v7761_v30, 2 }
0x2789   :  { %v7763_v4 = vadd.f32 %v7762_v23, %v7761_v30 }
0x278b   :  { %v7764_v48 = vrot.slane %v7763_v4, 1 }
0x278d   :  { %v7765_v51 = vadd.f32 %v7764_v48, %v7763_v4 }
0x278f   :  { %10091 = vpush %v7765_v51 }
0x27c0   :  { %s10092_s19 = spop %10091 }
0x27c1   :  { %v7767_v39 = vstv %s10092_s19 }
0x27c2   :  { %v7769_v25 = vmul.f32 0.25, %v7767_v39 }
0x27c4   :  { %7771 = vst.msk [vmem:[#allocation33] sm:$0x1] %vm7770_vm0, %v7769_v25 }
0x27c5   :  { %11270 = shalt.err (!%p11267_p2)
}
0x27c6   :  { %s11271_s9 = scalar_lea.hbm %s11572_s4, 16 }
0x27c7   :  { %p11272_p3 = scmp.ne.s32.totalorder %s11572_s4, %s11271_s9  ;;  %p11275_p4 = scmp.lt.u32.totalorder %s11271_s9, %s11572_s4 }
0x27c9   :  { %p11277_p5 = pnand %p11275_p4, %p11272_p3 }
0x27cb   :  { %11280 = shalt.err (!%p11277_p5)
}
0x27cc   :  { %7781 = dma.vmem_to_hbm [thread:$0]  %s7779_s13, 16, %s11572_s4, [#allocation5]  }
0x27cd   :  { %11301 = dma.done.wait [#allocation5], 16  }
0x27ce   :  { %11302 = vsyncadd [#allocation5], 4294967280 }
0x27cf   :  { %7785 = vsyncpa [#allocation4], 1 }
0x27d0   :  { %7786 = vsyncpa [#allocation7], 1 }
0x27d1   :  { %7787 = vsyncpa [#allocation10], 1 }
0x27d2   :  { %7788 = vsyncpa [#allocation13], 1 }
0x27d3   :  { %7789 = vsyncpa [#allocation16], 1 }
0x27d4   :  { %7790 = vsyncpa [#allocation19], 1 }
0x27d5   :  { %7791 = vsyncpa [#allocation22], 1 }
0x27d6   :  { %7792 = vsyncpa [#allocation25], 1 }
0x27d7   :  { %7793 = vsyncpa [#allocation28], 1 }
0x27d8   :  { %7794 = vsyncpa [#allocation31], 1 }
0x27d9   :  { %7795 = vsyncpa [#allocation5], 1 }

</bundles_post_ra>
